<compile_context>
chip_gen: v7x
topology: tpu7x:2x2x1
jax: 0.10.0
libtpu: 0.0.40
codegen_flags: <defaults>
</compile_context>

<pallas_src>
import jax
import jax.numpy as jnp
from jax.experimental import pallas as pl
from jax.experimental.pallas import tpu as pltpu

BN_EPS = 1e-5


def _detect_vmem_limit():
    try:
        cap = int(pltpu.get_tpu_info().vmem_capacity_bytes)
    except Exception:
        cap = 64 * 1024 * 1024          # conservative (v7x physical)
    return min(int(cap * 0.55), 80 * 1024 * 1024)


_VMEM_LIMIT = _detect_vmem_limit()
_TILE_BUDGET = _VMEM_LIMIT // 4


def _cparams(n_parallel=1):
    return pltpu.CompilerParams(
        dimension_semantics=("parallel",) * n_parallel,
        vmem_limit_bytes=_VMEM_LIMIT)


def _round_up(a, b):
    return -(-a // b) * b


def _choose_tm(M, K, C, extra_cols=0):
    # double-buffered bf16 (TM,K) input + (TM,C) output (+ residual) tiles
    per_row = 2 * 2 * (K + C + extra_cols) + 16
    tm = _TILE_BUDGET // max(per_row, 1)
    tm = max(8, min(2048, (tm // 8) * 8))
    return min(tm, _round_up(M, 8))


# --------------------------------------------------------------------------
# Pallas kernels
# --------------------------------------------------------------------------
def _make_mm_stats_kernel(has_prologue, has_residual, mask, tm, m_valid):
    """Matmul + per-channel sum / sum-of-squares, optional fused
    affine+ReLU(+residual) prologue on the input rows."""

    def _prologue(x_ref, a_ref, b_ref, r_ref):
        v = jnp.maximum(x_ref[...].astype(jnp.float32) * a_ref[...]
                        + b_ref[...], 0.0)
        if r_ref is not None:
            v = v + r_ref[...].astype(jnp.float32)
        if mask:  # zero out padded tail rows so BN stats stay exact
            rows = (jax.lax.broadcasted_iota(jnp.int32, v.shape, 0)
                    + pl.program_id(0) * tm)
            v = jnp.where(rows < m_valid, v, 0.0)
        return v.astype(jnp.bfloat16)

    def _finish(x, w_ref, y_ref, s_ref, q_ref):
        y = jnp.dot(x, w_ref[...], preferred_element_type=jnp.float32)
        y_ref[...] = y.astype(y_ref.dtype)
        s = jnp.sum(y, axis=0)
        q = jnp.sum(y * y, axis=0)
        s_ref[...] = jnp.broadcast_to(s[None, None, :], s_ref.shape)
        q_ref[...] = jnp.broadcast_to(q[None, None, :], q_ref.shape)

    def plain(x_ref, w_ref, y_ref, s_ref, q_ref):
        _finish(x_ref[...], w_ref, y_ref, s_ref, q_ref)

    def with_pro(x_ref, a_ref, b_ref, w_ref, y_ref, s_ref, q_ref):
        _finish(_prologue(x_ref, a_ref, b_ref, None), w_ref, y_ref, s_ref, q_ref)

    def with_pro_res(x_ref, a_ref, b_ref, r_ref, w_ref, y_ref, s_ref, q_ref):
        _finish(_prologue(x_ref, a_ref, b_ref, r_ref), w_ref, y_ref, s_ref, q_ref)

    if not has_prologue:
        return plain
    return with_pro_res if has_residual else with_pro


def _make_ep_kernel(has_residual):
    def ep(y_ref, a_ref, b_ref, o_ref):
        o_ref[...] = jnp.maximum(
            y_ref[...].astype(jnp.float32) * a_ref[...] + b_ref[...], 0.0
        ).astype(o_ref.dtype)

    def ep_res(y_ref, a_ref, b_ref, r_ref, o_ref):
        v = jnp.maximum(
            y_ref[...].astype(jnp.float32) * a_ref[...] + b_ref[...], 0.0)
        o_ref[...] = (v + r_ref[...].astype(jnp.float32)).astype(o_ref.dtype)

    return ep_res if has_residual else ep


def _pool_fused_kernel(y_ref, a_ref, b_ref, z_ref, o_ref):
    # fused: res = relu(affine(y)) + z, then 2x2 max pool (C stays on lanes)
    v = jnp.maximum(y_ref[...].astype(jnp.float32) * a_ref[...] + b_ref[...],
                    0.0)
    v = v + z_ref[...].astype(jnp.float32)        # (TB, 2, Wo, 2, C)
    m = jnp.maximum(v[:, 0], v[:, 1])             # (TB, Wo, 2, C)
    o_ref[...] = jnp.maximum(m[:, :, 0], m[:, :, 1]).astype(o_ref.dtype)


def _mm_stats_stack_kernel(x_ref, w_ref, y_ref, s_ref, q_ref):
    y = jnp.dot(x_ref[0], w_ref[0], preferred_element_type=jnp.float32)
    y_ref[...] = y[None].astype(y_ref.dtype)
    s = jnp.sum(y, axis=0)
    q = jnp.sum(y * y, axis=0)
    s_ref[...] = jnp.broadcast_to(s[None, None, None, :], s_ref.shape)
    q_ref[...] = jnp.broadcast_to(q[None, None, None, :], q_ref.shape)


def _ep_stack_kernel(y_ref, a_ref, b_ref, o_ref):
    o_ref[...] = jnp.maximum(
        y_ref[...].astype(jnp.float32) * a_ref[...] + b_ref[...], 0.0
    ).astype(o_ref.dtype)


def _out_kernel(x_ref, a_ref, b_ref, w_ref, bias_ref, o_ref):
    # prologue: up3 BN affine + ReLU (per packed column), then block-diagonal
    # 1x1 out-conv matmul with bias (no BN afterwards).
    x = jnp.maximum(x_ref[...].astype(jnp.float32) * a_ref[...] + b_ref[...],
                    0.0).astype(jnp.bfloat16)
    o_ref[...] = (jnp.dot(x, w_ref[...], preferred_element_type=jnp.float32)
                  + bias_ref[...])


# --------------------------------------------------------------------------
# Pallas call wrappers
# --------------------------------------------------------------------------
def _mm_stats(x2, w2, prologue=None):
    """x2: (M, K) rows (bf16).  prologue: None | (scale, shift) |
    (scale, shift, residual_rows) applied as relu(x*scale+shift)[+res] before
    the matmul.  Returns (y_raw bf16 (M, C), col_sum f32 (C,), col_sq f32 (C,))."""
    M, K = x2.shape
    C = w2.shape[1]
    has_pro = prologue is not None
    has_res = has_pro and len(prologue) == 3
    extra = K if has_res else 0
    TM = _choose_tm(M, K, C, extra)
    M_pad = _round_up(M, TM)
    G = M_pad // TM
    pad = M_pad - M

    x2 = x2.astype(jnp.bfloat16)
    if pad:
        x2 = jnp.pad(x2, ((0, pad), (0, 0)))
    args = [x2]
    in_specs = [pl.BlockSpec((TM, K), lambda i: (i, 0))]
    if has_pro:
        args += [prologue[0].reshape(1, K).astype(jnp.float32),
                 prologue[1].reshape(1, K).astype(jnp.float32)]
        in_specs += [pl.BlockSpec((1, K), lambda i: (0, 0)),
                     pl.BlockSpec((1, K), lambda i: (0, 0))]
        if has_res:
            r = prologue[2].astype(jnp.bfloat16)
            if pad:
                r = jnp.pad(r, ((0, pad), (0, 0)))
            args.append(r)
            in_specs.append(pl.BlockSpec((TM, K), lambda i: (i, 0)))
    args.append(w2)
    in_specs.append(pl.BlockSpec((K, C), lambda i: (0, 0)))

    kernel = _make_mm_stats_kernel(has_pro, has_res, pad != 0, TM, M)

    y, ps, pq = pl.pallas_call(
        kernel,
        out_shape=(jax.ShapeDtypeStruct((M_pad, C), jnp.bfloat16),
                   jax.ShapeDtypeStruct((G, 8, C), jnp.float32),
                   jax.ShapeDtypeStruct((G, 8, C), jnp.float32)),
        grid=(G,),
        in_specs=in_specs,
        out_specs=(pl.BlockSpec((TM, C), lambda i: (i, 0)),
                   pl.BlockSpec((1, 8, C), lambda i: (i, 0, 0)),
                   pl.BlockSpec((1, 8, C), lambda i: (i, 0, 0))),
        compiler_params=_cparams(1),
        cost_estimate=pl.CostEstimate(
            flops=2 * M_pad * K * C, transcendentals=0,
            bytes_accessed=2 * M_pad * (K + C) + 2 * K * C),
    )(*args)
    if pad:
        y = y[:M]
    return y, jnp.sum(ps[:, 0, :], axis=0), jnp.sum(pq[:, 0, :], axis=0)


def _affine_relu(y, scale, shift, residual=None, out_dtype=jnp.bfloat16):
    """Materialize relu(y*scale+shift)[+residual] (BN epilogue), bf16 store."""
    M, C = y.shape
    TM = _choose_tm(M, C, C, C if residual is not None else 0)
    M_pad = _round_up(M, TM)
    G = M_pad // TM
    pad = M_pad - M
    if pad:
        y = jnp.pad(y, ((0, pad), (0, 0)))
    args = [y, scale.reshape(1, C).astype(jnp.float32),
            shift.reshape(1, C).astype(jnp.float32)]
    in_specs = [pl.BlockSpec((TM, C), lambda i: (i, 0)),
                pl.BlockSpec((1, C), lambda i: (0, 0)),
                pl.BlockSpec((1, C), lambda i: (0, 0))]
    if residual is not None:
        r = residual.astype(jnp.bfloat16)
        if pad:
            r = jnp.pad(r, ((0, pad), (0, 0)))
        args.append(r)
        in_specs.append(pl.BlockSpec((TM, C), lambda i: (i, 0)))
    out = pl.pallas_call(
        _make_ep_kernel(residual is not None),
        out_shape=jax.ShapeDtypeStruct((M_pad, C), out_dtype),
        grid=(G,),
        in_specs=in_specs,
        out_specs=pl.BlockSpec((TM, C), lambda i: (i, 0)),
        compiler_params=_cparams(1),
    )(*args)
    return out[:M] if pad else out


def _maxpool_fused(y_raw, scale, shift, z, n, h, w):
    """Fused res-block epilogue (relu(affine(y))+z) + 2x2/2 max pool."""
    C = y_raw.shape[-1]
    ho, wo = h // 2, w // 2
    B = n * ho
    y5 = y_raw.reshape(B, 2, wo, 2, C)
    z5 = z.reshape(B, 2, wo, 2, C).astype(jnp.bfloat16)
    sc = scale.reshape(1, 1, 1, 1, C).astype(jnp.float32)
    sh = shift.reshape(1, 1, 1, 1, C).astype(jnp.float32)
    TB = B
    for t in (512, 256, 128, 64, 32, 16, 8):
        if B > t and B % t == 0:
            TB = t
            break
    out = pl.pallas_call(
        _pool_fused_kernel,
        out_shape=jax.ShapeDtypeStruct((B, wo, C), jnp.bfloat16),
        grid=(B // TB,),
        in_specs=[pl.BlockSpec((TB, 2, wo, 2, C), lambda i: (i, 0, 0, 0, 0)),
                  pl.BlockSpec((1, 1, 1, 1, C), lambda i: (0, 0, 0, 0, 0)),
                  pl.BlockSpec((1, 1, 1, 1, C), lambda i: (0, 0, 0, 0, 0)),
                  pl.BlockSpec((TB, 2, wo, 2, C), lambda i: (i, 0, 0, 0, 0))],
        out_specs=pl.BlockSpec((TB, wo, C), lambda i: (i, 0, 0)),
        compiler_params=_cparams(1),
    )(y5, sc, sh, z5)
    return out.reshape(n, ho, wo, C)


def _mm_stats_stacked(x_stack, w_stack):
    """Stacked independent matmuls (the three dilated ASPP branches) under a
    leading parallel grid axis."""
    Bx, M, K = x_stack.shape
    C = w_stack.shape[2]
    TM = _choose_tm(M, K, C)
    M_pad = _round_up(M, TM)
    G = M_pad // TM
    pad = M_pad - M
    x_stack = x_stack.astype(jnp.bfloat16)
    if pad:
        x_stack = jnp.pad(x_stack, ((0, 0), (0, pad), (0, 0)))
    y, ps, pq = pl.pallas_call(
        _mm_stats_stack_kernel,
        out_shape=(jax.ShapeDtypeStruct((Bx, M_pad, C), jnp.bfloat16),
                   jax.ShapeDtypeStruct((Bx, G, 8, C), jnp.float32),
                   jax.ShapeDtypeStruct((Bx, G, 8, C), jnp.float32)),
        grid=(Bx, G),
        in_specs=[pl.BlockSpec((1, TM, K), lambda b, i: (b, i, 0)),
                  pl.BlockSpec((1, K, C), lambda b, i: (b, 0, 0))],
        out_specs=(pl.BlockSpec((1, TM, C), lambda b, i: (b, i, 0)),
                   pl.BlockSpec((1, 1, 8, C), lambda b, i: (b, i, 0, 0)),
                   pl.BlockSpec((1, 1, 8, C), lambda b, i: (b, i, 0, 0))),
        compiler_params=_cparams(2),
        cost_estimate=pl.CostEstimate(
            flops=2 * Bx * M_pad * K * C, transcendentals=0,
            bytes_accessed=2 * Bx * (M_pad * (K + C) + K * C)),
    )(x_stack, w_stack)
    if pad:
        y = y[:, :M]
    return y, jnp.sum(ps[:, :, 0, :], axis=1), jnp.sum(pq[:, :, 0, :], axis=1)


def _affine_relu_stacked(y, scale, shift):
    Bx, M, C = y.shape
    TM = _choose_tm(M, C, C)
    M_pad = _round_up(M, TM)
    G = M_pad // TM
    pad = M_pad - M
    if pad:
        y = jnp.pad(y, ((0, 0), (0, pad), (0, 0)))
    out = pl.pallas_call(
        _ep_stack_kernel,
        out_shape=jax.ShapeDtypeStruct((Bx, M_pad, C), jnp.bfloat16),
        grid=(Bx, G),
        in_specs=[pl.BlockSpec((1, TM, C), lambda b, i: (b, i, 0)),
                  pl.BlockSpec((1, 1, C), lambda b, i: (b, 0, 0)),
                  pl.BlockSpec((1, 1, C), lambda b, i: (b, 0, 0))],
        out_specs=pl.BlockSpec((1, TM, C), lambda b, i: (b, i, 0)),
        compiler_params=_cparams(2),
    )(y, scale.reshape(Bx, 1, C).astype(jnp.float32),
      shift.reshape(Bx, 1, C).astype(jnp.float32))
    return out[:, :M] if pad else out


def _out_matmul(y_raw, scale_t, shift_t, p):
    """up3 BN/ReLU prologue + block-diagonal out_conv matmul (+bias), f32 out."""
    M, K = y_raw.shape
    C = p["w2"].shape[1]
    TM = _choose_tm(M, K, C)
    M_pad = _round_up(M, TM)
    G = M_pad // TM
    pad = M_pad - M
    if pad:
        y_raw = jnp.pad(y_raw, ((0, pad), (0, 0)))
    out = pl.pallas_call(
        _out_kernel,
        out_shape=jax.ShapeDtypeStruct((M_pad, C), jnp.float32),
        grid=(G,),
        in_specs=[pl.BlockSpec((TM, K), lambda i: (i, 0)),
                  pl.BlockSpec((1, K), lambda i: (0, 0)),
                  pl.BlockSpec((1, K), lambda i: (0, 0)),
                  pl.BlockSpec((K, C), lambda i: (0, 0)),
                  pl.BlockSpec((1, C), lambda i: (0, 0))],
        out_specs=pl.BlockSpec((TM, C), lambda i: (i, 0)),
        compiler_params=_cparams(1),
    )(y_raw, scale_t.reshape(1, K).astype(jnp.float32),
      shift_t.reshape(1, K).astype(jnp.float32), p["w2"], p["b2"])
    return out[:M] if pad else out


# --------------------------------------------------------------------------
# Conv helpers (im2col in JAX, BN stats -> scale/shift in tiny jnp)
# --------------------------------------------------------------------------
def _im2col(x_padded, kh, kw, stride, dilation):
    N, Hp, Wp, C = x_padded.shape
    Ho = (Hp - dilation * (kh - 1) - 1) // stride + 1
    Wo = (Wp - dilation * (kw - 1) - 1) // stride + 1
    cols = []
    for i in range(kh):
        for j in range(kw):
            r0, c0 = i * dilation, j * dilation
            patch = x_padded[:, r0:r0 + stride * (Ho - 1) + 1:stride,
                                c0:c0 + stride * (Wo - 1) + 1:stride, :]
            cols.append(patch)
    patches = jnp.concatenate(cols, axis=-1)
    return patches.reshape(N * Ho * Wo, kh * kw * C), (N, Ho, Wo)


def _bn_scale_shift(col_sum, col_sq, count, gamma, beta):
    # training-mode batch stats (biased variance); conv bias cancels with mean.
    mean = col_sum / count
    var = jnp.maximum(col_sq / count - mean * mean, 0.0)
    scale = gamma * jax.lax.rsqrt(var + BN_EPS)
    shift = beta - mean * scale
    return scale, shift


def conv_bn(x_act, p, *, k, stride=1, padding=0, dilation=1):
    """Conv on an *activated* NHWC tensor; returns raw matmul output + the BN
    scale/shift (the affine+ReLU is applied later, fused into the consumer)."""
    N, H, W, Cin = x_act.shape
    if k == 1 and stride == 1 and padding == 0:
        rows, dims = x_act.reshape(N * H * W, Cin), (N, H, W)
    else:
        xp = jnp.pad(x_act,
                     ((0, 0), (padding, padding), (padding, padding), (0, 0)))
        rows, dims = _im2col(xp, k, k, stride, dilation)
    y, s, q = _mm_stats(rows, p["w2"])
    scale, shift = _bn_scale_shift(s, q, rows.shape[0], p["gamma"], p["beta"])
    return y, dims, scale, shift


# --------------------------------------------------------------------------
# Parameter construction (deterministic, synthetic, torch layouts)
# --------------------------------------------------------------------------
def make_params(in_channel=4, out_channel=16, class_num=5, seed=0):
    base = jax.random.PRNGKey(seed)
    cnt = [0]

    def nk():
        cnt[0] += 1
        return jax.random.fold_in(base, cnt[0])

    def conv_p(cout, cin, k):
        fan_in = cin * k * k
        w = jax.random.normal(nk(), (cout, cin, k, k), jnp.float32) / jnp.sqrt(fan_in)
        b = 0.01 * jax.random.normal(nk(), (cout,), jnp.float32)
        return dict(w=w, b=b, gamma=jnp.ones((cout,), jnp.float32),
                    beta=jnp.zeros((cout,), jnp.float32))

    def convt_p(cin, cout, k):
        fan = cout * k * k
        w = jax.random.normal(nk(), (cin, cout, k, k), jnp.float32) / jnp.sqrt(fan)
        b = 0.01 * jax.random.normal(nk(), (cout,), jnp.float32)
        return dict(w=w, b=b, gamma=jnp.ones((cout,), jnp.float32),
                    beta=jnp.zeros((cout,), jnp.float32))

    def res_block_p(cin, cout):
        return dict(c11=conv_p(64, cin, 1), c12=conv_p(128, 64, 3),
                    c13=conv_p(cout, 128, 1), c2=conv_p(cout, cin, 1))

    oc = out_channel
    return dict(
        pre1=conv_p(oc, in_channel, 3), pre2=conv_p(oc, oc, 3), pre3=conv_p(oc, oc, 3),
        rb1=res_block_p(oc, oc * 2), rb2=res_block_p(oc * 2, oc * 2),
        rb3=res_block_p(oc * 2, oc * 4), rb4=res_block_p(oc * 4, oc * 4),
        aspp1=conv_p(oc * 2, oc * 4, 3),
        aspp2_1=conv_p(128, oc * 4, 1), aspp2_2=conv_p(oc * 2, 128, 3),
        aspp3_1=conv_p(128, oc * 4, 1), aspp3_2=conv_p(oc * 2, 128, 3),
        aspp4_1=conv_p(128, oc * 4, 1), aspp4_2=conv_p(oc * 2, 128, 3),
        after_aspp=conv_p(oc * 2, oc * 8, 3),
        up1=convt_p(oc * 2, oc * 4, 1),
        up2=convt_p(oc * 4, oc * 2, 3),
        up3=convt_p(oc * 2, oc, 4),
        out=conv_p(class_num, oc, 1),
    )


# --------------------------------------------------------------------------
# One-time weight repacking (hoisted out of the jitted forward)
# --------------------------------------------------------------------------
def _prep_conv(p):
    w = p["w"]
    cout, cin, kh, kw = w.shape
    w2 = jnp.transpose(w, (2, 3, 1, 0)).reshape(kh * kw * cin, cout)
    return dict(w2=w2.astype(jnp.bfloat16), gamma=p["gamma"], beta=p["beta"])


def _prep_convt(p):
    w = p["w"]                                    # (cin, cout, kh, kw)
    wc = jnp.transpose(w[:, :, ::-1, ::-1], (1, 0, 2, 3))
    cout, cin, kh, kw = wc.shape
    w2 = jnp.transpose(wc, (2, 3, 1, 0)).reshape(kh * kw * cin, cout)
    return dict(w2=w2.astype(jnp.bfloat16), gamma=p["gamma"], beta=p["beta"])


def _prep_conv1x1_merged(plist):
    w2 = jnp.concatenate([jnp.transpose(p["w"][:, :, 0, 0], (1, 0))
                          for p in plist], axis=1)
    return dict(w2=w2.astype(jnp.bfloat16),
                gamma=jnp.concatenate([p["gamma"] for p in plist]),
                beta=jnp.concatenate([p["beta"] for p in plist]))


def _prep_up3(p):
    # ConvTranspose k=4, s=4, p=0 == per-pixel matmul to 16 sub-pixel blocks.
    w = p["w"]                                    # (cin, cout, 4, 4)
    cin, cout, kh, kw = w.shape
    w2 = jnp.transpose(w, (0, 2, 3, 1)).reshape(cin, kh * kw * cout)
    return dict(w2=w2.astype(jnp.bfloat16), gamma=p["gamma"], beta=p["beta"])


def _prep_out_blockdiag(p, sub=16, lane_per=8):
    # 1x1 out-conv applied in the depth-to-space-packed layout of up3's output:
    # block-diagonal (sub*cin, sub*lane_per) weight, class cols padded to 8.
    w = p["w"][:, :, 0, 0]                        # (class, cin)
    cls, cin = w.shape
    blk = jnp.zeros((cin, lane_per), jnp.float32).at[:, :cls].set(w.T)
    wbd = jnp.zeros((sub * cin, sub * lane_per), jnp.float32)
    for s in range(sub):
        wbd = wbd.at[s * cin:(s + 1) * cin,
                     s * lane_per:(s + 1) * lane_per].set(blk)
    bias = jnp.tile(jnp.pad(p["b"], (0, lane_per - cls)), sub)
    return dict(w2=wbd.astype(jnp.bfloat16),
                b2=bias.reshape(1, sub * lane_per).astype(jnp.float32))


def _prep_aspp_dilated(plist):
    return dict(w2=jnp.stack([_prep_conv(p)["w2"] for p in plist], axis=0),
                gamma=jnp.stack([p["gamma"] for p in plist], axis=0),
                beta=jnp.stack([p["beta"] for p in plist], axis=0))


def prepare_params(P):
    def rb(p):
        return dict(c11_c2=_prep_conv1x1_merged([p["c11"], p["c2"]]),
                    c12=_prep_conv(p["c12"]), c13=_prep_conv(p["c13"]))
    return dict(
        pre1=_prep_conv(P["pre1"]), pre2=_prep_conv(P["pre2"]),
        pre3=_prep_conv(P["pre3"]),
        rb1=rb(P["rb1"]), rb2=rb(P["rb2"]), rb3=rb(P["rb3"]), rb4=rb(P["rb4"]),
        aspp1=_prep_conv(P["aspp1"]),
        aspp1x1=_prep_conv1x1_merged([P["aspp2_1"], P["aspp3_1"], P["aspp4_1"]]),
        aspp_dil=_prep_aspp_dilated([P["aspp2_2"], P["aspp3_2"], P["aspp4_2"]]),
        after_aspp=_prep_conv(P["after_aspp"]),
        up1=_prep_convt(P["up1"]), up2=_prep_convt(P["up2"]),
        up3=_prep_up3(P["up3"]),
        out=_prep_out_blockdiag(P["out"]),
    )


# --------------------------------------------------------------------------
# Forward pass (module boundary is NCHW like the PyTorch reference)
# --------------------------------------------------------------------------
def issegnet_forward(x_nchw, P, class_num):
    x = jnp.transpose(x_nchw, (0, 2, 3, 1)).astype(jnp.bfloat16)   # NCHW->NHWC

    # ----------------- _PreConv -----------------
    y, d, s, b = conv_bn(x, P["pre1"], k=3, stride=2, padding=1)
    act = _affine_relu(y, s, b).reshape(d + (-1,))
    y, d, s, b = conv_bn(act, P["pre2"], k=3, padding=1)
    act = _affine_relu(y, s, b).reshape(d + (-1,))
    y_pre3, d3, s_pre3, b_pre3 = conv_bn(act, P["pre3"], k=3, padding=1)
    n3, h3, w3 = d3

    # ----------------- res blocks -----------------
    def res_block(inp, p, n, h, w):
        # inp: {'rows': activated rows} or {'raw','scale','shift','res'} (the
        # previous layer's unnormalized output; its BN+ReLU(+shortcut add) is
        # applied as an in-kernel prologue of the merged [conv1_1|conv2] matmul)
        if "rows" in inp:
            ym, ss, qq = _mm_stats(inp["rows"], p["c11_c2"]["w2"])
            m_rows = inp["rows"].shape[0]
        else:
            pro = ((inp["scale"], inp["shift"]) if inp["res"] is None
                   else (inp["scale"], inp["shift"], inp["res"]))
            ym, ss, qq = _mm_stats(inp["raw"], p["c11_c2"]["w2"], prologue=pro)
            m_rows = inp["raw"].shape[0]
        sm, bm = _bn_scale_shift(ss, qq, m_rows,
                                 p["c11_c2"]["gamma"], p["c11_c2"]["beta"])
        m = _affine_relu(ym, sm, bm)               # (M, 64 + out_ch) activated
        z = m[:, 64:]                              # conv2 shortcut branch
        y64 = m[:, :64].reshape(n, h, w, 64)
        y12, _, s12, b12 = conv_bn(y64, p["c12"], k=3, padding=1)
        # c13 (1x1): c12's BN/ReLU fused in as a prologue
        y13, s13q, q13q = _mm_stats(y12, p["c13"]["w2"], prologue=(s12, b12))
        s13, b13 = _bn_scale_shift(s13q, q13q, y12.shape[0],
                                   p["c13"]["gamma"], p["c13"]["beta"])
        return dict(raw=y13, scale=s13, shift=b13, res=z)

    rb1 = res_block(dict(raw=y_pre3, scale=s_pre3, shift=b_pre3, res=None),
                    P["rb1"], n3, h3, w3)
    rb2 = res_block(rb1, P["rb2"], n3, h3, w3)
    pool1 = _maxpool_fused(rb2["raw"], rb2["scale"], rb2["shift"], rb2["res"],
                           n3, h3, w3)
    n4, h4, w4 = n3, h3 // 2, w3 // 2
    rb3 = res_block(dict(rows=pool1.reshape(-1, pool1.shape[-1])),
                    P["rb3"], n4, h4, w4)
    rb4 = res_block(rb3, P["rb4"], n4, h4, w4)
    pool2 = _maxpool_fused(rb4["raw"], rb4["scale"], rb4["shift"], rb4["res"],
                           n4, h4, w4)
    n5, h5, w5 = n4, h4 // 2, w4 // 2

    # ----------------- ASPP -----------------
    ya1, _, sa1, ba1 = conv_bn(pool2, P["aspp1"], k=3, padding=1)
    a1 = _affine_relu(ya1, sa1, ba1)                           # (M5, 2*oc)

    pool2_rows = pool2.reshape(-1, pool2.shape[-1])
    yp, sp, qp = _mm_stats(pool2_rows, P["aspp1x1"]["w2"])     # merged 3x 1x1
    spre, bpre = _bn_scale_shift(sp, qp, pool2_rows.shape[0],
                                 P["aspp1x1"]["gamma"], P["aspp1x1"]["beta"])
    a_pre = _affine_relu(yp, spre, bpre).reshape(n5, h5, w5, -1)

    def dil_patches(xs, dil):
        xp = jnp.pad(xs, ((0, 0), (dil, dil), (dil, dil), (0, 0)))
        rows, _ = _im2col(xp, 3, 3, 1, dil)
        return rows

    p_stack = jnp.stack([dil_patches(a_pre[..., 0:128], 2),
                         dil_patches(a_pre[..., 128:256], 4),
                         dil_patches(a_pre[..., 256:384], 8)], axis=0)
    y_st, s_st, q_st = _mm_stats_stacked(p_stack, P["aspp_dil"]["w2"])
    sc_st, sh_st = _bn_scale_shift(s_st, q_st, p_stack.shape[1],
                                   P["aspp_dil"]["gamma"], P["aspp_dil"]["beta"])
    a_dil = _affine_relu_stacked(y_st, sc_st, sh_st)           # (3, M5, 2*oc)
    a_dil = jnp.transpose(a_dil, (1, 0, 2)).reshape(a1.shape[0], -1)
    aspp = jnp.concatenate([a1, a_dil], axis=-1).reshape(n5, h5, w5, -1)

    # after_aspp 3x3; its BN/ReLU is fused into the up_1 matmul prologue
    y_aa, _, s_aa, b_aa = conv_bn(aspp, P["after_aspp"], k=3, padding=1)

    # ----------------- decoder -----------------
    # up_1 (1x1 transpose conv == 1x1 conv)
    y_u1, su1, qu1 = _mm_stats(y_aa, P["up1"]["w2"], prologue=(s_aa, b_aa))
    s_u1, b_u1 = _bn_scale_shift(su1, qu1, y_aa.shape[0],
                                 P["up1"]["gamma"], P["up1"]["beta"])
    # fuse_1 = relu(bn(up_1)) + pool_2  (materialized: up_2 needs spatial view)
    fuse1 = _affine_relu(y_u1, s_u1, b_u1,
                         residual=pool2.reshape(-1, pool2.shape[-1]))
    fuse1 = fuse1.reshape(n5, h5, w5, -1)

    # up_2: k=3, s=2, p=1, op=1 transpose conv, lowered as zero-dilate + conv.
    # TODO(synk): 4-phase sub-pixel decomposition would avoid the dilated zeros.
    C1 = fuse1.shape[-1]
    xd = jnp.zeros((n5, (h5 - 1) * 2 + 1, (w5 - 1) * 2 + 1, C1), fuse1.dtype)
    xd = xd.at[:, ::2, ::2, :].set(fuse1)
    xp = jnp.pad(xd, ((0, 0), (1, 2), (1, 2), (0, 0)))
    rows_u2, d_u2 = _im2col(xp, 3, 3, 1, 1)
    y_u2, su2, qu2 = _mm_stats(rows_u2, P["up2"]["w2"])
    s_u2, b_u2 = _bn_scale_shift(su2, qu2, rows_u2.shape[0],
                                 P["up2"]["gamma"], P["up2"]["beta"])

    # up_3: k=4, s=4 transpose conv == per-pixel matmul to 16 sub-pixel blocks;
    # fuse_2 = relu(bn(up_2)) + pool_1 is fused in as the prologue.
    pool1_rows = pool1.reshape(-1, pool1.shape[-1])
    y_u3, su3, qu3 = _mm_stats(y_u2, P["up3"]["w2"],
                               prologue=(s_u2, b_u2, pool1_rows))
    cout3 = P["up3"]["gamma"].shape[0]
    sub = P["up3"]["w2"].shape[1] // cout3                     # 16
    s_u3, b_u3 = _bn_scale_shift(jnp.sum(su3.reshape(sub, cout3), axis=0),
                                 jnp.sum(qu3.reshape(sub, cout3), axis=0),
                                 y_u2.shape[0] * sub,
                                 P["up3"]["gamma"], P["up3"]["beta"])
    s_u3t = jnp.tile(s_u3, sub)
    b_u3t = jnp.tile(b_u3, sub)

    # final 1x1 out-conv (bias, no BN) fused with up_3's BN/ReLU via the
    # block-diagonal weight; output stays depth-to-space packed (128 lanes).
    out_flat = _out_matmul(y_u3, s_u3t, b_u3t, P["out"])       # (M2, sub*lane)

    n_o, h_o, w_o = d_u2
    lane = P["out"]["b2"].shape[1] // sub                      # 8
    k3 = int(round(sub ** 0.5))                                # 4
    o = out_flat.reshape(n_o, h_o, w_o, k3, k3, lane)[..., :class_num]
    o = jnp.transpose(o, (0, 1, 3, 2, 4, 5)).reshape(
        n_o, h_o * k3, w_o * k3, class_num)
    return jnp.transpose(o, (0, 3, 1, 2))                      # NHWC -> NCHW


# --------------------------------------------------------------------------
if __name__ == "__main__":
    N, IN_C, H, W = 2, 4, 16, 16
    OUT_C, CLASS_NUM = 16, 5

    key = jax.random.PRNGKey(0)
    x = jax.random.normal(key, (N, IN_C, H, W), jnp.float32)   # NCHW input

    raw = make_params(in_channel=IN_C, out_channel=OUT_C,
                      class_num=CLASS_NUM, seed=0)
    params = prepare_params(raw)       # one-time weight repack, outside the jit

    fwd = jax.jit(issegnet_forward, static_argnums=2)
    y = jax.block_until_ready(fwd(x, params, CLASS_NUM))

    assert y.shape == (N, CLASS_NUM, H, W), y.shape
    assert bool(jnp.all(jnp.isfinite(y)))
    print("KERNEL_OK")
</pallas_src>

<mosaic_0001>
module attributes {stable_mosaic.version = 11 : i64} {
  func.func @plain(%arg0: i32, %arg1: memref<128x36xbf16, #tpu.memory_space<vmem>>, %arg2: memref<36x16xbf16, #tpu.memory_space<vmem>>, %arg3: memref<128x16xbf16, #tpu.memory_space<vmem>>, %arg4: memref<1x8x16xf32, #tpu.memory_space<vmem>>, %arg5: memref<1x8x16xf32, #tpu.memory_space<vmem>>) attributes {dimension_semantics = [#tpu.dimension_semantics<parallel>], iteration_bounds = array<i64: 1>, scalar_prefetch = 0 : i64, scratch_operands = 0 : i64, tpu.core_type = #tpu.core_type<tc>, window_params = [{transform_indices = @transform_0, window_bounds = array<i64: 128, 36>}, {pipeline_mode = #tpu.pipeline_mode<synchronous>, transform_indices = @transform_1, window_bounds = array<i64: 36, 16>}, {transform_indices = @transform_2, window_bounds = array<i64: 128, 16>}, {transform_indices = @transform_3, window_bounds = array<i64: 1, 8, 16>}, {transform_indices = @transform_4, window_bounds = array<i64: 1, 8, 16>}]} {
    %c0 = arith.constant 0 : index
    %c0_0 = arith.constant 0 : index
    %0 = vector.load %arg1[%c0, %c0_0] : memref<128x36xbf16, #tpu.memory_space<vmem>>, vector<128x36xbf16>
    %c0_1 = arith.constant 0 : index
    %c0_2 = arith.constant 0 : index
    %1 = vector.load %arg2[%c0_1, %c0_2] : memref<36x16xbf16, #tpu.memory_space<vmem>>, vector<36x16xbf16>
    %cst = arith.constant dense<0.000000e+00> : vector<128x16xf32>
    %2 = tpu.matmul %0, %1, %cst {dimension_numbers = #tpu.dot_dimension_numbers<[1], [0], [0], [1], [0, 0, 1, 1], [], []>} : vector<128x36xbf16>, vector<36x16xbf16>, vector<128x16xf32> -> vector<128x16xf32>
    %3 = arith.truncf %2 : vector<128x16xf32> to vector<128x16xbf16>
    %c0_3 = arith.constant 0 : index
    %c0_4 = arith.constant 0 : index
    %4 = vector.load %arg3[%c0_3, %c0_4] : memref<128x16xbf16, #tpu.memory_space<vmem>>, vector<128x16xbf16>
    tpu.vector_store %arg3[%c0_3, %c0_4], %3 {strides = array<i32>} : memref<128x16xbf16, #tpu.memory_space<vmem>>, vector<128x16xbf16>,
    %cst_5 = arith.constant dense<0.000000e+00> : vector<16xf32>
    %5 = vector.multi_reduction <add>, %2, %cst_5 [0] : vector<128x16xf32> to vector<16xf32>
    %6 = arith.mulf %2, %2 : vector<128x16xf32>
    %cst_6 = arith.constant dense<0.000000e+00> : vector<16xf32>
    %7 = vector.multi_reduction <add>, %6, %cst_6 [0] : vector<128x16xf32> to vector<16xf32>
    %8 = vector.shape_cast %5 : vector<16xf32> to vector<1x1x16xf32>
    %9 = vector.shape_cast %8 : vector<1x1x16xf32> to vector<1x1x16xf32>
    %10 = vector.broadcast %9 : vector<1x1x16xf32> to vector<1x8x16xf32>
    %c0_7 = arith.constant 0 : index
    %c0_8 = arith.constant 0 : index
    %c0_9 = arith.constant 0 : index
    %11 = vector.load %arg4[%c0_7, %c0_8, %c0_9] : memref<1x8x16xf32, #tpu.memory_space<vmem>>, vector<1x8x16xf32>
    tpu.vector_store %arg4[%c0_7, %c0_8, %c0_9], %10 {strides = array<i32>} : memref<1x8x16xf32, #tpu.memory_space<vmem>>, vector<1x8x16xf32>,
    %12 = vector.shape_cast %7 : vector<16xf32> to vector<1x1x16xf32>
    %13 = vector.shape_cast %12 : vector<1x1x16xf32> to vector<1x1x16xf32>
    %14 = vector.broadcast %13 : vector<1x1x16xf32> to vector<1x8x16xf32>
    %c0_10 = arith.constant 0 : index
    %c0_11 = arith.constant 0 : index
    %c0_12 = arith.constant 0 : index
    %15 = vector.load %arg5[%c0_10, %c0_11, %c0_12] : memref<1x8x16xf32, #tpu.memory_space<vmem>>, vector<1x8x16xf32>
    tpu.vector_store %arg5[%c0_10, %c0_11, %c0_12], %14 {strides = array<i32>} : memref<1x8x16xf32, #tpu.memory_space<vmem>>, vector<1x8x16xf32>,
    return
  }
  func.func @transform_0(%arg0: i32) -> (i32, i32) {
    %c0_i32 = arith.constant 0 : i32
    %c0_i32_0 = arith.constant 0 : i32
    return %arg0, %c0_i32 : i32, i32
  }
  func.func @transform_1(%arg0: i32) -> (i32, i32) {
    %c0_i32 = arith.constant 0 : i32
    %c0_i32_0 = arith.constant 0 : i32
    %c0_i32_1 = arith.constant 0 : i32
    return %c0_i32, %c0_i32_0 : i32, i32
  }
  func.func @transform_2(%arg0: i32) -> (i32, i32) {
    %c0_i32 = arith.constant 0 : i32
    %c0_i32_0 = arith.constant 0 : i32
    return %arg0, %c0_i32 : i32, i32
  }
  func.func @transform_3(%arg0: i32) -> (i32, i32, i32) {
    %c0_i32 = arith.constant 0 : i32
    %c0_i32_0 = arith.constant 0 : i32
    %c0_i32_1 = arith.constant 0 : i32
    return %arg0, %c0_i32, %c0_i32_0 : i32, i32, i32
  }
  func.func @transform_4(%arg0: i32) -> (i32, i32, i32) {
    %c0_i32 = arith.constant 0 : i32
    %c0_i32_0 = arith.constant 0 : i32
    %c0_i32_1 = arith.constant 0 : i32
    return %arg0, %c0_i32, %c0_i32_0 : i32, i32, i32
  }
}

module attributes {stable_mosaic.version = 11 : i64} {
  func.func @ep(%arg0: i32, %arg1: memref<128x16xbf16, #tpu.memory_space<vmem>>, %arg2: memref<1x16xf32, #tpu.memory_space<vmem>>, %arg3: memref<1x16xf32, #tpu.memory_space<vmem>>, %arg4: memref<128x16xbf16, #tpu.memory_space<vmem>>) attributes {dimension_semantics = [#tpu.dimension_semantics<parallel>], iteration_bounds = array<i64: 1>, scalar_prefetch = 0 : i64, scratch_operands = 0 : i64, tpu.core_type = #tpu.core_type<tc>, window_params = [{transform_indices = @transform_0, window_bounds = array<i64: 128, 16>}, {pipeline_mode = #tpu.pipeline_mode<synchronous>, transform_indices = @transform_1, window_bounds = array<i64: 1, 16>}, {pipeline_mode = #tpu.pipeline_mode<synchronous>, transform_indices = @transform_2, window_bounds = array<i64: 1, 16>}, {transform_indices = @transform_3, window_bounds = array<i64: 128, 16>}]} {
    %c0 = arith.constant 0 : index
    %c0_0 = arith.constant 0 : index
    %0 = vector.load %arg1[%c0, %c0_0] : memref<128x16xbf16, #tpu.memory_space<vmem>>, vector<128x16xbf16>
    %1 = arith.extf %0 : vector<128x16xbf16> to vector<128x16xf32>
    %c0_1 = arith.constant 0 : index
    %c0_2 = arith.constant 0 : index
    %2 = vector.load %arg2[%c0_1, %c0_2] : memref<1x16xf32, #tpu.memory_space<vmem>>, vector<1x16xf32>
    %3 = vector.broadcast %2 : vector<1x16xf32> to vector<128x16xf32>
    %4 = arith.mulf %1, %3 : vector<128x16xf32>
    %c0_3 = arith.constant 0 : index
    %c0_4 = arith.constant 0 : index
    %5 = vector.load %arg3[%c0_3, %c0_4] : memref<1x16xf32, #tpu.memory_space<vmem>>, vector<1x16xf32>
    %6 = vector.broadcast %5 : vector<1x16xf32> to vector<128x16xf32>
    %7 = arith.addf %4, %6 : vector<128x16xf32>
    %cst = arith.constant 0.000000e+00 : f32
    %8 = vector.broadcast %cst : f32 to vector<128x16xf32>
    %9 = arith.maximumf %7, %8 : vector<128x16xf32>
    %10 = arith.truncf %9 : vector<128x16xf32> to vector<128x16xbf16>
    %c0_5 = arith.constant 0 : index
    %c0_6 = arith.constant 0 : index
    %11 = vector.load %arg4[%c0_5, %c0_6] : memref<128x16xbf16, #tpu.memory_space<vmem>>, vector<128x16xbf16>
    tpu.vector_store %arg4[%c0_5, %c0_6], %10 {strides = array<i32>} : memref<128x16xbf16, #tpu.memory_space<vmem>>, vector<128x16xbf16>,
    return
  }
  func.func @transform_0(%arg0: i32) -> (i32, i32) {
    %c0_i32 = arith.constant 0 : i32
    %c0_i32_0 = arith.constant 0 : i32
    return %arg0, %c0_i32 : i32, i32
  }
  func.func @transform_1(%arg0: i32) -> (i32, i32) {
    %c0_i32 = arith.constant 0 : i32
    %c0_i32_0 = arith.constant 0 : i32
    %c0_i32_1 = arith.constant 0 : i32
    return %c0_i32, %c0_i32_0 : i32, i32
  }
  func.func @transform_2(%arg0: i32) -> (i32, i32) {
    %c0_i32 = arith.constant 0 : i32
    %c0_i32_0 = arith.constant 0 : i32
    %c0_i32_1 = arith.constant 0 : i32
    return %c0_i32, %c0_i32_0 : i32, i32
  }
  func.func @transform_3(%arg0: i32) -> (i32, i32) {
    %c0_i32 = arith.constant 0 : i32
    %c0_i32_0 = arith.constant 0 : i32
    return %arg0, %c0_i32 : i32, i32
  }
}

module attributes {stable_mosaic.version = 11 : i64} {
  func.func @plain(%arg0: i32, %arg1: memref<128x144xbf16, #tpu.memory_space<vmem>>, %arg2: memref<144x16xbf16, #tpu.memory_space<vmem>>, %arg3: memref<128x16xbf16, #tpu.memory_space<vmem>>, %arg4: memref<1x8x16xf32, #tpu.memory_space<vmem>>, %arg5: memref<1x8x16xf32, #tpu.memory_space<vmem>>) attributes {dimension_semantics = [#tpu.dimension_semantics<parallel>], iteration_bounds = array<i64: 1>, scalar_prefetch = 0 : i64, scratch_operands = 0 : i64, tpu.core_type = #tpu.core_type<tc>, window_params = [{transform_indices = @transform_0, window_bounds = array<i64: 128, 144>}, {pipeline_mode = #tpu.pipeline_mode<synchronous>, transform_indices = @transform_1, window_bounds = array<i64: 144, 16>}, {transform_indices = @transform_2, window_bounds = array<i64: 128, 16>}, {transform_indices = @transform_3, window_bounds = array<i64: 1, 8, 16>}, {transform_indices = @transform_4, window_bounds = array<i64: 1, 8, 16>}]} {
    %c0 = arith.constant 0 : index
    %c0_0 = arith.constant 0 : index
    %0 = vector.load %arg1[%c0, %c0_0] : memref<128x144xbf16, #tpu.memory_space<vmem>>, vector<128x144xbf16>
    %c0_1 = arith.constant 0 : index
    %c0_2 = arith.constant 0 : index
    %1 = vector.load %arg2[%c0_1, %c0_2] : memref<144x16xbf16, #tpu.memory_space<vmem>>, vector<144x16xbf16>
    %cst = arith.constant dense<0.000000e+00> : vector<128x16xf32>
    %2 = tpu.matmul %0, %1, %cst {dimension_numbers = #tpu.dot_dimension_numbers<[1], [0], [0], [1], [0, 0, 1, 1], [], []>} : vector<128x144xbf16>, vector<144x16xbf16>, vector<128x16xf32> -> vector<128x16xf32>
    %3 = arith.truncf %2 : vector<128x16xf32> to vector<128x16xbf16>
    %c0_3 = arith.constant 0 : index
    %c0_4 = arith.constant 0 : index
    %4 = vector.load %arg3[%c0_3, %c0_4] : memref<128x16xbf16, #tpu.memory_space<vmem>>, vector<128x16xbf16>
    tpu.vector_store %arg3[%c0_3, %c0_4], %3 {strides = array<i32>} : memref<128x16xbf16, #tpu.memory_space<vmem>>, vector<128x16xbf16>,
    %cst_5 = arith.constant dense<0.000000e+00> : vector<16xf32>
    %5 = vector.multi_reduction <add>, %2, %cst_5 [0] : vector<128x16xf32> to vector<16xf32>
    %6 = arith.mulf %2, %2 : vector<128x16xf32>
    %cst_6 = arith.constant dense<0.000000e+00> : vector<16xf32>
    %7 = vector.multi_reduction <add>, %6, %cst_6 [0] : vector<128x16xf32> to vector<16xf32>
    %8 = vector.shape_cast %5 : vector<16xf32> to vector<1x1x16xf32>
    %9 = vector.shape_cast %8 : vector<1x1x16xf32> to vector<1x1x16xf32>
    %10 = vector.broadcast %9 : vector<1x1x16xf32> to vector<1x8x16xf32>
    %c0_7 = arith.constant 0 : index
    %c0_8 = arith.constant 0 : index
    %c0_9 = arith.constant 0 : index
    %11 = vector.load %arg4[%c0_7, %c0_8, %c0_9] : memref<1x8x16xf32, #tpu.memory_space<vmem>>, vector<1x8x16xf32>
    tpu.vector_store %arg4[%c0_7, %c0_8, %c0_9], %10 {strides = array<i32>} : memref<1x8x16xf32, #tpu.memory_space<vmem>>, vector<1x8x16xf32>,
    %12 = vector.shape_cast %7 : vector<16xf32> to vector<1x1x16xf32>
    %13 = vector.shape_cast %12 : vector<1x1x16xf32> to vector<1x1x16xf32>
    %14 = vector.broadcast %13 : vector<1x1x16xf32> to vector<1x8x16xf32>
    %c0_10 = arith.constant 0 : index
    %c0_11 = arith.constant 0 : index
    %c0_12 = arith.constant 0 : index
    %15 = vector.load %arg5[%c0_10, %c0_11, %c0_12] : memref<1x8x16xf32, #tpu.memory_space<vmem>>, vector<1x8x16xf32>
    tpu.vector_store %arg5[%c0_10, %c0_11, %c0_12], %14 {strides = array<i32>} : memref<1x8x16xf32, #tpu.memory_space<vmem>>, vector<1x8x16xf32>,
    return
  }
  func.func @transform_0(%arg0: i32) -> (i32, i32) {
    %c0_i32 = arith.constant 0 : i32
    %c0_i32_0 = arith.constant 0 : i32
    return %arg0, %c0_i32 : i32, i32
  }
  func.func @transform_1(%arg0: i32) -> (i32, i32) {
    %c0_i32 = arith.constant 0 : i32
    %c0_i32_0 = arith.constant 0 : i32
    %c0_i32_1 = arith.constant 0 : i32
    return %c0_i32, %c0_i32_0 : i32, i32
  }
  func.func @transform_2(%arg0: i32) -> (i32, i32) {
    %c0_i32 = arith.constant 0 : i32
    %c0_i32_0 = arith.constant 0 : i32
    return %arg0, %c0_i32 : i32, i32
  }
  func.func @transform_3(%arg0: i32) -> (i32, i32, i32) {
    %c0_i32 = arith.constant 0 : i32
    %c0_i32_0 = arith.constant 0 : i32
    %c0_i32_1 = arith.constant 0 : i32
    return %arg0, %c0_i32, %c0_i32_0 : i32, i32, i32
  }
  func.func @transform_4(%arg0: i32) -> (i32, i32, i32) {
    %c0_i32 = arith.constant 0 : i32
    %c0_i32_0 = arith.constant 0 : i32
    %c0_i32_1 = arith.constant 0 : i32
    return %arg0, %c0_i32, %c0_i32_0 : i32, i32, i32
  }
}

module attributes {stable_mosaic.version = 11 : i64} {
  func.func @with_pro(%arg0: i32, %arg1: memref<128x16xbf16, #tpu.memory_space<vmem>>, %arg2: memref<1x16xf32, #tpu.memory_space<vmem>>, %arg3: memref<1x16xf32, #tpu.memory_space<vmem>>, %arg4: memref<16x96xbf16, #tpu.memory_space<vmem>>, %arg5: memref<128x96xbf16, #tpu.memory_space<vmem>>, %arg6: memref<1x8x96xf32, #tpu.memory_space<vmem>>, %arg7: memref<1x8x96xf32, #tpu.memory_space<vmem>>) attributes {dimension_semantics = [#tpu.dimension_semantics<parallel>], iteration_bounds = array<i64: 1>, scalar_prefetch = 0 : i64, scratch_operands = 0 : i64, tpu.core_type = #tpu.core_type<tc>, window_params = [{transform_indices = @transform_0, window_bounds = array<i64: 128, 16>}, {pipeline_mode = #tpu.pipeline_mode<synchronous>, transform_indices = @transform_1, window_bounds = array<i64: 1, 16>}, {pipeline_mode = #tpu.pipeline_mode<synchronous>, transform_indices = @transform_2, window_bounds = array<i64: 1, 16>}, {pipeline_mode = #tpu.pipeline_mode<synchronous>, transform_indices = @transform_3, window_bounds = array<i64: 16, 96>}, {transform_indices = @transform_4, window_bounds = array<i64: 128, 96>}, {transform_indices = @transform_5, window_bounds = array<i64: 1, 8, 96>}, {transform_indices = @transform_6, window_bounds = array<i64: 1, 8, 96>}]} {
    %c0 = arith.constant 0 : index
    %c0_0 = arith.constant 0 : index
    %0 = vector.load %arg1[%c0, %c0_0] : memref<128x16xbf16, #tpu.memory_space<vmem>>, vector<128x16xbf16>
    %1 = arith.extf %0 : vector<128x16xbf16> to vector<128x16xf32>
    %c0_1 = arith.constant 0 : index
    %c0_2 = arith.constant 0 : index
    %2 = vector.load %arg2[%c0_1, %c0_2] : memref<1x16xf32, #tpu.memory_space<vmem>>, vector<1x16xf32>
    %3 = vector.broadcast %2 : vector<1x16xf32> to vector<128x16xf32>
    %4 = arith.mulf %1, %3 : vector<128x16xf32>
    %c0_3 = arith.constant 0 : index
    %c0_4 = arith.constant 0 : index
    %5 = vector.load %arg3[%c0_3, %c0_4] : memref<1x16xf32, #tpu.memory_space<vmem>>, vector<1x16xf32>
    %6 = vector.broadcast %5 : vector<1x16xf32> to vector<128x16xf32>
    %7 = arith.addf %4, %6 : vector<128x16xf32>
    %cst = arith.constant 0.000000e+00 : f32
    %8 = vector.broadcast %cst : f32 to vector<128x16xf32>
    %9 = arith.maximumf %7, %8 : vector<128x16xf32>
    %10 = arith.truncf %9 : vector<128x16xf32> to vector<128x16xbf16>
    %c0_5 = arith.constant 0 : index
    %c0_6 = arith.constant 0 : index
    %11 = vector.load %arg4[%c0_5, %c0_6] : memref<16x96xbf16, #tpu.memory_space<vmem>>, vector<16x96xbf16>
    %cst_7 = arith.constant dense<0.000000e+00> : vector<128x96xf32>
    %12 = tpu.matmul %10, %11, %cst_7 {dimension_numbers = #tpu.dot_dimension_numbers<[1], [0], [0], [1], [0, 0, 1, 1], [], []>} : vector<128x16xbf16>, vector<16x96xbf16>, vector<128x96xf32> -> vector<128x96xf32>
    %13 = arith.truncf %12 : vector<128x96xf32> to vector<128x96xbf16>
    %c0_8 = arith.constant 0 : index
    %c0_9 = arith.constant 0 : index
    %14 = vector.load %arg5[%c0_8, %c0_9] : memref<128x96xbf16, #tpu.memory_space<vmem>>, vector<128x96xbf16>
    tpu.vector_store %arg5[%c0_8, %c0_9], %13 {strides = array<i32>} : memref<128x96xbf16, #tpu.memory_space<vmem>>, vector<128x96xbf16>,
    %cst_10 = arith.constant dense<0.000000e+00> : vector<96xf32>
    %15 = vector.multi_reduction <add>, %12, %cst_10 [0] : vector<128x96xf32> to vector<96xf32>
    %16 = arith.mulf %12, %12 : vector<128x96xf32>
    %cst_11 = arith.constant dense<0.000000e+00> : vector<96xf32>
    %17 = vector.multi_reduction <add>, %16, %cst_11 [0] : vector<128x96xf32> to vector<96xf32>
    %18 = vector.shape_cast %15 : vector<96xf32> to vector<1x1x96xf32>
    %19 = vector.shape_cast %18 : vector<1x1x96xf32> to vector<1x1x96xf32>
    %20 = vector.broadcast %19 : vector<1x1x96xf32> to vector<1x8x96xf32>
    %c0_12 = arith.constant 0 : index
    %c0_13 = arith.constant 0 : index
    %c0_14 = arith.constant 0 : index
    %21 = vector.load %arg6[%c0_12, %c0_13, %c0_14] : memref<1x8x96xf32, #tpu.memory_space<vmem>>, vector<1x8x96xf32>
    tpu.vector_store %arg6[%c0_12, %c0_13, %c0_14], %20 {strides = array<i32>} : memref<1x8x96xf32, #tpu.memory_space<vmem>>, vector<1x8x96xf32>,
    %22 = vector.shape_cast %17 : vector<96xf32> to vector<1x1x96xf32>
    %23 = vector.shape_cast %22 : vector<1x1x96xf32> to vector<1x1x96xf32>
    %24 = vector.broadcast %23 : vector<1x1x96xf32> to vector<1x8x96xf32>
    %c0_15 = arith.constant 0 : index
    %c0_16 = arith.constant 0 : index
    %c0_17 = arith.constant 0 : index
    %25 = vector.load %arg7[%c0_15, %c0_16, %c0_17] : memref<1x8x96xf32, #tpu.memory_space<vmem>>, vector<1x8x96xf32>
    tpu.vector_store %arg7[%c0_15, %c0_16, %c0_17], %24 {strides = array<i32>} : memref<1x8x96xf32, #tpu.memory_space<vmem>>, vector<1x8x96xf32>,
    return
  }
  func.func @transform_0(%arg0: i32) -> (i32, i32) {
    %c0_i32 = arith.constant 0 : i32
    %c0_i32_0 = arith.constant 0 : i32
    return %arg0, %c0_i32 : i32, i32
  }
  func.func @transform_1(%arg0: i32) -> (i32, i32) {
    %c0_i32 = arith.constant 0 : i32
    %c0_i32_0 = arith.constant 0 : i32
    %c0_i32_1 = arith.constant 0 : i32
    return %c0_i32, %c0_i32_0 : i32, i32
  }
  func.func @transform_2(%arg0: i32) -> (i32, i32) {
    %c0_i32 = arith.constant 0 : i32
    %c0_i32_0 = arith.constant 0 : i32
    %c0_i32_1 = arith.constant 0 : i32
    return %c0_i32, %c0_i32_0 : i32, i32
  }
  func.func @transform_3(%arg0: i32) -> (i32, i32) {
    %c0_i32 = arith.constant 0 : i32
    %c0_i32_0 = arith.constant 0 : i32
    %c0_i32_1 = arith.constant 0 : i32
    return %c0_i32, %c0_i32_0 : i32, i32
  }
  func.func @transform_4(%arg0: i32) -> (i32, i32) {
    %c0_i32 = arith.constant 0 : i32
    %c0_i32_0 = arith.constant 0 : i32
    return %arg0, %c0_i32 : i32, i32
  }
  func.func @transform_5(%arg0: i32) -> (i32, i32, i32) {
    %c0_i32 = arith.constant 0 : i32
    %c0_i32_0 = arith.constant 0 : i32
    %c0_i32_1 = arith.constant 0 : i32
    return %arg0, %c0_i32, %c0_i32_0 : i32, i32, i32
  }
  func.func @transform_6(%arg0: i32) -> (i32, i32, i32) {
    %c0_i32 = arith.constant 0 : i32
    %c0_i32_0 = arith.constant 0 : i32
    %c0_i32_1 = arith.constant 0 : i32
    return %arg0, %c0_i32, %c0_i32_0 : i32, i32, i32
  }
}

module attributes {stable_mosaic.version = 11 : i64} {
  func.func @ep(%arg0: i32, %arg1: memref<128x96xbf16, #tpu.memory_space<vmem>>, %arg2: memref<1x96xf32, #tpu.memory_space<vmem>>, %arg3: memref<1x96xf32, #tpu.memory_space<vmem>>, %arg4: memref<128x96xbf16, #tpu.memory_space<vmem>>) attributes {dimension_semantics = [#tpu.dimension_semantics<parallel>], iteration_bounds = array<i64: 1>, scalar_prefetch = 0 : i64, scratch_operands = 0 : i64, tpu.core_type = #tpu.core_type<tc>, window_params = [{transform_indices = @transform_0, window_bounds = array<i64: 128, 96>}, {pipeline_mode = #tpu.pipeline_mode<synchronous>, transform_indices = @transform_1, window_bounds = array<i64: 1, 96>}, {pipeline_mode = #tpu.pipeline_mode<synchronous>, transform_indices = @transform_2, window_bounds = array<i64: 1, 96>}, {transform_indices = @transform_3, window_bounds = array<i64: 128, 96>}]} {
    %c0 = arith.constant 0 : index
    %c0_0 = arith.constant 0 : index
    %0 = vector.load %arg1[%c0, %c0_0] : memref<128x96xbf16, #tpu.memory_space<vmem>>, vector<128x96xbf16>
    %1 = arith.extf %0 : vector<128x96xbf16> to vector<128x96xf32>
    %c0_1 = arith.constant 0 : index
    %c0_2 = arith.constant 0 : index
    %2 = vector.load %arg2[%c0_1, %c0_2] : memref<1x96xf32, #tpu.memory_space<vmem>>, vector<1x96xf32>
    %3 = vector.broadcast %2 : vector<1x96xf32> to vector<128x96xf32>
    %4 = arith.mulf %1, %3 : vector<128x96xf32>
    %c0_3 = arith.constant 0 : index
    %c0_4 = arith.constant 0 : index
    %5 = vector.load %arg3[%c0_3, %c0_4] : memref<1x96xf32, #tpu.memory_space<vmem>>, vector<1x96xf32>
    %6 = vector.broadcast %5 : vector<1x96xf32> to vector<128x96xf32>
    %7 = arith.addf %4, %6 : vector<128x96xf32>
    %cst = arith.constant 0.000000e+00 : f32
    %8 = vector.broadcast %cst : f32 to vector<128x96xf32>
    %9 = arith.maximumf %7, %8 : vector<128x96xf32>
    %10 = arith.truncf %9 : vector<128x96xf32> to vector<128x96xbf16>
    %c0_5 = arith.constant 0 : index
    %c0_6 = arith.constant 0 : index
    %11 = vector.load %arg4[%c0_5, %c0_6] : memref<128x96xbf16, #tpu.memory_space<vmem>>, vector<128x96xbf16>
    tpu.vector_store %arg4[%c0_5, %c0_6], %10 {strides = array<i32>} : memref<128x96xbf16, #tpu.memory_space<vmem>>, vector<128x96xbf16>,
    return
  }
  func.func @transform_0(%arg0: i32) -> (i32, i32) {
    %c0_i32 = arith.constant 0 : i32
    %c0_i32_0 = arith.constant 0 : i32
    return %arg0, %c0_i32 : i32, i32
  }
  func.func @transform_1(%arg0: i32) -> (i32, i32) {
    %c0_i32 = arith.constant 0 : i32
    %c0_i32_0 = arith.constant 0 : i32
    %c0_i32_1 = arith.constant 0 : i32
    return %c0_i32, %c0_i32_0 : i32, i32
  }
  func.func @transform_2(%arg0: i32) -> (i32, i32) {
    %c0_i32 = arith.constant 0 : i32
    %c0_i32_0 = arith.constant 0 : i32
    %c0_i32_1 = arith.constant 0 : i32
    return %c0_i32, %c0_i32_0 : i32, i32
  }
  func.func @transform_3(%arg0: i32) -> (i32, i32) {
    %c0_i32 = arith.constant 0 : i32
    %c0_i32_0 = arith.constant 0 : i32
    return %arg0, %c0_i32 : i32, i32
  }
}

module attributes {stable_mosaic.version = 11 : i64} {
  func.func @plain(%arg0: i32, %arg1: memref<128x576xbf16, #tpu.memory_space<vmem>>, %arg2: memref<576x128xbf16, #tpu.memory_space<vmem>>, %arg3: memref<128x128xbf16, #tpu.memory_space<vmem>>, %arg4: memref<1x8x128xf32, #tpu.memory_space<vmem>>, %arg5: memref<1x8x128xf32, #tpu.memory_space<vmem>>) attributes {dimension_semantics = [#tpu.dimension_semantics<parallel>], iteration_bounds = array<i64: 1>, scalar_prefetch = 0 : i64, scratch_operands = 0 : i64, tpu.core_type = #tpu.core_type<tc>, window_params = [{transform_indices = @transform_0, window_bounds = array<i64: 128, 576>}, {pipeline_mode = #tpu.pipeline_mode<synchronous>, transform_indices = @transform_1, window_bounds = array<i64: 576, 128>}, {transform_indices = @transform_2, window_bounds = array<i64: 128, 128>}, {transform_indices = @transform_3, window_bounds = array<i64: 1, 8, 128>}, {transform_indices = @transform_4, window_bounds = array<i64: 1, 8, 128>}]} {
    %c0 = arith.constant 0 : index
    %c0_0 = arith.constant 0 : index
    %0 = vector.load %arg1[%c0, %c0_0] : memref<128x576xbf16, #tpu.memory_space<vmem>>, vector<128x576xbf16>
    %c0_1 = arith.constant 0 : index
    %c0_2 = arith.constant 0 : index
    %1 = vector.load %arg2[%c0_1, %c0_2] : memref<576x128xbf16, #tpu.memory_space<vmem>>, vector<576x128xbf16>
    %cst = arith.constant dense<0.000000e+00> : vector<128x128xf32>
    %2 = tpu.matmul %0, %1, %cst {dimension_numbers = #tpu.dot_dimension_numbers<[1], [0], [0], [1], [0, 0, 1, 1], [], []>} : vector<128x576xbf16>, vector<576x128xbf16>, vector<128x128xf32> -> vector<128x128xf32>
    %3 = arith.truncf %2 : vector<128x128xf32> to vector<128x128xbf16>
    %c0_3 = arith.constant 0 : index
    %c0_4 = arith.constant 0 : index
    %4 = vector.load %arg3[%c0_3, %c0_4] : memref<128x128xbf16, #tpu.memory_space<vmem>>, vector<128x128xbf16>
    tpu.vector_store %arg3[%c0_3, %c0_4], %3 {strides = array<i32>} : memref<128x128xbf16, #tpu.memory_space<vmem>>, vector<128x128xbf16>,
    %cst_5 = arith.constant dense<0.000000e+00> : vector<128xf32>
    %5 = vector.multi_reduction <add>, %2, %cst_5 [0] : vector<128x128xf32> to vector<128xf32>
    %6 = arith.mulf %2, %2 : vector<128x128xf32>
    %cst_6 = arith.constant dense<0.000000e+00> : vector<128xf32>
    %7 = vector.multi_reduction <add>, %6, %cst_6 [0] : vector<128x128xf32> to vector<128xf32>
    %8 = vector.shape_cast %5 : vector<128xf32> to vector<1x1x128xf32>
    %9 = vector.shape_cast %8 : vector<1x1x128xf32> to vector<1x1x128xf32>
    %10 = vector.broadcast %9 : vector<1x1x128xf32> to vector<1x8x128xf32>
    %c0_7 = arith.constant 0 : index
    %c0_8 = arith.constant 0 : index
    %c0_9 = arith.constant 0 : index
    %11 = vector.load %arg4[%c0_7, %c0_8, %c0_9] : memref<1x8x128xf32, #tpu.memory_space<vmem>>, vector<1x8x128xf32>
    tpu.vector_store %arg4[%c0_7, %c0_8, %c0_9], %10 {strides = array<i32>} : memref<1x8x128xf32, #tpu.memory_space<vmem>>, vector<1x8x128xf32>,
    %12 = vector.shape_cast %7 : vector<128xf32> to vector<1x1x128xf32>
    %13 = vector.shape_cast %12 : vector<1x1x128xf32> to vector<1x1x128xf32>
    %14 = vector.broadcast %13 : vector<1x1x128xf32> to vector<1x8x128xf32>
    %c0_10 = arith.constant 0 : index
    %c0_11 = arith.constant 0 : index
    %c0_12 = arith.constant 0 : index
    %15 = vector.load %arg5[%c0_10, %c0_11, %c0_12] : memref<1x8x128xf32, #tpu.memory_space<vmem>>, vector<1x8x128xf32>
    tpu.vector_store %arg5[%c0_10, %c0_11, %c0_12], %14 {strides = array<i32>} : memref<1x8x128xf32, #tpu.memory_space<vmem>>, vector<1x8x128xf32>,
    return
  }
  func.func @transform_0(%arg0: i32) -> (i32, i32) {
    %c0_i32 = arith.constant 0 : i32
    %c0_i32_0 = arith.constant 0 : i32
    return %arg0, %c0_i32 : i32, i32
  }
  func.func @transform_1(%arg0: i32) -> (i32, i32) {
    %c0_i32 = arith.constant 0 : i32
    %c0_i32_0 = arith.constant 0 : i32
    %c0_i32_1 = arith.constant 0 : i32
    return %c0_i32, %c0_i32_0 : i32, i32
  }
  func.func @transform_2(%arg0: i32) -> (i32, i32) {
    %c0_i32 = arith.constant 0 : i32
    %c0_i32_0 = arith.constant 0 : i32
    return %arg0, %c0_i32 : i32, i32
  }
  func.func @transform_3(%arg0: i32) -> (i32, i32, i32) {
    %c0_i32 = arith.constant 0 : i32
    %c0_i32_0 = arith.constant 0 : i32
    %c0_i32_1 = arith.constant 0 : i32
    return %arg0, %c0_i32, %c0_i32_0 : i32, i32, i32
  }
  func.func @transform_4(%arg0: i32) -> (i32, i32, i32) {
    %c0_i32 = arith.constant 0 : i32
    %c0_i32_0 = arith.constant 0 : i32
    %c0_i32_1 = arith.constant 0 : i32
    return %arg0, %c0_i32, %c0_i32_0 : i32, i32, i32
  }
}

module attributes {stable_mosaic.version = 11 : i64} {
  func.func @with_pro(%arg0: i32, %arg1: memref<128x128xbf16, #tpu.memory_space<vmem>>, %arg2: memref<1x128xf32, #tpu.memory_space<vmem>>, %arg3: memref<1x128xf32, #tpu.memory_space<vmem>>, %arg4: memref<128x32xbf16, #tpu.memory_space<vmem>>, %arg5: memref<128x32xbf16, #tpu.memory_space<vmem>>, %arg6: memref<1x8x32xf32, #tpu.memory_space<vmem>>, %arg7: memref<1x8x32xf32, #tpu.memory_space<vmem>>) attributes {dimension_semantics = [#tpu.dimension_semantics<parallel>], iteration_bounds = array<i64: 1>, scalar_prefetch = 0 : i64, scratch_operands = 0 : i64, tpu.core_type = #tpu.core_type<tc>, window_params = [{transform_indices = @transform_0, window_bounds = array<i64: 128, 128>}, {pipeline_mode = #tpu.pipeline_mode<synchronous>, transform_indices = @transform_1, window_bounds = array<i64: 1, 128>}, {pipeline_mode = #tpu.pipeline_mode<synchronous>, transform_indices = @transform_2, window_bounds = array<i64: 1, 128>}, {pipeline_mode = #tpu.pipeline_mode<synchronous>, transform_indices = @transform_3, window_bounds = array<i64: 128, 32>}, {transform_indices = @transform_4, window_bounds = array<i64: 128, 32>}, {transform_indices = @transform_5, window_bounds = array<i64: 1, 8, 32>}, {transform_indices = @transform_6, window_bounds = array<i64: 1, 8, 32>}]} {
    %c0 = arith.constant 0 : index
    %c0_0 = arith.constant 0 : index
    %0 = vector.load %arg1[%c0, %c0_0] : memref<128x128xbf16, #tpu.memory_space<vmem>>, vector<128x128xbf16>
    %1 = arith.extf %0 : vector<128x128xbf16> to vector<128x128xf32>
    %c0_1 = arith.constant 0 : index
    %c0_2 = arith.constant 0 : index
    %2 = vector.load %arg2[%c0_1, %c0_2] : memref<1x128xf32, #tpu.memory_space<vmem>>, vector<1x128xf32>
    %3 = vector.broadcast %2 : vector<1x128xf32> to vector<128x128xf32>
    %4 = arith.mulf %1, %3 : vector<128x128xf32>
    %c0_3 = arith.constant 0 : index
    %c0_4 = arith.constant 0 : index
    %5 = vector.load %arg3[%c0_3, %c0_4] : memref<1x128xf32, #tpu.memory_space<vmem>>, vector<1x128xf32>
    %6 = vector.broadcast %5 : vector<1x128xf32> to vector<128x128xf32>
    %7 = arith.addf %4, %6 : vector<128x128xf32>
    %cst = arith.constant 0.000000e+00 : f32
    %8 = vector.broadcast %cst : f32 to vector<128x128xf32>
    %9 = arith.maximumf %7, %8 : vector<128x128xf32>
    %10 = arith.truncf %9 : vector<128x128xf32> to vector<128x128xbf16>
    %c0_5 = arith.constant 0 : index
    %c0_6 = arith.constant 0 : index
    %11 = vector.load %arg4[%c0_5, %c0_6] : memref<128x32xbf16, #tpu.memory_space<vmem>>, vector<128x32xbf16>
    %cst_7 = arith.constant dense<0.000000e+00> : vector<128x32xf32>
    %12 = tpu.matmul %10, %11, %cst_7 {dimension_numbers = #tpu.dot_dimension_numbers<[1], [0], [0], [1], [0, 0, 1, 1], [], []>} : vector<128x128xbf16>, vector<128x32xbf16>, vector<128x32xf32> -> vector<128x32xf32>
    %13 = arith.truncf %12 : vector<128x32xf32> to vector<128x32xbf16>
    %c0_8 = arith.constant 0 : index
    %c0_9 = arith.constant 0 : index
    %14 = vector.load %arg5[%c0_8, %c0_9] : memref<128x32xbf16, #tpu.memory_space<vmem>>, vector<128x32xbf16>
    tpu.vector_store %arg5[%c0_8, %c0_9], %13 {strides = array<i32>} : memref<128x32xbf16, #tpu.memory_space<vmem>>, vector<128x32xbf16>,
    %cst_10 = arith.constant dense<0.000000e+00> : vector<32xf32>
    %15 = vector.multi_reduction <add>, %12, %cst_10 [0] : vector<128x32xf32> to vector<32xf32>
    %16 = arith.mulf %12, %12 : vector<128x32xf32>
    %cst_11 = arith.constant dense<0.000000e+00> : vector<32xf32>
    %17 = vector.multi_reduction <add>, %16, %cst_11 [0] : vector<128x32xf32> to vector<32xf32>
    %18 = vector.shape_cast %15 : vector<32xf32> to vector<1x1x32xf32>
    %19 = vector.shape_cast %18 : vector<1x1x32xf32> to vector<1x1x32xf32>
    %20 = vector.broadcast %19 : vector<1x1x32xf32> to vector<1x8x32xf32>
    %c0_12 = arith.constant 0 : index
    %c0_13 = arith.constant 0 : index
    %c0_14 = arith.constant 0 : index
    %21 = vector.load %arg6[%c0_12, %c0_13, %c0_14] : memref<1x8x32xf32, #tpu.memory_space<vmem>>, vector<1x8x32xf32>
    tpu.vector_store %arg6[%c0_12, %c0_13, %c0_14], %20 {strides = array<i32>} : memref<1x8x32xf32, #tpu.memory_space<vmem>>, vector<1x8x32xf32>,
    %22 = vector.shape_cast %17 : vector<32xf32> to vector<1x1x32xf32>
    %23 = vector.shape_cast %22 : vector<1x1x32xf32> to vector<1x1x32xf32>
    %24 = vector.broadcast %23 : vector<1x1x32xf32> to vector<1x8x32xf32>
    %c0_15 = arith.constant 0 : index
    %c0_16 = arith.constant 0 : index
    %c0_17 = arith.constant 0 : index
    %25 = vector.load %arg7[%c0_15, %c0_16, %c0_17] : memref<1x8x32xf32, #tpu.memory_space<vmem>>, vector<1x8x32xf32>
    tpu.vector_store %arg7[%c0_15, %c0_16, %c0_17], %24 {strides = array<i32>} : memref<1x8x32xf32, #tpu.memory_space<vmem>>, vector<1x8x32xf32>,
    return
  }
  func.func @transform_0(%arg0: i32) -> (i32, i32) {
    %c0_i32 = arith.constant 0 : i32
    %c0_i32_0 = arith.constant 0 : i32
    return %arg0, %c0_i32 : i32, i32
  }
  func.func @transform_1(%arg0: i32) -> (i32, i32) {
    %c0_i32 = arith.constant 0 : i32
    %c0_i32_0 = arith.constant 0 : i32
    %c0_i32_1 = arith.constant 0 : i32
    return %c0_i32, %c0_i32_0 : i32, i32
  }
  func.func @transform_2(%arg0: i32) -> (i32, i32) {
    %c0_i32 = arith.constant 0 : i32
    %c0_i32_0 = arith.constant 0 : i32
    %c0_i32_1 = arith.constant 0 : i32
    return %c0_i32, %c0_i32_0 : i32, i32
  }
  func.func @transform_3(%arg0: i32) -> (i32, i32) {
    %c0_i32 = arith.constant 0 : i32
    %c0_i32_0 = arith.constant 0 : i32
    %c0_i32_1 = arith.constant 0 : i32
    return %c0_i32, %c0_i32_0 : i32, i32
  }
  func.func @transform_4(%arg0: i32) -> (i32, i32) {
    %c0_i32 = arith.constant 0 : i32
    %c0_i32_0 = arith.constant 0 : i32
    return %arg0, %c0_i32 : i32, i32
  }
  func.func @transform_5(%arg0: i32) -> (i32, i32, i32) {
    %c0_i32 = arith.constant 0 : i32
    %c0_i32_0 = arith.constant 0 : i32
    %c0_i32_1 = arith.constant 0 : i32
    return %arg0, %c0_i32, %c0_i32_0 : i32, i32, i32
  }
  func.func @transform_6(%arg0: i32) -> (i32, i32, i32) {
    %c0_i32 = arith.constant 0 : i32
    %c0_i32_0 = arith.constant 0 : i32
    %c0_i32_1 = arith.constant 0 : i32
    return %arg0, %c0_i32, %c0_i32_0 : i32, i32, i32
  }
}

module attributes {stable_mosaic.version = 11 : i64} {
  func.func @with_pro_res(%arg0: i32, %arg1: memref<128x32xbf16, #tpu.memory_space<vmem>>, %arg2: memref<1x32xf32, #tpu.memory_space<vmem>>, %arg3: memref<1x32xf32, #tpu.memory_space<vmem>>, %arg4: memref<128x32xbf16, #tpu.memory_space<vmem>>, %arg5: memref<32x96xbf16, #tpu.memory_space<vmem>>, %arg6: memref<128x96xbf16, #tpu.memory_space<vmem>>, %arg7: memref<1x8x96xf32, #tpu.memory_space<vmem>>, %arg8: memref<1x8x96xf32, #tpu.memory_space<vmem>>) attributes {dimension_semantics = [#tpu.dimension_semantics<parallel>], iteration_bounds = array<i64: 1>, scalar_prefetch = 0 : i64, scratch_operands = 0 : i64, tpu.core_type = #tpu.core_type<tc>, window_params = [{transform_indices = @transform_0, window_bounds = array<i64: 128, 32>}, {pipeline_mode = #tpu.pipeline_mode<synchronous>, transform_indices = @transform_1, window_bounds = array<i64: 1, 32>}, {pipeline_mode = #tpu.pipeline_mode<synchronous>, transform_indices = @transform_2, window_bounds = array<i64: 1, 32>}, {transform_indices = @transform_3, window_bounds = array<i64: 128, 32>}, {pipeline_mode = #tpu.pipeline_mode<synchronous>, transform_indices = @transform_4, window_bounds = array<i64: 32, 96>}, {transform_indices = @transform_5, window_bounds = array<i64: 128, 96>}, {transform_indices = @transform_6, window_bounds = array<i64: 1, 8, 96>}, {transform_indices = @transform_7, window_bounds = array<i64: 1, 8, 96>}]} {
    %c0 = arith.constant 0 : index
    %c0_0 = arith.constant 0 : index
    %0 = vector.load %arg1[%c0, %c0_0] : memref<128x32xbf16, #tpu.memory_space<vmem>>, vector<128x32xbf16>
    %1 = arith.extf %0 : vector<128x32xbf16> to vector<128x32xf32>
    %c0_1 = arith.constant 0 : index
    %c0_2 = arith.constant 0 : index
    %2 = vector.load %arg2[%c0_1, %c0_2] : memref<1x32xf32, #tpu.memory_space<vmem>>, vector<1x32xf32>
    %3 = vector.broadcast %2 : vector<1x32xf32> to vector<128x32xf32>
    %4 = arith.mulf %1, %3 : vector<128x32xf32>
    %c0_3 = arith.constant 0 : index
    %c0_4 = arith.constant 0 : index
    %5 = vector.load %arg3[%c0_3, %c0_4] : memref<1x32xf32, #tpu.memory_space<vmem>>, vector<1x32xf32>
    %6 = vector.broadcast %5 : vector<1x32xf32> to vector<128x32xf32>
    %7 = arith.addf %4, %6 : vector<128x32xf32>
    %cst = arith.constant 0.000000e+00 : f32
    %8 = vector.broadcast %cst : f32 to vector<128x32xf32>
    %9 = arith.maximumf %7, %8 : vector<128x32xf32>
    %c0_5 = arith.constant 0 : index
    %c0_6 = arith.constant 0 : index
    %10 = vector.load %arg4[%c0_5, %c0_6] : memref<128x32xbf16, #tpu.memory_space<vmem>>, vector<128x32xbf16>
    %11 = arith.extf %10 : vector<128x32xbf16> to vector<128x32xf32>
    %12 = arith.addf %9, %11 : vector<128x32xf32>
    %13 = arith.truncf %12 : vector<128x32xf32> to vector<128x32xbf16>
    %c0_7 = arith.constant 0 : index
    %c0_8 = arith.constant 0 : index
    %14 = vector.load %arg5[%c0_7, %c0_8] : memref<32x96xbf16, #tpu.memory_space<vmem>>, vector<32x96xbf16>
    %cst_9 = arith.constant dense<0.000000e+00> : vector<128x96xf32>
    %15 = tpu.matmul %13, %14, %cst_9 {dimension_numbers = #tpu.dot_dimension_numbers<[1], [0], [0], [1], [0, 0, 1, 1], [], []>} : vector<128x32xbf16>, vector<32x96xbf16>, vector<128x96xf32> -> vector<128x96xf32>
    %16 = arith.truncf %15 : vector<128x96xf32> to vector<128x96xbf16>
    %c0_10 = arith.constant 0 : index
    %c0_11 = arith.constant 0 : index
    %17 = vector.load %arg6[%c0_10, %c0_11] : memref<128x96xbf16, #tpu.memory_space<vmem>>, vector<128x96xbf16>
    tpu.vector_store %arg6[%c0_10, %c0_11], %16 {strides = array<i32>} : memref<128x96xbf16, #tpu.memory_space<vmem>>, vector<128x96xbf16>,
    %cst_12 = arith.constant dense<0.000000e+00> : vector<96xf32>
    %18 = vector.multi_reduction <add>, %15, %cst_12 [0] : vector<128x96xf32> to vector<96xf32>
    %19 = arith.mulf %15, %15 : vector<128x96xf32>
    %cst_13 = arith.constant dense<0.000000e+00> : vector<96xf32>
    %20 = vector.multi_reduction <add>, %19, %cst_13 [0] : vector<128x96xf32> to vector<96xf32>
    %21 = vector.shape_cast %18 : vector<96xf32> to vector<1x1x96xf32>
    %22 = vector.shape_cast %21 : vector<1x1x96xf32> to vector<1x1x96xf32>
    %23 = vector.broadcast %22 : vector<1x1x96xf32> to vector<1x8x96xf32>
    %c0_14 = arith.constant 0 : index
    %c0_15 = arith.constant 0 : index
    %c0_16 = arith.constant 0 : index
    %24 = vector.load %arg7[%c0_14, %c0_15, %c0_16] : memref<1x8x96xf32, #tpu.memory_space<vmem>>, vector<1x8x96xf32>
    tpu.vector_store %arg7[%c0_14, %c0_15, %c0_16], %23 {strides = array<i32>} : memref<1x8x96xf32, #tpu.memory_space<vmem>>, vector<1x8x96xf32>,
    %25 = vector.shape_cast %20 : vector<96xf32> to vector<1x1x96xf32>
    %26 = vector.shape_cast %25 : vector<1x1x96xf32> to vector<1x1x96xf32>
    %27 = vector.broadcast %26 : vector<1x1x96xf32> to vector<1x8x96xf32>
    %c0_17 = arith.constant 0 : index
    %c0_18 = arith.constant 0 : index
    %c0_19 = arith.constant 0 : index
    %28 = vector.load %arg8[%c0_17, %c0_18, %c0_19] : memref<1x8x96xf32, #tpu.memory_space<vmem>>, vector<1x8x96xf32>
    tpu.vector_store %arg8[%c0_17, %c0_18, %c0_19], %27 {strides = array<i32>} : memref<1x8x96xf32, #tpu.memory_space<vmem>>, vector<1x8x96xf32>,
    return
  }
  func.func @transform_0(%arg0: i32) -> (i32, i32) {
    %c0_i32 = arith.constant 0 : i32
    %c0_i32_0 = arith.constant 0 : i32
    return %arg0, %c0_i32 : i32, i32
  }
  func.func @transform_1(%arg0: i32) -> (i32, i32) {
    %c0_i32 = arith.constant 0 : i32
    %c0_i32_0 = arith.constant 0 : i32
    %c0_i32_1 = arith.constant 0 : i32
    return %c0_i32, %c0_i32_0 : i32, i32
  }
  func.func @transform_2(%arg0: i32) -> (i32, i32) {
    %c0_i32 = arith.constant 0 : i32
    %c0_i32_0 = arith.constant 0 : i32
    %c0_i32_1 = arith.constant 0 : i32
    return %c0_i32, %c0_i32_0 : i32, i32
  }
  func.func @transform_3(%arg0: i32) -> (i32, i32) {
    %c0_i32 = arith.constant 0 : i32
    %c0_i32_0 = arith.constant 0 : i32
    return %arg0, %c0_i32 : i32, i32
  }
  func.func @transform_4(%arg0: i32) -> (i32, i32) {
    %c0_i32 = arith.constant 0 : i32
    %c0_i32_0 = arith.constant 0 : i32
    %c0_i32_1 = arith.constant 0 : i32
    return %c0_i32, %c0_i32_0 : i32, i32
  }
  func.func @transform_5(%arg0: i32) -> (i32, i32) {
    %c0_i32 = arith.constant 0 : i32
    %c0_i32_0 = arith.constant 0 : i32
    return %arg0, %c0_i32 : i32, i32
  }
  func.func @transform_6(%arg0: i32) -> (i32, i32, i32) {
    %c0_i32 = arith.constant 0 : i32
    %c0_i32_0 = arith.constant 0 : i32
    %c0_i32_1 = arith.constant 0 : i32
    return %arg0, %c0_i32, %c0_i32_0 : i32, i32, i32
  }
  func.func @transform_7(%arg0: i32) -> (i32, i32, i32) {
    %c0_i32 = arith.constant 0 : i32
    %c0_i32_0 = arith.constant 0 : i32
    %c0_i32_1 = arith.constant 0 : i32
    return %arg0, %c0_i32, %c0_i32_0 : i32, i32, i32
  }
}

module attributes {stable_mosaic.version = 11 : i64} {
  func.func @_pool_fused_kernel(%arg0: i32, %arg1: memref<8x2x4x2x32xbf16, #tpu.memory_space<vmem>>, %arg2: memref<1x1x1x1x32xf32, #tpu.memory_space<vmem>>, %arg3: memref<1x1x1x1x32xf32, #tpu.memory_space<vmem>>, %arg4: memref<8x2x4x2x32xbf16, #tpu.memory_space<vmem>>, %arg5: memref<8x4x32xbf16, #tpu.memory_space<vmem>>) attributes {dimension_semantics = [#tpu.dimension_semantics<parallel>], iteration_bounds = array<i64: 1>, scalar_prefetch = 0 : i64, scratch_operands = 0 : i64, tpu.core_type = #tpu.core_type<tc>, window_params = [{transform_indices = @transform_0, window_bounds = array<i64: 8, 2, 4, 2, 32>}, {pipeline_mode = #tpu.pipeline_mode<synchronous>, transform_indices = @transform_1, window_bounds = array<i64: 1, 1, 1, 1, 32>}, {pipeline_mode = #tpu.pipeline_mode<synchronous>, transform_indices = @transform_2, window_bounds = array<i64: 1, 1, 1, 1, 32>}, {transform_indices = @transform_3, window_bounds = array<i64: 8, 2, 4, 2, 32>}, {transform_indices = @transform_4, window_bounds = array<i64: 8, 4, 32>}]} {
    %c0 = arith.constant 0 : index
    %c0_0 = arith.constant 0 : index
    %c0_1 = arith.constant 0 : index
    %c0_2 = arith.constant 0 : index
    %c0_3 = arith.constant 0 : index
    %0 = vector.load %arg1[%c0, %c0_0, %c0_1, %c0_2, %c0_3] : memref<8x2x4x2x32xbf16, #tpu.memory_space<vmem>>, vector<8x2x4x2x32xbf16>
    %1 = arith.extf %0 : vector<8x2x4x2x32xbf16> to vector<8x2x4x2x32xf32>
    %c0_4 = arith.constant 0 : index
    %c0_5 = arith.constant 0 : index
    %c0_6 = arith.constant 0 : index
    %c0_7 = arith.constant 0 : index
    %c0_8 = arith.constant 0 : index
    %2 = vector.load %arg2[%c0_4, %c0_5, %c0_6, %c0_7, %c0_8] : memref<1x1x1x1x32xf32, #tpu.memory_space<vmem>>, vector<1x1x1x1x32xf32>
    %3 = vector.broadcast %2 : vector<1x1x1x1x32xf32> to vector<8x2x4x2x32xf32>
    %4 = arith.mulf %1, %3 : vector<8x2x4x2x32xf32>
    %c0_9 = arith.constant 0 : index
    %c0_10 = arith.constant 0 : index
    %c0_11 = arith.constant 0 : index
    %c0_12 = arith.constant 0 : index
    %c0_13 = arith.constant 0 : index
    %5 = vector.load %arg3[%c0_9, %c0_10, %c0_11, %c0_12, %c0_13] : memref<1x1x1x1x32xf32, #tpu.memory_space<vmem>>, vector<1x1x1x1x32xf32>
    %6 = vector.broadcast %5 : vector<1x1x1x1x32xf32> to vector<8x2x4x2x32xf32>
    %7 = arith.addf %4, %6 : vector<8x2x4x2x32xf32>
    %cst = arith.constant 0.000000e+00 : f32
    %8 = vector.broadcast %cst : f32 to vector<8x2x4x2x32xf32>
    %9 = arith.maximumf %7, %8 : vector<8x2x4x2x32xf32>
    %c0_14 = arith.constant 0 : index
    %c0_15 = arith.constant 0 : index
    %c0_16 = arith.constant 0 : index
    %c0_17 = arith.constant 0 : index
    %c0_18 = arith.constant 0 : index
    %10 = vector.load %arg4[%c0_14, %c0_15, %c0_16, %c0_17, %c0_18] : memref<8x2x4x2x32xbf16, #tpu.memory_space<vmem>>, vector<8x2x4x2x32xbf16>
    %11 = arith.extf %10 : vector<8x2x4x2x32xbf16> to vector<8x2x4x2x32xf32>
    %12 = arith.addf %9, %11 : vector<8x2x4x2x32xf32>
    %13 = vector.extract_strided_slice %12 {offsets = [0, 0, 0, 0, 0], sizes = [8, 1, 4, 2, 32], strides = [1, 1, 1, 1, 1]} : vector<8x2x4x2x32xf32> to vector<8x1x4x2x32xf32>
    %14 = vector.shape_cast %13 : vector<8x1x4x2x32xf32> to vector<8x4x2x32xf32>
    %15 = vector.extract_strided_slice %12 {offsets = [0, 1, 0, 0, 0], sizes = [8, 1, 4, 2, 32], strides = [1, 1, 1, 1, 1]} : vector<8x2x4x2x32xf32> to vector<8x1x4x2x32xf32>
    %16 = vector.shape_cast %15 : vector<8x1x4x2x32xf32> to vector<8x4x2x32xf32>
    %17 = arith.maximumf %14, %16 : vector<8x4x2x32xf32>
    %18 = vector.extract_strided_slice %17 {offsets = [0, 0, 0, 0], sizes = [8, 4, 1, 32], strides = [1, 1, 1, 1]} : vector<8x4x2x32xf32> to vector<8x4x1x32xf32>
    %19 = vector.shape_cast %18 : vector<8x4x1x32xf32> to vector<8x4x32xf32>
    %20 = vector.extract_strided_slice %17 {offsets = [0, 0, 1, 0], sizes = [8, 4, 1, 32], strides = [1, 1, 1, 1]} : vector<8x4x2x32xf32> to vector<8x4x1x32xf32>
    %21 = vector.shape_cast %20 : vector<8x4x1x32xf32> to vector<8x4x32xf32>
    %22 = arith.maximumf %19, %21 : vector<8x4x32xf32>
    %23 = arith.truncf %22 : vector<8x4x32xf32> to vector<8x4x32xbf16>
    %c0_19 = arith.constant 0 : index
    %c0_20 = arith.constant 0 : index
    %c0_21 = arith.constant 0 : index
    %24 = vector.load %arg5[%c0_19, %c0_20, %c0_21] : memref<8x4x32xbf16, #tpu.memory_space<vmem>>, vector<8x4x32xbf16>
    tpu.vector_store %arg5[%c0_19, %c0_20, %c0_21], %23 {strides = array<i32>} : memref<8x4x32xbf16, #tpu.memory_space<vmem>>, vector<8x4x32xbf16>,
    return
  }
  func.func @transform_0(%arg0: i32) -> (i32, i32, i32, i32, i32) {
    %c0_i32 = arith.constant 0 : i32
    %c0_i32_0 = arith.constant 0 : i32
    %c0_i32_1 = arith.constant 0 : i32
    %c0_i32_2 = arith.constant 0 : i32
    %c0_i32_3 = arith.constant 0 : i32
    return %arg0, %c0_i32, %c0_i32_0, %c0_i32_1, %c0_i32_2 : i32, i32, i32, i32, i32
  }
  func.func @transform_1(%arg0: i32) -> (i32, i32, i32, i32, i32) {
    %c0_i32 = arith.constant 0 : i32
    %c0_i32_0 = arith.constant 0 : i32
    %c0_i32_1 = arith.constant 0 : i32
    %c0_i32_2 = arith.constant 0 : i32
    %c0_i32_3 = arith.constant 0 : i32
    %c0_i32_4 = arith.constant 0 : i32
    return %c0_i32, %c0_i32_0, %c0_i32_1, %c0_i32_2, %c0_i32_3 : i32, i32, i32, i32, i32
  }
  func.func @transform_2(%arg0: i32) -> (i32, i32, i32, i32, i32) {
    %c0_i32 = arith.constant 0 : i32
    %c0_i32_0 = arith.constant 0 : i32
    %c0_i32_1 = arith.constant 0 : i32
    %c0_i32_2 = arith.constant 0 : i32
    %c0_i32_3 = arith.constant 0 : i32
    %c0_i32_4 = arith.constant 0 : i32
    return %c0_i32, %c0_i32_0, %c0_i32_1, %c0_i32_2, %c0_i32_3 : i32, i32, i32, i32, i32
  }
  func.func @transform_3(%arg0: i32) -> (i32, i32, i32, i32, i32) {
    %c0_i32 = arith.constant 0 : i32
    %c0_i32_0 = arith.constant 0 : i32
    %c0_i32_1 = arith.constant 0 : i32
    %c0_i32_2 = arith.constant 0 : i32
    %c0_i32_3 = arith.constant 0 : i32
    return %arg0, %c0_i32, %c0_i32_0, %c0_i32_1, %c0_i32_2 : i32, i32, i32, i32, i32
  }
  func.func @transform_4(%arg0: i32) -> (i32, i32, i32) {
    %c0_i32 = arith.constant 0 : i32
    %c0_i32_0 = arith.constant 0 : i32
    %c0_i32_1 = arith.constant 0 : i32
    return %arg0, %c0_i32, %c0_i32_0 : i32, i32, i32
  }
}

module attributes {stable_mosaic.version = 11 : i64} {
  func.func @plain(%arg0: i32, %arg1: memref<32x32xbf16, #tpu.memory_space<vmem>>, %arg2: memref<32x128xbf16, #tpu.memory_space<vmem>>, %arg3: memref<32x128xbf16, #tpu.memory_space<vmem>>, %arg4: memref<1x8x128xf32, #tpu.memory_space<vmem>>, %arg5: memref<1x8x128xf32, #tpu.memory_space<vmem>>) attributes {dimension_semantics = [#tpu.dimension_semantics<parallel>], iteration_bounds = array<i64: 1>, scalar_prefetch = 0 : i64, scratch_operands = 0 : i64, tpu.core_type = #tpu.core_type<tc>, window_params = [{transform_indices = @transform_0, window_bounds = array<i64: 32, 32>}, {pipeline_mode = #tpu.pipeline_mode<synchronous>, transform_indices = @transform_1, window_bounds = array<i64: 32, 128>}, {transform_indices = @transform_2, window_bounds = array<i64: 32, 128>}, {transform_indices = @transform_3, window_bounds = array<i64: 1, 8, 128>}, {transform_indices = @transform_4, window_bounds = array<i64: 1, 8, 128>}]} {
    %c0 = arith.constant 0 : index
    %c0_0 = arith.constant 0 : index
    %0 = vector.load %arg1[%c0, %c0_0] : memref<32x32xbf16, #tpu.memory_space<vmem>>, vector<32x32xbf16>
    %c0_1 = arith.constant 0 : index
    %c0_2 = arith.constant 0 : index
    %1 = vector.load %arg2[%c0_1, %c0_2] : memref<32x128xbf16, #tpu.memory_space<vmem>>, vector<32x128xbf16>
    %cst = arith.constant dense<0.000000e+00> : vector<32x128xf32>
    %2 = tpu.matmul %0, %1, %cst {dimension_numbers = #tpu.dot_dimension_numbers<[1], [0], [0], [1], [0, 0, 1, 1], [], []>} : vector<32x32xbf16>, vector<32x128xbf16>, vector<32x128xf32> -> vector<32x128xf32>
    %3 = arith.truncf %2 : vector<32x128xf32> to vector<32x128xbf16>
    %c0_3 = arith.constant 0 : index
    %c0_4 = arith.constant 0 : index
    %4 = vector.load %arg3[%c0_3, %c0_4] : memref<32x128xbf16, #tpu.memory_space<vmem>>, vector<32x128xbf16>
    tpu.vector_store %arg3[%c0_3, %c0_4], %3 {strides = array<i32>} : memref<32x128xbf16, #tpu.memory_space<vmem>>, vector<32x128xbf16>,
    %cst_5 = arith.constant dense<0.000000e+00> : vector<128xf32>
    %5 = vector.multi_reduction <add>, %2, %cst_5 [0] : vector<32x128xf32> to vector<128xf32>
    %6 = arith.mulf %2, %2 : vector<32x128xf32>
    %cst_6 = arith.constant dense<0.000000e+00> : vector<128xf32>
    %7 = vector.multi_reduction <add>, %6, %cst_6 [0] : vector<32x128xf32> to vector<128xf32>
    %8 = vector.shape_cast %5 : vector<128xf32> to vector<1x1x128xf32>
    %9 = vector.shape_cast %8 : vector<1x1x128xf32> to vector<1x1x128xf32>
    %10 = vector.broadcast %9 : vector<1x1x128xf32> to vector<1x8x128xf32>
    %c0_7 = arith.constant 0 : index
    %c0_8 = arith.constant 0 : index
    %c0_9 = arith.constant 0 : index
    %11 = vector.load %arg4[%c0_7, %c0_8, %c0_9] : memref<1x8x128xf32, #tpu.memory_space<vmem>>, vector<1x8x128xf32>
    tpu.vector_store %arg4[%c0_7, %c0_8, %c0_9], %10 {strides = array<i32>} : memref<1x8x128xf32, #tpu.memory_space<vmem>>, vector<1x8x128xf32>,
    %12 = vector.shape_cast %7 : vector<128xf32> to vector<1x1x128xf32>
    %13 = vector.shape_cast %12 : vector<1x1x128xf32> to vector<1x1x128xf32>
    %14 = vector.broadcast %13 : vector<1x1x128xf32> to vector<1x8x128xf32>
    %c0_10 = arith.constant 0 : index
    %c0_11 = arith.constant 0 : index
    %c0_12 = arith.constant 0 : index
    %15 = vector.load %arg5[%c0_10, %c0_11, %c0_12] : memref<1x8x128xf32, #tpu.memory_space<vmem>>, vector<1x8x128xf32>
    tpu.vector_store %arg5[%c0_10, %c0_11, %c0_12], %14 {strides = array<i32>} : memref<1x8x128xf32, #tpu.memory_space<vmem>>, vector<1x8x128xf32>,
    return
  }
  func.func @transform_0(%arg0: i32) -> (i32, i32) {
    %c0_i32 = arith.constant 0 : i32
    %c0_i32_0 = arith.constant 0 : i32
    return %arg0, %c0_i32 : i32, i32
  }
  func.func @transform_1(%arg0: i32) -> (i32, i32) {
    %c0_i32 = arith.constant 0 : i32
    %c0_i32_0 = arith.constant 0 : i32
    %c0_i32_1 = arith.constant 0 : i32
    return %c0_i32, %c0_i32_0 : i32, i32
  }
  func.func @transform_2(%arg0: i32) -> (i32, i32) {
    %c0_i32 = arith.constant 0 : i32
    %c0_i32_0 = arith.constant 0 : i32
    return %arg0, %c0_i32 : i32, i32
  }
  func.func @transform_3(%arg0: i32) -> (i32, i32, i32) {
    %c0_i32 = arith.constant 0 : i32
    %c0_i32_0 = arith.constant 0 : i32
    %c0_i32_1 = arith.constant 0 : i32
    return %arg0, %c0_i32, %c0_i32_0 : i32, i32, i32
  }
  func.func @transform_4(%arg0: i32) -> (i32, i32, i32) {
    %c0_i32 = arith.constant 0 : i32
    %c0_i32_0 = arith.constant 0 : i32
    %c0_i32_1 = arith.constant 0 : i32
    return %arg0, %c0_i32, %c0_i32_0 : i32, i32, i32
  }
}

module attributes {stable_mosaic.version = 11 : i64} {
  func.func @ep(%arg0: i32, %arg1: memref<32x128xbf16, #tpu.memory_space<vmem>>, %arg2: memref<1x128xf32, #tpu.memory_space<vmem>>, %arg3: memref<1x128xf32, #tpu.memory_space<vmem>>, %arg4: memref<32x128xbf16, #tpu.memory_space<vmem>>) attributes {dimension_semantics = [#tpu.dimension_semantics<parallel>], iteration_bounds = array<i64: 1>, scalar_prefetch = 0 : i64, scratch_operands = 0 : i64, tpu.core_type = #tpu.core_type<tc>, window_params = [{transform_indices = @transform_0, window_bounds = array<i64: 32, 128>}, {pipeline_mode = #tpu.pipeline_mode<synchronous>, transform_indices = @transform_1, window_bounds = array<i64: 1, 128>}, {pipeline_mode = #tpu.pipeline_mode<synchronous>, transform_indices = @transform_2, window_bounds = array<i64: 1, 128>}, {transform_indices = @transform_3, window_bounds = array<i64: 32, 128>}]} {
    %c0 = arith.constant 0 : index
    %c0_0 = arith.constant 0 : index
    %0 = vector.load %arg1[%c0, %c0_0] : memref<32x128xbf16, #tpu.memory_space<vmem>>, vector<32x128xbf16>
    %1 = arith.extf %0 : vector<32x128xbf16> to vector<32x128xf32>
    %c0_1 = arith.constant 0 : index
    %c0_2 = arith.constant 0 : index
    %2 = vector.load %arg2[%c0_1, %c0_2] : memref<1x128xf32, #tpu.memory_space<vmem>>, vector<1x128xf32>
    %3 = vector.broadcast %2 : vector<1x128xf32> to vector<32x128xf32>
    %4 = arith.mulf %1, %3 : vector<32x128xf32>
    %c0_3 = arith.constant 0 : index
    %c0_4 = arith.constant 0 : index
    %5 = vector.load %arg3[%c0_3, %c0_4] : memref<1x128xf32, #tpu.memory_space<vmem>>, vector<1x128xf32>
    %6 = vector.broadcast %5 : vector<1x128xf32> to vector<32x128xf32>
    %7 = arith.addf %4, %6 : vector<32x128xf32>
    %cst = arith.constant 0.000000e+00 : f32
    %8 = vector.broadcast %cst : f32 to vector<32x128xf32>
    %9 = arith.maximumf %7, %8 : vector<32x128xf32>
    %10 = arith.truncf %9 : vector<32x128xf32> to vector<32x128xbf16>
    %c0_5 = arith.constant 0 : index
    %c0_6 = arith.constant 0 : index
    %11 = vector.load %arg4[%c0_5, %c0_6] : memref<32x128xbf16, #tpu.memory_space<vmem>>, vector<32x128xbf16>
    tpu.vector_store %arg4[%c0_5, %c0_6], %10 {strides = array<i32>} : memref<32x128xbf16, #tpu.memory_space<vmem>>, vector<32x128xbf16>,
    return
  }
  func.func @transform_0(%arg0: i32) -> (i32, i32) {
    %c0_i32 = arith.constant 0 : i32
    %c0_i32_0 = arith.constant 0 : i32
    return %arg0, %c0_i32 : i32, i32
  }
  func.func @transform_1(%arg0: i32) -> (i32, i32) {
    %c0_i32 = arith.constant 0 : i32
    %c0_i32_0 = arith.constant 0 : i32
    %c0_i32_1 = arith.constant 0 : i32
    return %c0_i32, %c0_i32_0 : i32, i32
  }
  func.func @transform_2(%arg0: i32) -> (i32, i32) {
    %c0_i32 = arith.constant 0 : i32
    %c0_i32_0 = arith.constant 0 : i32
    %c0_i32_1 = arith.constant 0 : i32
    return %c0_i32, %c0_i32_0 : i32, i32
  }
  func.func @transform_3(%arg0: i32) -> (i32, i32) {
    %c0_i32 = arith.constant 0 : i32
    %c0_i32_0 = arith.constant 0 : i32
    return %arg0, %c0_i32 : i32, i32
  }
}

module attributes {stable_mosaic.version = 11 : i64} {
  func.func @plain(%arg0: i32, %arg1: memref<32x576xbf16, #tpu.memory_space<vmem>>, %arg2: memref<576x128xbf16, #tpu.memory_space<vmem>>, %arg3: memref<32x128xbf16, #tpu.memory_space<vmem>>, %arg4: memref<1x8x128xf32, #tpu.memory_space<vmem>>, %arg5: memref<1x8x128xf32, #tpu.memory_space<vmem>>) attributes {dimension_semantics = [#tpu.dimension_semantics<parallel>], iteration_bounds = array<i64: 1>, scalar_prefetch = 0 : i64, scratch_operands = 0 : i64, tpu.core_type = #tpu.core_type<tc>, window_params = [{transform_indices = @transform_0, window_bounds = array<i64: 32, 576>}, {pipeline_mode = #tpu.pipeline_mode<synchronous>, transform_indices = @transform_1, window_bounds = array<i64: 576, 128>}, {transform_indices = @transform_2, window_bounds = array<i64: 32, 128>}, {transform_indices = @transform_3, window_bounds = array<i64: 1, 8, 128>}, {transform_indices = @transform_4, window_bounds = array<i64: 1, 8, 128>}]} {
    %c0 = arith.constant 0 : index
    %c0_0 = arith.constant 0 : index
    %0 = vector.load %arg1[%c0, %c0_0] : memref<32x576xbf16, #tpu.memory_space<vmem>>, vector<32x576xbf16>
    %c0_1 = arith.constant 0 : index
    %c0_2 = arith.constant 0 : index
    %1 = vector.load %arg2[%c0_1, %c0_2] : memref<576x128xbf16, #tpu.memory_space<vmem>>, vector<576x128xbf16>
    %cst = arith.constant dense<0.000000e+00> : vector<32x128xf32>
    %2 = tpu.matmul %0, %1, %cst {dimension_numbers = #tpu.dot_dimension_numbers<[1], [0], [0], [1], [0, 0, 1, 1], [], []>} : vector<32x576xbf16>, vector<576x128xbf16>, vector<32x128xf32> -> vector<32x128xf32>
    %3 = arith.truncf %2 : vector<32x128xf32> to vector<32x128xbf16>
    %c0_3 = arith.constant 0 : index
    %c0_4 = arith.constant 0 : index
    %4 = vector.load %arg3[%c0_3, %c0_4] : memref<32x128xbf16, #tpu.memory_space<vmem>>, vector<32x128xbf16>
    tpu.vector_store %arg3[%c0_3, %c0_4], %3 {strides = array<i32>} : memref<32x128xbf16, #tpu.memory_space<vmem>>, vector<32x128xbf16>,
    %cst_5 = arith.constant dense<0.000000e+00> : vector<128xf32>
    %5 = vector.multi_reduction <add>, %2, %cst_5 [0] : vector<32x128xf32> to vector<128xf32>
    %6 = arith.mulf %2, %2 : vector<32x128xf32>
    %cst_6 = arith.constant dense<0.000000e+00> : vector<128xf32>
    %7 = vector.multi_reduction <add>, %6, %cst_6 [0] : vector<32x128xf32> to vector<128xf32>
    %8 = vector.shape_cast %5 : vector<128xf32> to vector<1x1x128xf32>
    %9 = vector.shape_cast %8 : vector<1x1x128xf32> to vector<1x1x128xf32>
    %10 = vector.broadcast %9 : vector<1x1x128xf32> to vector<1x8x128xf32>
    %c0_7 = arith.constant 0 : index
    %c0_8 = arith.constant 0 : index
    %c0_9 = arith.constant 0 : index
    %11 = vector.load %arg4[%c0_7, %c0_8, %c0_9] : memref<1x8x128xf32, #tpu.memory_space<vmem>>, vector<1x8x128xf32>
    tpu.vector_store %arg4[%c0_7, %c0_8, %c0_9], %10 {strides = array<i32>} : memref<1x8x128xf32, #tpu.memory_space<vmem>>, vector<1x8x128xf32>,
    %12 = vector.shape_cast %7 : vector<128xf32> to vector<1x1x128xf32>
    %13 = vector.shape_cast %12 : vector<1x1x128xf32> to vector<1x1x128xf32>
    %14 = vector.broadcast %13 : vector<1x1x128xf32> to vector<1x8x128xf32>
    %c0_10 = arith.constant 0 : index
    %c0_11 = arith.constant 0 : index
    %c0_12 = arith.constant 0 : index
    %15 = vector.load %arg5[%c0_10, %c0_11, %c0_12] : memref<1x8x128xf32, #tpu.memory_space<vmem>>, vector<1x8x128xf32>
    tpu.vector_store %arg5[%c0_10, %c0_11, %c0_12], %14 {strides = array<i32>} : memref<1x8x128xf32, #tpu.memory_space<vmem>>, vector<1x8x128xf32>,
    return
  }
  func.func @transform_0(%arg0: i32) -> (i32, i32) {
    %c0_i32 = arith.constant 0 : i32
    %c0_i32_0 = arith.constant 0 : i32
    return %arg0, %c0_i32 : i32, i32
  }
  func.func @transform_1(%arg0: i32) -> (i32, i32) {
    %c0_i32 = arith.constant 0 : i32
    %c0_i32_0 = arith.constant 0 : i32
    %c0_i32_1 = arith.constant 0 : i32
    return %c0_i32, %c0_i32_0 : i32, i32
  }
  func.func @transform_2(%arg0: i32) -> (i32, i32) {
    %c0_i32 = arith.constant 0 : i32
    %c0_i32_0 = arith.constant 0 : i32
    return %arg0, %c0_i32 : i32, i32
  }
  func.func @transform_3(%arg0: i32) -> (i32, i32, i32) {
    %c0_i32 = arith.constant 0 : i32
    %c0_i32_0 = arith.constant 0 : i32
    %c0_i32_1 = arith.constant 0 : i32
    return %arg0, %c0_i32, %c0_i32_0 : i32, i32, i32
  }
  func.func @transform_4(%arg0: i32) -> (i32, i32, i32) {
    %c0_i32 = arith.constant 0 : i32
    %c0_i32_0 = arith.constant 0 : i32
    %c0_i32_1 = arith.constant 0 : i32
    return %arg0, %c0_i32, %c0_i32_0 : i32, i32, i32
  }
}

module attributes {stable_mosaic.version = 11 : i64} {
  func.func @with_pro(%arg0: i32, %arg1: memref<32x128xbf16, #tpu.memory_space<vmem>>, %arg2: memref<1x128xf32, #tpu.memory_space<vmem>>, %arg3: memref<1x128xf32, #tpu.memory_space<vmem>>, %arg4: memref<128x64xbf16, #tpu.memory_space<vmem>>, %arg5: memref<32x64xbf16, #tpu.memory_space<vmem>>, %arg6: memref<1x8x64xf32, #tpu.memory_space<vmem>>, %arg7: memref<1x8x64xf32, #tpu.memory_space<vmem>>) attributes {dimension_semantics = [#tpu.dimension_semantics<parallel>], iteration_bounds = array<i64: 1>, scalar_prefetch = 0 : i64, scratch_operands = 0 : i64, tpu.core_type = #tpu.core_type<tc>, window_params = [{transform_indices = @transform_0, window_bounds = array<i64: 32, 128>}, {pipeline_mode = #tpu.pipeline_mode<synchronous>, transform_indices = @transform_1, window_bounds = array<i64: 1, 128>}, {pipeline_mode = #tpu.pipeline_mode<synchronous>, transform_indices = @transform_2, window_bounds = array<i64: 1, 128>}, {pipeline_mode = #tpu.pipeline_mode<synchronous>, transform_indices = @transform_3, window_bounds = array<i64: 128, 64>}, {transform_indices = @transform_4, window_bounds = array<i64: 32, 64>}, {transform_indices = @transform_5, window_bounds = array<i64: 1, 8, 64>}, {transform_indices = @transform_6, window_bounds = array<i64: 1, 8, 64>}]} {
    %c0 = arith.constant 0 : index
    %c0_0 = arith.constant 0 : index
    %0 = vector.load %arg1[%c0, %c0_0] : memref<32x128xbf16, #tpu.memory_space<vmem>>, vector<32x128xbf16>
    %1 = arith.extf %0 : vector<32x128xbf16> to vector<32x128xf32>
    %c0_1 = arith.constant 0 : index
    %c0_2 = arith.constant 0 : index
    %2 = vector.load %arg2[%c0_1, %c0_2] : memref<1x128xf32, #tpu.memory_space<vmem>>, vector<1x128xf32>
    %3 = vector.broadcast %2 : vector<1x128xf32> to vector<32x128xf32>
    %4 = arith.mulf %1, %3 : vector<32x128xf32>
    %c0_3 = arith.constant 0 : index
    %c0_4 = arith.constant 0 : index
    %5 = vector.load %arg3[%c0_3, %c0_4] : memref<1x128xf32, #tpu.memory_space<vmem>>, vector<1x128xf32>
    %6 = vector.broadcast %5 : vector<1x128xf32> to vector<32x128xf32>
    %7 = arith.addf %4, %6 : vector<32x128xf32>
    %cst = arith.constant 0.000000e+00 : f32
    %8 = vector.broadcast %cst : f32 to vector<32x128xf32>
    %9 = arith.maximumf %7, %8 : vector<32x128xf32>
    %10 = arith.truncf %9 : vector<32x128xf32> to vector<32x128xbf16>
    %c0_5 = arith.constant 0 : index
    %c0_6 = arith.constant 0 : index
    %11 = vector.load %arg4[%c0_5, %c0_6] : memref<128x64xbf16, #tpu.memory_space<vmem>>, vector<128x64xbf16>
    %cst_7 = arith.constant dense<0.000000e+00> : vector<32x64xf32>
    %12 = tpu.matmul %10, %11, %cst_7 {dimension_numbers = #tpu.dot_dimension_numbers<[1], [0], [0], [1], [0, 0, 1, 1], [], []>} : vector<32x128xbf16>, vector<128x64xbf16>, vector<32x64xf32> -> vector<32x64xf32>
    %13 = arith.truncf %12 : vector<32x64xf32> to vector<32x64xbf16>
    %c0_8 = arith.constant 0 : index
    %c0_9 = arith.constant 0 : index
    %14 = vector.load %arg5[%c0_8, %c0_9] : memref<32x64xbf16, #tpu.memory_space<vmem>>, vector<32x64xbf16>
    tpu.vector_store %arg5[%c0_8, %c0_9], %13 {strides = array<i32>} : memref<32x64xbf16, #tpu.memory_space<vmem>>, vector<32x64xbf16>,
    %cst_10 = arith.constant dense<0.000000e+00> : vector<64xf32>
    %15 = vector.multi_reduction <add>, %12, %cst_10 [0] : vector<32x64xf32> to vector<64xf32>
    %16 = arith.mulf %12, %12 : vector<32x64xf32>
    %cst_11 = arith.constant dense<0.000000e+00> : vector<64xf32>
    %17 = vector.multi_reduction <add>, %16, %cst_11 [0] : vector<32x64xf32> to vector<64xf32>
    %18 = vector.shape_cast %15 : vector<64xf32> to vector<1x1x64xf32>
    %19 = vector.shape_cast %18 : vector<1x1x64xf32> to vector<1x1x64xf32>
    %20 = vector.broadcast %19 : vector<1x1x64xf32> to vector<1x8x64xf32>
    %c0_12 = arith.constant 0 : index
    %c0_13 = arith.constant 0 : index
    %c0_14 = arith.constant 0 : index
    %21 = vector.load %arg6[%c0_12, %c0_13, %c0_14] : memref<1x8x64xf32, #tpu.memory_space<vmem>>, vector<1x8x64xf32>
    tpu.vector_store %arg6[%c0_12, %c0_13, %c0_14], %20 {strides = array<i32>} : memref<1x8x64xf32, #tpu.memory_space<vmem>>, vector<1x8x64xf32>,
    %22 = vector.shape_cast %17 : vector<64xf32> to vector<1x1x64xf32>
    %23 = vector.shape_cast %22 : vector<1x1x64xf32> to vector<1x1x64xf32>
    %24 = vector.broadcast %23 : vector<1x1x64xf32> to vector<1x8x64xf32>
    %c0_15 = arith.constant 0 : index
    %c0_16 = arith.constant 0 : index
    %c0_17 = arith.constant 0 : index
    %25 = vector.load %arg7[%c0_15, %c0_16, %c0_17] : memref<1x8x64xf32, #tpu.memory_space<vmem>>, vector<1x8x64xf32>
    tpu.vector_store %arg7[%c0_15, %c0_16, %c0_17], %24 {strides = array<i32>} : memref<1x8x64xf32, #tpu.memory_space<vmem>>, vector<1x8x64xf32>,
    return
  }
  func.func @transform_0(%arg0: i32) -> (i32, i32) {
    %c0_i32 = arith.constant 0 : i32
    %c0_i32_0 = arith.constant 0 : i32
    return %arg0, %c0_i32 : i32, i32
  }
  func.func @transform_1(%arg0: i32) -> (i32, i32) {
    %c0_i32 = arith.constant 0 : i32
    %c0_i32_0 = arith.constant 0 : i32
    %c0_i32_1 = arith.constant 0 : i32
    return %c0_i32, %c0_i32_0 : i32, i32
  }
  func.func @transform_2(%arg0: i32) -> (i32, i32) {
    %c0_i32 = arith.constant 0 : i32
    %c0_i32_0 = arith.constant 0 : i32
    %c0_i32_1 = arith.constant 0 : i32
    return %c0_i32, %c0_i32_0 : i32, i32
  }
  func.func @transform_3(%arg0: i32) -> (i32, i32) {
    %c0_i32 = arith.constant 0 : i32
    %c0_i32_0 = arith.constant 0 : i32
    %c0_i32_1 = arith.constant 0 : i32
    return %c0_i32, %c0_i32_0 : i32, i32
  }
  func.func @transform_4(%arg0: i32) -> (i32, i32) {
    %c0_i32 = arith.constant 0 : i32
    %c0_i32_0 = arith.constant 0 : i32
    return %arg0, %c0_i32 : i32, i32
  }
  func.func @transform_5(%arg0: i32) -> (i32, i32, i32) {
    %c0_i32 = arith.constant 0 : i32
    %c0_i32_0 = arith.constant 0 : i32
    %c0_i32_1 = arith.constant 0 : i32
    return %arg0, %c0_i32, %c0_i32_0 : i32, i32, i32
  }
  func.func @transform_6(%arg0: i32) -> (i32, i32, i32) {
    %c0_i32 = arith.constant 0 : i32
    %c0_i32_0 = arith.constant 0 : i32
    %c0_i32_1 = arith.constant 0 : i32
    return %arg0, %c0_i32, %c0_i32_0 : i32, i32, i32
  }
}

module attributes {stable_mosaic.version = 11 : i64} {
  func.func @with_pro_res(%arg0: i32, %arg1: memref<32x64xbf16, #tpu.memory_space<vmem>>, %arg2: memref<1x64xf32, #tpu.memory_space<vmem>>, %arg3: memref<1x64xf32, #tpu.memory_space<vmem>>, %arg4: memref<32x64xbf16, #tpu.memory_space<vmem>>, %arg5: memref<64x128xbf16, #tpu.memory_space<vmem>>, %arg6: memref<32x128xbf16, #tpu.memory_space<vmem>>, %arg7: memref<1x8x128xf32, #tpu.memory_space<vmem>>, %arg8: memref<1x8x128xf32, #tpu.memory_space<vmem>>) attributes {dimension_semantics = [#tpu.dimension_semantics<parallel>], iteration_bounds = array<i64: 1>, scalar_prefetch = 0 : i64, scratch_operands = 0 : i64, tpu.core_type = #tpu.core_type<tc>, window_params = [{transform_indices = @transform_0, window_bounds = array<i64: 32, 64>}, {pipeline_mode = #tpu.pipeline_mode<synchronous>, transform_indices = @transform_1, window_bounds = array<i64: 1, 64>}, {pipeline_mode = #tpu.pipeline_mode<synchronous>, transform_indices = @transform_2, window_bounds = array<i64: 1, 64>}, {transform_indices = @transform_3, window_bounds = array<i64: 32, 64>}, {pipeline_mode = #tpu.pipeline_mode<synchronous>, transform_indices = @transform_4, window_bounds = array<i64: 64, 128>}, {transform_indices = @transform_5, window_bounds = array<i64: 32, 128>}, {transform_indices = @transform_6, window_bounds = array<i64: 1, 8, 128>}, {transform_indices = @transform_7, window_bounds = array<i64: 1, 8, 128>}]} {
    %c0 = arith.constant 0 : index
    %c0_0 = arith.constant 0 : index
    %0 = vector.load %arg1[%c0, %c0_0] : memref<32x64xbf16, #tpu.memory_space<vmem>>, vector<32x64xbf16>
    %1 = arith.extf %0 : vector<32x64xbf16> to vector<32x64xf32>
    %c0_1 = arith.constant 0 : index
    %c0_2 = arith.constant 0 : index
    %2 = vector.load %arg2[%c0_1, %c0_2] : memref<1x64xf32, #tpu.memory_space<vmem>>, vector<1x64xf32>
    %3 = vector.broadcast %2 : vector<1x64xf32> to vector<32x64xf32>
    %4 = arith.mulf %1, %3 : vector<32x64xf32>
    %c0_3 = arith.constant 0 : index
    %c0_4 = arith.constant 0 : index
    %5 = vector.load %arg3[%c0_3, %c0_4] : memref<1x64xf32, #tpu.memory_space<vmem>>, vector<1x64xf32>
    %6 = vector.broadcast %5 : vector<1x64xf32> to vector<32x64xf32>
    %7 = arith.addf %4, %6 : vector<32x64xf32>
    %cst = arith.constant 0.000000e+00 : f32
    %8 = vector.broadcast %cst : f32 to vector<32x64xf32>
    %9 = arith.maximumf %7, %8 : vector<32x64xf32>
    %c0_5 = arith.constant 0 : index
    %c0_6 = arith.constant 0 : index
    %10 = vector.load %arg4[%c0_5, %c0_6] : memref<32x64xbf16, #tpu.memory_space<vmem>>, vector<32x64xbf16>
    %11 = arith.extf %10 : vector<32x64xbf16> to vector<32x64xf32>
    %12 = arith.addf %9, %11 : vector<32x64xf32>
    %13 = arith.truncf %12 : vector<32x64xf32> to vector<32x64xbf16>
    %c0_7 = arith.constant 0 : index
    %c0_8 = arith.constant 0 : index
    %14 = vector.load %arg5[%c0_7, %c0_8] : memref<64x128xbf16, #tpu.memory_space<vmem>>, vector<64x128xbf16>
    %cst_9 = arith.constant dense<0.000000e+00> : vector<32x128xf32>
    %15 = tpu.matmul %13, %14, %cst_9 {dimension_numbers = #tpu.dot_dimension_numbers<[1], [0], [0], [1], [0, 0, 1, 1], [], []>} : vector<32x64xbf16>, vector<64x128xbf16>, vector<32x128xf32> -> vector<32x128xf32>
    %16 = arith.truncf %15 : vector<32x128xf32> to vector<32x128xbf16>
    %c0_10 = arith.constant 0 : index
    %c0_11 = arith.constant 0 : index
    %17 = vector.load %arg6[%c0_10, %c0_11] : memref<32x128xbf16, #tpu.memory_space<vmem>>, vector<32x128xbf16>
    tpu.vector_store %arg6[%c0_10, %c0_11], %16 {strides = array<i32>} : memref<32x128xbf16, #tpu.memory_space<vmem>>, vector<32x128xbf16>,
    %cst_12 = arith.constant dense<0.000000e+00> : vector<128xf32>
    %18 = vector.multi_reduction <add>, %15, %cst_12 [0] : vector<32x128xf32> to vector<128xf32>
    %19 = arith.mulf %15, %15 : vector<32x128xf32>
    %cst_13 = arith.constant dense<0.000000e+00> : vector<128xf32>
    %20 = vector.multi_reduction <add>, %19, %cst_13 [0] : vector<32x128xf32> to vector<128xf32>
    %21 = vector.shape_cast %18 : vector<128xf32> to vector<1x1x128xf32>
    %22 = vector.shape_cast %21 : vector<1x1x128xf32> to vector<1x1x128xf32>
    %23 = vector.broadcast %22 : vector<1x1x128xf32> to vector<1x8x128xf32>
    %c0_14 = arith.constant 0 : index
    %c0_15 = arith.constant 0 : index
    %c0_16 = arith.constant 0 : index
    %24 = vector.load %arg7[%c0_14, %c0_15, %c0_16] : memref<1x8x128xf32, #tpu.memory_space<vmem>>, vector<1x8x128xf32>
    tpu.vector_store %arg7[%c0_14, %c0_15, %c0_16], %23 {strides = array<i32>} : memref<1x8x128xf32, #tpu.memory_space<vmem>>, vector<1x8x128xf32>,
    %25 = vector.shape_cast %20 : vector<128xf32> to vector<1x1x128xf32>
    %26 = vector.shape_cast %25 : vector<1x1x128xf32> to vector<1x1x128xf32>
    %27 = vector.broadcast %26 : vector<1x1x128xf32> to vector<1x8x128xf32>
    %c0_17 = arith.constant 0 : index
    %c0_18 = arith.constant 0 : index
    %c0_19 = arith.constant 0 : index
    %28 = vector.load %arg8[%c0_17, %c0_18, %c0_19] : memref<1x8x128xf32, #tpu.memory_space<vmem>>, vector<1x8x128xf32>
    tpu.vector_store %arg8[%c0_17, %c0_18, %c0_19], %27 {strides = array<i32>} : memref<1x8x128xf32, #tpu.memory_space<vmem>>, vector<1x8x128xf32>,
    return
  }
  func.func @transform_0(%arg0: i32) -> (i32, i32) {
    %c0_i32 = arith.constant 0 : i32
    %c0_i32_0 = arith.constant 0 : i32
    return %arg0, %c0_i32 : i32, i32
  }
  func.func @transform_1(%arg0: i32) -> (i32, i32) {
    %c0_i32 = arith.constant 0 : i32
    %c0_i32_0 = arith.constant 0 : i32
    %c0_i32_1 = arith.constant 0 : i32
    return %c0_i32, %c0_i32_0 : i32, i32
  }
  func.func @transform_2(%arg0: i32) -> (i32, i32) {
    %c0_i32 = arith.constant 0 : i32
    %c0_i32_0 = arith.constant 0 : i32
    %c0_i32_1 = arith.constant 0 : i32
    return %c0_i32, %c0_i32_0 : i32, i32
  }
  func.func @transform_3(%arg0: i32) -> (i32, i32) {
    %c0_i32 = arith.constant 0 : i32
    %c0_i32_0 = arith.constant 0 : i32
    return %arg0, %c0_i32 : i32, i32
  }
  func.func @transform_4(%arg0: i32) -> (i32, i32) {
    %c0_i32 = arith.constant 0 : i32
    %c0_i32_0 = arith.constant 0 : i32
    %c0_i32_1 = arith.constant 0 : i32
    return %c0_i32, %c0_i32_0 : i32, i32
  }
  func.func @transform_5(%arg0: i32) -> (i32, i32) {
    %c0_i32 = arith.constant 0 : i32
    %c0_i32_0 = arith.constant 0 : i32
    return %arg0, %c0_i32 : i32, i32
  }
  func.func @transform_6(%arg0: i32) -> (i32, i32, i32) {
    %c0_i32 = arith.constant 0 : i32
    %c0_i32_0 = arith.constant 0 : i32
    %c0_i32_1 = arith.constant 0 : i32
    return %arg0, %c0_i32, %c0_i32_0 : i32, i32, i32
  }
  func.func @transform_7(%arg0: i32) -> (i32, i32, i32) {
    %c0_i32 = arith.constant 0 : i32
    %c0_i32_0 = arith.constant 0 : i32
    %c0_i32_1 = arith.constant 0 : i32
    return %arg0, %c0_i32, %c0_i32_0 : i32, i32, i32
  }
}

module attributes {stable_mosaic.version = 11 : i64} {
  func.func @_pool_fused_kernel(%arg0: i32, %arg1: memref<4x2x2x2x64xbf16, #tpu.memory_space<vmem>>, %arg2: memref<1x1x1x1x64xf32, #tpu.memory_space<vmem>>, %arg3: memref<1x1x1x1x64xf32, #tpu.memory_space<vmem>>, %arg4: memref<4x2x2x2x64xbf16, #tpu.memory_space<vmem>>, %arg5: memref<4x2x64xbf16, #tpu.memory_space<vmem>>) attributes {dimension_semantics = [#tpu.dimension_semantics<parallel>], iteration_bounds = array<i64: 1>, scalar_prefetch = 0 : i64, scratch_operands = 0 : i64, tpu.core_type = #tpu.core_type<tc>, window_params = [{transform_indices = @transform_0, window_bounds = array<i64: 4, 2, 2, 2, 64>}, {pipeline_mode = #tpu.pipeline_mode<synchronous>, transform_indices = @transform_1, window_bounds = array<i64: 1, 1, 1, 1, 64>}, {pipeline_mode = #tpu.pipeline_mode<synchronous>, transform_indices = @transform_2, window_bounds = array<i64: 1, 1, 1, 1, 64>}, {transform_indices = @transform_3, window_bounds = array<i64: 4, 2, 2, 2, 64>}, {transform_indices = @transform_4, window_bounds = array<i64: 4, 2, 64>}]} {
    %c0 = arith.constant 0 : index
    %c0_0 = arith.constant 0 : index
    %c0_1 = arith.constant 0 : index
    %c0_2 = arith.constant 0 : index
    %c0_3 = arith.constant 0 : index
    %0 = vector.load %arg1[%c0, %c0_0, %c0_1, %c0_2, %c0_3] : memref<4x2x2x2x64xbf16, #tpu.memory_space<vmem>>, vector<4x2x2x2x64xbf16>
    %1 = arith.extf %0 : vector<4x2x2x2x64xbf16> to vector<4x2x2x2x64xf32>
    %c0_4 = arith.constant 0 : index
    %c0_5 = arith.constant 0 : index
    %c0_6 = arith.constant 0 : index
    %c0_7 = arith.constant 0 : index
    %c0_8 = arith.constant 0 : index
    %2 = vector.load %arg2[%c0_4, %c0_5, %c0_6, %c0_7, %c0_8] : memref<1x1x1x1x64xf32, #tpu.memory_space<vmem>>, vector<1x1x1x1x64xf32>
    %3 = vector.broadcast %2 : vector<1x1x1x1x64xf32> to vector<4x2x2x2x64xf32>
    %4 = arith.mulf %1, %3 : vector<4x2x2x2x64xf32>
    %c0_9 = arith.constant 0 : index
    %c0_10 = arith.constant 0 : index
    %c0_11 = arith.constant 0 : index
    %c0_12 = arith.constant 0 : index
    %c0_13 = arith.constant 0 : index
    %5 = vector.load %arg3[%c0_9, %c0_10, %c0_11, %c0_12, %c0_13] : memref<1x1x1x1x64xf32, #tpu.memory_space<vmem>>, vector<1x1x1x1x64xf32>
    %6 = vector.broadcast %5 : vector<1x1x1x1x64xf32> to vector<4x2x2x2x64xf32>
    %7 = arith.addf %4, %6 : vector<4x2x2x2x64xf32>
    %cst = arith.constant 0.000000e+00 : f32
    %8 = vector.broadcast %cst : f32 to vector<4x2x2x2x64xf32>
    %9 = arith.maximumf %7, %8 : vector<4x2x2x2x64xf32>
    %c0_14 = arith.constant 0 : index
    %c0_15 = arith.constant 0 : index
    %c0_16 = arith.constant 0 : index
    %c0_17 = arith.constant 0 : index
    %c0_18 = arith.constant 0 : index
    %10 = vector.load %arg4[%c0_14, %c0_15, %c0_16, %c0_17, %c0_18] : memref<4x2x2x2x64xbf16, #tpu.memory_space<vmem>>, vector<4x2x2x2x64xbf16>
    %11 = arith.extf %10 : vector<4x2x2x2x64xbf16> to vector<4x2x2x2x64xf32>
    %12 = arith.addf %9, %11 : vector<4x2x2x2x64xf32>
    %13 = vector.extract_strided_slice %12 {offsets = [0, 0, 0, 0, 0], sizes = [4, 1, 2, 2, 64], strides = [1, 1, 1, 1, 1]} : vector<4x2x2x2x64xf32> to vector<4x1x2x2x64xf32>
    %14 = vector.shape_cast %13 : vector<4x1x2x2x64xf32> to vector<4x2x2x64xf32>
    %15 = vector.extract_strided_slice %12 {offsets = [0, 1, 0, 0, 0], sizes = [4, 1, 2, 2, 64], strides = [1, 1, 1, 1, 1]} : vector<4x2x2x2x64xf32> to vector<4x1x2x2x64xf32>
    %16 = vector.shape_cast %15 : vector<4x1x2x2x64xf32> to vector<4x2x2x64xf32>
    %17 = arith.maximumf %14, %16 : vector<4x2x2x64xf32>
    %18 = vector.extract_strided_slice %17 {offsets = [0, 0, 0, 0], sizes = [4, 2, 1, 64], strides = [1, 1, 1, 1]} : vector<4x2x2x64xf32> to vector<4x2x1x64xf32>
    %19 = vector.shape_cast %18 : vector<4x2x1x64xf32> to vector<4x2x64xf32>
    %20 = vector.extract_strided_slice %17 {offsets = [0, 0, 1, 0], sizes = [4, 2, 1, 64], strides = [1, 1, 1, 1]} : vector<4x2x2x64xf32> to vector<4x2x1x64xf32>
    %21 = vector.shape_cast %20 : vector<4x2x1x64xf32> to vector<4x2x64xf32>
    %22 = arith.maximumf %19, %21 : vector<4x2x64xf32>
    %23 = arith.truncf %22 : vector<4x2x64xf32> to vector<4x2x64xbf16>
    %c0_19 = arith.constant 0 : index
    %c0_20 = arith.constant 0 : index
    %c0_21 = arith.constant 0 : index
    %24 = vector.load %arg5[%c0_19, %c0_20, %c0_21] : memref<4x2x64xbf16, #tpu.memory_space<vmem>>, vector<4x2x64xbf16>
    tpu.vector_store %arg5[%c0_19, %c0_20, %c0_21], %23 {strides = array<i32>} : memref<4x2x64xbf16, #tpu.memory_space<vmem>>, vector<4x2x64xbf16>,
    return
  }
  func.func @transform_0(%arg0: i32) -> (i32, i32, i32, i32, i32) {
    %c0_i32 = arith.constant 0 : i32
    %c0_i32_0 = arith.constant 0 : i32
    %c0_i32_1 = arith.constant 0 : i32
    %c0_i32_2 = arith.constant 0 : i32
    %c0_i32_3 = arith.constant 0 : i32
    return %arg0, %c0_i32, %c0_i32_0, %c0_i32_1, %c0_i32_2 : i32, i32, i32, i32, i32
  }
  func.func @transform_1(%arg0: i32) -> (i32, i32, i32, i32, i32) {
    %c0_i32 = arith.constant 0 : i32
    %c0_i32_0 = arith.constant 0 : i32
    %c0_i32_1 = arith.constant 0 : i32
    %c0_i32_2 = arith.constant 0 : i32
    %c0_i32_3 = arith.constant 0 : i32
    %c0_i32_4 = arith.constant 0 : i32
    return %c0_i32, %c0_i32_0, %c0_i32_1, %c0_i32_2, %c0_i32_3 : i32, i32, i32, i32, i32
  }
  func.func @transform_2(%arg0: i32) -> (i32, i32, i32, i32, i32) {
    %c0_i32 = arith.constant 0 : i32
    %c0_i32_0 = arith.constant 0 : i32
    %c0_i32_1 = arith.constant 0 : i32
    %c0_i32_2 = arith.constant 0 : i32
    %c0_i32_3 = arith.constant 0 : i32
    %c0_i32_4 = arith.constant 0 : i32
    return %c0_i32, %c0_i32_0, %c0_i32_1, %c0_i32_2, %c0_i32_3 : i32, i32, i32, i32, i32
  }
  func.func @transform_3(%arg0: i32) -> (i32, i32, i32, i32, i32) {
    %c0_i32 = arith.constant 0 : i32
    %c0_i32_0 = arith.constant 0 : i32
    %c0_i32_1 = arith.constant 0 : i32
    %c0_i32_2 = arith.constant 0 : i32
    %c0_i32_3 = arith.constant 0 : i32
    return %arg0, %c0_i32, %c0_i32_0, %c0_i32_1, %c0_i32_2 : i32, i32, i32, i32, i32
  }
  func.func @transform_4(%arg0: i32) -> (i32, i32, i32) {
    %c0_i32 = arith.constant 0 : i32
    %c0_i32_0 = arith.constant 0 : i32
    %c0_i32_1 = arith.constant 0 : i32
    return %arg0, %c0_i32, %c0_i32_0 : i32, i32, i32
  }
}

module attributes {stable_mosaic.version = 11 : i64} {
  func.func @plain(%arg0: i32, %arg1: memref<8x576xbf16, #tpu.memory_space<vmem>>, %arg2: memref<576x32xbf16, #tpu.memory_space<vmem>>, %arg3: memref<8x32xbf16, #tpu.memory_space<vmem>>, %arg4: memref<1x8x32xf32, #tpu.memory_space<vmem>>, %arg5: memref<1x8x32xf32, #tpu.memory_space<vmem>>) attributes {dimension_semantics = [#tpu.dimension_semantics<parallel>], iteration_bounds = array<i64: 1>, scalar_prefetch = 0 : i64, scratch_operands = 0 : i64, tpu.core_type = #tpu.core_type<tc>, window_params = [{transform_indices = @transform_0, window_bounds = array<i64: 8, 576>}, {pipeline_mode = #tpu.pipeline_mode<synchronous>, transform_indices = @transform_1, window_bounds = array<i64: 576, 32>}, {transform_indices = @transform_2, window_bounds = array<i64: 8, 32>}, {transform_indices = @transform_3, window_bounds = array<i64: 1, 8, 32>}, {transform_indices = @transform_4, window_bounds = array<i64: 1, 8, 32>}]} {
    %c0 = arith.constant 0 : index
    %c0_0 = arith.constant 0 : index
    %0 = vector.load %arg1[%c0, %c0_0] : memref<8x576xbf16, #tpu.memory_space<vmem>>, vector<8x576xbf16>
    %c0_1 = arith.constant 0 : index
    %c0_2 = arith.constant 0 : index
    %1 = vector.load %arg2[%c0_1, %c0_2] : memref<576x32xbf16, #tpu.memory_space<vmem>>, vector<576x32xbf16>
    %cst = arith.constant dense<0.000000e+00> : vector<8x32xf32>
    %2 = tpu.matmul %0, %1, %cst {dimension_numbers = #tpu.dot_dimension_numbers<[1], [0], [0], [1], [0, 0, 1, 1], [], []>} : vector<8x576xbf16>, vector<576x32xbf16>, vector<8x32xf32> -> vector<8x32xf32>
    %3 = arith.truncf %2 : vector<8x32xf32> to vector<8x32xbf16>
    %c0_3 = arith.constant 0 : index
    %c0_4 = arith.constant 0 : index
    %4 = vector.load %arg3[%c0_3, %c0_4] : memref<8x32xbf16, #tpu.memory_space<vmem>>, vector<8x32xbf16>
    tpu.vector_store %arg3[%c0_3, %c0_4], %3 {strides = array<i32>} : memref<8x32xbf16, #tpu.memory_space<vmem>>, vector<8x32xbf16>,
    %cst_5 = arith.constant dense<0.000000e+00> : vector<32xf32>
    %5 = vector.multi_reduction <add>, %2, %cst_5 [0] : vector<8x32xf32> to vector<32xf32>
    %6 = arith.mulf %2, %2 : vector<8x32xf32>
    %cst_6 = arith.constant dense<0.000000e+00> : vector<32xf32>
    %7 = vector.multi_reduction <add>, %6, %cst_6 [0] : vector<8x32xf32> to vector<32xf32>
    %8 = vector.shape_cast %5 : vector<32xf32> to vector<1x1x32xf32>
    %9 = vector.shape_cast %8 : vector<1x1x32xf32> to vector<1x1x32xf32>
    %10 = vector.broadcast %9 : vector<1x1x32xf32> to vector<1x8x32xf32>
    %c0_7 = arith.constant 0 : index
    %c0_8 = arith.constant 0 : index
    %c0_9 = arith.constant 0 : index
    %11 = vector.load %arg4[%c0_7, %c0_8, %c0_9] : memref<1x8x32xf32, #tpu.memory_space<vmem>>, vector<1x8x32xf32>
    tpu.vector_store %arg4[%c0_7, %c0_8, %c0_9], %10 {strides = array<i32>} : memref<1x8x32xf32, #tpu.memory_space<vmem>>, vector<1x8x32xf32>,
    %12 = vector.shape_cast %7 : vector<32xf32> to vector<1x1x32xf32>
    %13 = vector.shape_cast %12 : vector<1x1x32xf32> to vector<1x1x32xf32>
    %14 = vector.broadcast %13 : vector<1x1x32xf32> to vector<1x8x32xf32>
    %c0_10 = arith.constant 0 : index
    %c0_11 = arith.constant 0 : index
    %c0_12 = arith.constant 0 : index
    %15 = vector.load %arg5[%c0_10, %c0_11, %c0_12] : memref<1x8x32xf32, #tpu.memory_space<vmem>>, vector<1x8x32xf32>
    tpu.vector_store %arg5[%c0_10, %c0_11, %c0_12], %14 {strides = array<i32>} : memref<1x8x32xf32, #tpu.memory_space<vmem>>, vector<1x8x32xf32>,
    return
  }
  func.func @transform_0(%arg0: i32) -> (i32, i32) {
    %c0_i32 = arith.constant 0 : i32
    %c0_i32_0 = arith.constant 0 : i32
    return %arg0, %c0_i32 : i32, i32
  }
  func.func @transform_1(%arg0: i32) -> (i32, i32) {
    %c0_i32 = arith.constant 0 : i32
    %c0_i32_0 = arith.constant 0 : i32
    %c0_i32_1 = arith.constant 0 : i32
    return %c0_i32, %c0_i32_0 : i32, i32
  }
  func.func @transform_2(%arg0: i32) -> (i32, i32) {
    %c0_i32 = arith.constant 0 : i32
    %c0_i32_0 = arith.constant 0 : i32
    return %arg0, %c0_i32 : i32, i32
  }
  func.func @transform_3(%arg0: i32) -> (i32, i32, i32) {
    %c0_i32 = arith.constant 0 : i32
    %c0_i32_0 = arith.constant 0 : i32
    %c0_i32_1 = arith.constant 0 : i32
    return %arg0, %c0_i32, %c0_i32_0 : i32, i32, i32
  }
  func.func @transform_4(%arg0: i32) -> (i32, i32, i32) {
    %c0_i32 = arith.constant 0 : i32
    %c0_i32_0 = arith.constant 0 : i32
    %c0_i32_1 = arith.constant 0 : i32
    return %arg0, %c0_i32, %c0_i32_0 : i32, i32, i32
  }
}

module attributes {stable_mosaic.version = 11 : i64} {
  func.func @ep(%arg0: i32, %arg1: memref<8x32xbf16, #tpu.memory_space<vmem>>, %arg2: memref<1x32xf32, #tpu.memory_space<vmem>>, %arg3: memref<1x32xf32, #tpu.memory_space<vmem>>, %arg4: memref<8x32xbf16, #tpu.memory_space<vmem>>) attributes {dimension_semantics = [#tpu.dimension_semantics<parallel>], iteration_bounds = array<i64: 1>, scalar_prefetch = 0 : i64, scratch_operands = 0 : i64, tpu.core_type = #tpu.core_type<tc>, window_params = [{transform_indices = @transform_0, window_bounds = array<i64: 8, 32>}, {pipeline_mode = #tpu.pipeline_mode<synchronous>, transform_indices = @transform_1, window_bounds = array<i64: 1, 32>}, {pipeline_mode = #tpu.pipeline_mode<synchronous>, transform_indices = @transform_2, window_bounds = array<i64: 1, 32>}, {transform_indices = @transform_3, window_bounds = array<i64: 8, 32>}]} {
    %c0 = arith.constant 0 : index
    %c0_0 = arith.constant 0 : index
    %0 = vector.load %arg1[%c0, %c0_0] : memref<8x32xbf16, #tpu.memory_space<vmem>>, vector<8x32xbf16>
    %1 = arith.extf %0 : vector<8x32xbf16> to vector<8x32xf32>
    %c0_1 = arith.constant 0 : index
    %c0_2 = arith.constant 0 : index
    %2 = vector.load %arg2[%c0_1, %c0_2] : memref<1x32xf32, #tpu.memory_space<vmem>>, vector<1x32xf32>
    %3 = vector.broadcast %2 : vector<1x32xf32> to vector<8x32xf32>
    %4 = arith.mulf %1, %3 : vector<8x32xf32>
    %c0_3 = arith.constant 0 : index
    %c0_4 = arith.constant 0 : index
    %5 = vector.load %arg3[%c0_3, %c0_4] : memref<1x32xf32, #tpu.memory_space<vmem>>, vector<1x32xf32>
    %6 = vector.broadcast %5 : vector<1x32xf32> to vector<8x32xf32>
    %7 = arith.addf %4, %6 : vector<8x32xf32>
    %cst = arith.constant 0.000000e+00 : f32
    %8 = vector.broadcast %cst : f32 to vector<8x32xf32>
    %9 = arith.maximumf %7, %8 : vector<8x32xf32>
    %10 = arith.truncf %9 : vector<8x32xf32> to vector<8x32xbf16>
    %c0_5 = arith.constant 0 : index
    %c0_6 = arith.constant 0 : index
    %11 = vector.load %arg4[%c0_5, %c0_6] : memref<8x32xbf16, #tpu.memory_space<vmem>>, vector<8x32xbf16>
    tpu.vector_store %arg4[%c0_5, %c0_6], %10 {strides = array<i32>} : memref<8x32xbf16, #tpu.memory_space<vmem>>, vector<8x32xbf16>,
    return
  }
  func.func @transform_0(%arg0: i32) -> (i32, i32) {
    %c0_i32 = arith.constant 0 : i32
    %c0_i32_0 = arith.constant 0 : i32
    return %arg0, %c0_i32 : i32, i32
  }
  func.func @transform_1(%arg0: i32) -> (i32, i32) {
    %c0_i32 = arith.constant 0 : i32
    %c0_i32_0 = arith.constant 0 : i32
    %c0_i32_1 = arith.constant 0 : i32
    return %c0_i32, %c0_i32_0 : i32, i32
  }
  func.func @transform_2(%arg0: i32) -> (i32, i32) {
    %c0_i32 = arith.constant 0 : i32
    %c0_i32_0 = arith.constant 0 : i32
    %c0_i32_1 = arith.constant 0 : i32
    return %c0_i32, %c0_i32_0 : i32, i32
  }
  func.func @transform_3(%arg0: i32) -> (i32, i32) {
    %c0_i32 = arith.constant 0 : i32
    %c0_i32_0 = arith.constant 0 : i32
    return %arg0, %c0_i32 : i32, i32
  }
}

module attributes {stable_mosaic.version = 11 : i64} {
  func.func @plain(%arg0: i32, %arg1: memref<8x64xbf16, #tpu.memory_space<vmem>>, %arg2: memref<64x384xbf16, #tpu.memory_space<vmem>>, %arg3: memref<8x384xbf16, #tpu.memory_space<vmem>>, %arg4: memref<1x8x384xf32, #tpu.memory_space<vmem>>, %arg5: memref<1x8x384xf32, #tpu.memory_space<vmem>>) attributes {dimension_semantics = [#tpu.dimension_semantics<parallel>], iteration_bounds = array<i64: 1>, scalar_prefetch = 0 : i64, scratch_operands = 0 : i64, tpu.core_type = #tpu.core_type<tc>, window_params = [{transform_indices = @transform_0, window_bounds = array<i64: 8, 64>}, {pipeline_mode = #tpu.pipeline_mode<synchronous>, transform_indices = @transform_1, window_bounds = array<i64: 64, 384>}, {transform_indices = @transform_2, window_bounds = array<i64: 8, 384>}, {transform_indices = @transform_3, window_bounds = array<i64: 1, 8, 384>}, {transform_indices = @transform_4, window_bounds = array<i64: 1, 8, 384>}]} {
    %c0 = arith.constant 0 : index
    %c0_0 = arith.constant 0 : index
    %0 = vector.load %arg1[%c0, %c0_0] : memref<8x64xbf16, #tpu.memory_space<vmem>>, vector<8x64xbf16>
    %c0_1 = arith.constant 0 : index
    %c0_2 = arith.constant 0 : index
    %1 = vector.load %arg2[%c0_1, %c0_2] : memref<64x384xbf16, #tpu.memory_space<vmem>>, vector<64x384xbf16>
    %cst = arith.constant dense<0.000000e+00> : vector<8x384xf32>
    %2 = tpu.matmul %0, %1, %cst {dimension_numbers = #tpu.dot_dimension_numbers<[1], [0], [0], [1], [0, 0, 1, 1], [], []>} : vector<8x64xbf16>, vector<64x384xbf16>, vector<8x384xf32> -> vector<8x384xf32>
    %3 = arith.truncf %2 : vector<8x384xf32> to vector<8x384xbf16>
    %c0_3 = arith.constant 0 : index
    %c0_4 = arith.constant 0 : index
    %4 = vector.load %arg3[%c0_3, %c0_4] : memref<8x384xbf16, #tpu.memory_space<vmem>>, vector<8x384xbf16>
    tpu.vector_store %arg3[%c0_3, %c0_4], %3 {strides = array<i32>} : memref<8x384xbf16, #tpu.memory_space<vmem>>, vector<8x384xbf16>,
    %cst_5 = arith.constant dense<0.000000e+00> : vector<384xf32>
    %5 = vector.multi_reduction <add>, %2, %cst_5 [0] : vector<8x384xf32> to vector<384xf32>
    %6 = arith.mulf %2, %2 : vector<8x384xf32>
    %cst_6 = arith.constant dense<0.000000e+00> : vector<384xf32>
    %7 = vector.multi_reduction <add>, %6, %cst_6 [0] : vector<8x384xf32> to vector<384xf32>
    %8 = vector.shape_cast %5 : vector<384xf32> to vector<1x1x384xf32>
    %9 = vector.shape_cast %8 : vector<1x1x384xf32> to vector<1x1x384xf32>
    %10 = vector.broadcast %9 : vector<1x1x384xf32> to vector<1x8x384xf32>
    %c0_7 = arith.constant 0 : index
    %c0_8 = arith.constant 0 : index
    %c0_9 = arith.constant 0 : index
    %11 = vector.load %arg4[%c0_7, %c0_8, %c0_9] : memref<1x8x384xf32, #tpu.memory_space<vmem>>, vector<1x8x384xf32>
    tpu.vector_store %arg4[%c0_7, %c0_8, %c0_9], %10 {strides = array<i32>} : memref<1x8x384xf32, #tpu.memory_space<vmem>>, vector<1x8x384xf32>,
    %12 = vector.shape_cast %7 : vector<384xf32> to vector<1x1x384xf32>
    %13 = vector.shape_cast %12 : vector<1x1x384xf32> to vector<1x1x384xf32>
    %14 = vector.broadcast %13 : vector<1x1x384xf32> to vector<1x8x384xf32>
    %c0_10 = arith.constant 0 : index
    %c0_11 = arith.constant 0 : index
    %c0_12 = arith.constant 0 : index
    %15 = vector.load %arg5[%c0_10, %c0_11, %c0_12] : memref<1x8x384xf32, #tpu.memory_space<vmem>>, vector<1x8x384xf32>
    tpu.vector_store %arg5[%c0_10, %c0_11, %c0_12], %14 {strides = array<i32>} : memref<1x8x384xf32, #tpu.memory_space<vmem>>, vector<1x8x384xf32>,
    return
  }
  func.func @transform_0(%arg0: i32) -> (i32, i32) {
    %c0_i32 = arith.constant 0 : i32
    %c0_i32_0 = arith.constant 0 : i32
    return %arg0, %c0_i32 : i32, i32
  }
  func.func @transform_1(%arg0: i32) -> (i32, i32) {
    %c0_i32 = arith.constant 0 : i32
    %c0_i32_0 = arith.constant 0 : i32
    %c0_i32_1 = arith.constant 0 : i32
    return %c0_i32, %c0_i32_0 : i32, i32
  }
  func.func @transform_2(%arg0: i32) -> (i32, i32) {
    %c0_i32 = arith.constant 0 : i32
    %c0_i32_0 = arith.constant 0 : i32
    return %arg0, %c0_i32 : i32, i32
  }
  func.func @transform_3(%arg0: i32) -> (i32, i32, i32) {
    %c0_i32 = arith.constant 0 : i32
    %c0_i32_0 = arith.constant 0 : i32
    %c0_i32_1 = arith.constant 0 : i32
    return %arg0, %c0_i32, %c0_i32_0 : i32, i32, i32
  }
  func.func @transform_4(%arg0: i32) -> (i32, i32, i32) {
    %c0_i32 = arith.constant 0 : i32
    %c0_i32_0 = arith.constant 0 : i32
    %c0_i32_1 = arith.constant 0 : i32
    return %arg0, %c0_i32, %c0_i32_0 : i32, i32, i32
  }
}

module attributes {stable_mosaic.version = 11 : i64} {
  func.func @ep(%arg0: i32, %arg1: memref<8x384xbf16, #tpu.memory_space<vmem>>, %arg2: memref<1x384xf32, #tpu.memory_space<vmem>>, %arg3: memref<1x384xf32, #tpu.memory_space<vmem>>, %arg4: memref<8x384xbf16, #tpu.memory_space<vmem>>) attributes {dimension_semantics = [#tpu.dimension_semantics<parallel>], iteration_bounds = array<i64: 1>, scalar_prefetch = 0 : i64, scratch_operands = 0 : i64, tpu.core_type = #tpu.core_type<tc>, window_params = [{transform_indices = @transform_0, window_bounds = array<i64: 8, 384>}, {pipeline_mode = #tpu.pipeline_mode<synchronous>, transform_indices = @transform_1, window_bounds = array<i64: 1, 384>}, {pipeline_mode = #tpu.pipeline_mode<synchronous>, transform_indices = @transform_2, window_bounds = array<i64: 1, 384>}, {transform_indices = @transform_3, window_bounds = array<i64: 8, 384>}]} {
    %c0 = arith.constant 0 : index
    %c0_0 = arith.constant 0 : index
    %0 = vector.load %arg1[%c0, %c0_0] : memref<8x384xbf16, #tpu.memory_space<vmem>>, vector<8x384xbf16>
    %1 = arith.extf %0 : vector<8x384xbf16> to vector<8x384xf32>
    %c0_1 = arith.constant 0 : index
    %c0_2 = arith.constant 0 : index
    %2 = vector.load %arg2[%c0_1, %c0_2] : memref<1x384xf32, #tpu.memory_space<vmem>>, vector<1x384xf32>
    %3 = vector.broadcast %2 : vector<1x384xf32> to vector<8x384xf32>
    %4 = arith.mulf %1, %3 : vector<8x384xf32>
    %c0_3 = arith.constant 0 : index
    %c0_4 = arith.constant 0 : index
    %5 = vector.load %arg3[%c0_3, %c0_4] : memref<1x384xf32, #tpu.memory_space<vmem>>, vector<1x384xf32>
    %6 = vector.broadcast %5 : vector<1x384xf32> to vector<8x384xf32>
    %7 = arith.addf %4, %6 : vector<8x384xf32>
    %cst = arith.constant 0.000000e+00 : f32
    %8 = vector.broadcast %cst : f32 to vector<8x384xf32>
    %9 = arith.maximumf %7, %8 : vector<8x384xf32>
    %10 = arith.truncf %9 : vector<8x384xf32> to vector<8x384xbf16>
    %c0_5 = arith.constant 0 : index
    %c0_6 = arith.constant 0 : index
    %11 = vector.load %arg4[%c0_5, %c0_6] : memref<8x384xbf16, #tpu.memory_space<vmem>>, vector<8x384xbf16>
    tpu.vector_store %arg4[%c0_5, %c0_6], %10 {strides = array<i32>} : memref<8x384xbf16, #tpu.memory_space<vmem>>, vector<8x384xbf16>,
    return
  }
  func.func @transform_0(%arg0: i32) -> (i32, i32) {
    %c0_i32 = arith.constant 0 : i32
    %c0_i32_0 = arith.constant 0 : i32
    return %arg0, %c0_i32 : i32, i32
  }
  func.func @transform_1(%arg0: i32) -> (i32, i32) {
    %c0_i32 = arith.constant 0 : i32
    %c0_i32_0 = arith.constant 0 : i32
    %c0_i32_1 = arith.constant 0 : i32
    return %c0_i32, %c0_i32_0 : i32, i32
  }
  func.func @transform_2(%arg0: i32) -> (i32, i32) {
    %c0_i32 = arith.constant 0 : i32
    %c0_i32_0 = arith.constant 0 : i32
    %c0_i32_1 = arith.constant 0 : i32
    return %c0_i32, %c0_i32_0 : i32, i32
  }
  func.func @transform_3(%arg0: i32) -> (i32, i32) {
    %c0_i32 = arith.constant 0 : i32
    %c0_i32_0 = arith.constant 0 : i32
    return %arg0, %c0_i32 : i32, i32
  }
}

module attributes {stable_mosaic.version = 11 : i64} {
  func.func @_mm_stats_stack_kernel(%arg0: i32, %arg1: i32, %arg2: memref<1x8x1152xbf16, #tpu.memory_space<vmem>>, %arg3: memref<1x1152x32xbf16, #tpu.memory_space<vmem>>, %arg4: memref<1x8x32xbf16, #tpu.memory_space<vmem>>, %arg5: memref<1x1x8x32xf32, #tpu.memory_space<vmem>>, %arg6: memref<1x1x8x32xf32, #tpu.memory_space<vmem>>) attributes {dimension_semantics = [#tpu.dimension_semantics<parallel>, #tpu.dimension_semantics<parallel>], iteration_bounds = array<i64: 3, 1>, scalar_prefetch = 0 : i64, scratch_operands = 0 : i64, tpu.core_type = #tpu.core_type<tc>, window_params = [{transform_indices = @transform_0, window_bounds = array<i64: 1, 8, 1152>}, {transform_indices = @transform_1, window_bounds = array<i64: 1, 1152, 32>}, {transform_indices = @transform_2, window_bounds = array<i64: 1, 8, 32>}, {transform_indices = @transform_3, window_bounds = array<i64: 1, 1, 8, 32>}, {transform_indices = @transform_4, window_bounds = array<i64: 1, 1, 8, 32>}]} {
    %c0 = arith.constant 0 : index
    %c0_0 = arith.constant 0 : index
    %c0_1 = arith.constant 0 : index
    %0 = vector.load %arg2[%c0, %c0_0, %c0_1] : memref<1x8x1152xbf16, #tpu.memory_space<vmem>>, vector<1x8x1152xbf16>
    %1 = vector.shape_cast %0 : vector<1x8x1152xbf16> to vector<8x1152xbf16>
    %c0_2 = arith.constant 0 : index
    %c0_3 = arith.constant 0 : index
    %c0_4 = arith.constant 0 : index
    %2 = vector.load %arg3[%c0_2, %c0_3, %c0_4] : memref<1x1152x32xbf16, #tpu.memory_space<vmem>>, vector<1x1152x32xbf16>
    %3 = vector.shape_cast %2 : vector<1x1152x32xbf16> to vector<1152x32xbf16>
    %cst = arith.constant dense<0.000000e+00> : vector<8x32xf32>
    %4 = tpu.matmul %1, %3, %cst {dimension_numbers = #tpu.dot_dimension_numbers<[1], [0], [0], [1], [0, 0, 1, 1], [], []>} : vector<8x1152xbf16>, vector<1152x32xbf16>, vector<8x32xf32> -> vector<8x32xf32>
    %5 = vector.shape_cast %4 : vector<8x32xf32> to vector<1x8x32xf32>
    %6 = arith.truncf %5 : vector<1x8x32xf32> to vector<1x8x32xbf16>
    %c0_5 = arith.constant 0 : index
    %c0_6 = arith.constant 0 : index
    %c0_7 = arith.constant 0 : index
    %7 = vector.load %arg4[%c0_5, %c0_6, %c0_7] : memref<1x8x32xbf16, #tpu.memory_space<vmem>>, vector<1x8x32xbf16>
    tpu.vector_store %arg4[%c0_5, %c0_6, %c0_7], %6 {strides = array<i32>} : memref<1x8x32xbf16, #tpu.memory_space<vmem>>, vector<1x8x32xbf16>,
    %cst_8 = arith.constant dense<0.000000e+00> : vector<32xf32>
    %8 = vector.multi_reduction <add>, %4, %cst_8 [0] : vector<8x32xf32> to vector<32xf32>
    %9 = arith.mulf %4, %4 : vector<8x32xf32>
    %cst_9 = arith.constant dense<0.000000e+00> : vector<32xf32>
    %10 = vector.multi_reduction <add>, %9, %cst_9 [0] : vector<8x32xf32> to vector<32xf32>
    %11 = vector.shape_cast %8 : vector<32xf32> to vector<1x1x1x32xf32>
    %12 = vector.shape_cast %11 : vector<1x1x1x32xf32> to vector<1x1x1x32xf32>
    %13 = vector.broadcast %12 : vector<1x1x1x32xf32> to vector<1x1x8x32xf32>
    %c0_10 = arith.constant 0 : index
    %c0_11 = arith.constant 0 : index
    %c0_12 = arith.constant 0 : index
    %c0_13 = arith.constant 0 : index
    %14 = vector.load %arg5[%c0_10, %c0_11, %c0_12, %c0_13] : memref<1x1x8x32xf32, #tpu.memory_space<vmem>>, vector<1x1x8x32xf32>
    tpu.vector_store %arg5[%c0_10, %c0_11, %c0_12, %c0_13], %13 {strides = array<i32>} : memref<1x1x8x32xf32, #tpu.memory_space<vmem>>, vector<1x1x8x32xf32>,
    %15 = vector.shape_cast %10 : vector<32xf32> to vector<1x1x1x32xf32>
    %16 = vector.shape_cast %15 : vector<1x1x1x32xf32> to vector<1x1x1x32xf32>
    %17 = vector.broadcast %16 : vector<1x1x1x32xf32> to vector<1x1x8x32xf32>
    %c0_14 = arith.constant 0 : index
    %c0_15 = arith.constant 0 : index
    %c0_16 = arith.constant 0 : index
    %c0_17 = arith.constant 0 : index
    %18 = vector.load %arg6[%c0_14, %c0_15, %c0_16, %c0_17] : memref<1x1x8x32xf32, #tpu.memory_space<vmem>>, vector<1x1x8x32xf32>
    tpu.vector_store %arg6[%c0_14, %c0_15, %c0_16, %c0_17], %17 {strides = array<i32>} : memref<1x1x8x32xf32, #tpu.memory_space<vmem>>, vector<1x1x8x32xf32>,
    return
  }
  func.func @transform_0(%arg0: i32, %arg1: i32) -> (i32, i32, i32) {
    %c0_i32 = arith.constant 0 : i32
    %c0_i32_0 = arith.constant 0 : i32
    return %arg0, %arg1, %c0_i32 : i32, i32, i32
  }
  func.func @transform_1(%arg0: i32, %arg1: i32) -> (i32, i32, i32) {
    %c0_i32 = arith.constant 0 : i32
    %c0_i32_0 = arith.constant 0 : i32
    %c0_i32_1 = arith.constant 0 : i32
    return %arg0, %c0_i32, %c0_i32_0 : i32, i32, i32
  }
  func.func @transform_2(%arg0: i32, %arg1: i32) -> (i32, i32, i32) {
    %c0_i32 = arith.constant 0 : i32
    %c0_i32_0 = arith.constant 0 : i32
    return %arg0, %arg1, %c0_i32 : i32, i32, i32
  }
  func.func @transform_3(%arg0: i32, %arg1: i32) -> (i32, i32, i32, i32) {
    %c0_i32 = arith.constant 0 : i32
    %c0_i32_0 = arith.constant 0 : i32
    %c0_i32_1 = arith.constant 0 : i32
    return %arg0, %arg1, %c0_i32, %c0_i32_0 : i32, i32, i32, i32
  }
  func.func @transform_4(%arg0: i32, %arg1: i32) -> (i32, i32, i32, i32) {
    %c0_i32 = arith.constant 0 : i32
    %c0_i32_0 = arith.constant 0 : i32
    %c0_i32_1 = arith.constant 0 : i32
    return %arg0, %arg1, %c0_i32, %c0_i32_0 : i32, i32, i32, i32
  }
}

module attributes {stable_mosaic.version = 11 : i64} {
  func.func @_ep_stack_kernel(%arg0: i32, %arg1: i32, %arg2: memref<1x8x32xbf16, #tpu.memory_space<vmem>>, %arg3: memref<1x1x32xf32, #tpu.memory_space<vmem>>, %arg4: memref<1x1x32xf32, #tpu.memory_space<vmem>>, %arg5: memref<1x8x32xbf16, #tpu.memory_space<vmem>>) attributes {dimension_semantics = [#tpu.dimension_semantics<parallel>, #tpu.dimension_semantics<parallel>], iteration_bounds = array<i64: 3, 1>, scalar_prefetch = 0 : i64, scratch_operands = 0 : i64, tpu.core_type = #tpu.core_type<tc>, window_params = [{transform_indices = @transform_0, window_bounds = array<i64: 1, 8, 32>}, {transform_indices = @transform_1, window_bounds = array<i64: 1, 1, 32>}, {transform_indices = @transform_2, window_bounds = array<i64: 1, 1, 32>}, {transform_indices = @transform_3, window_bounds = array<i64: 1, 8, 32>}]} {
    %c0 = arith.constant 0 : index
    %c0_0 = arith.constant 0 : index
    %c0_1 = arith.constant 0 : index
    %0 = vector.load %arg2[%c0, %c0_0, %c0_1] : memref<1x8x32xbf16, #tpu.memory_space<vmem>>, vector<1x8x32xbf16>
    %1 = arith.extf %0 : vector<1x8x32xbf16> to vector<1x8x32xf32>
    %c0_2 = arith.constant 0 : index
    %c0_3 = arith.constant 0 : index
    %c0_4 = arith.constant 0 : index
    %2 = vector.load %arg3[%c0_2, %c0_3, %c0_4] : memref<1x1x32xf32, #tpu.memory_space<vmem>>, vector<1x1x32xf32>
    %3 = vector.broadcast %2 : vector<1x1x32xf32> to vector<1x8x32xf32>
    %4 = arith.mulf %1, %3 : vector<1x8x32xf32>
    %c0_5 = arith.constant 0 : index
    %c0_6 = arith.constant 0 : index
    %c0_7 = arith.constant 0 : index
    %5 = vector.load %arg4[%c0_5, %c0_6, %c0_7] : memref<1x1x32xf32, #tpu.memory_space<vmem>>, vector<1x1x32xf32>
    %6 = vector.broadcast %5 : vector<1x1x32xf32> to vector<1x8x32xf32>
    %7 = arith.addf %4, %6 : vector<1x8x32xf32>
    %cst = arith.constant 0.000000e+00 : f32
    %8 = vector.broadcast %cst : f32 to vector<1x8x32xf32>
    %9 = arith.maximumf %7, %8 : vector<1x8x32xf32>
    %10 = arith.truncf %9 : vector<1x8x32xf32> to vector<1x8x32xbf16>
    %c0_8 = arith.constant 0 : index
    %c0_9 = arith.constant 0 : index
    %c0_10 = arith.constant 0 : index
    %11 = vector.load %arg5[%c0_8, %c0_9, %c0_10] : memref<1x8x32xbf16, #tpu.memory_space<vmem>>, vector<1x8x32xbf16>
    tpu.vector_store %arg5[%c0_8, %c0_9, %c0_10], %10 {strides = array<i32>} : memref<1x8x32xbf16, #tpu.memory_space<vmem>>, vector<1x8x32xbf16>,
    return
  }
  func.func @transform_0(%arg0: i32, %arg1: i32) -> (i32, i32, i32) {
    %c0_i32 = arith.constant 0 : i32
    %c0_i32_0 = arith.constant 0 : i32
    return %arg0, %arg1, %c0_i32 : i32, i32, i32
  }
  func.func @transform_1(%arg0: i32, %arg1: i32) -> (i32, i32, i32) {
    %c0_i32 = arith.constant 0 : i32
    %c0_i32_0 = arith.constant 0 : i32
    %c0_i32_1 = arith.constant 0 : i32
    return %arg0, %c0_i32, %c0_i32_0 : i32, i32, i32
  }
  func.func @transform_2(%arg0: i32, %arg1: i32) -> (i32, i32, i32) {
    %c0_i32 = arith.constant 0 : i32
    %c0_i32_0 = arith.constant 0 : i32
    %c0_i32_1 = arith.constant 0 : i32
    return %arg0, %c0_i32, %c0_i32_0 : i32, i32, i32
  }
  func.func @transform_3(%arg0: i32, %arg1: i32) -> (i32, i32, i32) {
    %c0_i32 = arith.constant 0 : i32
    %c0_i32_0 = arith.constant 0 : i32
    return %arg0, %arg1, %c0_i32 : i32, i32, i32
  }
}

module attributes {stable_mosaic.version = 11 : i64} {
  func.func @plain(%arg0: i32, %arg1: memref<8x1152xbf16, #tpu.memory_space<vmem>>, %arg2: memref<1152x32xbf16, #tpu.memory_space<vmem>>, %arg3: memref<8x32xbf16, #tpu.memory_space<vmem>>, %arg4: memref<1x8x32xf32, #tpu.memory_space<vmem>>, %arg5: memref<1x8x32xf32, #tpu.memory_space<vmem>>) attributes {dimension_semantics = [#tpu.dimension_semantics<parallel>], iteration_bounds = array<i64: 1>, scalar_prefetch = 0 : i64, scratch_operands = 0 : i64, tpu.core_type = #tpu.core_type<tc>, window_params = [{transform_indices = @transform_0, window_bounds = array<i64: 8, 1152>}, {pipeline_mode = #tpu.pipeline_mode<synchronous>, transform_indices = @transform_1, window_bounds = array<i64: 1152, 32>}, {transform_indices = @transform_2, window_bounds = array<i64: 8, 32>}, {transform_indices = @transform_3, window_bounds = array<i64: 1, 8, 32>}, {transform_indices = @transform_4, window_bounds = array<i64: 1, 8, 32>}]} {
    %c0 = arith.constant 0 : index
    %c0_0 = arith.constant 0 : index
    %0 = vector.load %arg1[%c0, %c0_0] : memref<8x1152xbf16, #tpu.memory_space<vmem>>, vector<8x1152xbf16>
    %c0_1 = arith.constant 0 : index
    %c0_2 = arith.constant 0 : index
    %1 = vector.load %arg2[%c0_1, %c0_2] : memref<1152x32xbf16, #tpu.memory_space<vmem>>, vector<1152x32xbf16>
    %cst = arith.constant dense<0.000000e+00> : vector<8x32xf32>
    %2 = tpu.matmul %0, %1, %cst {dimension_numbers = #tpu.dot_dimension_numbers<[1], [0], [0], [1], [0, 0, 1, 1], [], []>} : vector<8x1152xbf16>, vector<1152x32xbf16>, vector<8x32xf32> -> vector<8x32xf32>
    %3 = arith.truncf %2 : vector<8x32xf32> to vector<8x32xbf16>
    %c0_3 = arith.constant 0 : index
    %c0_4 = arith.constant 0 : index
    %4 = vector.load %arg3[%c0_3, %c0_4] : memref<8x32xbf16, #tpu.memory_space<vmem>>, vector<8x32xbf16>
    tpu.vector_store %arg3[%c0_3, %c0_4], %3 {strides = array<i32>} : memref<8x32xbf16, #tpu.memory_space<vmem>>, vector<8x32xbf16>,
    %cst_5 = arith.constant dense<0.000000e+00> : vector<32xf32>
    %5 = vector.multi_reduction <add>, %2, %cst_5 [0] : vector<8x32xf32> to vector<32xf32>
    %6 = arith.mulf %2, %2 : vector<8x32xf32>
    %cst_6 = arith.constant dense<0.000000e+00> : vector<32xf32>
    %7 = vector.multi_reduction <add>, %6, %cst_6 [0] : vector<8x32xf32> to vector<32xf32>
    %8 = vector.shape_cast %5 : vector<32xf32> to vector<1x1x32xf32>
    %9 = vector.shape_cast %8 : vector<1x1x32xf32> to vector<1x1x32xf32>
    %10 = vector.broadcast %9 : vector<1x1x32xf32> to vector<1x8x32xf32>
    %c0_7 = arith.constant 0 : index
    %c0_8 = arith.constant 0 : index
    %c0_9 = arith.constant 0 : index
    %11 = vector.load %arg4[%c0_7, %c0_8, %c0_9] : memref<1x8x32xf32, #tpu.memory_space<vmem>>, vector<1x8x32xf32>
    tpu.vector_store %arg4[%c0_7, %c0_8, %c0_9], %10 {strides = array<i32>} : memref<1x8x32xf32, #tpu.memory_space<vmem>>, vector<1x8x32xf32>,
    %12 = vector.shape_cast %7 : vector<32xf32> to vector<1x1x32xf32>
    %13 = vector.shape_cast %12 : vector<1x1x32xf32> to vector<1x1x32xf32>
    %14 = vector.broadcast %13 : vector<1x1x32xf32> to vector<1x8x32xf32>
    %c0_10 = arith.constant 0 : index
    %c0_11 = arith.constant 0 : index
    %c0_12 = arith.constant 0 : index
    %15 = vector.load %arg5[%c0_10, %c0_11, %c0_12] : memref<1x8x32xf32, #tpu.memory_space<vmem>>, vector<1x8x32xf32>
    tpu.vector_store %arg5[%c0_10, %c0_11, %c0_12], %14 {strides = array<i32>} : memref<1x8x32xf32, #tpu.memory_space<vmem>>, vector<1x8x32xf32>,
    return
  }
  func.func @transform_0(%arg0: i32) -> (i32, i32) {
    %c0_i32 = arith.constant 0 : i32
    %c0_i32_0 = arith.constant 0 : i32
    return %arg0, %c0_i32 : i32, i32
  }
  func.func @transform_1(%arg0: i32) -> (i32, i32) {
    %c0_i32 = arith.constant 0 : i32
    %c0_i32_0 = arith.constant 0 : i32
    %c0_i32_1 = arith.constant 0 : i32
    return %c0_i32, %c0_i32_0 : i32, i32
  }
  func.func @transform_2(%arg0: i32) -> (i32, i32) {
    %c0_i32 = arith.constant 0 : i32
    %c0_i32_0 = arith.constant 0 : i32
    return %arg0, %c0_i32 : i32, i32
  }
  func.func @transform_3(%arg0: i32) -> (i32, i32, i32) {
    %c0_i32 = arith.constant 0 : i32
    %c0_i32_0 = arith.constant 0 : i32
    %c0_i32_1 = arith.constant 0 : i32
    return %arg0, %c0_i32, %c0_i32_0 : i32, i32, i32
  }
  func.func @transform_4(%arg0: i32) -> (i32, i32, i32) {
    %c0_i32 = arith.constant 0 : i32
    %c0_i32_0 = arith.constant 0 : i32
    %c0_i32_1 = arith.constant 0 : i32
    return %arg0, %c0_i32, %c0_i32_0 : i32, i32, i32
  }
}

module attributes {stable_mosaic.version = 11 : i64} {
  func.func @with_pro(%arg0: i32, %arg1: memref<8x32xbf16, #tpu.memory_space<vmem>>, %arg2: memref<1x32xf32, #tpu.memory_space<vmem>>, %arg3: memref<1x32xf32, #tpu.memory_space<vmem>>, %arg4: memref<32x64xbf16, #tpu.memory_space<vmem>>, %arg5: memref<8x64xbf16, #tpu.memory_space<vmem>>, %arg6: memref<1x8x64xf32, #tpu.memory_space<vmem>>, %arg7: memref<1x8x64xf32, #tpu.memory_space<vmem>>) attributes {dimension_semantics = [#tpu.dimension_semantics<parallel>], iteration_bounds = array<i64: 1>, scalar_prefetch = 0 : i64, scratch_operands = 0 : i64, tpu.core_type = #tpu.core_type<tc>, window_params = [{transform_indices = @transform_0, window_bounds = array<i64: 8, 32>}, {pipeline_mode = #tpu.pipeline_mode<synchronous>, transform_indices = @transform_1, window_bounds = array<i64: 1, 32>}, {pipeline_mode = #tpu.pipeline_mode<synchronous>, transform_indices = @transform_2, window_bounds = array<i64: 1, 32>}, {pipeline_mode = #tpu.pipeline_mode<synchronous>, transform_indices = @transform_3, window_bounds = array<i64: 32, 64>}, {transform_indices = @transform_4, window_bounds = array<i64: 8, 64>}, {transform_indices = @transform_5, window_bounds = array<i64: 1, 8, 64>}, {transform_indices = @transform_6, window_bounds = array<i64: 1, 8, 64>}]} {
    %c0 = arith.constant 0 : index
    %c0_0 = arith.constant 0 : index
    %0 = vector.load %arg1[%c0, %c0_0] : memref<8x32xbf16, #tpu.memory_space<vmem>>, vector<8x32xbf16>
    %1 = arith.extf %0 : vector<8x32xbf16> to vector<8x32xf32>
    %c0_1 = arith.constant 0 : index
    %c0_2 = arith.constant 0 : index
    %2 = vector.load %arg2[%c0_1, %c0_2] : memref<1x32xf32, #tpu.memory_space<vmem>>, vector<1x32xf32>
    %3 = vector.broadcast %2 : vector<1x32xf32> to vector<8x32xf32>
    %4 = arith.mulf %1, %3 : vector<8x32xf32>
    %c0_3 = arith.constant 0 : index
    %c0_4 = arith.constant 0 : index
    %5 = vector.load %arg3[%c0_3, %c0_4] : memref<1x32xf32, #tpu.memory_space<vmem>>, vector<1x32xf32>
    %6 = vector.broadcast %5 : vector<1x32xf32> to vector<8x32xf32>
    %7 = arith.addf %4, %6 : vector<8x32xf32>
    %cst = arith.constant 0.000000e+00 : f32
    %8 = vector.broadcast %cst : f32 to vector<8x32xf32>
    %9 = arith.maximumf %7, %8 : vector<8x32xf32>
    %10 = arith.truncf %9 : vector<8x32xf32> to vector<8x32xbf16>
    %c0_5 = arith.constant 0 : index
    %c0_6 = arith.constant 0 : index
    %11 = vector.load %arg4[%c0_5, %c0_6] : memref<32x64xbf16, #tpu.memory_space<vmem>>, vector<32x64xbf16>
    %cst_7 = arith.constant dense<0.000000e+00> : vector<8x64xf32>
    %12 = tpu.matmul %10, %11, %cst_7 {dimension_numbers = #tpu.dot_dimension_numbers<[1], [0], [0], [1], [0, 0, 1, 1], [], []>} : vector<8x32xbf16>, vector<32x64xbf16>, vector<8x64xf32> -> vector<8x64xf32>
    %13 = arith.truncf %12 : vector<8x64xf32> to vector<8x64xbf16>
    %c0_8 = arith.constant 0 : index
    %c0_9 = arith.constant 0 : index
    %14 = vector.load %arg5[%c0_8, %c0_9] : memref<8x64xbf16, #tpu.memory_space<vmem>>, vector<8x64xbf16>
    tpu.vector_store %arg5[%c0_8, %c0_9], %13 {strides = array<i32>} : memref<8x64xbf16, #tpu.memory_space<vmem>>, vector<8x64xbf16>,
    %cst_10 = arith.constant dense<0.000000e+00> : vector<64xf32>
    %15 = vector.multi_reduction <add>, %12, %cst_10 [0] : vector<8x64xf32> to vector<64xf32>
    %16 = arith.mulf %12, %12 : vector<8x64xf32>
    %cst_11 = arith.constant dense<0.000000e+00> : vector<64xf32>
    %17 = vector.multi_reduction <add>, %16, %cst_11 [0] : vector<8x64xf32> to vector<64xf32>
    %18 = vector.shape_cast %15 : vector<64xf32> to vector<1x1x64xf32>
    %19 = vector.shape_cast %18 : vector<1x1x64xf32> to vector<1x1x64xf32>
    %20 = vector.broadcast %19 : vector<1x1x64xf32> to vector<1x8x64xf32>
    %c0_12 = arith.constant 0 : index
    %c0_13 = arith.constant 0 : index
    %c0_14 = arith.constant 0 : index
    %21 = vector.load %arg6[%c0_12, %c0_13, %c0_14] : memref<1x8x64xf32, #tpu.memory_space<vmem>>, vector<1x8x64xf32>
    tpu.vector_store %arg6[%c0_12, %c0_13, %c0_14], %20 {strides = array<i32>} : memref<1x8x64xf32, #tpu.memory_space<vmem>>, vector<1x8x64xf32>,
    %22 = vector.shape_cast %17 : vector<64xf32> to vector<1x1x64xf32>
    %23 = vector.shape_cast %22 : vector<1x1x64xf32> to vector<1x1x64xf32>
    %24 = vector.broadcast %23 : vector<1x1x64xf32> to vector<1x8x64xf32>
    %c0_15 = arith.constant 0 : index
    %c0_16 = arith.constant 0 : index
    %c0_17 = arith.constant 0 : index
    %25 = vector.load %arg7[%c0_15, %c0_16, %c0_17] : memref<1x8x64xf32, #tpu.memory_space<vmem>>, vector<1x8x64xf32>
    tpu.vector_store %arg7[%c0_15, %c0_16, %c0_17], %24 {strides = array<i32>} : memref<1x8x64xf32, #tpu.memory_space<vmem>>, vector<1x8x64xf32>,
    return
  }
  func.func @transform_0(%arg0: i32) -> (i32, i32) {
    %c0_i32 = arith.constant 0 : i32
    %c0_i32_0 = arith.constant 0 : i32
    return %arg0, %c0_i32 : i32, i32
  }
  func.func @transform_1(%arg0: i32) -> (i32, i32) {
    %c0_i32 = arith.constant 0 : i32
    %c0_i32_0 = arith.constant 0 : i32
    %c0_i32_1 = arith.constant 0 : i32
    return %c0_i32, %c0_i32_0 : i32, i32
  }
  func.func @transform_2(%arg0: i32) -> (i32, i32) {
    %c0_i32 = arith.constant 0 : i32
    %c0_i32_0 = arith.constant 0 : i32
    %c0_i32_1 = arith.constant 0 : i32
    return %c0_i32, %c0_i32_0 : i32, i32
  }
  func.func @transform_3(%arg0: i32) -> (i32, i32) {
    %c0_i32 = arith.constant 0 : i32
    %c0_i32_0 = arith.constant 0 : i32
    %c0_i32_1 = arith.constant 0 : i32
    return %c0_i32, %c0_i32_0 : i32, i32
  }
  func.func @transform_4(%arg0: i32) -> (i32, i32) {
    %c0_i32 = arith.constant 0 : i32
    %c0_i32_0 = arith.constant 0 : i32
    return %arg0, %c0_i32 : i32, i32
  }
  func.func @transform_5(%arg0: i32) -> (i32, i32, i32) {
    %c0_i32 = arith.constant 0 : i32
    %c0_i32_0 = arith.constant 0 : i32
    %c0_i32_1 = arith.constant 0 : i32
    return %arg0, %c0_i32, %c0_i32_0 : i32, i32, i32
  }
  func.func @transform_6(%arg0: i32) -> (i32, i32, i32) {
    %c0_i32 = arith.constant 0 : i32
    %c0_i32_0 = arith.constant 0 : i32
    %c0_i32_1 = arith.constant 0 : i32
    return %arg0, %c0_i32, %c0_i32_0 : i32, i32, i32
  }
}

module attributes {stable_mosaic.version = 11 : i64} {
  func.func @ep_res(%arg0: i32, %arg1: memref<8x64xbf16, #tpu.memory_space<vmem>>, %arg2: memref<1x64xf32, #tpu.memory_space<vmem>>, %arg3: memref<1x64xf32, #tpu.memory_space<vmem>>, %arg4: memref<8x64xbf16, #tpu.memory_space<vmem>>, %arg5: memref<8x64xbf16, #tpu.memory_space<vmem>>) attributes {dimension_semantics = [#tpu.dimension_semantics<parallel>], iteration_bounds = array<i64: 1>, scalar_prefetch = 0 : i64, scratch_operands = 0 : i64, tpu.core_type = #tpu.core_type<tc>, window_params = [{transform_indices = @transform_0, window_bounds = array<i64: 8, 64>}, {pipeline_mode = #tpu.pipeline_mode<synchronous>, transform_indices = @transform_1, window_bounds = array<i64: 1, 64>}, {pipeline_mode = #tpu.pipeline_mode<synchronous>, transform_indices = @transform_2, window_bounds = array<i64: 1, 64>}, {transform_indices = @transform_3, window_bounds = array<i64: 8, 64>}, {transform_indices = @transform_4, window_bounds = array<i64: 8, 64>}]} {
    %c0 = arith.constant 0 : index
    %c0_0 = arith.constant 0 : index
    %0 = vector.load %arg1[%c0, %c0_0] : memref<8x64xbf16, #tpu.memory_space<vmem>>, vector<8x64xbf16>
    %1 = arith.extf %0 : vector<8x64xbf16> to vector<8x64xf32>
    %c0_1 = arith.constant 0 : index
    %c0_2 = arith.constant 0 : index
    %2 = vector.load %arg2[%c0_1, %c0_2] : memref<1x64xf32, #tpu.memory_space<vmem>>, vector<1x64xf32>
    %3 = vector.broadcast %2 : vector<1x64xf32> to vector<8x64xf32>
    %4 = arith.mulf %1, %3 : vector<8x64xf32>
    %c0_3 = arith.constant 0 : index
    %c0_4 = arith.constant 0 : index
    %5 = vector.load %arg3[%c0_3, %c0_4] : memref<1x64xf32, #tpu.memory_space<vmem>>, vector<1x64xf32>
    %6 = vector.broadcast %5 : vector<1x64xf32> to vector<8x64xf32>
    %7 = arith.addf %4, %6 : vector<8x64xf32>
    %cst = arith.constant 0.000000e+00 : f32
    %8 = vector.broadcast %cst : f32 to vector<8x64xf32>
    %9 = arith.maximumf %7, %8 : vector<8x64xf32>
    %c0_5 = arith.constant 0 : index
    %c0_6 = arith.constant 0 : index
    %10 = vector.load %arg4[%c0_5, %c0_6] : memref<8x64xbf16, #tpu.memory_space<vmem>>, vector<8x64xbf16>
    %11 = arith.extf %10 : vector<8x64xbf16> to vector<8x64xf32>
    %12 = arith.addf %9, %11 : vector<8x64xf32>
    %13 = arith.truncf %12 : vector<8x64xf32> to vector<8x64xbf16>
    %c0_7 = arith.constant 0 : index
    %c0_8 = arith.constant 0 : index
    %14 = vector.load %arg5[%c0_7, %c0_8] : memref<8x64xbf16, #tpu.memory_space<vmem>>, vector<8x64xbf16>
    tpu.vector_store %arg5[%c0_7, %c0_8], %13 {strides = array<i32>} : memref<8x64xbf16, #tpu.memory_space<vmem>>, vector<8x64xbf16>,
    return
  }
  func.func @transform_0(%arg0: i32) -> (i32, i32) {
    %c0_i32 = arith.constant 0 : i32
    %c0_i32_0 = arith.constant 0 : i32
    return %arg0, %c0_i32 : i32, i32
  }
  func.func @transform_1(%arg0: i32) -> (i32, i32) {
    %c0_i32 = arith.constant 0 : i32
    %c0_i32_0 = arith.constant 0 : i32
    %c0_i32_1 = arith.constant 0 : i32
    return %c0_i32, %c0_i32_0 : i32, i32
  }
  func.func @transform_2(%arg0: i32) -> (i32, i32) {
    %c0_i32 = arith.constant 0 : i32
    %c0_i32_0 = arith.constant 0 : i32
    %c0_i32_1 = arith.constant 0 : i32
    return %c0_i32, %c0_i32_0 : i32, i32
  }
  func.func @transform_3(%arg0: i32) -> (i32, i32) {
    %c0_i32 = arith.constant 0 : i32
    %c0_i32_0 = arith.constant 0 : i32
    return %arg0, %c0_i32 : i32, i32
  }
  func.func @transform_4(%arg0: i32) -> (i32, i32) {
    %c0_i32 = arith.constant 0 : i32
    %c0_i32_0 = arith.constant 0 : i32
    return %arg0, %c0_i32 : i32, i32
  }
}

module attributes {stable_mosaic.version = 11 : i64} {
  func.func @with_pro_res(%arg0: i32, %arg1: memref<32x32xbf16, #tpu.memory_space<vmem>>, %arg2: memref<1x32xf32, #tpu.memory_space<vmem>>, %arg3: memref<1x32xf32, #tpu.memory_space<vmem>>, %arg4: memref<32x32xbf16, #tpu.memory_space<vmem>>, %arg5: memref<32x256xbf16, #tpu.memory_space<vmem>>, %arg6: memref<32x256xbf16, #tpu.memory_space<vmem>>, %arg7: memref<1x8x256xf32, #tpu.memory_space<vmem>>, %arg8: memref<1x8x256xf32, #tpu.memory_space<vmem>>) attributes {dimension_semantics = [#tpu.dimension_semantics<parallel>], iteration_bounds = array<i64: 1>, scalar_prefetch = 0 : i64, scratch_operands = 0 : i64, tpu.core_type = #tpu.core_type<tc>, window_params = [{transform_indices = @transform_0, window_bounds = array<i64: 32, 32>}, {pipeline_mode = #tpu.pipeline_mode<synchronous>, transform_indices = @transform_1, window_bounds = array<i64: 1, 32>}, {pipeline_mode = #tpu.pipeline_mode<synchronous>, transform_indices = @transform_2, window_bounds = array<i64: 1, 32>}, {transform_indices = @transform_3, window_bounds = array<i64: 32, 32>}, {pipeline_mode = #tpu.pipeline_mode<synchronous>, transform_indices = @transform_4, window_bounds = array<i64: 32, 256>}, {transform_indices = @transform_5, window_bounds = array<i64: 32, 256>}, {transform_indices = @transform_6, window_bounds = array<i64: 1, 8, 256>}, {transform_indices = @transform_7, window_bounds = array<i64: 1, 8, 256>}]} {
    %c0 = arith.constant 0 : index
    %c0_0 = arith.constant 0 : index
    %0 = vector.load %arg1[%c0, %c0_0] : memref<32x32xbf16, #tpu.memory_space<vmem>>, vector<32x32xbf16>
    %1 = arith.extf %0 : vector<32x32xbf16> to vector<32x32xf32>
    %c0_1 = arith.constant 0 : index
    %c0_2 = arith.constant 0 : index
    %2 = vector.load %arg2[%c0_1, %c0_2] : memref<1x32xf32, #tpu.memory_space<vmem>>, vector<1x32xf32>
    %3 = vector.broadcast %2 : vector<1x32xf32> to vector<32x32xf32>
    %4 = arith.mulf %1, %3 : vector<32x32xf32>
    %c0_3 = arith.constant 0 : index
    %c0_4 = arith.constant 0 : index
    %5 = vector.load %arg3[%c0_3, %c0_4] : memref<1x32xf32, #tpu.memory_space<vmem>>, vector<1x32xf32>
    %6 = vector.broadcast %5 : vector<1x32xf32> to vector<32x32xf32>
    %7 = arith.addf %4, %6 : vector<32x32xf32>
    %cst = arith.constant 0.000000e+00 : f32
    %8 = vector.broadcast %cst : f32 to vector<32x32xf32>
    %9 = arith.maximumf %7, %8 : vector<32x32xf32>
    %c0_5 = arith.constant 0 : index
    %c0_6 = arith.constant 0 : index
    %10 = vector.load %arg4[%c0_5, %c0_6] : memref<32x32xbf16, #tpu.memory_space<vmem>>, vector<32x32xbf16>
    %11 = arith.extf %10 : vector<32x32xbf16> to vector<32x32xf32>
    %12 = arith.addf %9, %11 : vector<32x32xf32>
    %13 = arith.truncf %12 : vector<32x32xf32> to vector<32x32xbf16>
    %c0_7 = arith.constant 0 : index
    %c0_8 = arith.constant 0 : index
    %14 = vector.load %arg5[%c0_7, %c0_8] : memref<32x256xbf16, #tpu.memory_space<vmem>>, vector<32x256xbf16>
    %cst_9 = arith.constant dense<0.000000e+00> : vector<32x256xf32>
    %15 = tpu.matmul %13, %14, %cst_9 {dimension_numbers = #tpu.dot_dimension_numbers<[1], [0], [0], [1], [0, 0, 1, 1], [], []>} : vector<32x32xbf16>, vector<32x256xbf16>, vector<32x256xf32> -> vector<32x256xf32>
    %16 = arith.truncf %15 : vector<32x256xf32> to vector<32x256xbf16>
    %c0_10 = arith.constant 0 : index
    %c0_11 = arith.constant 0 : index
    %17 = vector.load %arg6[%c0_10, %c0_11] : memref<32x256xbf16, #tpu.memory_space<vmem>>, vector<32x256xbf16>
    tpu.vector_store %arg6[%c0_10, %c0_11], %16 {strides = array<i32>} : memref<32x256xbf16, #tpu.memory_space<vmem>>, vector<32x256xbf16>,
    %cst_12 = arith.constant dense<0.000000e+00> : vector<256xf32>
    %18 = vector.multi_reduction <add>, %15, %cst_12 [0] : vector<32x256xf32> to vector<256xf32>
    %19 = arith.mulf %15, %15 : vector<32x256xf32>
    %cst_13 = arith.constant dense<0.000000e+00> : vector<256xf32>
    %20 = vector.multi_reduction <add>, %19, %cst_13 [0] : vector<32x256xf32> to vector<256xf32>
    %21 = vector.shape_cast %18 : vector<256xf32> to vector<1x1x256xf32>
    %22 = vector.shape_cast %21 : vector<1x1x256xf32> to vector<1x1x256xf32>
    %23 = vector.broadcast %22 : vector<1x1x256xf32> to vector<1x8x256xf32>
    %c0_14 = arith.constant 0 : index
    %c0_15 = arith.constant 0 : index
    %c0_16 = arith.constant 0 : index
    %24 = vector.load %arg7[%c0_14, %c0_15, %c0_16] : memref<1x8x256xf32, #tpu.memory_space<vmem>>, vector<1x8x256xf32>
    tpu.vector_store %arg7[%c0_14, %c0_15, %c0_16], %23 {strides = array<i32>} : memref<1x8x256xf32, #tpu.memory_space<vmem>>, vector<1x8x256xf32>,
    %25 = vector.shape_cast %20 : vector<256xf32> to vector<1x1x256xf32>
    %26 = vector.shape_cast %25 : vector<1x1x256xf32> to vector<1x1x256xf32>
    %27 = vector.broadcast %26 : vector<1x1x256xf32> to vector<1x8x256xf32>
    %c0_17 = arith.constant 0 : index
    %c0_18 = arith.constant 0 : index
    %c0_19 = arith.constant 0 : index
    %28 = vector.load %arg8[%c0_17, %c0_18, %c0_19] : memref<1x8x256xf32, #tpu.memory_space<vmem>>, vector<1x8x256xf32>
    tpu.vector_store %arg8[%c0_17, %c0_18, %c0_19], %27 {strides = array<i32>} : memref<1x8x256xf32, #tpu.memory_space<vmem>>, vector<1x8x256xf32>,
    return
  }
  func.func @transform_0(%arg0: i32) -> (i32, i32) {
    %c0_i32 = arith.constant 0 : i32
    %c0_i32_0 = arith.constant 0 : i32
    return %arg0, %c0_i32 : i32, i32
  }
  func.func @transform_1(%arg0: i32) -> (i32, i32) {
    %c0_i32 = arith.constant 0 : i32
    %c0_i32_0 = arith.constant 0 : i32
    %c0_i32_1 = arith.constant 0 : i32
    return %c0_i32, %c0_i32_0 : i32, i32
  }
  func.func @transform_2(%arg0: i32) -> (i32, i32) {
    %c0_i32 = arith.constant 0 : i32
    %c0_i32_0 = arith.constant 0 : i32
    %c0_i32_1 = arith.constant 0 : i32
    return %c0_i32, %c0_i32_0 : i32, i32
  }
  func.func @transform_3(%arg0: i32) -> (i32, i32) {
    %c0_i32 = arith.constant 0 : i32
    %c0_i32_0 = arith.constant 0 : i32
    return %arg0, %c0_i32 : i32, i32
  }
  func.func @transform_4(%arg0: i32) -> (i32, i32) {
    %c0_i32 = arith.constant 0 : i32
    %c0_i32_0 = arith.constant 0 : i32
    %c0_i32_1 = arith.constant 0 : i32
    return %c0_i32, %c0_i32_0 : i32, i32
  }
  func.func @transform_5(%arg0: i32) -> (i32, i32) {
    %c0_i32 = arith.constant 0 : i32
    %c0_i32_0 = arith.constant 0 : i32
    return %arg0, %c0_i32 : i32, i32
  }
  func.func @transform_6(%arg0: i32) -> (i32, i32, i32) {
    %c0_i32 = arith.constant 0 : i32
    %c0_i32_0 = arith.constant 0 : i32
    %c0_i32_1 = arith.constant 0 : i32
    return %arg0, %c0_i32, %c0_i32_0 : i32, i32, i32
  }
  func.func @transform_7(%arg0: i32) -> (i32, i32, i32) {
    %c0_i32 = arith.constant 0 : i32
    %c0_i32_0 = arith.constant 0 : i32
    %c0_i32_1 = arith.constant 0 : i32
    return %arg0, %c0_i32, %c0_i32_0 : i32, i32, i32
  }
}

module attributes {stable_mosaic.version = 11 : i64} {
  func.func @plain(%arg0: i32, %arg1: memref<32x576xbf16, #tpu.memory_space<vmem>>, %arg2: memref<576x32xbf16, #tpu.memory_space<vmem>>, %arg3: memref<32x32xbf16, #tpu.memory_space<vmem>>, %arg4: memref<1x8x32xf32, #tpu.memory_space<vmem>>, %arg5: memref<1x8x32xf32, #tpu.memory_space<vmem>>) attributes {dimension_semantics = [#tpu.dimension_semantics<parallel>], iteration_bounds = array<i64: 1>, scalar_prefetch = 0 : i64, scratch_operands = 0 : i64, tpu.core_type = #tpu.core_type<tc>, window_params = [{transform_indices = @transform_0, window_bounds = array<i64: 32, 576>}, {pipeline_mode = #tpu.pipeline_mode<synchronous>, transform_indices = @transform_1, window_bounds = array<i64: 576, 32>}, {transform_indices = @transform_2, window_bounds = array<i64: 32, 32>}, {transform_indices = @transform_3, window_bounds = array<i64: 1, 8, 32>}, {transform_indices = @transform_4, window_bounds = array<i64: 1, 8, 32>}]} {
    %c0 = arith.constant 0 : index
    %c0_0 = arith.constant 0 : index
    %0 = vector.load %arg1[%c0, %c0_0] : memref<32x576xbf16, #tpu.memory_space<vmem>>, vector<32x576xbf16>
    %c0_1 = arith.constant 0 : index
    %c0_2 = arith.constant 0 : index
    %1 = vector.load %arg2[%c0_1, %c0_2] : memref<576x32xbf16, #tpu.memory_space<vmem>>, vector<576x32xbf16>
    %cst = arith.constant dense<0.000000e+00> : vector<32x32xf32>
    %2 = tpu.matmul %0, %1, %cst {dimension_numbers = #tpu.dot_dimension_numbers<[1], [0], [0], [1], [0, 0, 1, 1], [], []>} : vector<32x576xbf16>, vector<576x32xbf16>, vector<32x32xf32> -> vector<32x32xf32>
    %3 = arith.truncf %2 : vector<32x32xf32> to vector<32x32xbf16>
    %c0_3 = arith.constant 0 : index
    %c0_4 = arith.constant 0 : index
    %4 = vector.load %arg3[%c0_3, %c0_4] : memref<32x32xbf16, #tpu.memory_space<vmem>>, vector<32x32xbf16>
    tpu.vector_store %arg3[%c0_3, %c0_4], %3 {strides = array<i32>} : memref<32x32xbf16, #tpu.memory_space<vmem>>, vector<32x32xbf16>,
    %cst_5 = arith.constant dense<0.000000e+00> : vector<32xf32>
    %5 = vector.multi_reduction <add>, %2, %cst_5 [0] : vector<32x32xf32> to vector<32xf32>
    %6 = arith.mulf %2, %2 : vector<32x32xf32>
    %cst_6 = arith.constant dense<0.000000e+00> : vector<32xf32>
    %7 = vector.multi_reduction <add>, %6, %cst_6 [0] : vector<32x32xf32> to vector<32xf32>
    %8 = vector.shape_cast %5 : vector<32xf32> to vector<1x1x32xf32>
    %9 = vector.shape_cast %8 : vector<1x1x32xf32> to vector<1x1x32xf32>
    %10 = vector.broadcast %9 : vector<1x1x32xf32> to vector<1x8x32xf32>
    %c0_7 = arith.constant 0 : index
    %c0_8 = arith.constant 0 : index
    %c0_9 = arith.constant 0 : index
    %11 = vector.load %arg4[%c0_7, %c0_8, %c0_9] : memref<1x8x32xf32, #tpu.memory_space<vmem>>, vector<1x8x32xf32>
    tpu.vector_store %arg4[%c0_7, %c0_8, %c0_9], %10 {strides = array<i32>} : memref<1x8x32xf32, #tpu.memory_space<vmem>>, vector<1x8x32xf32>,
    %12 = vector.shape_cast %7 : vector<32xf32> to vector<1x1x32xf32>
    %13 = vector.shape_cast %12 : vector<1x1x32xf32> to vector<1x1x32xf32>
    %14 = vector.broadcast %13 : vector<1x1x32xf32> to vector<1x8x32xf32>
    %c0_10 = arith.constant 0 : index
    %c0_11 = arith.constant 0 : index
    %c0_12 = arith.constant 0 : index
    %15 = vector.load %arg5[%c0_10, %c0_11, %c0_12] : memref<1x8x32xf32, #tpu.memory_space<vmem>>, vector<1x8x32xf32>
    tpu.vector_store %arg5[%c0_10, %c0_11, %c0_12], %14 {strides = array<i32>} : memref<1x8x32xf32, #tpu.memory_space<vmem>>, vector<1x8x32xf32>,
    return
  }
  func.func @transform_0(%arg0: i32) -> (i32, i32) {
    %c0_i32 = arith.constant 0 : i32
    %c0_i32_0 = arith.constant 0 : i32
    return %arg0, %c0_i32 : i32, i32
  }
  func.func @transform_1(%arg0: i32) -> (i32, i32) {
    %c0_i32 = arith.constant 0 : i32
    %c0_i32_0 = arith.constant 0 : i32
    %c0_i32_1 = arith.constant 0 : i32
    return %c0_i32, %c0_i32_0 : i32, i32
  }
  func.func @transform_2(%arg0: i32) -> (i32, i32) {
    %c0_i32 = arith.constant 0 : i32
    %c0_i32_0 = arith.constant 0 : i32
    return %arg0, %c0_i32 : i32, i32
  }
  func.func @transform_3(%arg0: i32) -> (i32, i32, i32) {
    %c0_i32 = arith.constant 0 : i32
    %c0_i32_0 = arith.constant 0 : i32
    %c0_i32_1 = arith.constant 0 : i32
    return %arg0, %c0_i32, %c0_i32_0 : i32, i32, i32
  }
  func.func @transform_4(%arg0: i32) -> (i32, i32, i32) {
    %c0_i32 = arith.constant 0 : i32
    %c0_i32_0 = arith.constant 0 : i32
    %c0_i32_1 = arith.constant 0 : i32
    return %arg0, %c0_i32, %c0_i32_0 : i32, i32, i32
  }
}

module attributes {stable_mosaic.version = 11 : i64} {
  func.func @_out_kernel(%arg0: i32, %arg1: memref<32x256xbf16, #tpu.memory_space<vmem>>, %arg2: memref<1x256xf32, #tpu.memory_space<vmem>>, %arg3: memref<1x256xf32, #tpu.memory_space<vmem>>, %arg4: memref<256x128xbf16, #tpu.memory_space<vmem>>, %arg5: memref<1x128xf32, #tpu.memory_space<vmem>>, %arg6: memref<32x128xf32, #tpu.memory_space<vmem>>) attributes {dimension_semantics = [#tpu.dimension_semantics<parallel>], iteration_bounds = array<i64: 1>, scalar_prefetch = 0 : i64, scratch_operands = 0 : i64, tpu.core_type = #tpu.core_type<tc>, window_params = [{transform_indices = @transform_0, window_bounds = array<i64: 32, 256>}, {pipeline_mode = #tpu.pipeline_mode<synchronous>, transform_indices = @transform_1, window_bounds = array<i64: 1, 256>}, {pipeline_mode = #tpu.pipeline_mode<synchronous>, transform_indices = @transform_2, window_bounds = array<i64: 1, 256>}, {pipeline_mode = #tpu.pipeline_mode<synchronous>, transform_indices = @transform_3, window_bounds = array<i64: 256, 128>}, {pipeline_mode = #tpu.pipeline_mode<synchronous>, transform_indices = @transform_4, window_bounds = array<i64: 1, 128>}, {transform_indices = @transform_5, window_bounds = array<i64: 32, 128>}]} {
    %c0 = arith.constant 0 : index
    %c0_0 = arith.constant 0 : index
    %0 = vector.load %arg1[%c0, %c0_0] : memref<32x256xbf16, #tpu.memory_space<vmem>>, vector<32x256xbf16>
    %1 = arith.extf %0 : vector<32x256xbf16> to vector<32x256xf32>
    %c0_1 = arith.constant 0 : index
    %c0_2 = arith.constant 0 : index
    %2 = vector.load %arg2[%c0_1, %c0_2] : memref<1x256xf32, #tpu.memory_space<vmem>>, vector<1x256xf32>
    %3 = vector.broadcast %2 : vector<1x256xf32> to vector<32x256xf32>
    %4 = arith.mulf %1, %3 : vector<32x256xf32>
    %c0_3 = arith.constant 0 : index
    %c0_4 = arith.constant 0 : index
    %5 = vector.load %arg3[%c0_3, %c0_4] : memref<1x256xf32, #tpu.memory_space<vmem>>, vector<1x256xf32>
    %6 = vector.broadcast %5 : vector<1x256xf32> to vector<32x256xf32>
    %7 = arith.addf %4, %6 : vector<32x256xf32>
    %cst = arith.constant 0.000000e+00 : f32
    %8 = vector.broadcast %cst : f32 to vector<32x256xf32>
    %9 = arith.maximumf %7, %8 : vector<32x256xf32>
    %10 = arith.truncf %9 : vector<32x256xf32> to vector<32x256xbf16>
    %c0_5 = arith.constant 0 : index
    %c0_6 = arith.constant 0 : index
    %11 = vector.load %arg4[%c0_5, %c0_6] : memref<256x128xbf16, #tpu.memory_space<vmem>>, vector<256x128xbf16>
    %cst_7 = arith.constant dense<0.000000e+00> : vector<32x128xf32>
    %12 = tpu.matmul %10, %11, %cst_7 {dimension_numbers = #tpu.dot_dimension_numbers<[1], [0], [0], [1], [0, 0, 1, 1], [], []>} : vector<32x256xbf16>, vector<256x128xbf16>, vector<32x128xf32> -> vector<32x128xf32>
    %c0_8 = arith.constant 0 : index
    %c0_9 = arith.constant 0 : index
    %13 = vector.load %arg5[%c0_8, %c0_9] : memref<1x128xf32, #tpu.memory_space<vmem>>, vector<1x128xf32>
    %14 = vector.broadcast %13 : vector<1x128xf32> to vector<32x128xf32>
    %15 = arith.addf %12, %14 : vector<32x128xf32>
    %c0_10 = arith.constant 0 : index
    %c0_11 = arith.constant 0 : index
    %16 = vector.load %arg6[%c0_10, %c0_11] : memref<32x128xf32, #tpu.memory_space<vmem>>, vector<32x128xf32>
    tpu.vector_store %arg6[%c0_10, %c0_11], %15 {strides = array<i32>} : memref<32x128xf32, #tpu.memory_space<vmem>>, vector<32x128xf32>,
    return
  }
  func.func @transform_0(%arg0: i32) -> (i32, i32) {
    %c0_i32 = arith.constant 0 : i32
    %c0_i32_0 = arith.constant 0 : i32
    return %arg0, %c0_i32 : i32, i32
  }
  func.func @transform_1(%arg0: i32) -> (i32, i32) {
    %c0_i32 = arith.constant 0 : i32
    %c0_i32_0 = arith.constant 0 : i32
    %c0_i32_1 = arith.constant 0 : i32
    return %c0_i32, %c0_i32_0 : i32, i32
  }
  func.func @transform_2(%arg0: i32) -> (i32, i32) {
    %c0_i32 = arith.constant 0 : i32
    %c0_i32_0 = arith.constant 0 : i32
    %c0_i32_1 = arith.constant 0 : i32
    return %c0_i32, %c0_i32_0 : i32, i32
  }
  func.func @transform_3(%arg0: i32) -> (i32, i32) {
    %c0_i32 = arith.constant 0 : i32
    %c0_i32_0 = arith.constant 0 : i32
    %c0_i32_1 = arith.constant 0 : i32
    return %c0_i32, %c0_i32_0 : i32, i32
  }
  func.func @transform_4(%arg0: i32) -> (i32, i32) {
    %c0_i32 = arith.constant 0 : i32
    %c0_i32_0 = arith.constant 0 : i32
    %c0_i32_1 = arith.constant 0 : i32
    return %c0_i32, %c0_i32_0 : i32, i32
  }
  func.func @transform_5(%arg0: i32) -> (i32, i32) {
    %c0_i32 = arith.constant 0 : i32
    %c0_i32_0 = arith.constant 0 : i32
    return %arg0, %c0_i32 : i32, i32
  }
}

</mosaic_0001>

<bundles_post_ra>
// kernel: issegnet_forward.36
= control target key start
LH: loop header
LB: loop body
LE: loop exit
PB: predicated region body
PF: predicated region fallthrough
CT: control target
= control target key end

     0   :  { %vm172_vm0 = vcmask 125952   ;;  %s416_s0 = inlined_call_operand.vmem [shape: bf16[128,16], index: 0, kind: input, shape index: {}]   ;;  %s417_s1 = inlined_call_operand.vmem [shape: f32[1,16], index: 1, kind: input, shape index: {}]   ;;  %s418_s2 = inlined_call_operand.vmem [shape: f32[1,16], index: 2, kind: input, shape index: {}]   ;;  %s419_s3 = inlined_call_operand.vmem [shape: bf16[128,16], index: 3, kind: output, shape index: {}]  }
   0x1   :  { %v228_v0 = vld [vmem:[%s416_s0] sm:$0xff]   ;;  %v259_v4 = vld [vmem:[%s416_s0 + $0x8] sm:$0xff]   ;;  %v260_v5 = vld [vmem:[%s416_s0 + $0x10] sm:$0xff]  }
   0x2   :  { %v292_v1 = vld [vmem:[%s417_s1] ss:$0 sm:$0xff]  ;;  %v229_v2 = vunpack.c.l.bf16 %v228_v0  ;;  %v230_v3 = vunpack.c.h.bf16 %v228_v0  ;;  %v261_v6 = vld [vmem:[%s416_s0 + $0x18] sm:$0xff]   ;;  %v233_v8 = vunpack.c.l.bf16 %v259_v4  ;;  %v234_v9 = vunpack.c.h.bf16 %v259_v4  ;;  %v263_v41 = vld [vmem:[%s416_s0 + $0x28] sm:$0xff]  }
   0x3   :  { %v306_v7 = vld [vmem:[%s418_s2] ss:$0 sm:$0xff]  ;;  %v237_v10 = vunpack.c.l.bf16 %v260_v5  ;;  %v238_v11 = vunpack.c.h.bf16 %v260_v5  ;;  %v241_v14 = vunpack.c.l.bf16 %v261_v6  ;;  %v242_v15 = vunpack.c.h.bf16 %v261_v6  ;;  %v264_v42 = vld [vmem:[%s416_s0 + $0x30] sm:$0xff]   ;;  %v265_v47 = vld [vmem:[%s416_s0 + $0x38] sm:$0xff]  }
   0x4   :  { %v53_v12 = vmul.f32 %v229_v2, %v292_v1  ;;  %v54_v13 = vmul.f32 %v230_v3, %v292_v1  ;;  %v55_v16 = vmul.f32 %v233_v8, %v292_v1  ;;  %v56_v17 = vmul.f32 %v234_v9, %v292_v1  ;;  %v262_v36 = vld [vmem:[%s416_s0 + $0x20] sm:$0xff]  }
   0x5   :  { %v57_v18 = vmul.f32 %v237_v10, %v292_v1  ;;  %v58_v19 = vmul.f32 %v238_v11, %v292_v1  ;;  %v59_v22 = vmul.f32 %v241_v14, %v292_v1  ;;  %v60_v23 = vmul.f32 %v242_v15, %v292_v1 }
   0x6   :  { %v76_v20 = vadd.f32 %v306_v7, %v53_v12  ;;  %v77_v21 = vadd.f32 %v306_v7, %v54_v13  ;;  %v78_v24 = vadd.f32 %v306_v7, %v55_v16  ;;  %v79_v25 = vadd.f32 %v306_v7, %v56_v17 }
   0x7   :  { %v80_v26 = vadd.f32 %v306_v7, %v57_v18  ;;  %v81_v27 = vadd.f32 %v306_v7, %v58_v19  ;;  %v82_v30 = vadd.f32 %v306_v7, %v59_v22  ;;  %v83_v31 = vadd.f32 %v306_v7, %v60_v23 }
   0x8   :  { %v92_v28 = vmax.f32 %v76_v20, 0.0  ;;  %v93_v29 = vmax.f32 %v77_v21, 0.0  ;;  %v94_v32 = vmax.f32 %v78_v24, 0.0  ;;  %v95_v33 = vmax.f32 %v79_v25, 0.0 }
   0x9   :  { %v96_v34 = vmax.f32 %v80_v26, 0.0  ;;  %v97_v35 = vmax.f32 %v81_v27, 0.0  ;;  %v98_v39 = vmax.f32 %v82_v30, 0.0  ;;  %v99_v40 = vmax.f32 %v83_v31, 0.0 }
   0xa   :  { %v211_v37 = vpack.c.bf16 %v92_v28, %v92_v28  ;;  %v212_v38 = vpack.c.bf16 %v93_v29, %v93_v29  ;;  %v213_v43 = vpack.c.bf16 %v94_v32, %v94_v32  ;;  %v214_v44 = vpack.c.bf16 %v95_v33, %v95_v33 }
   0xb   :  { %v215_v45 = vpack.c.bf16 %v96_v34, %v96_v34  ;;  %v216_v46 = vpack.c.bf16 %v97_v35, %v97_v35  ;;  %v217_v48 = vpack.c.bf16 %v98_v39, %v98_v39  ;;  %v218_v49 = vpack.c.bf16 %v99_v40, %v99_v40 }
   0xc   :  { %173 = vst.msk [vmem:[%s419_s3] sm:$0xf] %vm172_vm0, %v211_v37  ;;  %174 = vst.msk [vmem:[%s419_s3 + $0x4] sm:$0xf] %vm172_vm0, %v212_v38  ;;  %v245_v50 = vunpack.c.l.bf16 %v262_v36  ;;  %v246_v51 = vunpack.c.h.bf16 %v262_v36  ;;  %v249_v52 = vunpack.c.l.bf16 %v263_v41  ;;  %v250_v53 = vunpack.c.h.bf16 %v263_v41 }
   0xd   :  { %175 = vst.msk [vmem:[%s419_s3 + $0x8] sm:$0xf] %vm172_vm0, %v213_v43  ;;  %176 = vst.msk [vmem:[%s419_s3 + $0xc] sm:$0xf] %vm172_vm0, %v214_v44  ;;  %v253_v54 = vunpack.c.l.bf16 %v264_v42  ;;  %v254_v55 = vunpack.c.h.bf16 %v264_v42  ;;  %v257_v58 = vunpack.c.l.bf16 %v265_v47  ;;  %v258_v59 = vunpack.c.h.bf16 %v265_v47 }
   0xe   :  { %177 = vst.msk [vmem:[%s419_s3 + $0x10] sm:$0xf] %vm172_vm0, %v215_v45  ;;  %178 = vst.msk [vmem:[%s419_s3 + $0x14] sm:$0xf] %vm172_vm0, %v216_v46  ;;  %v61_v56 = vmul.f32 %v245_v50, %v292_v1  ;;  %v62_v57 = vmul.f32 %v246_v51, %v292_v1  ;;  %v63_v60 = vmul.f32 %v249_v52, %v292_v1 }
   0xf   :  { %179 = vst.msk [vmem:[%s419_s3 + $0x18] sm:$0xf] %vm172_vm0, %v217_v48  ;;  %180 = vst.msk [vmem:[%s419_s3 + $0x1c] sm:$0xf] %vm172_vm0, %v218_v49  ;;  %v64_v61 = vmul.f32 %v250_v53, %v292_v1  ;;  %v65_v62 = vmul.f32 %v253_v54, %v292_v1  ;;  %v66_v63 = vmul.f32 %v254_v55, %v292_v1 }
  0x10   :  { %v84_v0 = vadd.f32 %v306_v7, %v61_v56  ;;  %v85_v2 = vadd.f32 %v306_v7, %v62_v57  ;;  %v67_v3 = vmul.f32 %v257_v58, %v292_v1  ;;  %v68_v4 = vmul.f32 %v258_v59, %v292_v1 }
  0x11   :  { %v86_v5 = vadd.f32 %v306_v7, %v63_v60  ;;  %v87_v6 = vadd.f32 %v306_v7, %v64_v61  ;;  %v88_v8 = vadd.f32 %v306_v7, %v65_v62  ;;  %v89_v9 = vadd.f32 %v306_v7, %v66_v63 }
  0x12   :  { %v100_v10 = vmax.f32 %v84_v0, 0.0  ;;  %v101_v11 = vmax.f32 %v85_v2, 0.0  ;;  %v90_v12 = vadd.f32 %v306_v7, %v67_v3  ;;  %v91_v13 = vadd.f32 %v306_v7, %v68_v4 }
  0x13   :  { %v102_v14 = vmax.f32 %v86_v5, 0.0  ;;  %v103_v15 = vmax.f32 %v87_v6, 0.0  ;;  %v104_v16 = vmax.f32 %v88_v8, 0.0  ;;  %v105_v17 = vmax.f32 %v89_v9, 0.0 }
  0x14   :  { %v219_v18 = vpack.c.bf16 %v100_v10, %v100_v10  ;;  %v220_v1 = vpack.c.bf16 %v101_v11, %v101_v11  ;;  %v106_v19 = vmax.f32 %v90_v12, 0.0  ;;  %v107_v20 = vmax.f32 %v91_v13, 0.0 }
  0x15   :  { %v221_v21 = vpack.c.bf16 %v102_v14, %v102_v14  ;;  %v222_v22 = vpack.c.bf16 %v103_v15, %v103_v15  ;;  %v223_v23 = vpack.c.bf16 %v104_v16, %v104_v16  ;;  %v224_v24 = vpack.c.bf16 %v105_v17, %v105_v17 }
  0x16   :  { %181 = vst.msk [vmem:[%s419_s3 + $0x20] sm:$0xf] %vm172_vm0, %v219_v18  ;;  %182 = vst.msk [vmem:[%s419_s3 + $0x24] sm:$0xf] %vm172_vm0, %v220_v1  ;;  %v225_v7 = vpack.c.bf16 %v106_v19, %v106_v19  ;;  %v226_v25 = vpack.c.bf16 %v107_v20, %v107_v20 }
  0x17   :  { %183 = vst.msk [vmem:[%s419_s3 + $0x28] sm:$0xf] %vm172_vm0, %v221_v21  ;;  %184 = vst.msk [vmem:[%s419_s3 + $0x2c] sm:$0xf] %vm172_vm0, %v222_v22 }
  0x18   :  { %185 = vst.msk [vmem:[%s419_s3 + $0x30] sm:$0xf] %vm172_vm0, %v223_v23  ;;  %186 = vst.msk [vmem:[%s419_s3 + $0x34] sm:$0xf] %vm172_vm0, %v224_v24 }
  0x19   :  { %187 = vst.msk [vmem:[%s419_s3 + $0x38] sm:$0xf] %vm172_vm0, %v225_v7  ;;  %188 = vst.msk [vmem:[%s419_s3 + $0x3c] sm:$0xf] %vm172_vm0, %v226_v25 }

// kernel: issegnet_forward.35
= control target key start
LH: loop header
LB: loop body
LE: loop exit
PB: predicated region body
PF: predicated region fallthrough
CT: control target
= control target key end

     0   :  { %vm91_vm0 = vcmask 293888   ;;  %vm116_vm1 = vcmask 1041408   ;;  %vm281_vm2 = vcmask 125952   ;;  %vm298_vm3 = vcmask 130048   ;;  %s718_s1 = inlined_call_operand.vmem [shape: bf16[36,16], index: 1, kind: input, shape index: {}]   ;;  %s719_s0 = inlined_call_operand.vmem [shape: bf16[128,36], index: 0, kind: input, shape index: {}]   ;;  %s720_s2 = inlined_call_operand.vmem [shape: bf16[128,16], index: 2, kind: output, shape index: {0}]   ;;  %s721_s3 = inlined_call_operand.vmem [shape: f32[1,8,16], index: 3, kind: output, shape index: {1}]   ;;  %s722_s4 = inlined_call_operand.vmem [shape: f32[1,8,16], index: 4, kind: output, shape index: {2}]  }
   0x1   :  { %v495_v0 = vld [vmem:[%s718_s1] sm:$0xff]   ;;  %v496_v1 = vld [vmem:[%s718_s1 + $0x8] sm:$0xff]   ;;  %v497_v2 = vld [vmem:[%s718_s1 + $0x10] ss:$0 sps:$4 sm:$0x33]  }
   0x2   :  { %465 = vmatprep.subr.bf16.mxu0 %v495_v0  ;;  %v498_v3 = vld [vmem:[%s719_s0] sm:$0xff]   ;;  %487 = vmatprep.subr.bf16.mxu1 %v495_v0  ;;  %v118_v5 = vsel %vm116_vm1, %v497_v2, 0  ;;  %v499_v6 = vld [vmem:[%s719_s0 + $0x8] sm:$0xff]   ;;  %v500_v8 = vld [vmem:[%s719_s0 + $0x10] sm:$0xff]  }
   0x3   :  { %466 = vmatpush3.bf16.msra.mxu0 %v495_v0  ;;  %490 = vmatpush3.bf16.msra.mxu1 %v495_v0  ;;  %v502_v4 = vld [vmem:[%s719_s0 + $0x20] sm:$0xff]   ;;  %v503_v7 = vld [vmem:[%s719_s0 + $0x28] sm:$0xff]   ;;  %v504_v9 = vld [vmem:[%s719_s0 + $0x30] sm:$0xff]  }
   0x4   :  { %467 = vmatprep.subr.bf16.mxu0 %v496_v1  ;;  %471 = vmatprep.mubr.msk.bf16.mxu0 %vm91_vm0, %v498_v3  ;;  %v501_v10 = vld [vmem:[%s719_s0 + $0x18] sm:$0xff]  }
   0x5   :  { %488 = vmatprep.subr.bf16.mxu1 %v496_v1  ;;  %479 = vmatprep.mubr.msk.bf16.mxu1 %vm91_vm0, %v502_v4  ;;  %v505_v11 = vld [vmem:[%s719_s0 + $0x38] sm:$0xff]  }
   0x7   :  { %468 = vmatpush3.bf16.msra.mxu0 %v496_v1  ;;  %491 = vmatpush3.bf16.msra.mxu1 %v496_v1 }
   0x8   :  { %493 = vmatprep.subr.msk.bf16.mxu0 %vm116_vm1, %v497_v2  ;;  %494 = vmatprep.subr.msk.bf16.mxu1 %vm116_vm1, %v497_v2 }
   0xb   :  { %470 = vmatpush3.bf16.msra.mxu0 %v118_v5  ;;  %492 = vmatpush3.bf16.msra.mxu1 %v118_v5 }
   0xe   :  { %472 = vmatmul.mubr.msk.bf16.vlgmr.msra.gmra.mrb[0].mxu0 %vm91_vm0, %v499_v6  ;;  %480 = vmatmul.mubr.msk.bf16.vlgmr.msra.gmra.mrb[0].mxu1 %vm91_vm0, %v503_v7 }
   0xf   :  { %475 = vmatprep.mubr.msk.bf16.mxu0 %vm91_vm0, %v500_v8  ;;  %483 = vmatprep.mubr.msk.bf16.mxu1 %vm91_vm0, %v504_v9 }
  0x16   :  { %476 = vmatmul.mubr.msk.bf16.gmra.mrb[4].mxu0 %vm91_vm0, %v501_v10  ;;  %484 = vmatmul.mubr.msk.bf16.gmra.mrb[4].mxu1 %vm91_vm0, %v505_v11 }
  0xe1   :  { %v473_v12 = vpop.f32.mrb[0].mxu0  ;;  %v572_v13 = vpop.f32.mrb[0].mxu1 }
  0xe2   :  { %v440_v14 = vpack.c.bf16 %v473_v12, %v473_v12  ;;  %v154_v15 = vpop.f32.mrb[1].mxu0  ;;  %v448_v16 = vpack.c.bf16 %v572_v13, %v572_v13  ;;  %v576_v17 = vpop.f32.mrb[1].mxu1  ;;  %v338_v22 = vmul.f32 %v473_v12, %v473_v12  ;;  %v302_v33 = vsel %vm298_vm3, %v473_v12, 0.0 }
  0xe3   :  { %v438_v18 = vpack.c.bf16 %v154_v15, %v154_v15  ;;  %v336_v19 = vmul.f32 %v154_v15, %v154_v15  ;;  %v474_v20 = vpop.f32.mrb[2].mxu0  ;;  %v578_v21 = vpop.f32.mrb[2].mxu1  ;;  %v299_v26 = vsel %vm298_vm3, %v154_v15, 0.0  ;;  %v446_v32 = vpack.c.bf16 %v576_v17, %v576_v17 }
  0xe4   :  { %284 = vst.msk [vmem:[%s720_s2 + $0x8] sm:$0xf] %vm281_vm2, %v440_v14  ;;  %v441_v23 = vpack.c.bf16 %v474_v20, %v474_v20  ;;  %v157_v24 = vpop.f32.mrb[3].mxu0  ;;  %292 = vst.msk [vmem:[%s720_s2 + $0x28] sm:$0xf] %vm281_vm2, %v448_v16  ;;  %v588_v25 = vpop.f32.mrb[3].mxu1  ;;  %v339_v30 = vmul.f32 %v474_v20, %v474_v20  ;;  %v449_v36 = vpack.c.bf16 %v578_v21, %v578_v21 }
  0xe5   :  { %282 = vst.msk [vmem:[%s720_s2] sm:$0xf] %vm281_vm2, %v438_v18  ;;  %v439_v27 = vpack.c.bf16 %v157_v24, %v157_v24  ;;  %v300_v28 = vsel %vm298_vm3, %v157_v24, 0.0  ;;  %v337_v29 = vmul.f32 %v157_v24, %v157_v24  ;;  %v352_v34 = vsel %vm298_vm3, %v336_v19, 0.0  ;;  %290 = vst.msk [vmem:[%s720_s2 + $0x20] sm:$0xf] %vm281_vm2, %v446_v32 }
  0xe6   :  { %285 = vst.msk [vmem:[%s720_s2 + $0xc] sm:$0xf] %vm281_vm2, %v441_v23  ;;  %v301_v31 = vadd.f32 %v300_v28, %v299_v26  ;;  %v355_v39 = vsel %vm298_vm3, %v338_v22, 0.0  ;;  %293 = vst.msk [vmem:[%s720_s2 + $0x2c] sm:$0xf] %vm281_vm2, %v449_v36  ;;  %v447_v41 = vpack.c.bf16 %v588_v25, %v588_v25  ;;  %v304_v43 = vsel %vm298_vm3, %v474_v20, 0.0 }
  0xe7   :  { %283 = vst.msk [vmem:[%s720_s2 + $0x4] sm:$0xf] %vm281_vm2, %v439_v27  ;;  %v353_v35 = vsel %vm298_vm3, %v337_v29, 0.0  ;;  %v357_v44 = vsel %vm298_vm3, %v339_v30, 0.0  ;;  %v344_v3 = vmul.f32 %v576_v17, %v576_v17  ;;  %v314_v14 = vsel %vm298_vm3, %v576_v17, 0.0 }
  0xe8   :  { %v303_v37 = vadd.f32 %v302_v33, %v301_v31  ;;  %v354_v38 = vadd.f32 %v353_v35, %v352_v34  ;;  %291 = vst.msk [vmem:[%s720_s2 + $0x24] sm:$0xf] %vm281_vm2, %v447_v41  ;;  %v345_v23 = vmul.f32 %v588_v25, %v588_v25  ;;  %v346_v26 = vmul.f32 %v572_v13, %v572_v13 }
  0xe9   :  { %v477_v40 = vpop.f32.mrb[4].mxu0  ;;  %v622_v42 = vpop.f32.mrb[4].mxu1  ;;  %v367_v22 = vsel %vm298_vm3, %v344_v3, 0.0  ;;  %v316_v27 = vsel %vm298_vm3, %v588_v25, 0.0  ;;  %v318_v30 = vsel %vm298_vm3, %v572_v13, 0.0  ;;  %v347_v31 = vmul.f32 %v578_v21, %v578_v21 }
  0xea   :  { %v356_v45 = vadd.f32 %v355_v39, %v354_v38  ;;  %v444_v46 = vpack.c.bf16 %v477_v40, %v477_v40  ;;  %v170_v47 = vpop.f32.mrb[5].mxu0  ;;  %v202_v48 = vpop.f32.mrb[5].mxu1  ;;  %v305_v50 = vadd.f32 %v304_v43, %v303_v37  ;;  %v342_v62 = vmul.f32 %v477_v40, %v477_v40 }
  0xeb   :  { %v442_v49 = vpack.c.bf16 %v170_v47, %v170_v47  ;;  %v306_v51 = vsel %vm298_vm3, %v170_v47, 0.0  ;;  %v340_v52 = vmul.f32 %v170_v47, %v170_v47  ;;  %v478_v53 = vpop.f32.mrb[6].mxu0  ;;  %v631_v54 = vpop.f32.mrb[6].mxu1  ;;  %v452_v4 = vpack.c.bf16 %v622_v42, %v622_v42 }
  0xec   :  { %288 = vst.msk [vmem:[%s720_s2 + $0x18] sm:$0xf] %vm281_vm2, %v444_v46  ;;  %v358_v55 = vadd.f32 %v357_v44, %v356_v45  ;;  %v445_v56 = vpack.c.bf16 %v478_v53, %v478_v53  ;;  %v173_v57 = vpop.f32.mrb[7].mxu0  ;;  %v205_v58 = vpop.f32.mrb[7].mxu1  ;;  %v307_v59 = vadd.f32 %v306_v51, %v305_v50  ;;  %v310_v5 = vsel %vm298_vm3, %v477_v40, 0.0 }
  0xed   :  { %286 = vst.msk [vmem:[%s720_s2 + $0x10] sm:$0xf] %vm281_vm2, %v442_v49  ;;  %v359_v60 = vsel %vm298_vm3, %v340_v52, 0.0  ;;  %v443_v61 = vpack.c.bf16 %v173_v57, %v173_v57  ;;  %v308_v0 = vsel %vm298_vm3, %v173_v57, 0.0  ;;  %v341_v1 = vmul.f32 %v173_v57, %v173_v57  ;;  %296 = vst.msk [vmem:[%s720_s2 + $0x38] sm:$0xf] %vm281_vm2, %v452_v4 }
  0xee   :  { %v360_v63 = vadd.f32 %v359_v60, %v358_v55  ;;  %289 = vst.msk [vmem:[%s720_s2 + $0x1c] sm:$0xf] %vm281_vm2, %v445_v56  ;;  %v309_v2 = vadd.f32 %v308_v0, %v307_v59  ;;  %v343_v6 = vmul.f32 %v478_v53, %v478_v53  ;;  %v450_v8 = vpack.c.bf16 %v202_v48, %v202_v48 }
  0xef   :  { %287 = vst.msk [vmem:[%s720_s2 + $0x14] sm:$0xf] %vm281_vm2, %v443_v61  ;;  %v361_v7 = vsel %vm298_vm3, %v341_v1, 0.0  ;;  %v363_v11 = vsel %vm298_vm3, %v342_v62, 0.0  ;;  %v312_v12 = vsel %vm298_vm3, %v478_v53, 0.0  ;;  %v453_v15 = vpack.c.bf16 %v631_v54, %v631_v54 }
  0xf0   :  { %v311_v9 = vadd.f32 %v310_v5, %v309_v2  ;;  %v362_v10 = vadd.f32 %v361_v7, %v360_v63  ;;  %294 = vst.msk [vmem:[%s720_s2 + $0x30] sm:$0xf] %vm281_vm2, %v450_v8  ;;  %v451_v19 = vpack.c.bf16 %v205_v58, %v205_v58  ;;  %v365_v20 = vsel %vm298_vm3, %v343_v6, 0.0 }
  0xf1   :  { %297 = vst.msk [vmem:[%s720_s2 + $0x3c] sm:$0xf] %vm281_vm2, %v453_v15  ;;  %v369_v32 = vsel %vm298_vm3, %v345_v23, 0.0  ;;  %v348_v33 = vmul.f32 %v202_v48, %v202_v48  ;;  %v371_v36 = vsel %vm298_vm3, %v346_v26, 0.0  ;;  %v320_v37 = vsel %vm298_vm3, %v578_v21, 0.0 }
  0xf2   :  { %v364_v16 = vadd.f32 %v363_v11, %v362_v10  ;;  %v313_v18 = vadd.f32 %v312_v12, %v311_v9  ;;  %295 = vst.msk [vmem:[%s720_s2 + $0x34] sm:$0xf] %vm281_vm2, %v451_v19  ;;  %v322_v25 = vsel %vm298_vm3, %v202_v48, 0.0  ;;  %v373_v40 = vsel %vm298_vm3, %v347_v31, 0.0 }
  0xf3   :  { %v375_v13 = vsel %vm298_vm3, %v348_v33, 0.0  ;;  %v349_v41 = vmul.f32 %v205_v58, %v205_v58  ;;  %v350_v45 = vmul.f32 %v622_v42, %v622_v42  ;;  %v324_v46 = vsel %vm298_vm3, %v205_v58, 0.0 }
  0xf4   :  { %v315_v17 = vadd.f32 %v314_v14, %v313_v18  ;;  %v366_v24 = vadd.f32 %v365_v20, %v364_v16  ;;  %v326_v21 = vsel %vm298_vm3, %v622_v42, 0.0  ;;  %v351_v48 = vmul.f32 %v631_v54, %v631_v54 }
  0xf5   :  { %v377_v50 = vsel %vm298_vm3, %v349_v41, 0.0  ;;  %v379_v53 = vsel %vm298_vm3, %v350_v45, 0.0  ;;  %v328_v55 = vsel %vm298_vm3, %v631_v54, 0.0 }
  0xf6   :  { %v368_v28 = vadd.f32 %v367_v22, %v366_v24  ;;  %v317_v29 = vadd.f32 %v316_v27, %v315_v17  ;;  %v381_v58 = vsel %vm298_vm3, %v351_v48, 0.0 }
  0xf8   :  { %v319_v34 = vadd.f32 %v318_v30, %v317_v29  ;;  %v370_v35 = vadd.f32 %v369_v32, %v368_v28 }
  0xfa   :  { %v372_v38 = vadd.f32 %v371_v36, %v370_v35  ;;  %v321_v39 = vadd.f32 %v320_v37, %v319_v34 }
  0xfc   :  { %v323_v43 = vadd.f32 %v322_v25, %v321_v39  ;;  %v374_v44 = vadd.f32 %v373_v40, %v372_v38 }
  0xfe   :  { %v376_v47 = vadd.f32 %v375_v13, %v374_v44  ;;  %v325_v49 = vadd.f32 %v324_v46, %v323_v43 }
 0x100   :  { %v327_v51 = vadd.f32 %v326_v21, %v325_v49  ;;  %v378_v52 = vadd.f32 %v377_v50, %v376_v47 }
 0x102   :  { %v329_v56 = vadd.f32 %v328_v55, %v327_v51  ;;  %v380_v57 = vadd.f32 %v379_v53, %v378_v52 }
 0x104   :  { %v330_v59 = vrot.slane %v329_v56, 4  ;;  %v382_v60 = vadd.f32 %v381_v58, %v380_v57 }
 0x106   :  { %v331_v61 = vadd.f32 %v330_v59, %v329_v56  ;;  %v383_v42 = vrot.slane %v382_v60, 4 }
 0x108   :  { %v332_v62 = vrot.slane %v331_v61, 2  ;;  %v384_v63 = vadd.f32 %v383_v42, %v382_v60 }
 0x10a   :  { %v333_v0 = vadd.f32 %v332_v62, %v331_v61  ;;  %v385_v1 = vrot.slane %v384_v63, 2 }
 0x10c   :  { %v334_v2 = vrot.slane %v333_v0, 1  ;;  %v386_v3 = vadd.f32 %v385_v1, %v384_v63 }
 0x10e   :  { %v335_v4 = vadd.f32 %v334_v2, %v333_v0  ;;  %v387_v5 = vrot.slane %v386_v3, 1 }
 0x110   :  { %v388_v6 = vadd.f32 %v387_v5, %v386_v3  ;;  %389 = vst.msk [vmem:[%s721_s3] sm:$0xff] %vm298_vm3, %v335_v4 }
 0x112   :  { %390 = vst.msk [vmem:[%s722_s4] sm:$0xff] %vm298_vm3, %v388_v6 }

// kernel: issegnet_forward.41
= control target key start
LH: loop header
LB: loop body
LE: loop exit
PB: predicated region body
PF: predicated region fallthrough
CT: control target
= control target key end

     0   :  { %vm172_vm0 = vcmask 781312   ;;  %s416_s0 = inlined_call_operand.vmem [shape: bf16[128,96], index: 0, kind: input, shape index: {}]   ;;  %s417_s1 = inlined_call_operand.vmem [shape: f32[1,96], index: 1, kind: input, shape index: {}]   ;;  %s418_s2 = inlined_call_operand.vmem [shape: f32[1,96], index: 2, kind: input, shape index: {}]   ;;  %s419_s3 = inlined_call_operand.vmem [shape: bf16[128,96], index: 3, kind: output, shape index: {}]  }
   0x1   :  { %v228_v0 = vld [vmem:[%s416_s0] sm:$0xff]   ;;  %v259_v4 = vld [vmem:[%s416_s0 + $0x8] sm:$0xff]   ;;  %v260_v5 = vld [vmem:[%s416_s0 + $0x10] sm:$0xff]  }
   0x2   :  { %v292_v1 = vld [vmem:[%s417_s1] ss:$0 sm:$0xff]  ;;  %v229_v2 = vunpack.c.l.bf16 %v228_v0  ;;  %v230_v3 = vunpack.c.h.bf16 %v228_v0  ;;  %v261_v6 = vld [vmem:[%s416_s0 + $0x18] sm:$0xff]   ;;  %v233_v8 = vunpack.c.l.bf16 %v259_v4  ;;  %v234_v9 = vunpack.c.h.bf16 %v259_v4  ;;  %v263_v41 = vld [vmem:[%s416_s0 + $0x28] sm:$0xff]  }
   0x3   :  { %v306_v7 = vld [vmem:[%s418_s2] ss:$0 sm:$0xff]  ;;  %v237_v10 = vunpack.c.l.bf16 %v260_v5  ;;  %v238_v11 = vunpack.c.h.bf16 %v260_v5  ;;  %v241_v14 = vunpack.c.l.bf16 %v261_v6  ;;  %v242_v15 = vunpack.c.h.bf16 %v261_v6  ;;  %v264_v42 = vld [vmem:[%s416_s0 + $0x30] sm:$0xff]   ;;  %v265_v47 = vld [vmem:[%s416_s0 + $0x38] sm:$0xff]  }
   0x4   :  { %v53_v12 = vmul.f32 %v229_v2, %v292_v1  ;;  %v54_v13 = vmul.f32 %v230_v3, %v292_v1  ;;  %v55_v16 = vmul.f32 %v233_v8, %v292_v1  ;;  %v56_v17 = vmul.f32 %v234_v9, %v292_v1  ;;  %v262_v36 = vld [vmem:[%s416_s0 + $0x20] sm:$0xff]  }
   0x5   :  { %v57_v18 = vmul.f32 %v237_v10, %v292_v1  ;;  %v58_v19 = vmul.f32 %v238_v11, %v292_v1  ;;  %v59_v22 = vmul.f32 %v241_v14, %v292_v1  ;;  %v60_v23 = vmul.f32 %v242_v15, %v292_v1 }
   0x6   :  { %v76_v20 = vadd.f32 %v306_v7, %v53_v12  ;;  %v77_v21 = vadd.f32 %v306_v7, %v54_v13  ;;  %v78_v24 = vadd.f32 %v306_v7, %v55_v16  ;;  %v79_v25 = vadd.f32 %v306_v7, %v56_v17 }
   0x7   :  { %v80_v26 = vadd.f32 %v306_v7, %v57_v18  ;;  %v81_v27 = vadd.f32 %v306_v7, %v58_v19  ;;  %v82_v30 = vadd.f32 %v306_v7, %v59_v22  ;;  %v83_v31 = vadd.f32 %v306_v7, %v60_v23 }
   0x8   :  { %v92_v28 = vmax.f32 %v76_v20, 0.0  ;;  %v93_v29 = vmax.f32 %v77_v21, 0.0  ;;  %v94_v32 = vmax.f32 %v78_v24, 0.0  ;;  %v95_v33 = vmax.f32 %v79_v25, 0.0 }
   0x9   :  { %v96_v34 = vmax.f32 %v80_v26, 0.0  ;;  %v97_v35 = vmax.f32 %v81_v27, 0.0  ;;  %v98_v39 = vmax.f32 %v82_v30, 0.0  ;;  %v99_v40 = vmax.f32 %v83_v31, 0.0 }
   0xa   :  { %v211_v37 = vpack.c.bf16 %v92_v28, %v92_v28  ;;  %v212_v38 = vpack.c.bf16 %v93_v29, %v93_v29  ;;  %v213_v43 = vpack.c.bf16 %v94_v32, %v94_v32  ;;  %v214_v44 = vpack.c.bf16 %v95_v33, %v95_v33 }
   0xb   :  { %v215_v45 = vpack.c.bf16 %v96_v34, %v96_v34  ;;  %v216_v46 = vpack.c.bf16 %v97_v35, %v97_v35  ;;  %v217_v48 = vpack.c.bf16 %v98_v39, %v98_v39  ;;  %v218_v49 = vpack.c.bf16 %v99_v40, %v99_v40 }
   0xc   :  { %173 = vst.msk [vmem:[%s419_s3] sm:$0xf] %vm172_vm0, %v211_v37  ;;  %174 = vst.msk [vmem:[%s419_s3 + $0x4] sm:$0xf] %vm172_vm0, %v212_v38  ;;  %v245_v50 = vunpack.c.l.bf16 %v262_v36  ;;  %v246_v51 = vunpack.c.h.bf16 %v262_v36  ;;  %v249_v52 = vunpack.c.l.bf16 %v263_v41  ;;  %v250_v53 = vunpack.c.h.bf16 %v263_v41 }
   0xd   :  { %175 = vst.msk [vmem:[%s419_s3 + $0x8] sm:$0xf] %vm172_vm0, %v213_v43  ;;  %176 = vst.msk [vmem:[%s419_s3 + $0xc] sm:$0xf] %vm172_vm0, %v214_v44  ;;  %v253_v54 = vunpack.c.l.bf16 %v264_v42  ;;  %v254_v55 = vunpack.c.h.bf16 %v264_v42  ;;  %v257_v58 = vunpack.c.l.bf16 %v265_v47  ;;  %v258_v59 = vunpack.c.h.bf16 %v265_v47 }
   0xe   :  { %177 = vst.msk [vmem:[%s419_s3 + $0x10] sm:$0xf] %vm172_vm0, %v215_v45  ;;  %178 = vst.msk [vmem:[%s419_s3 + $0x14] sm:$0xf] %vm172_vm0, %v216_v46  ;;  %v61_v56 = vmul.f32 %v245_v50, %v292_v1  ;;  %v62_v57 = vmul.f32 %v246_v51, %v292_v1  ;;  %v63_v60 = vmul.f32 %v249_v52, %v292_v1 }
   0xf   :  { %179 = vst.msk [vmem:[%s419_s3 + $0x18] sm:$0xf] %vm172_vm0, %v217_v48  ;;  %180 = vst.msk [vmem:[%s419_s3 + $0x1c] sm:$0xf] %vm172_vm0, %v218_v49  ;;  %v64_v61 = vmul.f32 %v250_v53, %v292_v1  ;;  %v65_v62 = vmul.f32 %v253_v54, %v292_v1  ;;  %v66_v63 = vmul.f32 %v254_v55, %v292_v1 }
  0x10   :  { %v84_v0 = vadd.f32 %v306_v7, %v61_v56  ;;  %v85_v2 = vadd.f32 %v306_v7, %v62_v57  ;;  %v67_v3 = vmul.f32 %v257_v58, %v292_v1  ;;  %v68_v4 = vmul.f32 %v258_v59, %v292_v1 }
  0x11   :  { %v86_v5 = vadd.f32 %v306_v7, %v63_v60  ;;  %v87_v6 = vadd.f32 %v306_v7, %v64_v61  ;;  %v88_v8 = vadd.f32 %v306_v7, %v65_v62  ;;  %v89_v9 = vadd.f32 %v306_v7, %v66_v63 }
  0x12   :  { %v100_v10 = vmax.f32 %v84_v0, 0.0  ;;  %v101_v11 = vmax.f32 %v85_v2, 0.0  ;;  %v90_v12 = vadd.f32 %v306_v7, %v67_v3  ;;  %v91_v13 = vadd.f32 %v306_v7, %v68_v4 }
  0x13   :  { %v102_v14 = vmax.f32 %v86_v5, 0.0  ;;  %v103_v15 = vmax.f32 %v87_v6, 0.0  ;;  %v104_v16 = vmax.f32 %v88_v8, 0.0  ;;  %v105_v17 = vmax.f32 %v89_v9, 0.0 }
  0x14   :  { %v219_v18 = vpack.c.bf16 %v100_v10, %v100_v10  ;;  %v220_v1 = vpack.c.bf16 %v101_v11, %v101_v11  ;;  %v106_v19 = vmax.f32 %v90_v12, 0.0  ;;  %v107_v20 = vmax.f32 %v91_v13, 0.0 }
  0x15   :  { %v221_v21 = vpack.c.bf16 %v102_v14, %v102_v14  ;;  %v222_v22 = vpack.c.bf16 %v103_v15, %v103_v15  ;;  %v223_v23 = vpack.c.bf16 %v104_v16, %v104_v16  ;;  %v224_v24 = vpack.c.bf16 %v105_v17, %v105_v17 }
  0x16   :  { %181 = vst.msk [vmem:[%s419_s3 + $0x20] sm:$0xf] %vm172_vm0, %v219_v18  ;;  %182 = vst.msk [vmem:[%s419_s3 + $0x24] sm:$0xf] %vm172_vm0, %v220_v1  ;;  %v225_v7 = vpack.c.bf16 %v106_v19, %v106_v19  ;;  %v226_v25 = vpack.c.bf16 %v107_v20, %v107_v20 }
  0x17   :  { %183 = vst.msk [vmem:[%s419_s3 + $0x28] sm:$0xf] %vm172_vm0, %v221_v21  ;;  %184 = vst.msk [vmem:[%s419_s3 + $0x2c] sm:$0xf] %vm172_vm0, %v222_v22 }
  0x18   :  { %185 = vst.msk [vmem:[%s419_s3 + $0x30] sm:$0xf] %vm172_vm0, %v223_v23  ;;  %186 = vst.msk [vmem:[%s419_s3 + $0x34] sm:$0xf] %vm172_vm0, %v224_v24 }
  0x19   :  { %187 = vst.msk [vmem:[%s419_s3 + $0x38] sm:$0xf] %vm172_vm0, %v225_v7  ;;  %188 = vst.msk [vmem:[%s419_s3 + $0x3c] sm:$0xf] %vm172_vm0, %v226_v25 }

// kernel: issegnet_forward.37
= control target key start
LH: loop header
LB: loop body
LE: loop exit
PB: predicated region body
PF: predicated region fallthrough
CT: control target
= control target key end

     0   :  { %v599_v0 = vmov 0   ;;  %vm175_vm0 = vcmask 130048   ;;  %vm361_vm1 = vcmask 125952   ;;  %s854_s1 = inlined_call_operand.vmem [shape: bf16[144,16], index: 1, kind: input, shape index: {}]   ;;  %s855_s0 = inlined_call_operand.vmem [shape: bf16[128,144], index: 0, kind: input, shape index: {}]   ;;  %s856_s2 = inlined_call_operand.vmem [shape: bf16[128,16], index: 2, kind: output, shape index: {0}]   ;;  %s857_s3 = inlined_call_operand.vmem [shape: f32[1,8,16], index: 3, kind: output, shape index: {1}]   ;;  %s858_s4 = inlined_call_operand.vmem [shape: f32[1,8,16], index: 4, kind: output, shape index: {2}]  }
   0x1   :  { %200 = vmatprep.subr.bf16.mxu0 %v599_v0  ;;  %v566_v1 = vld [vmem:[%s854_s1] sm:$0xff]   ;;  %547 = vmatprep.subr.bf16.mxu1 %v599_v0  ;;  %v567_v2 = vld [vmem:[%s854_s1 + $0x8] sm:$0xff]   ;;  %v568_v3 = vld [vmem:[%s854_s1 + $0x10] sm:$0xff]  }
   0x2   :  { %201 = vmatpush1.bf16.msra.mxu0 %v566_v1  ;;  %556 = vmatpush1.bf16.msra.mxu1 %v566_v1  ;;  %v569_v4 = vld [vmem:[%s854_s1 + $0x18] sm:$0xff]   ;;  %v577_v5 = vld [vmem:[%s855_s0 + $0x4] ss:$8 sps:$4 sm:$0xff]   ;;  %v572_v9 = vld [vmem:[%s854_s1 + $0x30] sm:$0xff]  }
   0x3   :  { %202 = vmatprep.subr.bf16.mxu0 %v599_v0  ;;  %548 = vmatprep.subr.bf16.mxu1 %v599_v0  ;;  %v583_v6 = vld [vmem:[%s855_s0 + $0x44] ss:$8 sps:$4 sm:$0xff]   ;;  %v573_v10 = vld [vmem:[%s854_s1 + $0x38] sm:$0xff]   ;;  %v575_v12 = vld [vmem:[%s855_s0] ss:$8 sps:$4 sm:$0xff]  }
   0x4   :  { %507 = vmatprep.mubr.msk.bf16.mxu0 %vm175_vm0, %v577_v5  ;;  %v570_v7 = vld [vmem:[%s854_s1 + $0x20] sm:$0xff]   ;;  %511 = vmatprep.mubr.msk.bf16.mxu1 %vm175_vm0, %v583_v6  ;;  %v571_v8 = vld [vmem:[%s854_s1 + $0x28] sm:$0xff]   ;;  %v578_v14 = vld [vmem:[%s855_s0 + $0x14] ss:$8 sps:$4 sm:$0xff]  }
   0x5   :  { %v574_v11 = vld [vmem:[%s854_s1 + $0x40] sm:$0xff]   ;;  %v587_v15 = vld [vmem:[%s855_s0 + $0x54] ss:$8 sps:$4 sm:$0xff]   ;;  %v580_v16 = vld [vmem:[%s855_s0 + $0x10] ss:$8 sps:$4 sm:$0xff]  }
   0x6   :  { %203 = vmatpush1.bf16.msra.mxu0 %v567_v2  ;;  %557 = vmatpush1.bf16.msra.mxu1 %v567_v2  ;;  %v581_v13 = vld [vmem:[%s855_s0 + $0x40] ss:$8 sps:$4 sm:$0xff]   ;;  %v589_v17 = vld [vmem:[%s855_s0 + $0x50] ss:$8 sps:$4 sm:$0xff]   ;;  %v584_v18 = vld [vmem:[%s855_s0 + $0x24] ss:$8 sps:$4 sm:$0xff]  }
   0x7   :  { %204 = vmatprep.subr.bf16.mxu0 %v599_v0  ;;  %549 = vmatprep.subr.bf16.mxu1 %v599_v0  ;;  %v593_v19 = vld [vmem:[%s855_s0 + $0x64] ss:$8 sps:$4 sm:$0xff]   ;;  %v586_v20 = vld [vmem:[%s855_s0 + $0x20] ss:$8 sps:$4 sm:$0xff]   ;;  %v590_v22 = vld [vmem:[%s855_s0 + $0x34] ss:$8 sps:$4 sm:$0xff]  }
   0x8   :  { %v595_v21 = vld [vmem:[%s855_s0 + $0x60] ss:$8 sps:$4 sm:$0xff]   ;;  %v596_v23 = vld [vmem:[%s855_s0 + $0x74] ss:$8 sps:$4 sm:$0xff]   ;;  %v592_v24 = vld [vmem:[%s855_s0 + $0x30] ss:$8 sps:$4 sm:$0xff]  }
   0x9   :  { %v598_v25 = vld [vmem:[%s855_s0 + $0x70] ss:$8 sps:$4 sm:$0xff]  }
   0xa   :  { %205 = vmatpush1.bf16.msra.mxu0 %v568_v3  ;;  %558 = vmatpush1.bf16.msra.mxu1 %v568_v3 }
   0xb   :  { %206 = vmatprep.subr.bf16.mxu0 %v599_v0  ;;  %550 = vmatprep.subr.bf16.mxu1 %v599_v0 }
   0xe   :  { %207 = vmatpush1.bf16.msra.mxu0 %v569_v4  ;;  %559 = vmatpush1.bf16.msra.mxu1 %v569_v4 }
   0xf   :  { %208 = vmatprep.subr.bf16.mxu0 %v599_v0  ;;  %551 = vmatprep.subr.bf16.mxu1 %v599_v0 }
  0x12   :  { %209 = vmatpush1.bf16.msra.mxu0 %v570_v7  ;;  %560 = vmatpush1.bf16.msra.mxu1 %v570_v7 }
  0x13   :  { %210 = vmatprep.subr.bf16.mxu0 %v599_v0  ;;  %552 = vmatprep.subr.bf16.mxu1 %v599_v0 }
  0x16   :  { %211 = vmatpush1.bf16.msra.mxu0 %v571_v8  ;;  %561 = vmatpush1.bf16.msra.mxu1 %v571_v8 }
  0x17   :  { %212 = vmatprep.subr.bf16.mxu0 %v599_v0  ;;  %553 = vmatprep.subr.bf16.mxu1 %v599_v0 }
  0x1a   :  { %213 = vmatpush1.bf16.msra.mxu0 %v572_v9  ;;  %562 = vmatpush1.bf16.msra.mxu1 %v572_v9 }
  0x1b   :  { %214 = vmatprep.subr.bf16.mxu0 %v599_v0  ;;  %554 = vmatprep.subr.bf16.mxu1 %v599_v0 }
  0x1e   :  { %215 = vmatpush1.bf16.msra.mxu0 %v573_v10  ;;  %563 = vmatpush1.bf16.msra.mxu1 %v573_v10 }
  0x1f   :  { %216 = vmatprep.subr.bf16.mxu0 %v599_v0  ;;  %555 = vmatprep.subr.bf16.mxu1 %v599_v0 }
  0x22   :  { %217 = vmatpush1.bf16.msra.mxu0 %v574_v11  ;;  %564 = vmatpush1.bf16.msra.mxu1 %v574_v11 }
  0x25   :  { %233 = vmatmul.mubr.bf16.vlgmr.msra.gmra.mrb[0].mxu0 %v575_v12  ;;  %265 = vmatmul.mubr.bf16.vlgmr.msra.gmra.mrb[0].mxu1 %v581_v13 }
  0x26   :  { %508 = vmatprep.mubr.msk.bf16.mxu0 %vm175_vm0, %v578_v14  ;;  %512 = vmatprep.mubr.msk.bf16.mxu1 %vm175_vm0, %v587_v15 }
  0x2d   :  { %241 = vmatmul.mubr.bf16.gmra.mrb[4].mxu0 %v580_v16  ;;  %273 = vmatmul.mubr.bf16.gmra.mrb[4].mxu1 %v589_v17 }
  0x2e   :  { %509 = vmatprep.mubr.msk.bf16.mxu0 %vm175_vm0, %v584_v18  ;;  %513 = vmatprep.mubr.msk.bf16.mxu1 %vm175_vm0, %v593_v19 }
  0x35   :  { %249 = vmatmul.mubr.bf16.gmra.mrb[8].mxu0 %v586_v20  ;;  %281 = vmatmul.mubr.bf16.gmra.mrb[8].mxu1 %v595_v21 }
  0x36   :  { %510 = vmatprep.mubr.msk.bf16.mxu0 %vm175_vm0, %v590_v22  ;;  %514 = vmatprep.mubr.msk.bf16.mxu1 %vm175_vm0, %v596_v23 }
  0x3d   :  { %257 = vmatmul.mubr.bf16.gmra.mrb[12].mxu0 %v592_v24  ;;  %289 = vmatmul.mubr.bf16.gmra.mrb[12].mxu1 %v598_v25 }
  0xf8   :  { %v234_v26 = vpop.f32.mrb[0].mxu0  ;;  %v708_v27 = vpop.f32.mrb[0].mxu1 }
  0xf9   :  { %v531_v28 = vpack.c.bf16 %v234_v26, %v234_v26  ;;  %v415_v29 = vmul.f32 %v234_v26, %v234_v26  ;;  %v236_v30 = vpop.f32.mrb[1].mxu0  ;;  %v539_v31 = vpack.c.bf16 %v708_v27, %v708_v27  ;;  %v268_v32 = vpop.f32.mrb[1].mxu1  ;;  %v378_v35 = vsel %vm175_vm0, %v234_v26, 0.0 }
  0xfa   :  { %v237_v33 = vpop.f32.mrb[2].mxu0  ;;  %v712_v34 = vpop.f32.mrb[2].mxu1 }
  0xfb   :  { %362 = vst.msk [vmem:[%s856_s2] sm:$0xf] %vm361_vm1, %v531_v28  ;;  %v532_v36 = vpack.c.bf16 %v237_v33, %v237_v33  ;;  %v379_v37 = vsel %vm175_vm0, %v237_v33, 0.0  ;;  %v416_v38 = vmul.f32 %v237_v33, %v237_v33  ;;  %v239_v39 = vpop.f32.mrb[3].mxu0  ;;  %370 = vst.msk [vmem:[%s856_s2 + $0x20] sm:$0xf] %vm361_vm1, %v539_v31  ;;  %v540_v42 = vpack.c.bf16 %v712_v34, %v712_v34 }
  0xfc   :  { %v271_v40 = vpop.f32.mrb[3].mxu1  ;;  %v380_v41 = vadd.f32 %v379_v37, %v378_v35  ;;  %v431_v43 = vsel %vm175_vm0, %v415_v29, 0.0 }
  0xfd   :  { %363 = vst.msk [vmem:[%s856_s2 + $0x4] sm:$0xf] %vm361_vm1, %v532_v36  ;;  %v432_v44 = vsel %vm175_vm0, %v416_v38, 0.0  ;;  %371 = vst.msk [vmem:[%s856_s2 + $0x24] sm:$0xf] %vm361_vm1, %v540_v42  ;;  %v423_v36 = vmul.f32 %v708_v27, %v708_v27 }
  0xfe   :  { %v433_v45 = vadd.f32 %v432_v44, %v431_v43 }
 0x100   :  { %v242_v46 = vpop.f32.mrb[4].mxu0  ;;  %v736_v47 = vpop.f32.mrb[4].mxu1 }
 0x101   :  { %v533_v48 = vpack.c.bf16 %v242_v46, %v242_v46  ;;  %v381_v49 = vsel %vm175_vm0, %v242_v46, 0.0  ;;  %v417_v50 = vmul.f32 %v242_v46, %v242_v46  ;;  %v244_v51 = vpop.f32.mrb[5].mxu0  ;;  %v541_v52 = vpack.c.bf16 %v736_v47, %v736_v47  ;;  %v276_v53 = vpop.f32.mrb[5].mxu1 }
 0x102   :  { %v382_v54 = vadd.f32 %v381_v49, %v380_v41  ;;  %v245_v55 = vpop.f32.mrb[6].mxu0  ;;  %v741_v56 = vpop.f32.mrb[6].mxu1  ;;  %v424_v51 = vmul.f32 %v712_v34, %v712_v34 }
 0x103   :  { %364 = vst.msk [vmem:[%s856_s2 + $0x8] sm:$0xf] %vm361_vm1, %v533_v48  ;;  %v434_v57 = vsel %vm175_vm0, %v417_v50, 0.0  ;;  %v534_v58 = vpack.c.bf16 %v245_v55, %v245_v55  ;;  %v383_v59 = vsel %vm175_vm0, %v245_v55, 0.0  ;;  %v418_v60 = vmul.f32 %v245_v55, %v245_v55  ;;  %v247_v61 = vpop.f32.mrb[7].mxu0  ;;  %v279_v62 = vpop.f32.mrb[7].mxu1 }
 0x104   :  { %372 = vst.msk [vmem:[%s856_s2 + $0x28] sm:$0xf] %vm361_vm1, %v541_v52  ;;  %v435_v63 = vadd.f32 %v434_v57, %v433_v45  ;;  %v384_v0 = vadd.f32 %v383_v59, %v382_v54  ;;  %v542_v1 = vpack.c.bf16 %v741_v56, %v741_v56  ;;  %v393_v50 = vsel %vm175_vm0, %v708_v27, 0.0 }
 0x105   :  { %365 = vst.msk [vmem:[%s856_s2 + $0xc] sm:$0xf] %vm361_vm1, %v534_v58  ;;  %v436_v2 = vsel %vm175_vm0, %v418_v60, 0.0  ;;  %v446_v55 = vsel %vm175_vm0, %v423_v36, 0.0  ;;  %v395_v27 = vsel %vm175_vm0, %v712_v34, 0.0  ;;  %v425_v57 = vmul.f32 %v736_v47, %v736_v47 }
 0x106   :  { %v437_v3 = vadd.f32 %v436_v2, %v435_v63  ;;  %373 = vst.msk [vmem:[%s856_s2 + $0x2c] sm:$0xf] %vm361_vm1, %v542_v1  ;;  %v448_v60 = vsel %vm175_vm0, %v424_v51, 0.0  ;;  %v397_v61 = vsel %vm175_vm0, %v736_v47, 0.0  ;;  %v426_v62 = vmul.f32 %v741_v56, %v741_v56 }
 0x107   :  { %v450_v1 = vsel %vm175_vm0, %v425_v57, 0.0  ;;  %v399_v34 = vsel %vm175_vm0, %v741_v56, 0.0 }
 0x108   :  { %v250_v4 = vpop.f32.mrb[8].mxu0  ;;  %v764_v5 = vpop.f32.mrb[8].mxu1 }
 0x109   :  { %v535_v6 = vpack.c.bf16 %v250_v4, %v250_v4  ;;  %v385_v7 = vsel %vm175_vm0, %v250_v4, 0.0  ;;  %v419_v8 = vmul.f32 %v250_v4, %v250_v4  ;;  %v252_v9 = vpop.f32.mrb[9].mxu0  ;;  %v543_v10 = vpack.c.bf16 %v764_v5, %v764_v5  ;;  %v284_v11 = vpop.f32.mrb[9].mxu1 }
 0x10a   :  { %v386_v12 = vadd.f32 %v385_v7, %v384_v0  ;;  %v253_v13 = vpop.f32.mrb[10].mxu0  ;;  %v769_v14 = vpop.f32.mrb[10].mxu1  ;;  %v427_v2 = vmul.f32 %v764_v5, %v764_v5  ;;  %v401_v47 = vsel %vm175_vm0, %v764_v5, 0.0 }
 0x10b   :  { %366 = vst.msk [vmem:[%s856_s2 + $0x10] sm:$0xf] %vm361_vm1, %v535_v6  ;;  %v438_v15 = vsel %vm175_vm0, %v419_v8, 0.0  ;;  %v536_v16 = vpack.c.bf16 %v253_v13, %v253_v13  ;;  %v387_v17 = vsel %vm175_vm0, %v253_v13, 0.0  ;;  %v420_v18 = vmul.f32 %v253_v13, %v253_v13  ;;  %v255_v19 = vpop.f32.mrb[11].mxu0  ;;  %v287_v20 = vpop.f32.mrb[11].mxu1 }
 0x10c   :  { %374 = vst.msk [vmem:[%s856_s2 + $0x30] sm:$0xf] %vm361_vm1, %v543_v10  ;;  %v439_v21 = vadd.f32 %v438_v15, %v437_v3  ;;  %v388_v22 = vadd.f32 %v387_v17, %v386_v12  ;;  %v544_v23 = vpack.c.bf16 %v769_v14, %v769_v14  ;;  %v452_v6 = vsel %vm175_vm0, %v426_v62, 0.0 }
 0x10d   :  { %367 = vst.msk [vmem:[%s856_s2 + $0x14] sm:$0xf] %vm361_vm1, %v536_v16  ;;  %v440_v24 = vsel %vm175_vm0, %v420_v18, 0.0  ;;  %v428_v7 = vmul.f32 %v769_v14, %v769_v14  ;;  %v454_v11 = vsel %vm175_vm0, %v427_v2, 0.0  ;;  %v403_v56 = vsel %vm175_vm0, %v769_v14, 0.0 }
 0x10e   :  { %v441_v25 = vadd.f32 %v440_v24, %v439_v21  ;;  %375 = vst.msk [vmem:[%s856_s2 + $0x34] sm:$0xf] %vm361_vm1, %v544_v23 }
 0x10f   :  { %v456_v16 = vsel %vm175_vm0, %v428_v7, 0.0 }
 0x110   :  { %v258_v26 = vpop.f32.mrb[12].mxu0  ;;  %v290_v28 = vpop.f32.mrb[12].mxu1 }
 0x111   :  { %v537_v29 = vpack.c.bf16 %v258_v26, %v258_v26  ;;  %v389_v30 = vsel %vm175_vm0, %v258_v26, 0.0  ;;  %v421_v31 = vmul.f32 %v258_v26, %v258_v26  ;;  %v260_v32 = vpop.f32.mrb[13].mxu0  ;;  %v545_v33 = vpack.c.bf16 %v290_v28, %v290_v28  ;;  %v292_v35 = vpop.f32.mrb[13].mxu1 }
 0x112   :  { %v390_v37 = vadd.f32 %v389_v30, %v388_v22  ;;  %v261_v38 = vpop.f32.mrb[14].mxu0  ;;  %v293_v39 = vpop.f32.mrb[14].mxu1  ;;  %v429_v8 = vmul.f32 %v290_v28, %v290_v28  ;;  %v405_v12 = vsel %vm175_vm0, %v290_v28, 0.0 }
 0x113   :  { %368 = vst.msk [vmem:[%s856_s2 + $0x18] sm:$0xf] %vm361_vm1, %v537_v29  ;;  %v442_v40 = vsel %vm175_vm0, %v421_v31, 0.0  ;;  %v538_v41 = vpack.c.bf16 %v261_v38, %v261_v38  ;;  %v391_v42 = vsel %vm175_vm0, %v261_v38, 0.0  ;;  %v422_v43 = vmul.f32 %v261_v38, %v261_v38  ;;  %v263_v44 = vpop.f32.mrb[15].mxu0  ;;  %v295_v45 = vpop.f32.mrb[15].mxu1 }
 0x114   :  { %376 = vst.msk [vmem:[%s856_s2 + $0x38] sm:$0xf] %vm361_vm1, %v545_v33  ;;  %v443_v46 = vadd.f32 %v442_v40, %v441_v25  ;;  %v392_v48 = vadd.f32 %v391_v42, %v390_v37  ;;  %v546_v49 = vpack.c.bf16 %v293_v39, %v293_v39  ;;  %v458_v17 = vsel %vm175_vm0, %v429_v8, 0.0 }
 0x115   :  { %369 = vst.msk [vmem:[%s856_s2 + $0x1c] sm:$0xf] %vm361_vm1, %v538_v41  ;;  %v444_v52 = vsel %vm175_vm0, %v422_v43, 0.0  ;;  %v430_v5 = vmul.f32 %v293_v39, %v293_v39  ;;  %v407_v20 = vsel %vm175_vm0, %v293_v39, 0.0 }
 0x116   :  { %v394_v53 = vadd.f32 %v393_v50, %v392_v48  ;;  %v445_v54 = vadd.f32 %v444_v52, %v443_v46  ;;  %377 = vst.msk [vmem:[%s856_s2 + $0x3c] sm:$0xf] %vm361_vm1, %v546_v49 }
 0x117   :  { %v460_v23 = vsel %vm175_vm0, %v430_v5, 0.0 }
 0x118   :  { %v396_v58 = vadd.f32 %v395_v27, %v394_v53  ;;  %v447_v59 = vadd.f32 %v446_v55, %v445_v54 }
 0x11a   :  { %v449_v63 = vadd.f32 %v448_v60, %v447_v59  ;;  %v398_v0 = vadd.f32 %v397_v61, %v396_v58 }
 0x11c   :  { %v400_v3 = vadd.f32 %v399_v34, %v398_v0  ;;  %v451_v4 = vadd.f32 %v450_v1, %v449_v63 }
 0x11e   :  { %v402_v9 = vadd.f32 %v401_v47, %v400_v3  ;;  %v453_v10 = vadd.f32 %v452_v6, %v451_v4 }
 0x120   :  { %v455_v13 = vadd.f32 %v454_v11, %v453_v10  ;;  %v404_v15 = vadd.f32 %v403_v56, %v402_v9 }
 0x122   :  { %v457_v18 = vadd.f32 %v456_v16, %v455_v13  ;;  %v406_v19 = vadd.f32 %v405_v12, %v404_v15 }
 0x124   :  { %v459_v21 = vadd.f32 %v458_v17, %v457_v18  ;;  %v408_v22 = vadd.f32 %v407_v20, %v406_v19 }
 0x126   :  { %v409_v24 = vrot.slane %v408_v22, 4  ;;  %v461_v25 = vadd.f32 %v460_v23, %v459_v21 }
 0x128   :  { %v410_v14 = vadd.f32 %v409_v24, %v408_v22  ;;  %v462_v26 = vrot.slane %v461_v25, 4 }
 0x12a   :  { %v411_v28 = vrot.slane %v410_v14, 2  ;;  %v463_v29 = vadd.f32 %v462_v26, %v461_v25 }
 0x12c   :  { %v412_v30 = vadd.f32 %v411_v28, %v410_v14  ;;  %v464_v31 = vrot.slane %v463_v29, 2 }
 0x12e   :  { %v413_v32 = vrot.slane %v412_v30, 1  ;;  %v465_v33 = vadd.f32 %v464_v31, %v463_v29 }
 0x130   :  { %v414_v35 = vadd.f32 %v413_v32, %v412_v30  ;;  %v466_v36 = vrot.slane %v465_v33, 1 }
 0x132   :  { %v467_v37 = vadd.f32 %v466_v36, %v465_v33  ;;  %468 = vst.msk [vmem:[%s857_s3] sm:$0xff] %vm175_vm0, %v414_v35 }
 0x134   :  { %469 = vst.msk [vmem:[%s858_s4] sm:$0xff] %vm175_vm0, %v467_v37 }

// kernel: issegnet_forward.40
= control target key start
LH: loop header
LB: loop body
LE: loop exit
PB: predicated region body
PF: predicated region fallthrough
CT: control target
= control target key end

     0   :  { %vm131_vm0 = vcmask 130048   ;;  %vm317_vm1 = vcmask 781312   ;;  %vm334_vm2 = vcmask 785408   ;;  %s767_s3 = inlined_call_operand.vmem [shape: bf16[16,96], index: 3, kind: input, shape index: {}]   ;;  %s768_s0 = inlined_call_operand.vmem [shape: bf16[128,16], index: 0, kind: input, shape index: {}]   ;;  %s769_s1 = inlined_call_operand.vmem [shape: f32[1,16], index: 1, kind: input, shape index: {}]   ;;  %s770_s2 = inlined_call_operand.vmem [shape: f32[1,16], index: 2, kind: input, shape index: {}]   ;;  %s771_s4 = inlined_call_operand.vmem [shape: bf16[128,96], index: 4, kind: output, shape index: {0}]   ;;  %s772_s5 = inlined_call_operand.vmem [shape: f32[1,8,96], index: 5, kind: output, shape index: {1}]   ;;  %s773_s6 = inlined_call_operand.vmem [shape: f32[1,8,96], index: 6, kind: output, shape index: {2}]  }
   0x1   :  { %v550_v0 = vld [vmem:[%s767_s3] sm:$0xff]   ;;  %v514_v5 = vld [vmem:[%s768_s0 + $0x8] sm:$0xff]   ;;  %v515_v6 = vld [vmem:[%s768_s0 + $0x10] sm:$0xff]  }
   0x2   :  { %v483_v1 = vld [vmem:[%s768_s0] sm:$0xff]   ;;  %530 = vmatprep.subr.bf16.mxu0 %v550_v0  ;;  %v516_v7 = vld [vmem:[%s768_s0 + $0x18] sm:$0xff]   ;;  %548 = vmatprep.subr.bf16.mxu1 %v550_v0  ;;  %v488_v9 = vunpack.c.l.bf16 %v514_v5  ;;  %v489_v10 = vunpack.c.h.bf16 %v514_v5  ;;  %v492_v11 = vunpack.c.l.bf16 %v515_v6  ;;  %v493_v12 = vunpack.c.h.bf16 %v515_v6  ;;  %v518_v34 = vld [vmem:[%s768_s0 + $0x28] sm:$0xff]  }
   0x3   :  { %v595_v2 = vld [vmem:[%s769_s1] ss:$0 sm:$0xff]  ;;  %v484_v3 = vunpack.c.l.bf16 %v483_v1  ;;  %v485_v4 = vunpack.c.h.bf16 %v483_v1  ;;  %531 = vmatpush3.bf16.msra.mxu0 %v550_v0  ;;  %549 = vmatpush3.bf16.msra.mxu1 %v550_v0  ;;  %v496_v15 = vunpack.c.l.bf16 %v516_v7  ;;  %v497_v16 = vunpack.c.h.bf16 %v516_v7  ;;  %v519_v39 = vld [vmem:[%s768_s0 + $0x30] sm:$0xff]   ;;  %v520_v43 = vld [vmem:[%s768_s0 + $0x38] sm:$0xff]  }
   0x4   :  { %v609_v8 = vld [vmem:[%s770_s2] ss:$0 sm:$0xff]  ;;  %v62_v17 = vmul.f32 %v488_v9, %v595_v2  ;;  %v63_v18 = vmul.f32 %v489_v10, %v595_v2  ;;  %v64_v19 = vmul.f32 %v492_v11, %v595_v2  ;;  %v65_v20 = vmul.f32 %v493_v12, %v595_v2 }
   0x5   :  { %v60_v13 = vmul.f32 %v484_v3, %v595_v2  ;;  %v61_v14 = vmul.f32 %v485_v4, %v595_v2  ;;  %v66_v23 = vmul.f32 %v496_v15, %v595_v2  ;;  %v67_v24 = vmul.f32 %v497_v16, %v595_v2  ;;  %v517_v29 = vld [vmem:[%s768_s0 + $0x20] sm:$0xff]  }
   0x6   :  { %v85_v25 = vadd.f32 %v609_v8, %v62_v17  ;;  %v86_v26 = vadd.f32 %v609_v8, %v63_v18  ;;  %v87_v27 = vadd.f32 %v609_v8, %v64_v19  ;;  %v88_v28 = vadd.f32 %v609_v8, %v65_v20 }
   0x7   :  { %v83_v21 = vadd.f32 %v609_v8, %v60_v13  ;;  %v84_v22 = vadd.f32 %v609_v8, %v61_v14  ;;  %v89_v32 = vadd.f32 %v609_v8, %v66_v23  ;;  %v90_v33 = vadd.f32 %v609_v8, %v67_v24 }
   0x8   :  { %v101_v35 = vmax.f32 %v85_v25, 0.0  ;;  %v102_v36 = vmax.f32 %v86_v26, 0.0  ;;  %v103_v37 = vmax.f32 %v87_v27, 0.0  ;;  %v104_v38 = vmax.f32 %v88_v28, 0.0 }
   0x9   :  { %v99_v30 = vmax.f32 %v83_v21, 0.0  ;;  %v100_v31 = vmax.f32 %v84_v22, 0.0  ;;  %v105_v41 = vmax.f32 %v89_v32, 0.0  ;;  %v500_v42 = vunpack.c.l.bf16 %v517_v29 }
   0xa   :  { %v116_v44 = vpack.c.bf16 %v102_v36, %v101_v35  ;;  %v117_v45 = vpack.c.bf16 %v104_v38, %v103_v37  ;;  %v501_v46 = vunpack.c.h.bf16 %v517_v29  ;;  %v504_v47 = vunpack.c.l.bf16 %v518_v34 }
   0xb   :  { %v115_v40 = vpack.c.bf16 %v100_v31, %v99_v30  ;;  %v106_v48 = vmax.f32 %v90_v33, 0.0  ;;  %v68_v49 = vmul.f32 %v500_v42, %v595_v2  ;;  %v505_v50 = vunpack.c.h.bf16 %v518_v34 }
   0xc   :  { %v508_v51 = vunpack.c.l.bf16 %v519_v39  ;;  %v69_v52 = vmul.f32 %v501_v46, %v595_v2  ;;  %v70_v53 = vmul.f32 %v504_v47, %v595_v2  ;;  %v509_v54 = vunpack.c.h.bf16 %v519_v39 }
   0xd   :  { %532 = vmatprep.mubr.msk.bf16.mxu0 %vm131_vm0, %v115_v40  ;;  %v512_v55 = vunpack.c.l.bf16 %v520_v43  ;;  %v91_v56 = vadd.f32 %v609_v8, %v68_v49  ;;  %v71_v57 = vmul.f32 %v505_v50, %v595_v2  ;;  %v513_v59 = vunpack.c.h.bf16 %v520_v43 }
   0xe   :  { %533 = vmatmul.mubr.msk.bf16.vlgmr.msra.gmra.mrb[0].mxu0 %vm131_vm0, %v116_v44  ;;  %v72_v58 = vmul.f32 %v508_v51, %v595_v2  ;;  %v92_v60 = vadd.f32 %v609_v8, %v69_v52  ;;  %v93_v61 = vadd.f32 %v609_v8, %v70_v53  ;;  %v73_v62 = vmul.f32 %v509_v54, %v595_v2 }
   0xf   :  { %536 = vmatprep.mubr.msk.bf16.mxu0 %vm131_vm0, %v117_v45  ;;  %v74_v63 = vmul.f32 %v512_v55, %v595_v2  ;;  %v107_v0 = vmax.f32 %v91_v56, 0.0  ;;  %v94_v1 = vadd.f32 %v609_v8, %v71_v57  ;;  %v75_v4 = vmul.f32 %v513_v59, %v595_v2 }
  0x10   :  { %v95_v3 = vadd.f32 %v609_v8, %v72_v58  ;;  %v118_v5 = vpack.c.bf16 %v106_v48, %v105_v41  ;;  %v108_v6 = vmax.f32 %v92_v60, 0.0  ;;  %v109_v7 = vmax.f32 %v93_v61, 0.0 }
  0x11   :  { %v96_v9 = vadd.f32 %v609_v8, %v73_v62  ;;  %v110_v10 = vmax.f32 %v94_v1, 0.0  ;;  %v97_v12 = vadd.f32 %v609_v8, %v74_v63  ;;  %v98_v13 = vadd.f32 %v609_v8, %v75_v4 }
  0x12   :  { %v111_v11 = vmax.f32 %v95_v3, 0.0  ;;  %v119_v14 = vpack.c.bf16 %v108_v6, %v107_v0 }
  0x13   :  { %v112_v15 = vmax.f32 %v96_v9, 0.0  ;;  %v120_v16 = vpack.c.bf16 %v110_v10, %v109_v7  ;;  %v113_v2 = vmax.f32 %v97_v12, 0.0  ;;  %v114_v18 = vmax.f32 %v98_v13, 0.0 }
  0x14   :  { %540 = vmatprep.mubr.msk.bf16.mxu1 %vm131_vm0, %v119_v14 }
  0x15   :  { %v121_v17 = vpack.c.bf16 %v112_v15, %v111_v11  ;;  %541 = vmatmul.mubr.msk.bf16.vlgmr.msra.gmra.mrb[0].mxu1 %vm131_vm0, %v120_v16  ;;  %v122_v19 = vpack.c.bf16 %v114_v18, %v113_v2 }
  0x16   :  { %537 = vmatmul.mubr.msk.bf16.gmra.mrb[4].mxu0 %vm131_vm0, %v118_v5 }
  0x17   :  { %544 = vmatprep.mubr.msk.bf16.mxu1 %vm131_vm0, %v121_v17 }
  0x1d   :  { %545 = vmatmul.mubr.msk.bf16.gmra.mrb[4].mxu1 %vm131_vm0, %v122_v19 }
  0xe1   :  { %v534_v20 = vpop.f32.mrb[0].mxu0 }
  0xe2   :  { %v468_v8 = vpack.c.bf16 %v534_v20, %v534_v20  ;;  %v190_v21 = vpop.f32.mrb[1].mxu0  ;;  %v374_v25 = vmul.f32 %v534_v20, %v534_v20  ;;  %v338_v34 = vsel %vm334_vm2, %v534_v20, 0.0 }
  0xe3   :  { %v466_v22 = vpack.c.bf16 %v190_v21, %v190_v21  ;;  %v372_v23 = vmul.f32 %v190_v21, %v190_v21  ;;  %v535_v24 = vpop.f32.mrb[2].mxu0  ;;  %v335_v28 = vsel %vm334_vm2, %v190_v21, 0.0 }
  0xe4   :  { %320 = vst.msk [vmem:[%s771_s4 + $0x8] sm:$0xf] %vm317_vm1, %v468_v8  ;;  %v469_v26 = vpack.c.bf16 %v535_v24, %v535_v24  ;;  %v193_v27 = vpop.f32.mrb[3].mxu0  ;;  %v375_v32 = vmul.f32 %v535_v24, %v535_v24  ;;  %v391_v39 = vsel %vm334_vm2, %v374_v25, 0.0  ;;  %v340_v41 = vsel %vm334_vm2, %v535_v24, 0.0 }
  0xe5   :  { %318 = vst.msk [vmem:[%s771_s4] sm:$0xf] %vm317_vm1, %v466_v22  ;;  %v467_v29 = vpack.c.bf16 %v193_v27, %v193_v27  ;;  %v336_v30 = vsel %vm334_vm2, %v193_v27, 0.0  ;;  %v373_v31 = vmul.f32 %v193_v27, %v193_v27  ;;  %v388_v35 = vsel %vm334_vm2, %v372_v23, 0.0 }
  0xe6   :  { %321 = vst.msk [vmem:[%s771_s4 + $0xc] sm:$0xf] %vm317_vm1, %v469_v26  ;;  %v337_v33 = vadd.f32 %v336_v30, %v335_v28  ;;  %v393_v42 = vsel %vm334_vm2, %v375_v32, 0.0 }
  0xe7   :  { %319 = vst.msk [vmem:[%s771_s4 + $0x4] sm:$0xf] %vm317_vm1, %v467_v29  ;;  %v389_v36 = vsel %vm334_vm2, %v373_v31, 0.0 }
  0xe8   :  { %v339_v37 = vadd.f32 %v338_v34, %v337_v33  ;;  %v390_v38 = vadd.f32 %v389_v36, %v388_v35  ;;  %v542_v46 = vpop.f32.mrb[0].mxu1 }
  0xe9   :  { %v538_v40 = vpop.f32.mrb[4].mxu0  ;;  %v222_v52 = vpop.f32.mrb[1].mxu1  ;;  %v476_v1 = vpack.c.bf16 %v542_v46, %v542_v46  ;;  %v382_v28 = vmul.f32 %v542_v46, %v542_v46  ;;  %v354_v31 = vsel %vm334_vm2, %v542_v46, 0.0 }
  0xea   :  { %v392_v43 = vadd.f32 %v391_v39, %v390_v38  ;;  %v472_v44 = vpack.c.bf16 %v538_v40, %v538_v40  ;;  %v206_v45 = vpop.f32.mrb[5].mxu0  ;;  %v341_v48 = vadd.f32 %v340_v41, %v339_v37  ;;  %v543_v56 = vpop.f32.mrb[2].mxu1  ;;  %v378_v57 = vmul.f32 %v538_v40, %v538_v40 }
  0xeb   :  { %v470_v47 = vpack.c.bf16 %v206_v45, %v206_v45  ;;  %v342_v49 = vsel %vm334_vm2, %v206_v45, 0.0  ;;  %v376_v50 = vmul.f32 %v206_v45, %v206_v45  ;;  %v539_v51 = vpop.f32.mrb[6].mxu0  ;;  %v225_v61 = vpop.f32.mrb[3].mxu1  ;;  %v346_v3 = vsel %vm334_vm2, %v538_v40, 0.0  ;;  %328 = vst.msk [vmem:[%s771_s4 + $0x28] sm:$0xf] %vm317_vm1, %v476_v1 }
  0xec   :  { %324 = vst.msk [vmem:[%s771_s4 + $0x18] sm:$0xf] %vm317_vm1, %v472_v44  ;;  %v394_v53 = vadd.f32 %v393_v42, %v392_v43  ;;  %v473_v54 = vpack.c.bf16 %v539_v51, %v539_v51  ;;  %v209_v55 = vpop.f32.mrb[7].mxu0  ;;  %v343_v58 = vadd.f32 %v342_v49, %v341_v48  ;;  %v379_v5 = vmul.f32 %v539_v51, %v539_v51 }
  0xed   :  { %322 = vst.msk [vmem:[%s771_s4 + $0x10] sm:$0xf] %vm317_vm1, %v470_v47  ;;  %v395_v59 = vsel %vm334_vm2, %v376_v50, 0.0  ;;  %v471_v60 = vpack.c.bf16 %v209_v55, %v209_v55  ;;  %v344_v63 = vsel %vm334_vm2, %v209_v55, 0.0  ;;  %v377_v0 = vmul.f32 %v209_v55, %v209_v55 }
  0xee   :  { %v396_v62 = vadd.f32 %v395_v59, %v394_v53  ;;  %325 = vst.msk [vmem:[%s771_s4 + $0x1c] sm:$0xf] %vm317_vm1, %v473_v54  ;;  %v345_v4 = vadd.f32 %v344_v63, %v343_v58  ;;  %v474_v7 = vpack.c.bf16 %v222_v52, %v222_v52  ;;  %v380_v9 = vmul.f32 %v222_v52, %v222_v52 }
  0xef   :  { %323 = vst.msk [vmem:[%s771_s4 + $0x14] sm:$0xf] %vm317_vm1, %v471_v60  ;;  %v397_v6 = vsel %vm334_vm2, %v377_v0, 0.0  ;;  %v477_v12 = vpack.c.bf16 %v543_v56, %v543_v56  ;;  %v399_v13 = vsel %vm334_vm2, %v378_v57, 0.0  ;;  %v348_v14 = vsel %vm334_vm2, %v539_v51, 0.0 }
  0xf0   :  { %v347_v10 = vadd.f32 %v346_v3, %v345_v4  ;;  %v398_v11 = vadd.f32 %v397_v6, %v396_v62  ;;  %326 = vst.msk [vmem:[%s771_s4 + $0x20] sm:$0xf] %vm317_vm1, %v474_v7  ;;  %v350_v15 = vsel %vm334_vm2, %v222_v52, 0.0  ;;  %v475_v16 = vpack.c.bf16 %v225_v61, %v225_v61  ;;  %v546_v17 = vpop.f32.mrb[4].mxu1 }
  0xf1   :  { %329 = vst.msk [vmem:[%s771_s4 + $0x2c] sm:$0xf] %vm317_vm1, %v477_v12  ;;  %v238_v19 = vpop.f32.mrb[5].mxu1  ;;  %v401_v20 = vsel %vm334_vm2, %v379_v5, 0.0  ;;  %v403_v8 = vsel %vm334_vm2, %v380_v9, 0.0  ;;  %v381_v21 = vmul.f32 %v225_v61, %v225_v61  ;;  %v480_v22 = vpack.c.bf16 %v546_v17, %v546_v17 }
  0xf2   :  { %v400_v2 = vadd.f32 %v399_v13, %v398_v11  ;;  %v349_v18 = vadd.f32 %v348_v14, %v347_v10  ;;  %327 = vst.msk [vmem:[%s771_s4 + $0x24] sm:$0xf] %vm317_vm1, %v475_v16  ;;  %v547_v23 = vpop.f32.mrb[6].mxu1  ;;  %v478_v26 = vpack.c.bf16 %v238_v19, %v238_v19  ;;  %v352_v29 = vsel %vm334_vm2, %v225_v61, 0.0 }
  0xf3   :  { %v241_v27 = vpop.f32.mrb[7].mxu1  ;;  %332 = vst.msk [vmem:[%s771_s4 + $0x38] sm:$0xf] %vm317_vm1, %v480_v22  ;;  %v481_v30 = vpack.c.bf16 %v547_v23, %v547_v23  ;;  %v383_v34 = vmul.f32 %v543_v56, %v543_v56  ;;  %v405_v35 = vsel %vm334_vm2, %v381_v21, 0.0  ;;  %v384_v36 = vmul.f32 %v238_v19, %v238_v19 }
  0xf4   :  { %v351_v24 = vadd.f32 %v350_v15, %v349_v18  ;;  %v402_v25 = vadd.f32 %v401_v20, %v400_v2  ;;  %330 = vst.msk [vmem:[%s771_s4 + $0x30] sm:$0xf] %vm317_vm1, %v478_v26  ;;  %v479_v37 = vpack.c.bf16 %v241_v27, %v241_v27  ;;  %v407_v40 = vsel %vm334_vm2, %v382_v28, 0.0 }
  0xf5   :  { %333 = vst.msk [vmem:[%s771_s4 + $0x3c] sm:$0xf] %vm317_vm1, %v481_v30  ;;  %v356_v41 = vsel %vm334_vm2, %v543_v56, 0.0  ;;  %v358_v42 = vsel %vm334_vm2, %v238_v19, 0.0  ;;  %v409_v45 = vsel %vm334_vm2, %v383_v34, 0.0  ;;  %v411_v46 = vsel %vm334_vm2, %v384_v36, 0.0 }
  0xf6   :  { %v404_v32 = vadd.f32 %v403_v8, %v402_v25  ;;  %v353_v33 = vadd.f32 %v352_v29, %v351_v24  ;;  %331 = vst.msk [vmem:[%s771_s4 + $0x34] sm:$0xf] %vm317_vm1, %v479_v37  ;;  %v385_v47 = vmul.f32 %v241_v27, %v241_v27  ;;  %v386_v50 = vmul.f32 %v546_v17, %v546_v17 }
  0xf7   :  { %v360_v51 = vsel %vm334_vm2, %v241_v27, 0.0  ;;  %v362_v54 = vsel %vm334_vm2, %v546_v17, 0.0  ;;  %v387_v55 = vmul.f32 %v547_v23, %v547_v23  ;;  %v364_v60 = vsel %vm334_vm2, %v547_v23, 0.0 }
  0xf8   :  { %v355_v38 = vadd.f32 %v354_v31, %v353_v33  ;;  %v406_v39 = vadd.f32 %v405_v35, %v404_v32  ;;  %v413_v56 = vsel %vm334_vm2, %v385_v47, 0.0  ;;  %v415_v59 = vsel %vm334_vm2, %v386_v50, 0.0 }
  0xf9   :  { %v417_v63 = vsel %vm334_vm2, %v387_v55, 0.0 }
  0xfa   :  { %v408_v43 = vadd.f32 %v407_v40, %v406_v39  ;;  %v357_v44 = vadd.f32 %v356_v41, %v355_v38 }
  0xfc   :  { %v359_v48 = vadd.f32 %v358_v42, %v357_v44  ;;  %v410_v49 = vadd.f32 %v409_v45, %v408_v43 }
  0xfe   :  { %v412_v52 = vadd.f32 %v411_v46, %v410_v49  ;;  %v361_v53 = vadd.f32 %v360_v51, %v359_v48 }
 0x100   :  { %v363_v57 = vadd.f32 %v362_v54, %v361_v53  ;;  %v414_v58 = vadd.f32 %v413_v56, %v412_v52 }
 0x102   :  { %v365_v61 = vadd.f32 %v364_v60, %v363_v57  ;;  %v416_v62 = vadd.f32 %v415_v59, %v414_v58 }
 0x104   :  { %v366_v0 = vrot.slane %v365_v61, 4  ;;  %v418_v1 = vadd.f32 %v417_v63, %v416_v62 }
 0x106   :  { %v367_v3 = vadd.f32 %v366_v0, %v365_v61  ;;  %v419_v4 = vrot.slane %v418_v1, 4 }
 0x108   :  { %v368_v5 = vrot.slane %v367_v3, 2  ;;  %v420_v6 = vadd.f32 %v419_v4, %v418_v1 }
 0x10a   :  { %v369_v7 = vadd.f32 %v368_v5, %v367_v3  ;;  %v421_v9 = vrot.slane %v420_v6, 2 }
 0x10c   :  { %v370_v10 = vrot.slane %v369_v7, 1  ;;  %v422_v11 = vadd.f32 %v421_v9, %v420_v6 }
 0x10e   :  { %v371_v12 = vadd.f32 %v370_v10, %v369_v7  ;;  %v423_v13 = vrot.slane %v422_v11, 1 }
 0x110   :  { %v424_v14 = vadd.f32 %v423_v13, %v422_v11  ;;  %425 = vst.msk [vmem:[%s772_s5] sm:$0xff] %vm334_vm2, %v371_v12 }
 0x112   :  { %426 = vst.msk [vmem:[%s773_s6] sm:$0xff] %vm334_vm2, %v424_v14 }

// kernel: issegnet_forward.43
= control target key start
LH: loop header
LB: loop body
LE: loop exit
PB: predicated region body
PF: predicated region fallthrough
CT: control target
= control target key end

     0   :  { %vm348_vm0 = vcmask 257024   ;;  %vm365_vm1 = vcmask 261120   ;;  %s894_s3 = inlined_call_operand.vmem [shape: bf16[128,32], index: 3, kind: input, shape index: {}]   ;;  %s895_s0 = inlined_call_operand.vmem [shape: bf16[128,128], index: 0, kind: input, shape index: {}]   ;;  %s896_s1 = inlined_call_operand.vmem [shape: f32[1,128], index: 1, kind: input, shape index: {}]   ;;  %s897_s2 = inlined_call_operand.vmem [shape: f32[1,128], index: 2, kind: input, shape index: {}]   ;;  %s898_s4 = inlined_call_operand.vmem [shape: bf16[128,32], index: 4, kind: output, shape index: {0}]   ;;  %s899_s5 = inlined_call_operand.vmem [shape: f32[1,8,32], index: 5, kind: output, shape index: {1}]   ;;  %s900_s6 = inlined_call_operand.vmem [shape: f32[1,8,32], index: 6, kind: output, shape index: {2}]  }
   0x1   :  { %v615_v0 = vld [vmem:[%s894_s3] sm:$0xff]   ;;  %v616_v1 = vld [vmem:[%s894_s3 + $0x8] sm:$0xff]   ;;  %v617_v2 = vld [vmem:[%s894_s3 + $0x10] sm:$0xff]  }
   0x2   :  { %567 = vmatprep.subr.bf16.mxu0 %v615_v0  ;;  %599 = vmatprep.subr.bf16.mxu1 %v615_v0  ;;  %v618_v3 = vld [vmem:[%s894_s3 + $0x18] sm:$0xff]   ;;  %v513_v4 = vld [vmem:[%s895_s0] sm:$0xff]   ;;  %v544_v8 = vld [vmem:[%s895_s0 + $0x8] sm:$0xff]  }
   0x3   :  { %568 = vmatpush3.bf16.msra.mxu0 %v615_v0  ;;  %607 = vmatpush3.bf16.msra.mxu1 %v615_v0  ;;  %v676_v5 = vld [vmem:[%s896_s1] ss:$0 sm:$0xff]  ;;  %v514_v6 = vunpack.c.l.bf16 %v513_v4  ;;  %v515_v7 = vunpack.c.h.bf16 %v513_v4  ;;  %v545_v9 = vld [vmem:[%s895_s0 + $0x10] sm:$0xff]   ;;  %v518_v11 = vunpack.c.l.bf16 %v544_v8  ;;  %v519_v14 = vunpack.c.h.bf16 %v544_v8  ;;  %v546_v22 = vld [vmem:[%s895_s0 + $0x18] sm:$0xff]  }
   0x4   :  { %569 = vmatprep.subr.bf16.mxu0 %v616_v1  ;;  %600 = vmatprep.subr.bf16.mxu1 %v616_v1  ;;  %v687_v10 = vld [vmem:[%s897_s2] ss:$0 sm:$0xff]  ;;  %v522_v17 = vunpack.c.l.bf16 %v545_v9  ;;  %v523_v21 = vunpack.c.h.bf16 %v545_v9  ;;  %v548_v27 = vld [vmem:[%s895_s0 + $0x28] sm:$0xff]   ;;  %v549_v30 = vld [vmem:[%s895_s0 + $0x30] sm:$0xff]   ;;  %v526_v32 = vunpack.c.l.bf16 %v546_v22  ;;  %v527_v33 = vunpack.c.h.bf16 %v546_v22 }
   0x5   :  { %v60_v12 = vmul.f32 %v514_v6, %v676_v5  ;;  %v61_v13 = vmul.f32 %v515_v7, %v676_v5  ;;  %v547_v15 = vld [vmem:[%s895_s0 + $0x20] sm:$0xff]   ;;  %v62_v20 = vmul.f32 %v518_v11, %v676_v5  ;;  %v63_v26 = vmul.f32 %v519_v14, %v676_v5  ;;  %v620_v28 = vld [vmem:[%s894_s3 + $0x28] sm:$0xff]   ;;  %v550_v39 = vld [vmem:[%s895_s0 + $0x38] sm:$0xff]  }
   0x6   :  { %v619_v16 = vld [vmem:[%s894_s3 + $0x20] sm:$0xff]   ;;  %v530_v23 = vunpack.c.l.bf16 %v547_v15  ;;  %v64_v29 = vmul.f32 %v522_v17, %v676_v5  ;;  %v531_v34 = vunpack.c.h.bf16 %v547_v15  ;;  %v65_v36 = vmul.f32 %v523_v21, %v676_v5  ;;  %v621_v44 = vld [vmem:[%s894_s3 + $0x30] sm:$0xff]   ;;  %v622_v61 = vld [vmem:[%s894_s3 + $0x38] sm:$0xff]  }
   0x7   :  { %570 = vmatpush3.bf16.msra.mxu0 %v616_v1  ;;  %608 = vmatpush3.bf16.msra.mxu1 %v616_v1  ;;  %v83_v18 = vadd.f32 %v687_v10, %v60_v12  ;;  %v84_v19 = vadd.f32 %v687_v10, %v61_v13  ;;  %v85_v35 = vadd.f32 %v687_v10, %v62_v20  ;;  %v534_v38 = vunpack.c.l.bf16 %v548_v27 }
   0x8   :  { %571 = vmatprep.subr.bf16.mxu0 %v617_v2  ;;  %601 = vmatprep.subr.bf16.mxu1 %v617_v2  ;;  %v68_v37 = vmul.f32 %v530_v23, %v676_v5  ;;  %v86_v40 = vadd.f32 %v687_v10, %v63_v26  ;;  %v69_v41 = vmul.f32 %v531_v34, %v676_v5  ;;  %v535_v42 = vunpack.c.h.bf16 %v548_v27 }
   0x9   :  { %v99_v24 = vmax.f32 %v83_v18, 0.0  ;;  %v100_v25 = vmax.f32 %v84_v19, 0.0  ;;  %v538_v43 = vunpack.c.l.bf16 %v549_v30  ;;  %v87_v45 = vadd.f32 %v687_v10, %v64_v29 }
   0xa   :  { %v91_v46 = vadd.f32 %v687_v10, %v68_v37  ;;  %v70_v47 = vmul.f32 %v534_v38, %v676_v5  ;;  %v539_v48 = vunpack.c.h.bf16 %v549_v30  ;;  %v92_v49 = vadd.f32 %v687_v10, %v69_v41 }
   0xb   :  { %572 = vmatpush3.bf16.msra.mxu0 %v617_v2  ;;  %609 = vmatpush3.bf16.msra.mxu1 %v617_v2  ;;  %v115_v31 = vpack.c.bf16 %v100_v25, %v99_v24  ;;  %v71_v50 = vmul.f32 %v535_v42, %v676_v5  ;;  %v72_v51 = vmul.f32 %v538_v43, %v676_v5  ;;  %v542_v52 = vunpack.c.l.bf16 %v550_v39 }
   0xc   :  { %573 = vmatprep.subr.bf16.mxu0 %v618_v3  ;;  %602 = vmatprep.subr.bf16.mxu1 %v618_v3  ;;  %v107_v53 = vmax.f32 %v91_v46, 0.0  ;;  %v93_v54 = vadd.f32 %v687_v10, %v70_v47  ;;  %v73_v55 = vmul.f32 %v539_v48, %v676_v5  ;;  %v543_v56 = vunpack.c.h.bf16 %v550_v39 }
   0xd   :  { %583 = vmatprep.mubr.bf16.mxu0 %v115_v31  ;;  %v88_v57 = vadd.f32 %v687_v10, %v65_v36  ;;  %v108_v58 = vmax.f32 %v92_v49, 0.0  ;;  %v94_v59 = vadd.f32 %v687_v10, %v71_v50  ;;  %v95_v60 = vadd.f32 %v687_v10, %v72_v51 }
   0xe   :  { %v66_v62 = vmul.f32 %v526_v32, %v676_v5  ;;  %v96_v63 = vadd.f32 %v687_v10, %v73_v55  ;;  %v101_v0 = vmax.f32 %v85_v35, 0.0  ;;  %v102_v1 = vmax.f32 %v86_v40, 0.0 }
   0xf   :  { %574 = vmatpush3.bf16.msra.mxu0 %v618_v3  ;;  %610 = vmatpush3.bf16.msra.mxu1 %v618_v3  ;;  %v67_v2 = vmul.f32 %v527_v33, %v676_v5  ;;  %v119_v3 = vpack.c.bf16 %v108_v58, %v107_v53  ;;  %v109_v4 = vmax.f32 %v93_v54, 0.0  ;;  %v110_v6 = vmax.f32 %v94_v59, 0.0 }
  0x10   :  { %575 = vmatprep.subr.bf16.mxu0 %v619_v16  ;;  %603 = vmatprep.subr.bf16.mxu1 %v619_v16  ;;  %v74_v7 = vmul.f32 %v542_v52, %v676_v5  ;;  %v75_v8 = vmul.f32 %v543_v56, %v676_v5  ;;  %v103_v9 = vmax.f32 %v87_v45, 0.0  ;;  %v104_v11 = vmax.f32 %v88_v57, 0.0 }
  0x11   :  { %v111_v12 = vmax.f32 %v95_v60, 0.0  ;;  %v112_v13 = vmax.f32 %v96_v63, 0.0  ;;  %v89_v14 = vadd.f32 %v687_v10, %v66_v62  ;;  %v90_v15 = vadd.f32 %v687_v10, %v67_v2  ;;  %591 = vmatprep.mubr.bf16.mxu1 %v119_v3 }
  0x12   :  { %v120_v17 = vpack.c.bf16 %v110_v6, %v109_v4  ;;  %v97_v18 = vadd.f32 %v687_v10, %v74_v7  ;;  %v98_v19 = vadd.f32 %v687_v10, %v75_v8  ;;  %v117_v5 = vpack.c.bf16 %v104_v11, %v103_v9 }
  0x13   :  { %576 = vmatpush3.bf16.msra.mxu0 %v619_v16  ;;  %611 = vmatpush3.bf16.msra.mxu1 %v619_v16  ;;  %v116_v16 = vpack.c.bf16 %v102_v1, %v101_v0  ;;  %v121_v20 = vpack.c.bf16 %v112_v13, %v111_v12  ;;  %v105_v21 = vmax.f32 %v89_v14, 0.0  ;;  %v106_v22 = vmax.f32 %v90_v15, 0.0 }
  0x14   :  { %577 = vmatprep.subr.bf16.mxu0 %v620_v28  ;;  %604 = vmatprep.subr.bf16.mxu1 %v620_v28  ;;  %v113_v23 = vmax.f32 %v97_v18, 0.0  ;;  %v114_v24 = vmax.f32 %v98_v19, 0.0 }
  0x15   :  { %v118_v25 = vpack.c.bf16 %v106_v22, %v105_v21 }
  0x16   :  { %v122_v26 = vpack.c.bf16 %v114_v24, %v113_v23 }
  0x17   :  { %578 = vmatpush3.bf16.msra.mxu0 %v620_v28  ;;  %612 = vmatpush3.bf16.msra.mxu1 %v620_v28 }
  0x18   :  { %579 = vmatprep.subr.bf16.mxu0 %v621_v44  ;;  %605 = vmatprep.subr.bf16.mxu1 %v621_v44 }
  0x1b   :  { %580 = vmatpush3.bf16.msra.mxu0 %v621_v44  ;;  %613 = vmatpush3.bf16.msra.mxu1 %v621_v44 }
  0x1c   :  { %581 = vmatprep.subr.bf16.mxu0 %v622_v61  ;;  %606 = vmatprep.subr.bf16.mxu1 %v622_v61 }
  0x1f   :  { %582 = vmatpush3.bf16.msra.mxu0 %v622_v61  ;;  %614 = vmatpush3.bf16.msra.mxu1 %v622_v61 }
  0x22   :  { %584 = vmatmul.mubr.bf16.vlgmr.msra.gmra.mrb[0].mxu0 %v116_v16  ;;  %592 = vmatmul.mubr.bf16.vlgmr.msra.gmra.mrb[0].mxu1 %v120_v17 }
  0x23   :  { %587 = vmatprep.mubr.bf16.mxu0 %v117_v5  ;;  %595 = vmatprep.mubr.bf16.mxu1 %v121_v20 }
  0x2a   :  { %588 = vmatmul.mubr.bf16.gmra.mrb[4].mxu0 %v118_v25  ;;  %596 = vmatmul.mubr.bf16.gmra.mrb[4].mxu1 %v122_v26 }
  0xf5   :  { %v585_v27 = vpop.f32.mrb[0].mxu0  ;;  %v748_v28 = vpop.f32.mrb[0].mxu1 }
  0xf6   :  { %v498_v10 = vpack.c.bf16 %v585_v27, %v585_v27  ;;  %v221_v29 = vpop.f32.mrb[1].mxu0  ;;  %v506_v30 = vpack.c.bf16 %v748_v28, %v748_v28  ;;  %v752_v31 = vpop.f32.mrb[1].mxu1  ;;  %v405_v36 = vmul.f32 %v585_v27, %v585_v27  ;;  %v369_v47 = vsel %vm365_vm1, %v585_v27, 0.0 }
  0xf7   :  { %v496_v32 = vpack.c.bf16 %v221_v29, %v221_v29  ;;  %v403_v33 = vmul.f32 %v221_v29, %v221_v29  ;;  %v586_v34 = vpop.f32.mrb[2].mxu0  ;;  %v754_v35 = vpop.f32.mrb[2].mxu1  ;;  %v366_v40 = vsel %vm365_vm1, %v221_v29, 0.0  ;;  %v504_v46 = vpack.c.bf16 %v752_v31, %v752_v31 }
  0xf8   :  { %351 = vst.msk [vmem:[%s898_s4 + $0x8] sm:$0xf] %vm348_vm0, %v498_v10  ;;  %v499_v37 = vpack.c.bf16 %v586_v34, %v586_v34  ;;  %v224_v38 = vpop.f32.mrb[3].mxu0  ;;  %359 = vst.msk [vmem:[%s898_s4 + $0x28] sm:$0xf] %vm348_vm0, %v506_v30  ;;  %v764_v39 = vpop.f32.mrb[3].mxu1  ;;  %v406_v44 = vmul.f32 %v586_v34, %v586_v34  ;;  %v507_v50 = vpack.c.bf16 %v754_v35, %v754_v35 }
  0xf9   :  { %349 = vst.msk [vmem:[%s898_s4] sm:$0xf] %vm348_vm0, %v496_v32  ;;  %v497_v41 = vpack.c.bf16 %v224_v38, %v224_v38  ;;  %v367_v42 = vsel %vm365_vm1, %v224_v38, 0.0  ;;  %v404_v43 = vmul.f32 %v224_v38, %v224_v38  ;;  %v419_v48 = vsel %vm365_vm1, %v403_v33, 0.0  ;;  %357 = vst.msk [vmem:[%s898_s4 + $0x20] sm:$0xf] %vm348_vm0, %v504_v46 }
  0xfa   :  { %352 = vst.msk [vmem:[%s898_s4 + $0xc] sm:$0xf] %vm348_vm0, %v499_v37  ;;  %v368_v45 = vadd.f32 %v367_v42, %v366_v40  ;;  %v422_v53 = vsel %vm365_vm1, %v405_v36, 0.0  ;;  %360 = vst.msk [vmem:[%s898_s4 + $0x2c] sm:$0xf] %vm348_vm0, %v507_v50  ;;  %v505_v55 = vpack.c.bf16 %v764_v39, %v764_v39  ;;  %v371_v57 = vsel %vm365_vm1, %v586_v34, 0.0 }
  0xfb   :  { %350 = vst.msk [vmem:[%s898_s4 + $0x4] sm:$0xf] %vm348_vm0, %v497_v41  ;;  %v420_v49 = vsel %vm365_vm1, %v404_v43, 0.0  ;;  %v424_v58 = vsel %vm365_vm1, %v406_v44, 0.0  ;;  %v411_v19 = vmul.f32 %v752_v31, %v752_v31  ;;  %v381_v10 = vsel %vm365_vm1, %v752_v31, 0.0 }
  0xfc   :  { %v370_v51 = vadd.f32 %v369_v47, %v368_v45  ;;  %v421_v52 = vadd.f32 %v420_v49, %v419_v48  ;;  %358 = vst.msk [vmem:[%s898_s4 + $0x24] sm:$0xf] %vm348_vm0, %v505_v55  ;;  %v412_v37 = vmul.f32 %v764_v39, %v764_v39  ;;  %v413_v40 = vmul.f32 %v748_v28, %v748_v28 }
  0xfd   :  { %v589_v54 = vpop.f32.mrb[4].mxu0  ;;  %v798_v56 = vpop.f32.mrb[4].mxu1  ;;  %v434_v36 = vsel %vm365_vm1, %v411_v19, 0.0  ;;  %v383_v41 = vsel %vm365_vm1, %v764_v39, 0.0  ;;  %v385_v44 = vsel %vm365_vm1, %v748_v28, 0.0  ;;  %v414_v45 = vmul.f32 %v754_v35, %v754_v35 }
  0xfe   :  { %v423_v59 = vadd.f32 %v422_v53, %v421_v52  ;;  %v502_v60 = vpack.c.bf16 %v589_v54, %v589_v54  ;;  %v237_v61 = vpop.f32.mrb[5].mxu0  ;;  %v269_v62 = vpop.f32.mrb[5].mxu1  ;;  %v372_v0 = vadd.f32 %v371_v57, %v370_v51  ;;  %v409_v14 = vmul.f32 %v589_v54, %v589_v54 }
  0xff   :  { %v500_v63 = vpack.c.bf16 %v237_v61, %v237_v61  ;;  %v373_v1 = vsel %vm365_vm1, %v237_v61, 0.0  ;;  %v407_v2 = vmul.f32 %v237_v61, %v237_v61  ;;  %v590_v3 = vpop.f32.mrb[6].mxu0  ;;  %v807_v4 = vpop.f32.mrb[6].mxu1  ;;  %v510_v5 = vpack.c.bf16 %v798_v56, %v798_v56 }
 0x100   :  { %355 = vst.msk [vmem:[%s898_s4 + $0x18] sm:$0xf] %vm348_vm0, %v502_v60  ;;  %v425_v6 = vadd.f32 %v424_v58, %v423_v59  ;;  %v503_v7 = vpack.c.bf16 %v590_v3, %v590_v3  ;;  %v240_v8 = vpop.f32.mrb[7].mxu0  ;;  %v272_v9 = vpop.f32.mrb[7].mxu1  ;;  %v374_v11 = vadd.f32 %v373_v1, %v372_v0  ;;  %v377_v20 = vsel %vm365_vm1, %v589_v54, 0.0 }
 0x101   :  { %353 = vst.msk [vmem:[%s898_s4 + $0x10] sm:$0xf] %vm348_vm0, %v500_v63  ;;  %v426_v12 = vsel %vm365_vm1, %v407_v2, 0.0  ;;  %v501_v13 = vpack.c.bf16 %v240_v8, %v240_v8  ;;  %v375_v16 = vsel %vm365_vm1, %v240_v8, 0.0  ;;  %v408_v17 = vmul.f32 %v240_v8, %v240_v8  ;;  %363 = vst.msk [vmem:[%s898_s4 + $0x38] sm:$0xf] %vm348_vm0, %v510_v5 }
 0x102   :  { %v427_v15 = vadd.f32 %v426_v12, %v425_v6  ;;  %356 = vst.msk [vmem:[%s898_s4 + $0x1c] sm:$0xf] %vm348_vm0, %v503_v7  ;;  %v376_v18 = vadd.f32 %v375_v16, %v374_v11  ;;  %v410_v21 = vmul.f32 %v590_v3, %v590_v3  ;;  %v508_v23 = vpack.c.bf16 %v269_v62, %v269_v62 }
 0x103   :  { %354 = vst.msk [vmem:[%s898_s4 + $0x14] sm:$0xf] %vm348_vm0, %v501_v13  ;;  %v428_v22 = vsel %vm365_vm1, %v408_v17, 0.0  ;;  %v430_v26 = vsel %vm365_vm1, %v409_v14, 0.0  ;;  %v379_v27 = vsel %vm365_vm1, %v590_v3, 0.0  ;;  %v511_v29 = vpack.c.bf16 %v807_v4, %v807_v4 }
 0x104   :  { %v378_v24 = vadd.f32 %v377_v20, %v376_v18  ;;  %v429_v25 = vadd.f32 %v428_v22, %v427_v15  ;;  %361 = vst.msk [vmem:[%s898_s4 + $0x30] sm:$0xf] %vm348_vm0, %v508_v23  ;;  %v509_v33 = vpack.c.bf16 %v272_v9, %v272_v9  ;;  %v432_v34 = vsel %vm365_vm1, %v410_v21, 0.0 }
 0x105   :  { %364 = vst.msk [vmem:[%s898_s4 + $0x3c] sm:$0xf] %vm348_vm0, %v511_v29  ;;  %v436_v46 = vsel %vm365_vm1, %v412_v37, 0.0  ;;  %v415_v47 = vmul.f32 %v269_v62, %v269_v62  ;;  %v438_v50 = vsel %vm365_vm1, %v413_v40, 0.0  ;;  %v387_v51 = vsel %vm365_vm1, %v754_v35, 0.0 }
 0x106   :  { %v431_v30 = vadd.f32 %v430_v26, %v429_v25  ;;  %v380_v32 = vadd.f32 %v379_v27, %v378_v24  ;;  %362 = vst.msk [vmem:[%s898_s4 + $0x34] sm:$0xf] %vm348_vm0, %v509_v33  ;;  %v389_v39 = vsel %vm365_vm1, %v269_v62, 0.0  ;;  %v440_v54 = vsel %vm365_vm1, %v414_v45, 0.0 }
 0x107   :  { %v442_v28 = vsel %vm365_vm1, %v415_v47, 0.0  ;;  %v416_v55 = vmul.f32 %v272_v9, %v272_v9  ;;  %v417_v59 = vmul.f32 %v798_v56, %v798_v56  ;;  %v391_v60 = vsel %vm365_vm1, %v272_v9, 0.0 }
 0x108   :  { %v382_v31 = vadd.f32 %v381_v10, %v380_v32  ;;  %v433_v38 = vadd.f32 %v432_v34, %v431_v30  ;;  %v393_v35 = vsel %vm365_vm1, %v798_v56, 0.0  ;;  %v418_v62 = vmul.f32 %v807_v4, %v807_v4 }
 0x109   :  { %v444_v0 = vsel %vm365_vm1, %v416_v55, 0.0  ;;  %v446_v3 = vsel %vm365_vm1, %v417_v59, 0.0  ;;  %v395_v6 = vsel %vm365_vm1, %v807_v4, 0.0 }
 0x10a   :  { %v435_v42 = vadd.f32 %v434_v36, %v433_v38  ;;  %v384_v43 = vadd.f32 %v383_v41, %v382_v31  ;;  %v448_v9 = vsel %vm365_vm1, %v418_v62, 0.0 }
 0x10c   :  { %v386_v48 = vadd.f32 %v385_v44, %v384_v43  ;;  %v437_v49 = vadd.f32 %v436_v46, %v435_v42 }
 0x10e   :  { %v439_v52 = vadd.f32 %v438_v50, %v437_v49  ;;  %v388_v53 = vadd.f32 %v387_v51, %v386_v48 }
 0x110   :  { %v390_v57 = vadd.f32 %v389_v39, %v388_v53  ;;  %v441_v58 = vadd.f32 %v440_v54, %v439_v52 }
 0x112   :  { %v443_v61 = vadd.f32 %v442_v28, %v441_v58  ;;  %v392_v63 = vadd.f32 %v391_v60, %v390_v57 }
 0x114   :  { %v394_v1 = vadd.f32 %v393_v35, %v392_v63  ;;  %v445_v2 = vadd.f32 %v444_v0, %v443_v61 }
 0x116   :  { %v396_v7 = vadd.f32 %v395_v6, %v394_v1  ;;  %v447_v8 = vadd.f32 %v446_v3, %v445_v2 }
 0x118   :  { %v397_v11 = vrot.slane %v396_v7, 4  ;;  %v449_v12 = vadd.f32 %v448_v9, %v447_v8 }
 0x11a   :  { %v398_v13 = vadd.f32 %v397_v11, %v396_v7  ;;  %v450_v56 = vrot.slane %v449_v12, 4 }
 0x11c   :  { %v399_v14 = vrot.slane %v398_v13, 2  ;;  %v451_v15 = vadd.f32 %v450_v56, %v449_v12 }
 0x11e   :  { %v400_v16 = vadd.f32 %v399_v14, %v398_v13  ;;  %v452_v17 = vrot.slane %v451_v15, 2 }
 0x120   :  { %v401_v18 = vrot.slane %v400_v16, 1  ;;  %v453_v19 = vadd.f32 %v452_v17, %v451_v15 }
 0x122   :  { %v402_v5 = vadd.f32 %v401_v18, %v400_v16  ;;  %v454_v20 = vrot.slane %v453_v19, 1 }
 0x124   :  { %v455_v21 = vadd.f32 %v454_v20, %v453_v19  ;;  %456 = vst.msk [vmem:[%s899_s5] sm:$0xff] %vm365_vm1, %v402_v5 }
 0x126   :  { %457 = vst.msk [vmem:[%s900_s6] sm:$0xff] %vm365_vm1, %v455_v21 }

// kernel: issegnet_forward.42
= control target key start
LH: loop header
LB: loop body
LE: loop exit
PB: predicated region body
PF: predicated region fallthrough
CT: control target
= control target key end

     0   :  { %vm551_vm0 = vcmask 523264   ;;  %s1782_s1 = inlined_call_operand.vmem [shape: bf16[576,128], index: 1, kind: input, shape index: {}]   ;;  %s1783_s0 = inlined_call_operand.vmem [shape: bf16[128,576], index: 0, kind: input, shape index: {}]   ;;  %s1784_s2 = inlined_call_operand.vmem [shape: bf16[128,128], index: 2, kind: output, shape index: {0}]   ;;  %s1785_s3 = inlined_call_operand.vmem [shape: f32[1,8,128], index: 3, kind: output, shape index: {1}]   ;;  %s1786_s4 = inlined_call_operand.vmem [shape: f32[1,8,128], index: 4, kind: output, shape index: {2}]  }
   0x1   :  { %v1354_v0 = vld [vmem:[%s1782_s1 + $0x40] sm:$0xff]   ;;  %v1358_v4 = vld [vmem:[%s1782_s1 + $0x48] sm:$0xff]   ;;  %v1362_v8 = vld [vmem:[%s1782_s1 + $0x50] sm:$0xff]  }
   0x2   :  { %v1355_v1 = vld [vmem:[%s1782_s1 + $0xc0] sm:$0xff]   ;;  %1182 = vmatprep.subr.bf16.mxu0 %v1354_v0  ;;  %v1359_v5 = vld [vmem:[%s1782_s1 + $0xc8] sm:$0xff]   ;;  %v1363_v9 = vld [vmem:[%s1782_s1 + $0xd0] sm:$0xff]  }
   0x3   :  { %v1356_v2 = vld [vmem:[%s1782_s1] sm:$0xff]   ;;  %1246 = vmatprep.subr.bf16.mxu1 %v1355_v1  ;;  %v1360_v6 = vld [vmem:[%s1782_s1 + $0x8] sm:$0xff]   ;;  %v1364_v10 = vld [vmem:[%s1782_s1 + $0x10] sm:$0xff]  }
   0x4   :  { %v1357_v3 = vld [vmem:[%s1782_s1 + $0x80] sm:$0xff]   ;;  %1183 = vmatpush3.bf16.msra.mxu0 %v1356_v2  ;;  %v1361_v7 = vld [vmem:[%s1782_s1 + $0x88] sm:$0xff]   ;;  %v1365_v11 = vld [vmem:[%s1782_s1 + $0x90] sm:$0xff]  }
   0x5   :  { %1247 = vmatpush3.bf16.msra.mxu1 %v1357_v3  ;;  %1184 = vmatprep.subr.bf16.mxu0 %v1358_v4  ;;  %v1366_v12 = vld [vmem:[%s1782_s1 + $0x58] sm:$0xff]   ;;  %v1370_v16 = vld [vmem:[%s1782_s1 + $0x60] sm:$0xff]   ;;  %v1374_v20 = vld [vmem:[%s1782_s1 + $0x68] sm:$0xff]  }
   0x6   :  { %1248 = vmatprep.subr.bf16.mxu1 %v1359_v5  ;;  %v1367_v13 = vld [vmem:[%s1782_s1 + $0xd8] sm:$0xff]   ;;  %v1371_v17 = vld [vmem:[%s1782_s1 + $0xe0] sm:$0xff]   ;;  %v1375_v21 = vld [vmem:[%s1782_s1 + $0xe8] sm:$0xff]  }
   0x7   :  { %v1368_v14 = vld [vmem:[%s1782_s1 + $0x18] sm:$0xff]   ;;  %v1372_v18 = vld [vmem:[%s1782_s1 + $0x20] sm:$0xff]   ;;  %v1376_v22 = vld [vmem:[%s1782_s1 + $0x28] sm:$0xff]  }
   0x8   :  { %1185 = vmatpush3.bf16.msra.mxu0 %v1360_v6  ;;  %v1369_v15 = vld [vmem:[%s1782_s1 + $0x98] sm:$0xff]   ;;  %v1373_v19 = vld [vmem:[%s1782_s1 + $0xa0] sm:$0xff]   ;;  %v1377_v23 = vld [vmem:[%s1782_s1 + $0xa8] sm:$0xff]  }
   0x9   :  { %1249 = vmatpush3.bf16.msra.mxu1 %v1361_v7  ;;  %1186 = vmatprep.subr.bf16.mxu0 %v1362_v8  ;;  %v1378_v24 = vld [vmem:[%s1782_s1 + $0x70] sm:$0xff]   ;;  %v1382_v28 = vld [vmem:[%s1782_s1 + $0x78] sm:$0xff]   ;;  %v1391_v35 = vld [vmem:[%s1783_s0 + $0xc] ss:$20 sps:$4 sm:$0xff]  }
   0xa   :  { %1250 = vmatprep.subr.bf16.mxu1 %v1363_v9  ;;  %v1379_v25 = vld [vmem:[%s1782_s1 + $0xf0] sm:$0xff]   ;;  %v1383_v29 = vld [vmem:[%s1782_s1 + $0xf8] sm:$0xff]   ;;  %v1392_v36 = vld [vmem:[%s1782_s1 + $0x100] sm:$0xff]   ;;  %705 = vmatprep.mubr.bf16.mxu1 %v1391_v35 }
   0xb   :  { %v1380_v26 = vld [vmem:[%s1782_s1 + $0x30] sm:$0xff]   ;;  %v1384_v30 = vld [vmem:[%s1782_s1 + $0x38] sm:$0xff]   ;;  %v1393_v37 = vld [vmem:[%s1783_s0 + $0x2c] ss:$20 sps:$4 sm:$0xff]  }
   0xc   :  { %1187 = vmatpush3.bf16.msra.mxu0 %v1364_v10  ;;  %v1381_v27 = vld [vmem:[%s1782_s1 + $0xb0] sm:$0xff]   ;;  %v1385_v31 = vld [vmem:[%s1782_s1 + $0xb8] sm:$0xff]   ;;  %v1405_v42 = vld [vmem:[%s1782_s1 + $0x108] sm:$0xff]  }
   0xd   :  { %1251 = vmatpush3.bf16.msra.mxu1 %v1365_v11  ;;  %1188 = vmatprep.subr.bf16.mxu0 %v1366_v12  ;;  %v1386_v32 = vld [vmem:[%s1783_s0] ss:$20 sps:$4 sm:$0xff]   ;;  %v1388_v33 = vld [vmem:[%s1783_s0 + $0x4] ss:$20 sps:$4 sm:$0xff]   ;;  %v1389_v34 = vld [vmem:[%s1783_s0 + $0x8] ss:$20 sps:$4 sm:$0xff]  }
   0xe   :  { %1252 = vmatprep.subr.bf16.mxu1 %v1367_v13  ;;  %608 = vmatprep.mubr.bf16.mxu0 %v1388_v33  ;;  %v1395_v38 = vld [vmem:[%s1783_s0 + $0x34] ss:$20 sps:$4 sm:$0xff]   ;;  %v1398_v40 = vld [vmem:[%s1783_s0 + $0x30] ss:$20 sps:$4 sm:$0xff]   ;;  %v1404_v45 = vld [vmem:[%s1783_s0 + $0x58] ss:$20 sps:$4 sm:$0xff]  }
   0xf   :  { %v1397_v39 = vld [vmem:[%s1783_s0 + $0x28] ss:$20 sps:$4 sm:$0xff]   ;;  %v1403_v44 = vld [vmem:[%s1783_s0 + $0x50] ss:$20 sps:$4 sm:$0xff]   ;;  %v1410_v50 = vld [vmem:[%s1783_s0 + $0x78] ss:$20 sps:$4 sm:$0xff]  }
  0x10   :  { %1189 = vmatpush3.bf16.msra.mxu0 %v1368_v14  ;;  %v1399_v41 = vld [vmem:[%s1783_s0 + $0x54] ss:$20 sps:$4 sm:$0xff]   ;;  %v1401_v43 = vld [vmem:[%s1783_s0 + $0x5c] ss:$20 sps:$4 sm:$0xff]   ;;  %v1408_v48 = vld [vmem:[%s1783_s0 + $0x84] ss:$20 sps:$4 sm:$0xff]  }
  0x11   :  { %1253 = vmatpush3.bf16.msra.mxu1 %v1369_v15  ;;  %1190 = vmatprep.subr.bf16.mxu0 %v1370_v16  ;;  %v1418_v46 = vld [vmem:[%s1782_s1 + $0x110] sm:$0xff]   ;;  %v1431_v49 = vld [vmem:[%s1782_s1 + $0x118] sm:$0xff]   ;;  %v1414_v53 = vld [vmem:[%s1783_s0 + $0xac] ss:$20 sps:$4 sm:$0xff]  }
  0x12   :  { %1254 = vmatprep.subr.bf16.mxu1 %v1371_v17  ;;  %v1406_v47 = vld [vmem:[%s1783_s0 + $0x7c] ss:$20 sps:$4 sm:$0xff]   ;;  %v1411_v51 = vld [vmem:[%s1783_s0 + $0x80] ss:$20 sps:$4 sm:$0xff]   ;;  %v1412_v52 = vld [vmem:[%s1783_s0 + $0xa4] ss:$20 sps:$4 sm:$0xff]  }
  0x13   :  { %v1416_v54 = vld [vmem:[%s1783_s0 + $0xa0] ss:$20 sps:$4 sm:$0xff]   ;;  %v1417_v55 = vld [vmem:[%s1783_s0 + $0xa8] ss:$20 sps:$4 sm:$0xff]   ;;  %v1424_v59 = vld [vmem:[%s1783_s0 + $0xd0] ss:$20 sps:$4 sm:$0xff]  }
  0x14   :  { %1191 = vmatpush3.bf16.msra.mxu0 %v1372_v18  ;;  %v1419_v56 = vld [vmem:[%s1783_s0 + $0xcc] ss:$20 sps:$4 sm:$0xff]   ;;  %v1421_v57 = vld [vmem:[%s1783_s0 + $0xd4] ss:$20 sps:$4 sm:$0xff]   ;;  %v1427_v61 = vld [vmem:[%s1783_s0 + $0xfc] ss:$20 sps:$4 sm:$0xff]  }
  0x15   :  { %1255 = vmatpush3.bf16.msra.mxu1 %v1373_v19  ;;  %1192 = vmatprep.subr.bf16.mxu0 %v1374_v20  ;;  %v1423_v58 = vld [vmem:[%s1783_s0 + $0xc8] ss:$20 sps:$4 sm:$0xff]   ;;  %v1429_v62 = vld [vmem:[%s1783_s0 + $0xf0] ss:$20 sps:$4 sm:$0xff]   ;;  %v1430_v63 = vld [vmem:[%s1783_s0 + $0xf8] ss:$20 sps:$4 sm:$0xff]  }
  0x16   :  { %1256 = vmatprep.subr.bf16.mxu1 %v1375_v21  ;;  %v1425_v60 = vld [vmem:[%s1783_s0 + $0xf4] ss:$20 sps:$4 sm:$0xff]   ;;  %v1432_v0 = vld [vmem:[%s1783_s0 + $0x11c] ss:$20 sps:$4 sm:$0xff]   ;;  %v1434_v1 = vld [vmem:[%s1783_s0 + $0x124] ss:$20 sps:$4 sm:$0xff]  }
  0x17   :  { %v1436_v2 = vld [vmem:[%s1783_s0 + $0x118] ss:$20 sps:$4 sm:$0xff]   ;;  %v1437_v3 = vld [vmem:[%s1783_s0 + $0x120] ss:$20 sps:$4 sm:$0xff]   ;;  %v1438_v4 = vld [vmem:[%s1783_s0 + $0x10] ss:$20 sps:$4 sm:$0xff]  }
  0x18   :  { %1193 = vmatpush3.bf16.msra.mxu0 %v1376_v22  ;;  %v1439_v5 = vld [vmem:[%s1783_s0 + $0xb0] ss:$20 sps:$4 sm:$0xff]   ;;  %v1440_v6 = vld [vmem:[%s1783_s0 + $0x38] ss:$20 sps:$4 sm:$0xff]   ;;  %v1442_v8 = vld [vmem:[%s1783_s0 + $0x60] ss:$20 sps:$4 sm:$0xff]  }
  0x19   :  { %1257 = vmatpush3.bf16.msra.mxu1 %v1377_v23  ;;  %1194 = vmatprep.subr.bf16.mxu0 %v1378_v24  ;;  %v1441_v7 = vld [vmem:[%s1783_s0 + $0xd8] ss:$20 sps:$4 sm:$0xff]   ;;  %v1443_v9 = vld [vmem:[%s1783_s0 + $0x100] ss:$20 sps:$4 sm:$0xff]   ;;  %v1444_v10 = vld [vmem:[%s1783_s0 + $0x88] ss:$20 sps:$4 sm:$0xff]  }
  0x1a   :  { %1258 = vmatprep.subr.bf16.mxu1 %v1379_v25  ;;  %v1445_v11 = vld [vmem:[%s1783_s0 + $0x128] ss:$20 sps:$4 sm:$0xff]  }
  0x1c   :  { %1195 = vmatpush3.bf16.msra.mxu0 %v1380_v26 }
  0x1d   :  { %1259 = vmatpush3.bf16.msra.mxu1 %v1381_v27  ;;  %1196 = vmatprep.subr.bf16.mxu0 %v1382_v28 }
  0x1e   :  { %1260 = vmatprep.subr.bf16.mxu1 %v1383_v29 }
  0x20   :  { %1197 = vmatpush3.bf16.msra.mxu0 %v1384_v30 }
  0x21   :  { %1261 = vmatpush3.bf16.msra.mxu1 %v1385_v31  ;;  %1322 = vmatprep.subr.bf16.mxu0 %v1392_v36 }
  0x22   :  { %1346 = vmatprep.subr.bf16.mxu1 %v1392_v36 }
  0x23   :  { %609 = vmatmul.mubr.bf16.vlgmr.msra.gmra.mrb[0].mxu0 %v1386_v32 }
  0x24   :  { %706 = vmatmul.mubr.bf16.vlgmr.msra.gmra.mrb[0].mxu1 %v1389_v34  ;;  %1323 = vmatpush3.bf16.msra.mxu0 %v1392_v36 }
  0x25   :  { %616 = vmatprep.mubr.bf16.mxu0 %v1393_v37  ;;  %713 = vmatprep.mubr.bf16.mxu1 %v1395_v38 }
  0x26   :  { %1350 = vmatpush3.bf16.msra.mxu1 %v1392_v36  ;;  %1324 = vmatprep.subr.bf16.mxu0 %v1405_v42 }
  0x27   :  { %1347 = vmatprep.subr.bf16.mxu1 %v1405_v42 }
  0x28   :  { %1325 = vmatpush3.bf16.msra.mxu0 %v1405_v42 }
  0x29   :  { %1326 = vmatprep.subr.bf16.mxu0 %v1418_v46 }
  0x2a   :  { %1351 = vmatpush3.bf16.msra.mxu1 %v1405_v42 }
  0x2b   :  { %617 = vmatmul.mubr.bf16.gmra.mrb[4].mxu0 %v1397_v39  ;;  %1348 = vmatprep.subr.bf16.mxu1 %v1418_v46 }
  0x2c   :  { %714 = vmatmul.mubr.bf16.gmra.mrb[4].mxu1 %v1398_v40  ;;  %624 = vmatprep.mubr.bf16.mxu0 %v1399_v41 }
  0x2d   :  { %721 = vmatprep.mubr.bf16.mxu1 %v1401_v43  ;;  %1327 = vmatpush3.bf16.msra.mxu0 %v1418_v46 }
  0x2e   :  { %1352 = vmatpush3.bf16.msra.mxu1 %v1418_v46  ;;  %1328 = vmatprep.subr.bf16.mxu0 %v1431_v49 }
  0x2f   :  { %1349 = vmatprep.subr.bf16.mxu1 %v1431_v49 }
  0x31   :  { %1329 = vmatpush3.bf16.msra.mxu0 %v1431_v49 }
  0x32   :  { %1353 = vmatpush3.bf16.msra.mxu1 %v1431_v49 }
  0x33   :  { %625 = vmatmul.mubr.bf16.gmra.mrb[8].mxu0 %v1403_v44 }
  0x34   :  { %722 = vmatmul.mubr.bf16.gmra.mrb[8].mxu1 %v1404_v45  ;;  %632 = vmatprep.mubr.bf16.mxu0 %v1406_v47 }
  0x35   :  { %729 = vmatprep.mubr.bf16.mxu1 %v1408_v48 }
  0x3b   :  { %633 = vmatmul.mubr.bf16.gmra.mrb[12].mxu0 %v1410_v50 }
  0x3c   :  { %730 = vmatmul.mubr.bf16.gmra.mrb[12].mxu1 %v1411_v51  ;;  %640 = vmatprep.mubr.bf16.mxu0 %v1412_v52 }
  0x3d   :  { %737 = vmatprep.mubr.bf16.mxu1 %v1414_v53 }
  0x43   :  { %641 = vmatmul.mubr.bf16.gmra.mrb[16].mxu0 %v1416_v54 }
  0x44   :  { %738 = vmatmul.mubr.bf16.gmra.mrb[16].mxu1 %v1417_v55  ;;  %648 = vmatprep.mubr.bf16.mxu0 %v1419_v56 }
  0x45   :  { %745 = vmatprep.mubr.bf16.mxu1 %v1421_v57 }
  0x4b   :  { %649 = vmatmul.mubr.bf16.gmra.mrb[20].mxu0 %v1423_v58 }
  0x4c   :  { %746 = vmatmul.mubr.bf16.gmra.mrb[20].mxu1 %v1424_v59  ;;  %656 = vmatprep.mubr.bf16.mxu0 %v1425_v60 }
  0x4d   :  { %753 = vmatprep.mubr.bf16.mxu1 %v1427_v61 }
  0x53   :  { %657 = vmatmul.mubr.bf16.gmra.mrb[24].mxu0 %v1429_v62 }
  0x54   :  { %754 = vmatmul.mubr.bf16.gmra.mrb[24].mxu1 %v1430_v63  ;;  %664 = vmatprep.mubr.bf16.mxu0 %v1432_v0 }
  0x55   :  { %761 = vmatprep.mubr.bf16.mxu1 %v1434_v1 }
  0x5b   :  { %665 = vmatmul.mubr.bf16.gmra.mrb[28].mxu0 %v1436_v2 }
  0x5c   :  { %762 = vmatmul.mubr.bf16.gmra.mrb[28].mxu1 %v1437_v3  ;;  %1330 = vmatprep.mubr.msk.bf16.mxu0 %vm551_vm0, %v1438_v4 }
  0x5d   :  { %1338 = vmatprep.mubr.msk.bf16.mxu1 %vm551_vm0, %v1439_v5 }
  0x63   :  { %1331 = vmatmul.mubr.msk.bf16.vlgmr.msra.gmra.mrb[32].mxu0 %vm551_vm0, %v1440_v6 }
  0x64   :  { %1339 = vmatmul.mubr.msk.bf16.vlgmr.msra.gmra.mrb[32].mxu1 %vm551_vm0, %v1441_v7  ;;  %1334 = vmatprep.mubr.msk.bf16.mxu0 %vm551_vm0, %v1442_v8 }
  0x65   :  { %1342 = vmatprep.mubr.msk.bf16.mxu1 %vm551_vm0, %v1443_v9 }
  0x6b   :  { %1335 = vmatmul.mubr.msk.bf16.gmra.mrb[36].mxu0 %vm551_vm0, %v1444_v10 }
  0x6c   :  { %1343 = vmatmul.mubr.msk.bf16.gmra.mrb[36].mxu1 %vm551_vm0, %v1445_v11 }
  0xf6   :  { %v1198_v12 = vpop.f32.mrb[0].mxu0 }
  0xf7   :  { %v1262_v13 = vpop.f32.mrb[0].mxu1  ;;  %v1199_v14 = vpop.f32.mrb[1].mxu0 }
  0xf8   :  { %v1200_v15 = vadd.f32 %v1199_v14, %v1198_v12  ;;  %v1263_v16 = vpop.f32.mrb[1].mxu1  ;;  %v1201_v17 = vpop.f32.mrb[2].mxu0 }
  0xf9   :  { %v1264_v18 = vadd.f32 %v1263_v16, %v1262_v13  ;;  %v1265_v19 = vpop.f32.mrb[2].mxu1  ;;  %v1202_v20 = vpop.f32.mrb[3].mxu0 }
  0xfa   :  { %v1203_v21 = vadd.f32 %v1202_v20, %v1201_v17  ;;  %v1266_v22 = vpop.f32.mrb[3].mxu1 }
  0xfb   :  { %v1267_v23 = vadd.f32 %v1266_v22, %v1265_v19  ;;  %v1707_v24 = vadd.f32 %v1264_v18, %v1200_v15 }
  0xfd   :  { %v1709_v25 = vadd.f32 %v1267_v23, %v1203_v21 }
  0xfe   :  { %v1204_v26 = vpop.f32.mrb[4].mxu0 }
  0xff   :  { %v1268_v27 = vpop.f32.mrb[4].mxu1  ;;  %v1205_v28 = vpop.f32.mrb[5].mxu0 }
 0x100   :  { %v1206_v29 = vadd.f32 %v1205_v28, %v1204_v26  ;;  %v1269_v30 = vpop.f32.mrb[5].mxu1  ;;  %v1207_v31 = vpop.f32.mrb[6].mxu0 }
 0x101   :  { %v1270_v32 = vadd.f32 %v1269_v30, %v1268_v27  ;;  %v1271_v33 = vpop.f32.mrb[6].mxu1  ;;  %v1208_v34 = vpop.f32.mrb[7].mxu0 }
 0x102   :  { %v1209_v35 = vadd.f32 %v1208_v34, %v1207_v31  ;;  %v1272_v36 = vpop.f32.mrb[7].mxu1 }
 0x103   :  { %v1273_v37 = vadd.f32 %v1272_v36, %v1271_v33  ;;  %v1711_v38 = vadd.f32 %v1270_v32, %v1206_v29 }
 0x105   :  { %v1713_v39 = vadd.f32 %v1273_v37, %v1209_v35 }
 0x106   :  { %v1210_v40 = vpop.f32.mrb[8].mxu0 }
 0x107   :  { %v1274_v41 = vpop.f32.mrb[8].mxu1  ;;  %v1211_v42 = vpop.f32.mrb[9].mxu0 }
 0x108   :  { %v1212_v43 = vadd.f32 %v1211_v42, %v1210_v40  ;;  %v1275_v44 = vpop.f32.mrb[9].mxu1  ;;  %v1213_v45 = vpop.f32.mrb[10].mxu0 }
 0x109   :  { %v1276_v46 = vadd.f32 %v1275_v44, %v1274_v41  ;;  %v1277_v47 = vpop.f32.mrb[10].mxu1  ;;  %v1214_v48 = vpop.f32.mrb[11].mxu0 }
 0x10a   :  { %v1215_v49 = vadd.f32 %v1214_v48, %v1213_v45  ;;  %v1278_v50 = vpop.f32.mrb[11].mxu1 }
 0x10b   :  { %v1279_v51 = vadd.f32 %v1278_v50, %v1277_v47  ;;  %v1715_v52 = vadd.f32 %v1276_v46, %v1212_v43 }
 0x10d   :  { %v1717_v53 = vadd.f32 %v1279_v51, %v1215_v49 }
 0x10e   :  { %v1216_v54 = vpop.f32.mrb[12].mxu0 }
 0x10f   :  { %v1280_v55 = vpop.f32.mrb[12].mxu1  ;;  %v1217_v56 = vpop.f32.mrb[13].mxu0 }
 0x110   :  { %v1218_v57 = vadd.f32 %v1217_v56, %v1216_v54  ;;  %v1281_v58 = vpop.f32.mrb[13].mxu1  ;;  %v1219_v59 = vpop.f32.mrb[14].mxu0 }
 0x111   :  { %v1282_v60 = vadd.f32 %v1281_v58, %v1280_v55  ;;  %v1283_v61 = vpop.f32.mrb[14].mxu1  ;;  %v1220_v62 = vpop.f32.mrb[15].mxu0 }
 0x112   :  { %v1221_v63 = vadd.f32 %v1220_v62, %v1219_v59  ;;  %v1284_v0 = vpop.f32.mrb[15].mxu1 }
 0x113   :  { %v1285_v1 = vadd.f32 %v1284_v0, %v1283_v61  ;;  %v1719_v2 = vadd.f32 %v1282_v60, %v1218_v57 }
 0x115   :  { %v1721_v3 = vadd.f32 %v1285_v1, %v1221_v63 }
 0x116   :  { %v1222_v4 = vpop.f32.mrb[16].mxu0 }
 0x117   :  { %v1286_v5 = vpop.f32.mrb[16].mxu1  ;;  %v1223_v6 = vpop.f32.mrb[17].mxu0 }
 0x118   :  { %v1224_v7 = vadd.f32 %v1223_v6, %v1222_v4  ;;  %v1287_v8 = vpop.f32.mrb[17].mxu1  ;;  %v1225_v9 = vpop.f32.mrb[18].mxu0 }
 0x119   :  { %v1288_v10 = vadd.f32 %v1287_v8, %v1286_v5  ;;  %v1289_v11 = vpop.f32.mrb[18].mxu1  ;;  %v1226_v12 = vpop.f32.mrb[19].mxu0 }
 0x11a   :  { %v1227_v13 = vadd.f32 %v1226_v12, %v1225_v9  ;;  %v1290_v14 = vpop.f32.mrb[19].mxu1 }
 0x11b   :  { %v1291_v15 = vadd.f32 %v1290_v14, %v1289_v11  ;;  %v740_v16 = vadd.f32 %v1288_v10, %v1224_v7 }
 0x11d   :  { %v743_v17 = vadd.f32 %v1291_v15, %v1227_v13 }
 0x11e   :  { %v1228_v18 = vpop.f32.mrb[20].mxu0 }
 0x11f   :  { %v1292_v19 = vpop.f32.mrb[20].mxu1  ;;  %v1229_v20 = vpop.f32.mrb[21].mxu0 }
 0x120   :  { %v1230_v21 = vadd.f32 %v1229_v20, %v1228_v18  ;;  %v1293_v22 = vpop.f32.mrb[21].mxu1  ;;  %v1231_v23 = vpop.f32.mrb[22].mxu0 }
 0x121   :  { %v1294_v26 = vadd.f32 %v1293_v22, %v1292_v19  ;;  %v1295_v27 = vpop.f32.mrb[22].mxu1  ;;  %v1232_v28 = vpop.f32.mrb[23].mxu0 }
 0x122   :  { %v1233_v29 = vadd.f32 %v1232_v28, %v1231_v23  ;;  %v1296_v30 = vpop.f32.mrb[23].mxu1 }
 0x123   :  { %v1297_v31 = vadd.f32 %v1296_v30, %v1295_v27  ;;  %v748_v32 = vadd.f32 %v1294_v26, %v1230_v21 }
 0x125   :  { %v751_v33 = vadd.f32 %v1297_v31, %v1233_v29 }
 0x126   :  { %v1234_v34 = vpop.f32.mrb[24].mxu0 }
 0x127   :  { %v1298_v35 = vpop.f32.mrb[24].mxu1  ;;  %v1235_v36 = vpop.f32.mrb[25].mxu0 }
 0x128   :  { %v1236_v37 = vadd.f32 %v1235_v36, %v1234_v34  ;;  %v1299_v40 = vpop.f32.mrb[25].mxu1  ;;  %v1237_v41 = vpop.f32.mrb[26].mxu0 }
 0x129   :  { %v1300_v42 = vadd.f32 %v1299_v40, %v1298_v35  ;;  %v1301_v43 = vpop.f32.mrb[26].mxu1  ;;  %v1238_v44 = vpop.f32.mrb[27].mxu0 }
 0x12a   :  { %v1239_v45 = vadd.f32 %v1238_v44, %v1237_v41  ;;  %v1302_v46 = vpop.f32.mrb[27].mxu1 }
 0x12b   :  { %v1303_v47 = vadd.f32 %v1302_v46, %v1301_v43  ;;  %v756_v48 = vadd.f32 %v1300_v42, %v1236_v37 }
 0x12d   :  { %v1723_v49 = vadd.f32 %v1303_v47, %v1239_v45 }
 0x12e   :  { %v1240_v50 = vpop.f32.mrb[28].mxu0 }
 0x12f   :  { %v1304_v51 = vpop.f32.mrb[28].mxu1  ;;  %v1241_v54 = vpop.f32.mrb[29].mxu0 }
 0x130   :  { %v1242_v55 = vadd.f32 %v1241_v54, %v1240_v50  ;;  %v1305_v56 = vpop.f32.mrb[29].mxu1  ;;  %v1243_v57 = vpop.f32.mrb[30].mxu0 }
 0x131   :  { %v1306_v58 = vadd.f32 %v1305_v56, %v1304_v51  ;;  %v1307_v59 = vpop.f32.mrb[30].mxu1  ;;  %v1244_v60 = vpop.f32.mrb[31].mxu0 }
 0x132   :  { %v1245_v61 = vadd.f32 %v1244_v60, %v1243_v57  ;;  %v1308_v62 = vpop.f32.mrb[31].mxu1 }
 0x133   :  { %v1309_v63 = vadd.f32 %v1308_v62, %v1307_v59  ;;  %v764_v0 = vadd.f32 %v1306_v58, %v1242_v55 }
 0x135   :  { %v767_v1 = vadd.f32 %v1309_v63, %v1245_v61 }
 0x136   :  { %v1332_v4 = vpop.f32.mrb[32].mxu0 }
 0x137   :  { %v813_v5 = vadd.f32 %v1332_v4, %v1711_v38  ;;  %v1340_v6 = vpop.f32.mrb[32].mxu1  ;;  %v804_v7 = vpop.f32.mrb[33].mxu0 }
 0x138   :  { %v1726_v8 = vadd.f32 %v1340_v6, %v748_v32  ;;  %v805_v9 = vadd.f32 %v804_v7, %v1707_v24  ;;  %v836_v10 = vpop.f32.mrb[33].mxu1  ;;  %v1333_v11 = vpop.f32.mrb[34].mxu0 }
 0x139   :  { %v1729_v12 = vadd.f32 %v836_v10, %v740_v16  ;;  %v816_v13 = vadd.f32 %v1333_v11, %v1713_v39  ;;  %v1341_v14 = vpop.f32.mrb[34].mxu1  ;;  %v807_v15 = vpop.f32.mrb[35].mxu0  ;;  %v970_v27 = vmul.f32 %v813_v5, %v813_v5 }
 0x13a   :  { %v1732_v18 = vadd.f32 %v1341_v14, %v751_v33  ;;  %v808_v19 = vadd.f32 %v807_v15, %v1709_v25  ;;  %v839_v20 = vpop.f32.mrb[35].mxu1  ;;  %v968_v26 = vmul.f32 %v805_v9, %v805_v9  ;;  %v978_v7 = vmul.f32 %v1726_v8, %v1726_v8 }
 0x13b   :  { %v1143_v38 = vpack.c.bf16 %v816_v13, %v813_v5  ;;  %v840_v21 = vadd.f32 %v839_v20, %v743_v17  ;;  %v971_v37 = vmul.f32 %v816_v13, %v816_v13  ;;  %v976_v63 = vmul.f32 %v1729_v12, %v1729_v12 }
 0x13c   :  { %v1163_v22 = vpack.c.bf16 %v1732_v18, %v1726_v8  ;;  %v1138_v23 = vpack.c.bf16 %v808_v19, %v805_v9  ;;  %v947_v24 = vadd.f32 %v808_v19, %v805_v9  ;;  %v969_v39 = vmul.f32 %v808_v19, %v808_v19 }
 0x13d   :  { %1175 = vst [vmem:[%s1784_s2 + $0x8] sm:$0xff] %v1143_v38   ;;  %v1158_v16 = vpack.c.bf16 %v840_v21, %v1729_v12  ;;  %v977_v4 = vmul.f32 %v840_v21, %v840_v21  ;;  %v979_v11 = vmul.f32 %v1732_v18, %v1732_v18 }
 0x13e   :  { %1179 = vst [vmem:[%s1784_s2 + $0x28] sm:$0xff] %v1163_v22   ;;  %1139 = vst [vmem:[%s1784_s2] sm:$0xff] %v1138_v23   ;;  %v948_v25 = vadd.f32 %v947_v24, %v813_v5  ;;  %v1336_v17 = vpop.f32.mrb[36].mxu0  ;;  %v984_v28 = vadd.f32 %v969_v39, %v968_v26 }
 0x13f   :  { %1178 = vst [vmem:[%s1784_s2 + $0x20] sm:$0xff] %v1158_v16   ;;  %v829_v29 = vadd.f32 %v1336_v17, %v1719_v2  ;;  %v1344_v30 = vpop.f32.mrb[36].mxu1  ;;  %v820_v31 = vpop.f32.mrb[37].mxu0 }
 0x140   :  { %v861_v32 = vadd.f32 %v1344_v30, %v764_v0  ;;  %v821_v33 = vadd.f32 %v820_v31, %v1715_v52  ;;  %v949_v34 = vadd.f32 %v948_v25, %v816_v13  ;;  %v852_v35 = vpop.f32.mrb[37].mxu1  ;;  %v1337_v36 = vpop.f32.mrb[38].mxu0  ;;  %v985_v40 = vadd.f32 %v984_v28, %v970_v27 }
 0x141   :  { %v853_v41 = vadd.f32 %v852_v35, %v756_v48  ;;  %v832_v42 = vadd.f32 %v1337_v36, %v1721_v3  ;;  %v1345_v43 = vpop.f32.mrb[38].mxu1  ;;  %v823_v44 = vpop.f32.mrb[39].mxu0  ;;  %v974_v59 = vmul.f32 %v829_v29, %v829_v29 }
 0x142   :  { %v950_v45 = vadd.f32 %v949_v34, %v821_v33  ;;  %v972_v46 = vmul.f32 %v821_v33, %v821_v33  ;;  %v864_v47 = vadd.f32 %v1345_v43, %v767_v1  ;;  %v855_v50 = vpop.f32.mrb[39].mxu1  ;;  %v986_v2 = vadd.f32 %v985_v40, %v971_v37 }
 0x143   :  { %v1153_v51 = vpack.c.bf16 %v832_v42, %v829_v29  ;;  %v824_v55 = vadd.f32 %v823_v44, %v1717_v53  ;;  %v856_v52 = vadd.f32 %v855_v50, %v1723_v49  ;;  %v975_v60 = vmul.f32 %v832_v42, %v832_v42 }
 0x144   :  { %v1173_v54 = vpack.c.bf16 %v864_v47, %v861_v32  ;;  %v987_v56 = vadd.f32 %v986_v2, %v972_v46  ;;  %v980_v15 = vmul.f32 %v853_v41, %v853_v41  ;;  %v982_v23 = vmul.f32 %v861_v32, %v861_v32 }
 0x145   :  { %1177 = vst [vmem:[%s1784_s2 + $0x18] sm:$0xff] %v1153_v51   ;;  %v1148_v3 = vpack.c.bf16 %v824_v55, %v821_v33  ;;  %v951_v48 = vadd.f32 %v950_v45, %v824_v55  ;;  %v973_v57 = vmul.f32 %v824_v55, %v824_v55  ;;  %v1168_v58 = vpack.c.bf16 %v856_v52, %v853_v41 }
 0x146   :  { %1181 = vst [vmem:[%s1784_s2 + $0x38] sm:$0xff] %v1173_v54   ;;  %v981_v38 = vmul.f32 %v856_v52, %v856_v52  ;;  %v983_v26 = vmul.f32 %v864_v47, %v864_v47 }
 0x147   :  { %1176 = vst [vmem:[%s1784_s2 + $0x10] sm:$0xff] %v1148_v3   ;;  %v952_v53 = vadd.f32 %v951_v48, %v829_v29  ;;  %v988_v49 = vadd.f32 %v987_v56, %v973_v57  ;;  %1180 = vst [vmem:[%s1784_s2 + $0x30] sm:$0xff] %v1168_v58  }
 0x149   :  { %v953_v61 = vadd.f32 %v952_v53, %v832_v42  ;;  %v989_v62 = vadd.f32 %v988_v49, %v974_v59 }
 0x14b   :  { %v954_v0 = vadd.f32 %v953_v61, %v1729_v12  ;;  %v990_v1 = vadd.f32 %v989_v62, %v975_v60 }
 0x14d   :  { %v991_v5 = vadd.f32 %v990_v1, %v976_v63  ;;  %v955_v6 = vadd.f32 %v954_v0, %v840_v21 }
 0x14f   :  { %v956_v9 = vadd.f32 %v955_v6, %v1726_v8  ;;  %v992_v10 = vadd.f32 %v991_v5, %v977_v4 }
 0x151   :  { %v957_v13 = vadd.f32 %v956_v9, %v1732_v18  ;;  %v993_v14 = vadd.f32 %v992_v10, %v978_v7 }
 0x153   :  { %v958_v19 = vadd.f32 %v957_v13, %v853_v41  ;;  %v994_v20 = vadd.f32 %v993_v14, %v979_v11 }
 0x155   :  { %v959_v12 = vadd.f32 %v958_v19, %v856_v52  ;;  %v995_v22 = vadd.f32 %v994_v20, %v980_v15 }
 0x157   :  { %v960_v21 = vadd.f32 %v959_v12, %v861_v32  ;;  %v996_v24 = vadd.f32 %v995_v22, %v981_v38 }
 0x159   :  { %v961_v39 = vadd.f32 %v960_v21, %v864_v47  ;;  %v997_v16 = vadd.f32 %v996_v24, %v982_v23 }
 0x15b   :  { %v962_v8 = vrot.slane %v961_v39, 4  ;;  %v998_v25 = vadd.f32 %v997_v16, %v983_v26 }
 0x15d   :  { %v963_v17 = vadd.f32 %v962_v8, %v961_v39  ;;  %v999_v27 = vrot.slane %v998_v25, 4 }
 0x15f   :  { %v964_v28 = vrot.slane %v963_v17, 2  ;;  %v1000_v29 = vadd.f32 %v999_v27, %v998_v25 }
 0x161   :  { %v965_v18 = vadd.f32 %v964_v28, %v963_v17  ;;  %v1001_v30 = vrot.slane %v1000_v29, 2 }
 0x163   :  { %v966_v31 = vrot.slane %v965_v18, 1  ;;  %v1002_v33 = vadd.f32 %v1001_v30, %v1000_v29 }
 0x165   :  { %v967_v34 = vadd.f32 %v966_v31, %v965_v18  ;;  %v1003_v35 = vrot.slane %v1002_v33, 1 }
 0x167   :  { %v1004_v36 = vadd.f32 %v1003_v35, %v1002_v33  ;;  %1005 = vst [vmem:[%s1785_s3] sm:$0xff] %v967_v34 }
 0x169   :  { %1006 = vst [vmem:[%s1786_s4] sm:$0xff] %v1004_v36 }

// kernel: issegnet_forward.44
= control target key start
LH: loop header
LB: loop body
LE: loop exit
PB: predicated region body
PF: predicated region fallthrough
CT: control target
= control target key end

     0   :  { %vm190_vm0 = vcmask 261120   ;;  %vm376_vm1 = vcmask 781312   ;;  %vm393_vm2 = vcmask 785408   ;;  %s904_s4 = inlined_call_operand.vmem [shape: bf16[32,96], index: 4, kind: input, shape index: {}]   ;;  %s905_s0 = inlined_call_operand.vmem [shape: bf16[128,32], index: 0, kind: input, shape index: {}]   ;;  %s906_s1 = inlined_call_operand.vmem [shape: f32[1,32], index: 1, kind: input, shape index: {}]   ;;  %s907_s3 = inlined_call_operand.vmem [shape: bf16[128,32], index: 3, kind: input, shape index: {}]   ;;  %s908_s2 = inlined_call_operand.vmem [shape: f32[1,32], index: 2, kind: input, shape index: {}]   ;;  %s909_s5 = inlined_call_operand.vmem [shape: bf16[128,96], index: 5, kind: output, shape index: {0}]   ;;  %s910_s6 = inlined_call_operand.vmem [shape: f32[1,8,96], index: 6, kind: output, shape index: {1}]   ;;  %s911_s7 = inlined_call_operand.vmem [shape: f32[1,8,96], index: 7, kind: output, shape index: {2}]  }
   0x1   :  { %v654_v0 = vld [vmem:[%s904_s4] sm:$0xff]   ;;  %v655_v1 = vld [vmem:[%s904_s4 + $0x8] sm:$0xff]   ;;  %v607_v14 = vld [vmem:[%s905_s0 + $0x10] sm:$0xff]  }
   0x2   :  { %630 = vmatprep.subr.bf16.mxu0 %v654_v0  ;;  %v543_v2 = vld [vmem:[%s905_s0] sm:$0xff]   ;;  %650 = vmatprep.subr.bf16.mxu1 %v654_v0  ;;  %v606_v7 = vld [vmem:[%s905_s0 + $0x8] sm:$0xff]   ;;  %v614_v15 = vld [vmem:[%s907_s3 + $0x10] sm:$0xff]   ;;  %v552_v22 = vunpack.c.l.bf16 %v607_v14  ;;  %v553_v23 = vunpack.c.h.bf16 %v607_v14 }
   0x3   :  { %v708_v3 = vld [vmem:[%s906_s1] ss:$0 sm:$0xff]  ;;  %631 = vmatpush3.bf16.msra.mxu0 %v654_v0  ;;  %v544_v4 = vunpack.c.l.bf16 %v543_v2  ;;  %v545_v5 = vunpack.c.h.bf16 %v543_v2  ;;  %v613_v8 = vld [vmem:[%s907_s3 + $0x8] sm:$0xff]   ;;  %652 = vmatpush3.bf16.msra.mxu1 %v654_v0  ;;  %v548_v12 = vunpack.c.l.bf16 %v606_v7  ;;  %v549_v13 = vunpack.c.h.bf16 %v606_v7  ;;  %v608_v24 = vld [vmem:[%s905_s0 + $0x18] sm:$0xff]  }
   0x4   :  { %v575_v6 = vld [vmem:[%s907_s3] sm:$0xff]   ;;  %632 = vmatprep.subr.bf16.mxu0 %v655_v1  ;;  %651 = vmatprep.subr.bf16.mxu1 %v655_v1  ;;  %v580_v18 = vunpack.c.l.bf16 %v613_v8  ;;  %v581_v19 = vunpack.c.h.bf16 %v613_v8  ;;  %v584_v27 = vunpack.c.l.bf16 %v614_v15  ;;  %v585_v28 = vunpack.c.h.bf16 %v614_v15  ;;  %v615_v41 = vld [vmem:[%s907_s3 + $0x18] sm:$0xff]   ;;  %v610_v56 = vld [vmem:[%s905_s0 + $0x28] sm:$0xff]  }
   0x5   :  { %v722_v9 = vld [vmem:[%s908_s2] ss:$0 sm:$0xff]  ;;  %v576_v10 = vunpack.c.l.bf16 %v575_v6  ;;  %v577_v11 = vunpack.c.h.bf16 %v575_v6  ;;  %v63_v16 = vmul.f32 %v544_v4, %v708_v3  ;;  %v64_v17 = vmul.f32 %v545_v5, %v708_v3  ;;  %v611_v7 = vld [vmem:[%s905_s0 + $0x30] sm:$0xff]  }
   0x6   :  { %v65_v20 = vmul.f32 %v548_v12, %v708_v3  ;;  %v66_v21 = vmul.f32 %v549_v13, %v708_v3  ;;  %v67_v31 = vmul.f32 %v552_v22, %v708_v3  ;;  %v68_v32 = vmul.f32 %v553_v23, %v708_v3  ;;  %v609_v50 = vld [vmem:[%s905_s0 + $0x20] sm:$0xff]   ;;  %v618_v13 = vld [vmem:[%s907_s3 + $0x30] sm:$0xff]   ;;  %v612_v22 = vld [vmem:[%s905_s0 + $0x38] sm:$0xff]  }
   0x7   :  { %633 = vmatpush3.bf16.msra.mxu0 %v655_v1  ;;  %v86_v25 = vadd.f32 %v722_v9, %v63_v16  ;;  %v87_v26 = vadd.f32 %v722_v9, %v64_v17  ;;  %653 = vmatpush3.bf16.msra.mxu1 %v655_v1  ;;  %v556_v35 = vunpack.c.l.bf16 %v608_v24  ;;  %v557_v36 = vunpack.c.h.bf16 %v608_v24  ;;  %v616_v55 = vld [vmem:[%s907_s3 + $0x20] sm:$0xff]   ;;  %v617_v1 = vld [vmem:[%s907_s3 + $0x28] sm:$0xff]  }
   0x8   :  { %v88_v29 = vadd.f32 %v722_v9, %v65_v20  ;;  %v89_v30 = vadd.f32 %v722_v9, %v66_v21  ;;  %v90_v39 = vadd.f32 %v722_v9, %v67_v31  ;;  %v91_v40 = vadd.f32 %v722_v9, %v68_v32 }
   0x9   :  { %v102_v33 = vmax.f32 %v86_v25, 0.0  ;;  %v103_v34 = vmax.f32 %v87_v26, 0.0  ;;  %v69_v44 = vmul.f32 %v556_v35, %v708_v3  ;;  %v70_v45 = vmul.f32 %v557_v36, %v708_v3 }
   0xa   :  { %v104_v37 = vmax.f32 %v88_v29, 0.0  ;;  %v105_v38 = vmax.f32 %v89_v30, 0.0  ;;  %v106_v48 = vmax.f32 %v90_v39, 0.0  ;;  %v107_v49 = vmax.f32 %v91_v40, 0.0  ;;  %v619_v39 = vld [vmem:[%s907_s3 + $0x38] sm:$0xff]  }
   0xb   :  { %v150_v42 = vadd.f32 %v576_v10, %v102_v33  ;;  %v151_v43 = vadd.f32 %v577_v11, %v103_v34  ;;  %v92_v52 = vadd.f32 %v722_v9, %v69_v44  ;;  %v93_v53 = vadd.f32 %v722_v9, %v70_v45 }
   0xc   :  { %v152_v46 = vadd.f32 %v580_v18, %v104_v37  ;;  %v153_v47 = vadd.f32 %v581_v19, %v105_v38  ;;  %v588_v54 = vunpack.c.l.bf16 %v615_v41  ;;  %v154_v58 = vadd.f32 %v584_v27, %v106_v48 }
   0xd   :  { %v166_v51 = vpack.c.bf16 %v151_v43, %v150_v42  ;;  %v155_v59 = vadd.f32 %v585_v28, %v107_v49  ;;  %v589_v60 = vunpack.c.h.bf16 %v615_v41  ;;  %v108_v61 = vmax.f32 %v92_v52, 0.0 }
   0xe   :  { %v167_v57 = vpack.c.bf16 %v153_v47, %v152_v46  ;;  %v109_v62 = vmax.f32 %v93_v53, 0.0  ;;  %v560_v63 = vunpack.c.l.bf16 %v609_v50  ;;  %v561_v0 = vunpack.c.h.bf16 %v609_v50 }
   0xf   :  { %634 = vmatprep.mubr.msk.bf16.mxu0 %vm190_vm0, %v166_v51  ;;  %v168_v2 = vpack.c.bf16 %v155_v59, %v154_v58  ;;  %v592_v4 = vunpack.c.l.bf16 %v616_v55  ;;  %v593_v5 = vunpack.c.h.bf16 %v616_v55  ;;  %v564_v6 = vunpack.c.l.bf16 %v610_v56 }
  0x10   :  { %635 = vmatmul.mubr.msk.bf16.vlgmr.msra.gmra.mrb[0].mxu0 %vm190_vm0, %v167_v57  ;;  %v156_v8 = vadd.f32 %v588_v54, %v108_v61  ;;  %v157_v10 = vadd.f32 %v589_v60, %v109_v62  ;;  %v71_v11 = vmul.f32 %v560_v63, %v708_v3  ;;  %v72_v12 = vmul.f32 %v561_v0, %v708_v3 }
  0x11   :  { %638 = vmatprep.mubr.msk.bf16.mxu0 %vm190_vm0, %v168_v2  ;;  %v565_v14 = vunpack.c.h.bf16 %v610_v56  ;;  %v73_v15 = vmul.f32 %v564_v6, %v708_v3  ;;  %v596_v16 = vunpack.c.l.bf16 %v617_v1  ;;  %v597_v17 = vunpack.c.h.bf16 %v617_v1 }
  0x12   :  { %v169_v18 = vpack.c.bf16 %v157_v10, %v156_v8  ;;  %v94_v19 = vadd.f32 %v722_v9, %v71_v11  ;;  %v95_v20 = vadd.f32 %v722_v9, %v72_v12  ;;  %v568_v21 = vunpack.c.l.bf16 %v611_v7 }
  0x13   :  { %v74_v23 = vmul.f32 %v565_v14, %v708_v3  ;;  %v96_v24 = vadd.f32 %v722_v9, %v73_v15  ;;  %v569_v25 = vunpack.c.h.bf16 %v611_v7  ;;  %v600_v26 = vunpack.c.l.bf16 %v618_v13 }
  0x14   :  { %v110_v27 = vmax.f32 %v94_v19, 0.0  ;;  %v111_v28 = vmax.f32 %v95_v20, 0.0  ;;  %v75_v29 = vmul.f32 %v568_v21, %v708_v3  ;;  %v601_v30 = vunpack.c.h.bf16 %v618_v13 }
  0x15   :  { %v97_v31 = vadd.f32 %v722_v9, %v74_v23  ;;  %v112_v32 = vmax.f32 %v96_v24, 0.0  ;;  %v76_v33 = vmul.f32 %v569_v25, %v708_v3  ;;  %v572_v34 = vunpack.c.l.bf16 %v612_v22 }
  0x16   :  { %v158_v35 = vadd.f32 %v592_v4, %v110_v27  ;;  %v159_v36 = vadd.f32 %v593_v5, %v111_v28  ;;  %v98_v37 = vadd.f32 %v722_v9, %v75_v29  ;;  %v573_v38 = vunpack.c.h.bf16 %v612_v22 }
  0x17   :  { %v113_v40 = vmax.f32 %v97_v31, 0.0  ;;  %v160_v41 = vadd.f32 %v596_v16, %v112_v32  ;;  %v99_v42 = vadd.f32 %v722_v9, %v76_v33  ;;  %v77_v43 = vmul.f32 %v572_v34, %v708_v3 }
  0x18   :  { %639 = vmatmul.mubr.msk.bf16.gmra.mrb[4].mxu0 %vm190_vm0, %v169_v18  ;;  %v170_v44 = vpack.c.bf16 %v159_v36, %v158_v35  ;;  %v114_v45 = vmax.f32 %v98_v37, 0.0  ;;  %v78_v46 = vmul.f32 %v573_v38, %v708_v3  ;;  %v604_v50 = vunpack.c.l.bf16 %v619_v39 }
  0x19   :  { %v161_v47 = vadd.f32 %v597_v17, %v113_v40  ;;  %v115_v48 = vmax.f32 %v99_v42, 0.0  ;;  %v100_v49 = vadd.f32 %v722_v9, %v77_v43  ;;  %v605_v53 = vunpack.c.h.bf16 %v619_v39 }
  0x1a   :  { %642 = vmatprep.mubr.msk.bf16.mxu1 %vm190_vm0, %v170_v44  ;;  %v162_v51 = vadd.f32 %v600_v26, %v114_v45  ;;  %v101_v52 = vadd.f32 %v722_v9, %v78_v46 }
  0x1b   :  { %v171_v54 = vpack.c.bf16 %v161_v47, %v160_v41  ;;  %v163_v55 = vadd.f32 %v601_v30, %v115_v48  ;;  %v116_v56 = vmax.f32 %v100_v49, 0.0 }
  0x1c   :  { %v117_v57 = vmax.f32 %v101_v52, 0.0 }
  0x1d   :  { %643 = vmatmul.mubr.msk.bf16.vlgmr.msra.gmra.mrb[0].mxu1 %vm190_vm0, %v171_v54  ;;  %v172_v58 = vpack.c.bf16 %v163_v55, %v162_v51  ;;  %v164_v59 = vadd.f32 %v604_v50, %v116_v56 }
  0x1e   :  { %v165_v3 = vadd.f32 %v605_v53, %v117_v57 }
  0x1f   :  { %646 = vmatprep.mubr.msk.bf16.mxu1 %vm190_vm0, %v172_v58 }
  0x20   :  { %v173_v60 = vpack.c.bf16 %v165_v3, %v164_v59 }
  0x25   :  { %647 = vmatmul.mubr.msk.bf16.gmra.mrb[4].mxu1 %vm190_vm0, %v173_v60 }
  0xe3   :  { %v636_v61 = vpop.f32.mrb[0].mxu0 }
  0xe4   :  { %v528_v62 = vpack.c.bf16 %v636_v61, %v636_v61  ;;  %v249_v9 = vpop.f32.mrb[1].mxu0  ;;  %v433_v2 = vmul.f32 %v636_v61, %v636_v61  ;;  %v397_v13 = vsel %vm393_vm2, %v636_v61, 0.0 }
  0xe5   :  { %v526_v63 = vpack.c.bf16 %v249_v9, %v249_v9  ;;  %v431_v0 = vmul.f32 %v249_v9, %v249_v9  ;;  %v637_v1 = vpop.f32.mrb[2].mxu0  ;;  %v394_v6 = vsel %vm393_vm2, %v249_v9, 0.0 }
  0xe6   :  { %379 = vst.msk [vmem:[%s909_s5 + $0x8] sm:$0xf] %vm376_vm1, %v528_v62  ;;  %v529_v4 = vpack.c.bf16 %v637_v1, %v637_v1  ;;  %v252_v5 = vpop.f32.mrb[3].mxu0  ;;  %v434_v11 = vmul.f32 %v637_v1, %v637_v1  ;;  %v450_v18 = vsel %vm393_vm2, %v433_v2, 0.0  ;;  %v399_v20 = vsel %vm393_vm2, %v637_v1, 0.0 }
  0xe7   :  { %377 = vst.msk [vmem:[%s909_s5] sm:$0xf] %vm376_vm1, %v526_v63  ;;  %v527_v7 = vpack.c.bf16 %v252_v5, %v252_v5  ;;  %v395_v8 = vsel %vm393_vm2, %v252_v5, 0.0  ;;  %v432_v10 = vmul.f32 %v252_v5, %v252_v5  ;;  %v447_v14 = vsel %vm393_vm2, %v431_v0, 0.0 }
  0xe8   :  { %380 = vst.msk [vmem:[%s909_s5 + $0xc] sm:$0xf] %vm376_vm1, %v529_v4  ;;  %v396_v12 = vadd.f32 %v395_v8, %v394_v6  ;;  %v452_v21 = vsel %vm393_vm2, %v434_v11, 0.0 }
  0xe9   :  { %378 = vst.msk [vmem:[%s909_s5 + $0x4] sm:$0xf] %vm376_vm1, %v527_v7  ;;  %v448_v15 = vsel %vm393_vm2, %v432_v10, 0.0 }
  0xea   :  { %v398_v16 = vadd.f32 %v397_v13, %v396_v12  ;;  %v449_v17 = vadd.f32 %v448_v15, %v447_v14 }
  0xeb   :  { %v640_v19 = vpop.f32.mrb[4].mxu0 }
  0xec   :  { %v451_v22 = vadd.f32 %v450_v18, %v449_v17  ;;  %v532_v23 = vpack.c.bf16 %v640_v19, %v640_v19  ;;  %v265_v24 = vpop.f32.mrb[5].mxu0  ;;  %v400_v26 = vadd.f32 %v399_v20, %v398_v16  ;;  %v437_v33 = vmul.f32 %v640_v19, %v640_v19 }
  0xed   :  { %v530_v25 = vpack.c.bf16 %v265_v24, %v265_v24  ;;  %v401_v27 = vsel %vm393_vm2, %v265_v24, 0.0  ;;  %v435_v28 = vmul.f32 %v265_v24, %v265_v24  ;;  %v641_v29 = vpop.f32.mrb[6].mxu0  ;;  %v405_v42 = vsel %vm393_vm2, %v640_v19, 0.0 }
  0xee   :  { %383 = vst.msk [vmem:[%s909_s5 + $0x18] sm:$0xf] %vm376_vm1, %v532_v23  ;;  %v453_v30 = vadd.f32 %v452_v21, %v451_v22  ;;  %v533_v31 = vpack.c.bf16 %v641_v29, %v641_v29  ;;  %v268_v32 = vpop.f32.mrb[7].mxu0  ;;  %v402_v34 = vadd.f32 %v401_v27, %v400_v26  ;;  %v438_v43 = vmul.f32 %v641_v29, %v641_v29 }
  0xef   :  { %381 = vst.msk [vmem:[%s909_s5 + $0x10] sm:$0xf] %vm376_vm1, %v530_v25  ;;  %v454_v35 = vsel %vm393_vm2, %v435_v28, 0.0  ;;  %v531_v36 = vpack.c.bf16 %v268_v32, %v268_v32  ;;  %v403_v38 = vsel %vm393_vm2, %v268_v32, 0.0  ;;  %v436_v39 = vmul.f32 %v268_v32, %v268_v32 }
  0xf0   :  { %v455_v37 = vadd.f32 %v454_v35, %v453_v30  ;;  %384 = vst.msk [vmem:[%s909_s5 + $0x1c] sm:$0xf] %vm376_vm1, %v533_v31  ;;  %v404_v40 = vadd.f32 %v403_v38, %v402_v34  ;;  %v644_v41 = vpop.f32.mrb[0].mxu1  ;;  %v458_v47 = vsel %vm393_vm2, %v437_v33, 0.0  ;;  %v407_v52 = vsel %vm393_vm2, %v641_v29, 0.0 }
  0xf1   :  { %382 = vst.msk [vmem:[%s909_s5 + $0x14] sm:$0xf] %vm376_vm1, %v531_v36  ;;  %v456_v44 = vsel %vm393_vm2, %v436_v39, 0.0  ;;  %v536_v45 = vpack.c.bf16 %v644_v41, %v644_v41  ;;  %v281_v46 = vpop.f32.mrb[1].mxu1  ;;  %v460_v3 = vsel %vm393_vm2, %v438_v43, 0.0  ;;  %v441_v62 = vmul.f32 %v644_v41, %v644_v41 }
  0xf2   :  { %v406_v48 = vadd.f32 %v405_v42, %v404_v40  ;;  %v457_v49 = vadd.f32 %v456_v44, %v455_v37  ;;  %v534_v50 = vpack.c.bf16 %v281_v46, %v281_v46  ;;  %v645_v51 = vpop.f32.mrb[2].mxu1  ;;  %v409_v53 = vsel %vm393_vm2, %v281_v46, 0.0 }
  0xf3   :  { %387 = vst.msk [vmem:[%s909_s5 + $0x28] sm:$0xf] %vm376_vm1, %v536_v45  ;;  %v439_v54 = vmul.f32 %v281_v46, %v281_v46  ;;  %v537_v55 = vpack.c.bf16 %v645_v51, %v645_v51  ;;  %v284_v56 = vpop.f32.mrb[3].mxu1  ;;  %v413_v5 = vsel %vm393_vm2, %v644_v41, 0.0  ;;  %v442_v6 = vmul.f32 %v645_v51, %v645_v51 }
  0xf4   :  { %v459_v57 = vadd.f32 %v458_v47, %v457_v49  ;;  %385 = vst.msk [vmem:[%s909_s5 + $0x20] sm:$0xf] %vm376_vm1, %v534_v50  ;;  %v408_v58 = vadd.f32 %v407_v52, %v406_v48  ;;  %v535_v59 = vpack.c.bf16 %v284_v56, %v284_v56  ;;  %v440_v61 = vmul.f32 %v284_v56, %v284_v56 }
  0xf5   :  { %v462_v60 = vsel %vm393_vm2, %v439_v54, 0.0  ;;  %388 = vst.msk [vmem:[%s909_s5 + $0x2c] sm:$0xf] %vm376_vm1, %v537_v55  ;;  %v411_v0 = vsel %vm393_vm2, %v284_v56, 0.0  ;;  %v466_v11 = vsel %vm393_vm2, %v441_v62, 0.0  ;;  %v415_v16 = vsel %vm393_vm2, %v645_v51, 0.0 }
  0xf6   :  { %v410_v9 = vadd.f32 %v409_v53, %v408_v58  ;;  %v461_v63 = vadd.f32 %v460_v3, %v459_v57  ;;  %386 = vst.msk [vmem:[%s909_s5 + $0x24] sm:$0xf] %vm376_vm1, %v535_v59  ;;  %v464_v7 = vsel %vm393_vm2, %v440_v61, 0.0  ;;  %v468_v24 = vsel %vm393_vm2, %v442_v6, 0.0 }
  0xf8   :  { %v463_v1 = vadd.f32 %v462_v60, %v461_v63  ;;  %v412_v2 = vadd.f32 %v411_v0, %v410_v9  ;;  %v648_v4 = vpop.f32.mrb[4].mxu1 }
  0xf9   :  { %v540_v8 = vpack.c.bf16 %v648_v4, %v648_v4  ;;  %v297_v10 = vpop.f32.mrb[5].mxu1  ;;  %v445_v29 = vmul.f32 %v648_v4, %v648_v4  ;;  %v421_v33 = vsel %vm393_vm2, %v648_v4, 0.0 }
  0xfa   :  { %v414_v12 = vadd.f32 %v413_v5, %v412_v2  ;;  %v465_v13 = vadd.f32 %v464_v7, %v463_v1  ;;  %v538_v14 = vpack.c.bf16 %v297_v10, %v297_v10  ;;  %v649_v15 = vpop.f32.mrb[6].mxu1  ;;  %v417_v17 = vsel %vm393_vm2, %v297_v10, 0.0 }
  0xfb   :  { %391 = vst.msk [vmem:[%s909_s5 + $0x38] sm:$0xf] %vm376_vm1, %v540_v8  ;;  %v443_v18 = vmul.f32 %v297_v10, %v297_v10  ;;  %v541_v19 = vpack.c.bf16 %v649_v15, %v649_v15  ;;  %v300_v20 = vpop.f32.mrb[7].mxu1  ;;  %v446_v34 = vmul.f32 %v649_v15, %v649_v15  ;;  %v474_v38 = vsel %vm393_vm2, %v445_v29, 0.0 }
  0xfc   :  { %v467_v21 = vadd.f32 %v466_v11, %v465_v13  ;;  %389 = vst.msk [vmem:[%s909_s5 + $0x30] sm:$0xf] %vm376_vm1, %v538_v14  ;;  %v416_v22 = vadd.f32 %v415_v16, %v414_v12  ;;  %v539_v23 = vpack.c.bf16 %v300_v20, %v300_v20  ;;  %v444_v26 = vmul.f32 %v300_v20, %v300_v20 }
  0xfd   :  { %v470_v25 = vsel %vm393_vm2, %v443_v18, 0.0  ;;  %392 = vst.msk [vmem:[%s909_s5 + $0x3c] sm:$0xf] %vm376_vm1, %v541_v19  ;;  %v419_v30 = vsel %vm393_vm2, %v300_v20, 0.0  ;;  %v423_v39 = vsel %vm393_vm2, %v649_v15, 0.0  ;;  %v476_v42 = vsel %vm393_vm2, %v446_v34, 0.0 }
  0xfe   :  { %v418_v27 = vadd.f32 %v417_v17, %v416_v22  ;;  %v469_v28 = vadd.f32 %v468_v24, %v467_v21  ;;  %390 = vst.msk [vmem:[%s909_s5 + $0x34] sm:$0xf] %vm376_vm1, %v539_v23  ;;  %v472_v35 = vsel %vm393_vm2, %v444_v26, 0.0 }
 0x100   :  { %v471_v31 = vadd.f32 %v470_v25, %v469_v28  ;;  %v420_v32 = vadd.f32 %v419_v30, %v418_v27 }
 0x102   :  { %v422_v36 = vadd.f32 %v421_v33, %v420_v32  ;;  %v473_v37 = vadd.f32 %v472_v35, %v471_v31 }
 0x104   :  { %v424_v40 = vadd.f32 %v423_v39, %v422_v36  ;;  %v475_v41 = vadd.f32 %v474_v38, %v473_v37 }
 0x106   :  { %v425_v43 = vrot.slane %v424_v40, 4  ;;  %v477_v44 = vadd.f32 %v476_v42, %v475_v41 }
 0x108   :  { %v426_v45 = vadd.f32 %v425_v43, %v424_v40  ;;  %v478_v46 = vrot.slane %v477_v44, 4 }
 0x10a   :  { %v427_v47 = vrot.slane %v426_v45, 2  ;;  %v479_v48 = vadd.f32 %v478_v46, %v477_v44 }
 0x10c   :  { %v428_v49 = vadd.f32 %v427_v47, %v426_v45  ;;  %v480_v50 = vrot.slane %v479_v48, 2 }
 0x10e   :  { %v429_v51 = vrot.slane %v428_v49, 1  ;;  %v481_v52 = vadd.f32 %v480_v50, %v479_v48 }
 0x110   :  { %v430_v53 = vadd.f32 %v429_v51, %v428_v49  ;;  %v482_v54 = vrot.slane %v481_v52, 1 }
 0x112   :  { %v483_v55 = vadd.f32 %v482_v54, %v481_v52  ;;  %484 = vst.msk [vmem:[%s910_s6] sm:$0xff] %vm393_vm2, %v430_v53 }
 0x114   :  { %485 = vst.msk [vmem:[%s911_s7] sm:$0xff] %vm393_vm2, %v483_v55 }

// kernel: issegnet_forward.49
= control target key start
LH: loop header
LB: loop body
LE: loop exit
PB: predicated region body
PF: predicated region fallthrough
CT: control target
= control target key end

     0   :  { %vm45_vm0 = vcmask 261120   ;;  %s247_s1 = inlined_call_operand.vmem [shape: bf16[32,128], index: 1, kind: input, shape index: {}]   ;;  %s248_s0 = inlined_call_operand.vmem [shape: bf16[32,32], index: 0, kind: input, shape index: {}]   ;;  %s249_s2 = inlined_call_operand.vmem [shape: bf16[32,128], index: 2, kind: output, shape index: {0}]   ;;  %s250_s3 = inlined_call_operand.vmem [shape: f32[1,8,128], index: 3, kind: output, shape index: {1}]   ;;  %s251_s4 = inlined_call_operand.vmem [shape: f32[1,8,128], index: 4, kind: output, shape index: {2}]  }
   0x1   :  { %v194_v0 = vld [vmem:[%s247_s1] sm:$0xff]   ;;  %v195_v1 = vld [vmem:[%s247_s1 + $0x8] sm:$0xff]  }
   0x2   :  { %186 = vmatprep.subr.bf16.mxu0 %v194_v0  ;;  %v196_v2 = vld [vmem:[%s248_s0] sm:$0xff]   ;;  %v197_v3 = vld [vmem:[%s248_s0 + $0x8] sm:$0xff]  }
   0x3   :  { %187 = vmatpush3.bf16.msra.mxu0 %v194_v0  ;;  %190 = vmatprep.mubr.msk.bf16.mxu0 %vm45_vm0, %v196_v2 }
   0x4   :  { %188 = vmatprep.subr.bf16.mxu0 %v195_v1 }
   0x7   :  { %189 = vmatpush3.bf16.msra.mxu0 %v195_v1 }
   0xa   :  { %191 = vmatmul.mubr.msk.bf16.vlgmr.msra.gmra.mrb[0].mxu0 %vm45_vm0, %v197_v3 }
  0xdd   :  { %v192_v4 = vpop.f32.mrb[0].mxu0 }
  0xde   :  { %v86_v5 = vpop.f32.mrb[1].mxu0  ;;  %v132_v13 = vmul.f32 %v192_v4, %v192_v4 }
  0xdf   :  { %v193_v6 = vpop.f32.mrb[2].mxu0  ;;  %v130_v9 = vmul.f32 %v86_v5, %v86_v5 }
  0xe0   :  { %v179_v7 = vpack.c.bf16 %v193_v6, %v192_v4  ;;  %v89_v8 = vpop.f32.mrb[3].mxu0  ;;  %v133_v16 = vmul.f32 %v193_v6, %v193_v6 }
  0xe1   :  { %v174_v10 = vpack.c.bf16 %v89_v8, %v86_v5  ;;  %v121_v11 = vadd.f32 %v89_v8, %v86_v5  ;;  %v131_v12 = vmul.f32 %v89_v8, %v89_v8 }
  0xe2   :  { %181 = vst [vmem:[%s249_s2 + $0x8] sm:$0xff] %v179_v7  }
  0xe3   :  { %175 = vst [vmem:[%s249_s2] sm:$0xff] %v174_v10   ;;  %v122_v14 = vadd.f32 %v192_v4, %v121_v11  ;;  %v134_v15 = vadd.f32 %v131_v12, %v130_v9 }
  0xe5   :  { %v123_v17 = vadd.f32 %v193_v6, %v122_v14  ;;  %v135_v18 = vadd.f32 %v134_v15, %v132_v13 }
  0xe7   :  { %v124_v19 = vrot.slane %v123_v17, 4  ;;  %v136_v20 = vadd.f32 %v135_v18, %v133_v16 }
  0xe9   :  { %v125_v21 = vadd.f32 %v124_v19, %v123_v17  ;;  %v137_v22 = vrot.slane %v136_v20, 4 }
  0xeb   :  { %v126_v23 = vrot.slane %v125_v21, 2  ;;  %v138_v24 = vadd.f32 %v137_v22, %v136_v20 }
  0xed   :  { %v127_v25 = vadd.f32 %v126_v23, %v125_v21  ;;  %v139_v26 = vrot.slane %v138_v24, 2 }
  0xef   :  { %v128_v27 = vrot.slane %v127_v25, 1  ;;  %v140_v28 = vadd.f32 %v139_v26, %v138_v24 }
  0xf1   :  { %v129_v29 = vadd.f32 %v128_v27, %v127_v25  ;;  %v141_v30 = vrot.slane %v140_v28, 1 }
  0xf3   :  { %v142_v31 = vadd.f32 %v141_v30, %v140_v28  ;;  %143 = vst [vmem:[%s250_s3] sm:$0xff] %v129_v29 }
  0xf5   :  { %144 = vst [vmem:[%s251_s4] sm:$0xff] %v142_v31 }

// kernel: issegnet_forward.50
= control target key start
LH: loop header
LB: loop body
LE: loop exit
PB: predicated region body
PF: predicated region fallthrough
CT: control target
= control target key end

     0   :  { %s140_s0 = inlined_call_operand.vmem [shape: bf16[32,128], index: 0, kind: input, shape index: {}]   ;;  %s141_s1 = inlined_call_operand.vmem [shape: f32[1,128], index: 1, kind: input, shape index: {}]   ;;  %s142_s2 = inlined_call_operand.vmem [shape: f32[1,128], index: 2, kind: input, shape index: {}]   ;;  %s143_s3 = inlined_call_operand.vmem [shape: bf16[32,128], index: 3, kind: output, shape index: {}]  }
   0x1   :  { %v83_v0 = vld [vmem:[%s140_s0] sm:$0xff]   ;;  %v100_v4 = vld [vmem:[%s140_s0 + $0x8] sm:$0xff]  }
   0x2   :  { %v72_v1 = vld [vmem:[%s141_s1] ss:$0 sm:$0xff]  ;;  %v84_v2 = vunpack.c.l.bf16 %v83_v0  ;;  %v85_v3 = vunpack.c.h.bf16 %v83_v0  ;;  %v88_v6 = vunpack.c.l.bf16 %v100_v4  ;;  %v89_v7 = vunpack.c.h.bf16 %v100_v4 }
   0x3   :  { %v73_v5 = vld [vmem:[%s142_s2] ss:$0 sm:$0xff] }
   0x4   :  { %v29_v8 = vmul.f32 %v84_v2, %v72_v1  ;;  %v30_v9 = vmul.f32 %v85_v3, %v72_v1  ;;  %v31_v10 = vmul.f32 %v88_v6, %v72_v1  ;;  %v32_v11 = vmul.f32 %v89_v7, %v72_v1 }
   0x6   :  { %v40_v12 = vadd.f32 %v73_v5, %v29_v8  ;;  %v41_v13 = vadd.f32 %v73_v5, %v30_v9  ;;  %v42_v14 = vadd.f32 %v73_v5, %v31_v10  ;;  %v43_v15 = vadd.f32 %v73_v5, %v32_v11 }
   0x8   :  { %v44_v16 = vmax.f32 %v40_v12, 0.0  ;;  %v45_v17 = vmax.f32 %v41_v13, 0.0  ;;  %v46_v18 = vmax.f32 %v42_v14, 0.0  ;;  %v47_v19 = vmax.f32 %v43_v15, 0.0 }
   0xa   :  { %v93_v20 = vpack.c.bf16 %v45_v17, %v44_v16  ;;  %v98_v21 = vpack.c.bf16 %v47_v19, %v46_v18 }
   0xc   :  { %94 = vst [vmem:[%s143_s3] sm:$0xff] %v93_v20   ;;  %101 = vst [vmem:[%s143_s3 + $0x8] sm:$0xff] %v98_v21  }

// kernel: issegnet_forward.48
= control target key start
LH: loop header
LB: loop body
LE: loop exit
PB: predicated region body
PF: predicated region fallthrough
CT: control target
= control target key end

     0   :  { %vm1280_vm0 = vcmask 1041409   ;;  %vm1283_vm1 = vcmask 1042434   ;;  %vm1286_vm2 = vcmask 1043459   ;;  %vm1402_vm3 = vcmask 254976   ;;  %s3645_s0 = inlined_call_operand.vmem [shape: bf16[8,2,4,2,32], index: 0, kind: input, shape index: {}]   ;;  %s3646_s1 = inlined_call_operand.vmem [shape: f32[1,1,1,1,32], index: 1, kind: input, shape index: {}]   ;;  %s3647_s2 = inlined_call_operand.vmem [shape: f32[1,1,1,1,32], index: 2, kind: input, shape index: {}]   ;;  %s3648_s3 = inlined_call_operand.vmem [shape: bf16[8,2,4,2,32], index: 3, kind: input, shape index: {}]   ;;  %s3649_s4 = inlined_call_operand.vmem [shape: bf16[8,4,32], index: 4, kind: output, shape index: {}]  }
   0x1   :  { %v1479_v0 = vld [vmem:[%s3645_s0] sm:$0x1]  ;;  %v1484_v1 = vld [vmem:[%s3645_s0 + $0x1] sm:$0x1]  ;;  %v1489_v2 = vld [vmem:[%s3645_s0 + $0x2] sm:$0x1] }
   0x2   :  { %v1494_v3 = vld [vmem:[%s3645_s0 + $0x3] sm:$0x1]  ;;  %v1499_v4 = vld [vmem:[%s3645_s0 + $0x4] sm:$0x1]  ;;  %v1504_v5 = vld [vmem:[%s3645_s0 + $0x5] sm:$0x1] }
   0x3   :  { %v1509_v6 = vld [vmem:[%s3645_s0 + $0x6] sm:$0x1]  ;;  %v1514_v7 = vld [vmem:[%s3645_s0 + $0x7] sm:$0x1]  ;;  %v1519_v8 = vld [vmem:[%s3645_s0 + $0x8] sm:$0x1] }
   0x4   :  { %v1524_v9 = vld [vmem:[%s3645_s0 + $0x9] sm:$0x1]  ;;  %v1529_v10 = vld [vmem:[%s3645_s0 + $0xa] sm:$0x1]  ;;  %v1534_v11 = vld [vmem:[%s3645_s0 + $0xb] sm:$0x1] }
   0x5   :  { %v1539_v12 = vld [vmem:[%s3645_s0 + $0xc] sm:$0x1]  ;;  %v1544_v13 = vld [vmem:[%s3645_s0 + $0xd] sm:$0x1]  ;;  %v1549_v14 = vld [vmem:[%s3645_s0 + $0xe] sm:$0x1] }
   0x6   :  { %v1554_v15 = vld [vmem:[%s3645_s0 + $0xf] sm:$0x1]  ;;  %v1559_v16 = vld [vmem:[%s3645_s0 + $0x10] sm:$0x1]  ;;  %v1564_v17 = vld [vmem:[%s3645_s0 + $0x11] sm:$0x1] }
   0x7   :  { %v1569_v18 = vld [vmem:[%s3645_s0 + $0x12] sm:$0x1]  ;;  %v1574_v19 = vld [vmem:[%s3645_s0 + $0x13] sm:$0x1]  ;;  %v1579_v20 = vld [vmem:[%s3645_s0 + $0x14] sm:$0x1] }
   0x8   :  { %v1586_v23 = vld [vmem:[%s3645_s0 + $0x15] sm:$0x1]  ;;  %v1591_v24 = vld [vmem:[%s3645_s0 + $0x16] sm:$0x1]  ;;  %v1596_v25 = vld [vmem:[%s3645_s0 + $0x17] sm:$0x1] }
   0x9   :  { %v1601_v26 = vld [vmem:[%s3645_s0 + $0x18] sm:$0x1]  ;;  %v1610_v31 = vld [vmem:[%s3645_s0 + $0x19] sm:$0x1]  ;;  %v1615_v32 = vld [vmem:[%s3645_s0 + $0x1a] sm:$0x1] }
   0xa   :  { %v1620_v33 = vld [vmem:[%s3645_s0 + $0x1b] sm:$0x1]  ;;  %v1625_v34 = vld [vmem:[%s3645_s0 + $0x1c] sm:$0x1]  ;;  %v1634_v39 = vld [vmem:[%s3645_s0 + $0x1d] sm:$0x1] }
   0xb   :  { %v1639_v40 = vld [vmem:[%s3645_s0 + $0x1e] sm:$0x1]  ;;  %v1644_v41 = vld [vmem:[%s3645_s0 + $0x1f] sm:$0x1]  ;;  %v1649_v42 = vld [vmem:[%s3645_s0 + $0x20] sm:$0x1] }
   0xc   :  { %v1658_v47 = vld [vmem:[%s3645_s0 + $0x21] sm:$0x1]  ;;  %v1663_v48 = vld [vmem:[%s3645_s0 + $0x22] sm:$0x1]  ;;  %v1668_v49 = vld [vmem:[%s3645_s0 + $0x23] sm:$0x1] }
   0xd   :  { %v1673_v50 = vld [vmem:[%s3645_s0 + $0x24] sm:$0x1]  ;;  %v1682_v55 = vld [vmem:[%s3645_s0 + $0x25] sm:$0x1]  ;;  %v1687_v56 = vld [vmem:[%s3645_s0 + $0x26] sm:$0x1] }
   0xe   :  { %v1692_v57 = vld [vmem:[%s3645_s0 + $0x27] sm:$0x1]  ;;  %v1700_v62 = vld [vmem:[%s3645_s0 + $0x28] sm:$0x1]  ;;  %v1705_v63 = vld [vmem:[%s3645_s0 + $0x29] sm:$0x1] }
   0xf   :  { %3760 = vst [vmem:[#allocation2_spill] sm:$0xff] %v1700_v62  ;;  %3761 = vst [vmem:[#allocation3_spill] sm:$0xff] %v1705_v63  ;;  %v1710_v54 = vld [vmem:[%s3645_s0 + $0x2a] sm:$0x1]  ;;  %v1719_v53 = vld [vmem:[%s3645_s0 + $0x2b] sm:$0x1]  ;;  %v3771_v63 = vunpack.c.l.bf16 %v1479_v0  ;;  %v3775_v0 = vunpack.c.l.bf16 %v1499_v4  ;;  %v3779_v4 = vunpack.c.l.bf16 %v1519_v8  ;;  %v3783_v8 = vunpack.c.l.bf16 %v1539_v12 }
  0x10   :  { %3762 = vst [vmem:[#allocation4_spill] sm:$0xff] %v1710_v54  ;;  %3763 = vst [vmem:[#allocation5_spill] sm:$0xff] %v1719_v53  ;;  %v1724_v52 = vld [vmem:[%s3645_s0 + $0x2c] sm:$0x1]  ;;  %v1729_v59 = vld [vmem:[%s3645_s0 + $0x2d] sm:$0x1]  ;;  %v3787_v12 = vunpack.c.l.bf16 %v1559_v16  ;;  %v3791_v16 = vunpack.c.l.bf16 %v1579_v20  ;;  %v3795_v20 = vunpack.c.l.bf16 %v1601_v26  ;;  %v3799_v26 = vunpack.c.l.bf16 %v1625_v34 }
  0x11   :  { %3764 = vst [vmem:[#allocation6_spill] sm:$0xff] %v1724_v52  ;;  %3765 = vst [vmem:[#allocation7_spill] sm:$0xff] %v1729_v59  ;;  %v1738_v46 = vld [vmem:[%s3645_s0 + $0x2e] sm:$0x1]  ;;  %v1743_v45 = vld [vmem:[%s3645_s0 + $0x2f] sm:$0x1]  ;;  %v3773_v52 = vunpack.c.l.bf16 %v1489_v2  ;;  %v3777_v2 = vunpack.c.l.bf16 %v1509_v6  ;;  %v3781_v6 = vunpack.c.l.bf16 %v1529_v10  ;;  %v3785_v10 = vunpack.c.l.bf16 %v1549_v14 }
  0x12   :  { %3766 = vst [vmem:[#allocation8_spill] sm:$0xff] %v1738_v46  ;;  %3767 = vst [vmem:[#allocation9_spill] sm:$0xff] %v1743_v45  ;;  %v1748_v60 = vld [vmem:[%s3645_s0 + $0x30] sm:$0x1]  ;;  %v1757_v43 = vld [vmem:[%s3645_s0 + $0x31] sm:$0x1]  ;;  %v3774_v45 = vunpack.c.l.bf16 %v1494_v3  ;;  %v3778_v3 = vunpack.c.l.bf16 %v1514_v7  ;;  %v3782_v7 = vunpack.c.l.bf16 %v1534_v11  ;;  %v3786_v11 = vunpack.c.l.bf16 %v1554_v15 }
  0x13   :  { %3768 = vst [vmem:[#allocation10_spill] sm:$0xff] %v1748_v60  ;;  %v1762_v38 = vld [vmem:[%s3645_s0 + $0x32] sm:$0x1]  ;;  %v1767_v61 = vld [vmem:[%s3645_s0 + $0x33] sm:$0x1]  ;;  %v3789_v14 = vunpack.c.l.bf16 %v1569_v18  ;;  %v3790_v15 = vunpack.c.l.bf16 %v1574_v19  ;;  %v3793_v18 = vunpack.c.l.bf16 %v1591_v24  ;;  %v3794_v19 = vunpack.c.l.bf16 %v1596_v25 }
  0x14   :  { %v1776_v36 = vld [vmem:[%s3645_s0 + $0x34] sm:$0x1]  ;;  %v1781_v35 = vld [vmem:[%s3645_s0 + $0x35] sm:$0x1]  ;;  %v1786_v58 = vld [vmem:[%s3645_s0 + $0x36] sm:$0x1]  ;;  %v3797_v24 = vunpack.c.l.bf16 %v1615_v32  ;;  %v3798_v25 = vunpack.c.l.bf16 %v1620_v33  ;;  %v3801_v32 = vunpack.c.l.bf16 %v1639_v40  ;;  %v3802_v33 = vunpack.c.l.bf16 %v1644_v41 }
  0x15   :  { %v1795_v29 = vld [vmem:[%s3645_s0 + $0x37] sm:$0x1]  ;;  %v1800_v28 = vld [vmem:[%s3645_s0 + $0x38] sm:$0x1]  ;;  %v1805_v51 = vld [vmem:[%s3645_s0 + $0x39] sm:$0x1]  ;;  %v3803_v34 = vunpack.c.l.bf16 %v1649_v42  ;;  %v3805_v40 = vunpack.c.l.bf16 %v1663_v48  ;;  %v3806_v41 = vunpack.c.l.bf16 %v1668_v49  ;;  %v3807_v42 = vunpack.c.l.bf16 %v1673_v50 }
  0x16   :  { %3769 = vst [vmem:[#allocation11_spill] sm:$0xff] %v1795_v29  ;;  %3770 = vst [vmem:[#allocation12_spill] sm:$0xff] %v1800_v28  ;;  %v1814_v22 = vld [vmem:[%s3645_s0 + $0x3a] sm:$0x1]  ;;  %v1819_v21 = vld [vmem:[%s3645_s0 + $0x3b] sm:$0x1]  ;;  %v3772_v29 = vunpack.c.l.bf16 %v1484_v1  ;;  %v3776_v1 = vunpack.c.l.bf16 %v1504_v5  ;;  %v3780_v5 = vunpack.c.l.bf16 %v1524_v9  ;;  %v3784_v9 = vunpack.c.l.bf16 %v1544_v13 }
  0x17   :  { %v1824_v44 = vld [vmem:[%s3645_s0 + $0x3c] sm:$0x1]  ;;  %v1833_v53 = vld [vmem:[%s3645_s0 + $0x3d] sm:$0x1]  ;;  %v1838_v54 = vld [vmem:[%s3645_s0 + $0x3e] sm:$0x1]  ;;  %v3788_v13 = vunpack.c.l.bf16 %v1564_v17  ;;  %v3792_v17 = vunpack.c.l.bf16 %v1586_v23  ;;  %v3796_v23 = vunpack.c.l.bf16 %v1610_v31  ;;  %v3800_v31 = vunpack.c.l.bf16 %v1634_v39 }
  0x18   :  { %v1843_v37 = vld [vmem:[%s3645_s0 + $0x3f] sm:$0x1]  ;;  %v1856_v62 = vld [vmem:[%s3646_s1] ss:$0 sm:$0xff]  ;;  %v3804_v39 = vunpack.c.l.bf16 %v1658_v47  ;;  %v3808_v47 = vunpack.c.l.bf16 %v1682_v55  ;;  %v3810_v48 = vunpack.c.l.bf16 %v1687_v56  ;;  %v3812_v49 = vunpack.c.l.bf16 %v1692_v57  ;;  %v3817_v27 = vld [vmem:[#allocation3_spill] sm:$0xff] }
  0x19   :  { %v1868_v28 = vmul.f32 %v1856_v62, %v3771_v63  ;;  %v1873_v30 = vmul.f32 %v1856_v62, %v3772_v29  ;;  %v1878_v60 = vmul.f32 %v1856_v62, %v3773_v52  ;;  %v1883_v46 = vmul.f32 %v1856_v62, %v3774_v45  ;;  %v3814_v59 = vld [vmem:[#allocation2_spill] sm:$0xff] }
  0x1a   :  { %v1888_v63 = vmul.f32 %v1856_v62, %v3775_v0  ;;  %v1893_v29 = vmul.f32 %v1856_v62, %v3776_v1  ;;  %v1898_v52 = vmul.f32 %v1856_v62, %v3777_v2  ;;  %v1903_v45 = vmul.f32 %v1856_v62, %v3778_v3 }
  0x1b   :  { %v1908_v0 = vmul.f32 %v1856_v62, %v3779_v4  ;;  %v1913_v1 = vmul.f32 %v1856_v62, %v3780_v5  ;;  %v1918_v2 = vmul.f32 %v1856_v62, %v3781_v6  ;;  %v1923_v3 = vmul.f32 %v1856_v62, %v3782_v7 }
  0x1c   :  { %v1928_v4 = vmul.f32 %v1856_v62, %v3783_v8  ;;  %v1933_v5 = vmul.f32 %v1856_v62, %v3784_v9  ;;  %v1938_v6 = vmul.f32 %v1856_v62, %v3785_v10  ;;  %v1943_v7 = vmul.f32 %v1856_v62, %v3786_v11 }
  0x1d   :  { %v1948_v8 = vmul.f32 %v1856_v62, %v3787_v12  ;;  %v1953_v9 = vmul.f32 %v1856_v62, %v3788_v13  ;;  %v1958_v10 = vmul.f32 %v1856_v62, %v3789_v14  ;;  %v1963_v11 = vmul.f32 %v1856_v62, %v3790_v15 }
  0x1e   :  { %v1968_v12 = vmul.f32 %v1856_v62, %v3791_v16  ;;  %v1973_v13 = vmul.f32 %v1856_v62, %v3792_v17  ;;  %v1978_v14 = vmul.f32 %v1856_v62, %v3793_v18  ;;  %v1983_v15 = vmul.f32 %v1856_v62, %v3794_v19 }
  0x1f   :  { %v1988_v16 = vmul.f32 %v1856_v62, %v3795_v20  ;;  %v1993_v17 = vmul.f32 %v1856_v62, %v3796_v23  ;;  %v1998_v18 = vmul.f32 %v1856_v62, %v3797_v24  ;;  %v2003_v19 = vmul.f32 %v1856_v62, %v3798_v25 }
  0x20   :  { %v2008_v20 = vmul.f32 %v1856_v62, %v3799_v26  ;;  %v2013_v23 = vmul.f32 %v1856_v62, %v3800_v31  ;;  %v2018_v24 = vmul.f32 %v1856_v62, %v3801_v32  ;;  %v2023_v25 = vmul.f32 %v1856_v62, %v3802_v33 }
  0x21   :  { %v2028_v26 = vmul.f32 %v1856_v62, %v3803_v34  ;;  %v2033_v31 = vmul.f32 %v1856_v62, %v3804_v39  ;;  %v2038_v32 = vmul.f32 %v1856_v62, %v3805_v40  ;;  %v2043_v33 = vmul.f32 %v1856_v62, %v3806_v41 }
  0x22   :  { %v2048_v34 = vmul.f32 %v1856_v62, %v3807_v42  ;;  %v2053_v39 = vmul.f32 %v1856_v62, %v3808_v47  ;;  %v2058_v40 = vmul.f32 %v1856_v62, %v3810_v48  ;;  %v2063_v41 = vmul.f32 %v1856_v62, %v3812_v49 }
  0x23   :  { %v3815_v50 = vunpack.c.l.bf16 %v3814_v59  ;;  %v3818_v55 = vunpack.c.l.bf16 %v3817_v27 }
  0x24   :  { %3809 = vst [vmem:[#allocation13_spill] sm:$0xff] %v2053_v39  ;;  %3811 = vst [vmem:[#allocation14_spill] sm:$0xff] %v2058_v40  ;;  %v3820_v39 = vld [vmem:[#allocation4_spill] sm:$0xff]  ;;  %v3823_v40 = vld [vmem:[#allocation5_spill] sm:$0xff] }
  0x25   :  { %3813 = vst [vmem:[#allocation15_spill] sm:$0xff] %v2063_v41  ;;  %v2068_v42 = vmul.f32 %v1856_v62, %v3815_v50  ;;  %v2073_v47 = vmul.f32 %v1856_v62, %v3818_v55  ;;  %v3821_v56 = vunpack.c.l.bf16 %v3820_v39  ;;  %v3824_v57 = vunpack.c.l.bf16 %v3823_v40  ;;  %v3826_v41 = vld [vmem:[#allocation6_spill] sm:$0xff] }
  0x26   :  { %v3827_v59 = vunpack.c.l.bf16 %v3826_v41 }
  0x27   :  { %3816 = vst [vmem:[#allocation2_spill] sm:$0xff] %v2068_v42  ;;  %3819 = vst [vmem:[#allocation3_spill] sm:$0xff] %v2073_v47  ;;  %v2078_v48 = vmul.f32 %v1856_v62, %v3821_v56  ;;  %v2083_v49 = vmul.f32 %v1856_v62, %v3824_v57  ;;  %v3828_v42 = vld [vmem:[#allocation7_spill] sm:$0xff]  ;;  %v3830_v47 = vld [vmem:[#allocation8_spill] sm:$0xff] }
  0x28   :  { %v2088_v50 = vmul.f32 %v1856_v62, %v3827_v59  ;;  %v3829_v27 = vunpack.c.l.bf16 %v3828_v42  ;;  %v3831_v39 = vunpack.c.l.bf16 %v3830_v47  ;;  %v3836_v42 = vunpack.c.l.bf16 %v1757_v43 }
  0x29   :  { %3822 = vst [vmem:[#allocation4_spill] sm:$0xff] %v2078_v48  ;;  %3825 = vst [vmem:[#allocation5_spill] sm:$0xff] %v2083_v49  ;;  %v3832_v48 = vld [vmem:[#allocation9_spill] sm:$0xff]  ;;  %v3834_v49 = vld [vmem:[#allocation10_spill] sm:$0xff]  ;;  %v3837_v47 = vunpack.c.l.bf16 %v1762_v38  ;;  %v3842_v43 = vunpack.c.l.bf16 %v1781_v35  ;;  %v3843_v38 = vunpack.c.l.bf16 %v1786_v58  ;;  %v3849_v58 = vunpack.c.l.bf16 %v1805_v51 }
  0x2a   :  { %v2093_v55 = vmul.f32 %v1856_v62, %v3829_v27  ;;  %v2098_v56 = vmul.f32 %v1856_v62, %v3831_v39  ;;  %v3833_v40 = vunpack.c.l.bf16 %v3832_v48  ;;  %v3835_v41 = vunpack.c.l.bf16 %v3834_v49  ;;  %v2153_v35 = vld [vmem:[%s3647_s2] ss:$0 sm:$0xff] }
  0x2b   :  { %v2113_v27 = vmul.f32 %v1856_v62, %v3836_v42  ;;  %v2118_v39 = vmul.f32 %v1856_v62, %v3837_v47  ;;  %v3839_v48 = vunpack.c.l.bf16 %v1767_v61  ;;  %v3841_v49 = vunpack.c.l.bf16 %v1776_v36 }
  0x2c   :  { %v2103_v57 = vmul.f32 %v1856_v62, %v3833_v40  ;;  %v2108_v59 = vmul.f32 %v1856_v62, %v3835_v41  ;;  %v2133_v42 = vmul.f32 %v1856_v62, %v3842_v43  ;;  %v2138_v47 = vmul.f32 %v1856_v62, %v3843_v38 }
  0x2d   :  { %3838 = vst [vmem:[#allocation6_spill] sm:$0xff] %v2118_v39  ;;  %v2123_v40 = vmul.f32 %v1856_v62, %v3839_v48  ;;  %v2128_v41 = vmul.f32 %v1856_v62, %v3841_v49  ;;  %v3844_v39 = vld [vmem:[#allocation11_spill] sm:$0xff]  ;;  %v2158_v43 = vmul.f32 %v1856_v62, %v3849_v58  ;;  %v3853_v51 = vunpack.c.l.bf16 %v1833_v53 }
  0x2e   :  { %v3845_v61 = vunpack.c.l.bf16 %v3844_v39  ;;  %v3850_v39 = vunpack.c.l.bf16 %v1814_v22  ;;  %v3854_v22 = vunpack.c.l.bf16 %v1838_v54  ;;  %v2196_v53 = vadd.f32 %v2153_v35, %v1873_v30 }
  0x2f   :  { %3840 = vst [vmem:[#allocation7_spill] sm:$0xff] %v2123_v40  ;;  %v3846_v40 = vld [vmem:[#allocation12_spill] sm:$0xff]  ;;  %v2178_v58 = vmul.f32 %v1856_v62, %v3853_v51  ;;  %v2204_v54 = vadd.f32 %v2153_v35, %v1883_v46  ;;  %v2216_v30 = vadd.f32 %v2153_v35, %v1898_v52  ;;  %v2224_v46 = vadd.f32 %v2153_v35, %v1908_v0  ;;  %v3877_v51 = vld [vmem:[#allocation14_spill] sm:$0xff] }
  0x30   :  { %v2143_v48 = vmul.f32 %v1856_v62, %v3845_v61  ;;  %v3847_v36 = vunpack.c.l.bf16 %v3846_v40  ;;  %v2163_v38 = vmul.f32 %v1856_v62, %v3850_v39  ;;  %v3851_v40 = vunpack.c.l.bf16 %v1819_v21 }
  0x31   :  { %v2183_v39 = vmul.f32 %v1856_v62, %v3854_v22  ;;  %v3855_v21 = vunpack.c.l.bf16 %v1843_v37  ;;  %v2208_v37 = vadd.f32 %v2153_v35, %v1888_v63  ;;  %v2232_v63 = vadd.f32 %v2153_v35, %v1918_v2  ;;  %v3879_v22 = vld [vmem:[#allocation15_spill] sm:$0xff] }
  0x32   :  { %v2148_v49 = vmul.f32 %v1856_v62, %v3847_v36  ;;  %v2168_v61 = vmul.f32 %v1856_v62, %v3851_v40  ;;  %v3852_v36 = vunpack.c.l.bf16 %v1824_v44  ;;  %v2192_v44 = vadd.f32 %v2153_v35, %v1868_v28 }
  0x33   :  { %v2188_v40 = vmul.f32 %v1856_v62, %v3855_v21  ;;  %v2212_v28 = vadd.f32 %v2153_v35, %v1893_v29  ;;  %v2236_v29 = vadd.f32 %v2153_v35, %v1923_v3  ;;  %v2240_v52 = vadd.f32 %v2153_v35, %v1928_v4  ;;  %v3881_v21 = vld [vmem:[#allocation2_spill] sm:$0xff] }
  0x34   :  { %3848 = vst [vmem:[#allocation8_spill] sm:$0xff] %v2148_v49  ;;  %v2173_v49 = vmul.f32 %v1856_v62, %v3852_v36  ;;  %v2200_v36 = vadd.f32 %v2153_v35, %v1878_v60  ;;  %v2220_v60 = vadd.f32 %v2153_v35, %v1903_v45  ;;  %v2228_v62 = vadd.f32 %v2153_v35, %v1913_v1 }
  0x35   :  { %v2244_v45 = vadd.f32 %v2153_v35, %v1933_v5  ;;  %v2248_v0 = vadd.f32 %v2153_v35, %v1938_v6  ;;  %v2252_v1 = vadd.f32 %v2153_v35, %v1943_v7  ;;  %v2256_v2 = vadd.f32 %v2153_v35, %v1948_v8 }
  0x36   :  { %v2260_v3 = vadd.f32 %v2153_v35, %v1953_v9  ;;  %v2264_v4 = vadd.f32 %v2153_v35, %v1958_v10  ;;  %v2268_v5 = vadd.f32 %v2153_v35, %v1963_v11  ;;  %v2272_v6 = vadd.f32 %v2153_v35, %v1968_v12 }
  0x37   :  { %v2276_v7 = vadd.f32 %v2153_v35, %v1973_v13  ;;  %v2280_v8 = vadd.f32 %v2153_v35, %v1978_v14  ;;  %v2284_v9 = vadd.f32 %v2153_v35, %v1983_v15  ;;  %v2288_v10 = vadd.f32 %v2153_v35, %v1988_v16 }
  0x38   :  { %3856 = vst [vmem:[#allocation9_spill] sm:$0xff] %v2264_v4  ;;  %3857 = vst [vmem:[#allocation10_spill] sm:$0xff] %v2268_v5  ;;  %v2292_v11 = vadd.f32 %v2153_v35, %v1993_v17  ;;  %v2296_v12 = vadd.f32 %v2153_v35, %v1998_v18  ;;  %v2300_v13 = vadd.f32 %v2153_v35, %v2003_v19  ;;  %v2734_v5 = vld [vmem:[%s3648_s3 + $0x28] sm:$0x1]  ;;  %v2739_v4 = vld [vmem:[%s3648_s3 + $0x29] sm:$0x1] }
  0x39   :  { %3858 = vst [vmem:[#allocation11_spill] sm:$0xff] %v2272_v6  ;;  %3859 = vst [vmem:[#allocation12_spill] sm:$0xff] %v2276_v7  ;;  %v2304_v14 = vadd.f32 %v2153_v35, %v2008_v20  ;;  %v2308_v15 = vadd.f32 %v2153_v35, %v2013_v23  ;;  %v2312_v16 = vadd.f32 %v2153_v35, %v2018_v24  ;;  %v2720_v7 = vld [vmem:[%s3648_s3 + $0x26] sm:$0x1]  ;;  %v2801_v6 = vld [vmem:[%s3648_s3 + $0x33] sm:$0x1] }
  0x3a   :  { %3860 = vst [vmem:[#allocation16_spill] sm:$0xff] %v2280_v8  ;;  %3861 = vst [vmem:[#allocation17_spill] sm:$0xff] %v2284_v9  ;;  %v2316_v17 = vadd.f32 %v2153_v35, %v2023_v25  ;;  %v2320_v18 = vadd.f32 %v2153_v35, %v2028_v26  ;;  %v2324_v19 = vadd.f32 %v2153_v35, %v2033_v31  ;;  %v3875_v25 = vld [vmem:[#allocation13_spill] sm:$0xff]  ;;  %v2715_v8 = vld [vmem:[%s3648_s3 + $0x25] sm:$0x1] }
  0x3b   :  { %3862 = vst [vmem:[#allocation18_spill] sm:$0xff] %v2288_v10  ;;  %3863 = vst [vmem:[#allocation19_spill] sm:$0xff] %v2292_v11  ;;  %v2328_v20 = vadd.f32 %v2153_v35, %v2038_v32  ;;  %v2332_v23 = vadd.f32 %v2153_v35, %v2043_v33  ;;  %v2336_v24 = vadd.f32 %v2153_v35, %v2048_v34  ;;  %v2648_v11 = vld [vmem:[%s3648_s3 + $0x1a] sm:$0x1]  ;;  %v2763_v10 = vld [vmem:[%s3648_s3 + $0x2d] sm:$0x1] }
  0x3c   :  { %3864 = vst [vmem:[#allocation20_spill] sm:$0xff] %v2296_v12  ;;  %3865 = vst [vmem:[#allocation21_spill] sm:$0xff] %v2300_v13  ;;  %v2340_v26 = vadd.f32 %v2153_v35, %v3875_v25  ;;  %v2344_v31 = vadd.f32 %v2153_v35, %v3877_v51  ;;  %v2348_v32 = vadd.f32 %v2153_v35, %v3879_v22  ;;  %v2643_v12 = vld [vmem:[%s3648_s3 + $0x19] sm:$0x1]  ;;  %v2696_v13 = vld [vmem:[%s3648_s3 + $0x22] sm:$0x1] }
  0x3d   :  { %3866 = vst [vmem:[#allocation22_spill] sm:$0xff] %v2304_v14  ;;  %3867 = vst [vmem:[#allocation23_spill] sm:$0xff] %v2308_v15  ;;  %v2352_v33 = vadd.f32 %v2153_v35, %v3881_v21  ;;  %v2368_v22 = vadd.f32 %v2153_v35, %v2088_v50  ;;  %v2372_v21 = vadd.f32 %v2153_v35, %v2093_v55  ;;  %v2691_v14 = vld [vmem:[%s3648_s3 + $0x21] sm:$0x1]  ;;  %v2725_v15 = vld [vmem:[%s3648_s3 + $0x27] sm:$0x1] }
  0x3e   :  { %3868 = vst [vmem:[#allocation24_spill] sm:$0xff] %v2312_v16  ;;  %3869 = vst [vmem:[#allocation25_spill] sm:$0xff] %v2316_v17  ;;  %v2388_v50 = vadd.f32 %v2153_v35, %v2113_v27  ;;  %v2408_v27 = vadd.f32 %v2153_v35, %v2138_v47  ;;  %v2428_v47 = vadd.f32 %v2153_v35, %v2168_v61  ;;  %v2542_v61 = vld [vmem:[%s3648_s3 + $0x8] sm:$0x1]  ;;  %v2672_v17 = vld [vmem:[%s3648_s3 + $0x1e] sm:$0x1] }
  0x3f   :  { %3870 = vst [vmem:[#allocation26_spill] sm:$0xff] %v2320_v18  ;;  %3871 = vst [vmem:[#allocation27_spill] sm:$0xff] %v2324_v19  ;;  %v2575_v19 = vld [vmem:[%s3648_s3 + $0xd] sm:$0x1]  ;;  %v2667_v18 = vld [vmem:[%s3648_s3 + $0x1d] sm:$0x1] }
  0x40   :  { %3872 = vst [vmem:[#allocation28_spill] sm:$0xff] %v2328_v20  ;;  %3873 = vst [vmem:[#allocation29_spill] sm:$0xff] %v2332_v23  ;;  %v3883_v23 = vld [vmem:[#allocation3_spill] sm:$0xff]  ;;  %v2701_v20 = vld [vmem:[%s3648_s3 + $0x23] sm:$0x1] }
  0x41   :  { %3874 = vst [vmem:[#allocation30_spill] sm:$0xff] %v2336_v24  ;;  %3876 = vst [vmem:[#allocation13_spill] sm:$0xff] %v2340_v26  ;;  %v2356_v34 = vadd.f32 %v2153_v35, %v3883_v23  ;;  %v3885_v24 = vld [vmem:[#allocation4_spill] sm:$0xff]  ;;  %v3887_v26 = vld [vmem:[#allocation5_spill] sm:$0xff]  ;;  %v2376_v23 = vadd.f32 %v2153_v35, %v2098_v56 }
  0x42   :  { %3878 = vst [vmem:[#allocation14_spill] sm:$0xff] %v2344_v31  ;;  %3880 = vst [vmem:[#allocation15_spill] sm:$0xff] %v2348_v32  ;;  %v2360_v25 = vadd.f32 %v2153_v35, %v3885_v24  ;;  %v2364_v51 = vadd.f32 %v2153_v35, %v3887_v26  ;;  %v2380_v24 = vadd.f32 %v2153_v35, %v2103_v57  ;;  %v2658_v32 = vld [vmem:[%s3648_s3 + $0x1c] sm:$0x1]  ;;  %v2677_v31 = vld [vmem:[%s3648_s3 + $0x1f] sm:$0x1] }
  0x43   :  { %3882 = vst [vmem:[#allocation2_spill] sm:$0xff] %v2352_v33  ;;  %3884 = vst [vmem:[#allocation3_spill] sm:$0xff] %v2356_v34  ;;  %v2384_v26 = vadd.f32 %v2153_v35, %v2108_v59  ;;  %v2400_v57 = vadd.f32 %v2153_v35, %v2128_v41  ;;  %v2404_v59 = vadd.f32 %v2153_v35, %v2133_v42  ;;  %v2608_v34 = vld [vmem:[%s3648_s3 + $0x13] sm:$0x1]  ;;  %v2706_v16 = vld [vmem:[%s3648_s3 + $0x24] sm:$0x1] }
  0x44   :  { %3886 = vst [vmem:[#allocation4_spill] sm:$0xff] %v2360_v25  ;;  %3888 = vst [vmem:[#allocation5_spill] sm:$0xff] %v2364_v51  ;;  %v2420_v41 = vadd.f32 %v2153_v35, %v2158_v43  ;;  %v2424_v42 = vadd.f32 %v2153_v35, %v2163_v38  ;;  %v2440_v43 = vadd.f32 %v2153_v35, %v2183_v39  ;;  %v2580_v51 = vld [vmem:[%s3648_s3 + $0xe] sm:$0x1]  ;;  %v2603_v25 = vld [vmem:[%s3648_s3 + $0x12] sm:$0x1] }
  0x45   :  { %3889 = vst [vmem:[#allocation31_spill] sm:$0xff] %v2368_v22  ;;  %3890 = vst [vmem:[#allocation32_spill] sm:$0xff] %v2372_v21  ;;  %v3895_v22 = vld [vmem:[#allocation6_spill] sm:$0xff]  ;;  %v3897_v21 = vld [vmem:[#allocation7_spill] sm:$0xff]  ;;  %v2444_v38 = vadd.f32 %v2153_v35, %v2188_v40 }
  0x46   :  { %3891 = vst [vmem:[#allocation33_spill] sm:$0xff] %v2376_v23  ;;  %3892 = vst [vmem:[#allocation34_spill] sm:$0xff] %v2380_v24  ;;  %v2392_v55 = vadd.f32 %v2153_v35, %v3895_v22  ;;  %v2396_v56 = vadd.f32 %v2153_v35, %v3897_v21  ;;  %v2412_v22 = vadd.f32 %v2153_v35, %v2143_v48  ;;  %v2527_v24 = vld [vmem:[%s3648_s3 + $0x5] sm:$0x1]  ;;  %v2532_v23 = vld [vmem:[%s3648_s3 + $0x6] sm:$0x1] }
  0x47   :  { %3893 = vst [vmem:[#allocation35_spill] sm:$0xff] %v2384_v26  ;;  %3894 = vst [vmem:[#allocation36_spill] sm:$0xff] %v2388_v50  ;;  %v2432_v48 = vadd.f32 %v2153_v35, %v2173_v49  ;;  %v2537_v40 = vld [vmem:[%s3648_s3 + $0x7] sm:$0x1]  ;;  %v2556_v50 = vld [vmem:[%s3648_s3 + $0xa] sm:$0x1] }
  0x48   :  { %3896 = vst [vmem:[#allocation6_spill] sm:$0xff] %v2392_v55  ;;  %3898 = vst [vmem:[#allocation7_spill] sm:$0xff] %v2396_v56  ;;  %v3903_v55 = vld [vmem:[#allocation8_spill] sm:$0xff]  ;;  %v2561_v26 = vld [vmem:[%s3648_s3 + $0xb] sm:$0x1] }
  0x49   :  { %3899 = vst [vmem:[#allocation37_spill] sm:$0xff] %v2400_v57  ;;  %3900 = vst [vmem:[#allocation38_spill] sm:$0xff] %v2404_v59  ;;  %v2416_v21 = vadd.f32 %v2153_v35, %v3903_v55  ;;  %v2436_v55 = vadd.f32 %v2153_v35, %v2178_v58  ;;  %v2513_v58 = vld [vmem:[%s3648_s3 + $0x3] sm:$0x1]  ;;  %v2518_v35 = vld [vmem:[%s3648_s3 + $0x4] sm:$0x1] }
  0x4a   :  { %3901 = vst [vmem:[#allocation39_spill] sm:$0xff] %v2408_v27  ;;  %3902 = vst [vmem:[#allocation40_spill] sm:$0xff] %v2412_v22  ;;  %v2566_v57 = vld [vmem:[%s3648_s3 + $0xc] sm:$0x1]  ;;  %v2585_v56 = vld [vmem:[%s3648_s3 + $0xf] sm:$0x1] }
  0x4b   :  { %3904 = vst [vmem:[#allocation8_spill] sm:$0xff] %v2416_v21  ;;  %3905 = vst [vmem:[#allocation41_spill] sm:$0xff] %v2420_v41  ;;  %v2590_v27 = vld [vmem:[%s3648_s3 + $0x10] sm:$0x1]  ;;  %v2598_v41 = vld [vmem:[%s3648_s3 + $0x11] sm:$0x1] }
  0x4c   :  { %3906 = vst [vmem:[#allocation42_spill] sm:$0xff] %v2424_v42  ;;  %3907 = vst [vmem:[#allocation43_spill] sm:$0xff] %v2428_v47  ;;  %v2503_v47 = vld [vmem:[%s3648_s3 + $0x1] sm:$0x1]  ;;  %v2613_v22 = vld [vmem:[%s3648_s3 + $0x14] sm:$0x1] }
  0x4d   :  { %3908 = vst [vmem:[#allocation44_spill] sm:$0xff] %v2432_v48  ;;  %3909 = vst [vmem:[#allocation45_spill] sm:$0xff] %v2436_v55  ;;  %v2494_v55 = vld [vmem:[%s3648_s3] sm:$0x1]  ;;  %v2508_v48 = vld [vmem:[%s3648_s3 + $0x2] sm:$0x1] }
  0x4e   :  { %3910 = vst [vmem:[#allocation46_spill] sm:$0xff] %v2440_v43  ;;  %3911 = vst [vmem:[#allocation47_spill] sm:$0xff] %v2444_v38  ;;  %v2551_v43 = vld [vmem:[%s3648_s3 + $0x9] sm:$0x1]  ;;  %v2619_v21 = vld [vmem:[%s3648_s3 + $0x15] sm:$0x1] }
  0x4f   :  { %3923 = vst [vmem:[#allocation48_spill] sm:$0xff] %v2603_v25  ;;  %3924 = vst [vmem:[#allocation49_spill] sm:$0xff] %v2608_v34  ;;  %v2624_v38 = vld [vmem:[%s3648_s3 + $0x16] sm:$0x1]  ;;  %v2629_v59 = vld [vmem:[%s3648_s3 + $0x17] sm:$0x1] }
  0x50   :  { %3925 = vst [vmem:[#allocation50_spill] sm:$0xff] %v2613_v22  ;;  %3926 = vst [vmem:[#allocation51_spill] sm:$0xff] %v2624_v38  ;;  %v2634_v39 = vld [vmem:[%s3648_s3 + $0x18] sm:$0x1]  ;;  %v2653_v49 = vld [vmem:[%s3648_s3 + $0x1b] sm:$0x1] }
  0x51   :  { %3927 = vst [vmem:[#allocation52_spill] sm:$0xff] %v2629_v59  ;;  %3928 = vst [vmem:[#allocation53_spill] sm:$0xff] %v2634_v39  ;;  %v2682_v42 = vld [vmem:[%s3648_s3 + $0x20] sm:$0x1]  ;;  %v2744_v33 = vld [vmem:[%s3648_s3 + $0x2a] sm:$0x1] }
  0x52   :  { %3929 = vst [vmem:[#allocation54_spill] sm:$0xff] %v2648_v11  ;;  %3930 = vst [vmem:[#allocation55_spill] sm:$0xff] %v2653_v49  ;;  %v2753_v34 = vld [vmem:[%s3648_s3 + $0x2b] sm:$0x1]  ;;  %v2758_v25 = vld [vmem:[%s3648_s3 + $0x2c] sm:$0x1] }
  0x53   :  { %3931 = vst [vmem:[#allocation56_spill] sm:$0xff] %v2658_v32  ;;  %3932 = vst [vmem:[#allocation57_spill] sm:$0xff] %v2672_v17  ;;  %v2772_v59 = vld [vmem:[%s3648_s3 + $0x2e] sm:$0x1]  ;;  %v2777_v38 = vld [vmem:[%s3648_s3 + $0x2f] sm:$0x1] }
  0x54   :  { %3933 = vst [vmem:[#allocation58_spill] sm:$0xff] %v2677_v31  ;;  %3934 = vst [vmem:[#allocation59_spill] sm:$0xff] %v2682_v42  ;;  %v2782_v9 = vld [vmem:[%s3648_s3 + $0x30] sm:$0x1]  ;;  %v2791_v49 = vld [vmem:[%s3648_s3 + $0x31] sm:$0x1] }
  0x55   :  { %3935 = vst [vmem:[#allocation60_spill] sm:$0xff] %v2691_v14  ;;  %3936 = vst [vmem:[#allocation61_spill] sm:$0xff] %v2696_v13  ;;  %v2796_v11 = vld [vmem:[%s3648_s3 + $0x32] sm:$0x1]  ;;  %v2810_v31 = vld [vmem:[%s3648_s3 + $0x34] sm:$0x1]  ;;  %v3968_v14 = vunpack.c.l.bf16 %v2503_v47 }
  0x56   :  { %3937 = vst [vmem:[#allocation62_spill] sm:$0xff] %v2701_v20  ;;  %3938 = vst [vmem:[#allocation63_spill] sm:$0xff] %v2706_v16  ;;  %v2815_v17 = vld [vmem:[%s3648_s3 + $0x35] sm:$0x1]  ;;  %v2820_v22 = vld [vmem:[%s3648_s3 + $0x36] sm:$0x1] }
  0x57   :  { %3939 = vst [vmem:[#allocation64_spill] sm:$0xff] %v2715_v8  ;;  %3940 = vst [vmem:[#allocation65_spill] sm:$0xff] %v2720_v7  ;;  %v2829_v20 = vld [vmem:[%s3648_s3 + $0x37] sm:$0x1]  ;;  %v2834_v13 = vld [vmem:[%s3648_s3 + $0x38] sm:$0x1] }
  0x58   :  { %3941 = vst [vmem:[#allocation66_spill] sm:$0xff] %v2725_v15  ;;  %3942 = vst [vmem:[#allocation67_spill] sm:$0xff] %v2734_v5  ;;  %v2839_v39 = vld [vmem:[%s3648_s3 + $0x39] sm:$0x1]  ;;  %v2848_v15 = vld [vmem:[%s3648_s3 + $0x3a] sm:$0x1] }
  0x59   :  { %3943 = vst [vmem:[#allocation68_spill] sm:$0xff] %v2739_v4  ;;  %3944 = vst [vmem:[#allocation69_spill] sm:$0xff] %v2744_v33  ;;  %v2853_v7 = vld [vmem:[%s3648_s3 + $0x3b] sm:$0x1]  ;;  %v2858_v32 = vld [vmem:[%s3648_s3 + $0x3c] sm:$0x1] }
  0x5a   :  { %3945 = vst [vmem:[#allocation70_spill] sm:$0xff] %v2753_v34  ;;  %3946 = vst [vmem:[#allocation71_spill] sm:$0xff] %v2758_v25  ;;  %v2867_v34 = vld [vmem:[%s3648_s3 + $0x3d] sm:$0x1]  ;;  %v2872_v33 = vld [vmem:[%s3648_s3 + $0x3e] sm:$0x1]  ;;  %v3971_v25 = vunpack.c.l.bf16 %v2508_v48  ;;  %v3983_v48 = vunpack.c.l.bf16 %v2537_v40  ;;  %v3991_v40 = vunpack.c.l.bf16 %v2561_v26  ;;  %v3999_v26 = vunpack.c.l.bf16 %v2585_v56 }
  0x5b   :  { %3947 = vst [vmem:[#allocation72_spill] sm:$0xff] %v2763_v10  ;;  %3948 = vst [vmem:[#allocation73_spill] sm:$0xff] %v2772_v59  ;;  %v2877_v42 = vld [vmem:[%s3648_s3 + $0x3f] sm:$0x1]  ;;  %v3964_v59 = vmax.f32 %v2192_v44, 0.0  ;;  %v3965_v10 = vunpack.c.l.bf16 %v2494_v55  ;;  %v3967_v8 = vmax.f32 %v2196_v53, 0.0  ;;  %v3974_v44 = vunpack.c.l.bf16 %v2513_v58 }
  0x5c   :  { %3949 = vst [vmem:[#allocation74_spill] sm:$0xff] %v2777_v38  ;;  %3950 = vst [vmem:[#allocation75_spill] sm:$0xff] %v2782_v9  ;;  %v3970_v5 = vmax.f32 %v2200_v36, 0.0  ;;  %v3973_v38 = vmax.f32 %v2204_v54, 0.0  ;;  %v3977_v53 = vunpack.c.l.bf16 %v2518_v35  ;;  %v3980_v47 = vmax.f32 %v2216_v30, 0.0 }
  0x5d   :  { %3951 = vst [vmem:[#allocation76_spill] sm:$0xff] %v2801_v6  ;;  %3952 = vst [vmem:[#allocation77_spill] sm:$0xff] %v2810_v31  ;;  %v2904_v4 = vadd.f32 %v3968_v14, %v3967_v8  ;;  %v3978_v8 = vmax.f32 %v2212_v28, 0.0  ;;  %v3979_v14 = vunpack.c.l.bf16 %v2527_v24  ;;  %v3982_v54 = vmax.f32 %v2220_v60, 0.0 }
  0x5e   :  { %3953 = vst [vmem:[#allocation78_spill] sm:$0xff] %v2815_v17  ;;  %3954 = vst [vmem:[#allocation79_spill] sm:$0xff] %v2820_v22  ;;  %v2910_v16 = vadd.f32 %v3971_v25, %v3970_v5  ;;  %v2916_v9 = vadd.f32 %v3974_v44, %v3973_v38  ;;  %v3981_v5 = vunpack.c.l.bf16 %v2532_v23  ;;  %v3985_v38 = vunpack.c.l.bf16 %v2542_v61 }
  0x5f   :  { %3955 = vst [vmem:[#allocation80_spill] sm:$0xff] %v2829_v20  ;;  %3956 = vst [vmem:[#allocation81_spill] sm:$0xff] %v2834_v13  ;;  %v2898_v20 = vadd.f32 %v3965_v10, %v3964_v59  ;;  %v3976_v10 = vmax.f32 %v2208_v37, 0.0  ;;  %v484_v36 = vadd.f32 %v3979_v14, %v3978_v8  ;;  %v486_v55 = vadd.f32 %v3983_v48, %v3982_v54  ;;  %v4004_v48 = vld [vmem:[#allocation9_spill] sm:$0xff] }
  0x60   :  { %3957 = vst [vmem:[#allocation82_spill] sm:$0xff] %v2839_v39  ;;  %3958 = vst [vmem:[#allocation83_spill] sm:$0xff] %v2848_v15  ;;  %v485_v25 = vadd.f32 %v3981_v5, %v3980_v47  ;;  %v3984_v37 = vmax.f32 %v2224_v46, 0.0  ;;  %v3986_v28 = vmax.f32 %v2228_v62, 0.0  ;;  %v3987_v24 = vunpack.c.l.bf16 %v2551_v43  ;;  %v4099_v15 = vld [vmem:[#allocation69_spill] sm:$0xff] }
  0x61   :  { %3959 = vst [vmem:[#allocation84_spill] sm:$0xff] %v2853_v7  ;;  %3960 = vst [vmem:[#allocation85_spill] sm:$0xff] %v2858_v32  ;;  %v483_v59 = vadd.f32 %v3977_v53, %v3976_v10  ;;  %v3988_v30 = vmax.f32 %v2232_v63, 0.0  ;;  %v3989_v23 = vunpack.c.l.bf16 %v2556_v50  ;;  %v3990_v60 = vmax.f32 %v2236_v29, 0.0  ;;  %v4091_v32 = vld [vmem:[#allocation67_spill] sm:$0xff]  ;;  %v4095_v7 = vld [vmem:[#allocation68_spill] sm:$0xff] }
  0x62   :  { %3961 = vst [vmem:[#allocation86_spill] sm:$0xff] %v2867_v34  ;;  %3962 = vst [vmem:[#allocation87_spill] sm:$0xff] %v2872_v33  ;;  %v487_v58 = vadd.f32 %v3985_v38, %v3984_v37  ;;  %v488_v35 = vadd.f32 %v3987_v24, %v3986_v28  ;;  %v3992_v46 = vmax.f32 %v2240_v52, 0.0  ;;  %v3993_v61 = vunpack.c.l.bf16 %v2566_v57  ;;  %v4006_v37 = vld [vmem:[#allocation48_spill] sm:$0xff]  ;;  %v4008_v28 = vld [vmem:[#allocation10_spill] sm:$0xff] }
  0x63   :  { %3963 = vst [vmem:[#allocation88_spill] sm:$0xff] %v2877_v42  ;;  %3966 = vst [vmem:[#allocation89_spill] sm:$0xff] %v2898_v20  ;;  %v489_v44 = vadd.f32 %v3989_v23, %v3988_v30  ;;  %v490_v10 = vadd.f32 %v3991_v40, %v3990_v60  ;;  %v3994_v62 = vmax.f32 %v2244_v45, 0.0  ;;  %v3995_v43 = vunpack.c.l.bf16 %v2575_v19  ;;  %v4010_v24 = vld [vmem:[#allocation49_spill] sm:$0xff]  ;;  %v4012_v23 = vld [vmem:[#allocation11_spill] sm:$0xff] }
  0x64   :  { %3969 = vst [vmem:[#allocation90_spill] sm:$0xff] %v2904_v4  ;;  %3972 = vst [vmem:[#allocation91_spill] sm:$0xff] %v2910_v16  ;;  %v491_v53 = vadd.f32 %v3993_v61, %v3992_v46  ;;  %v3996_v63 = vmax.f32 %v2248_v0, 0.0  ;;  %v3997_v50 = vunpack.c.l.bf16 %v2580_v51  ;;  %v3998_v29 = vmax.f32 %v2252_v1, 0.0  ;;  %v4014_v60 = vld [vmem:[#allocation50_spill] sm:$0xff]  ;;  %v4016_v46 = vld [vmem:[#allocation12_spill] sm:$0xff] }
  0x65   :  { %3975 = vst [vmem:[#allocation92_spill] sm:$0xff] %v2916_v9  ;;  %v492_v8 = vadd.f32 %v3995_v43, %v3994_v62  ;;  %v4000_v52 = vmax.f32 %v2256_v2, 0.0  ;;  %v4001_v57 = vunpack.c.l.bf16 %v2590_v27  ;;  %v4002_v45 = vmax.f32 %v2260_v3, 0.0  ;;  %v4019_v62 = vld [vmem:[#allocation16_spill] sm:$0xff]  ;;  %v4067_v16 = vld [vmem:[#allocation61_spill] sm:$0xff]  ;;  %v4071_v4 = vld [vmem:[#allocation62_spill] sm:$0xff] }
  0x66   :  { %v493_v14 = vadd.f32 %v3997_v50, %v3996_v63  ;;  %v494_v47 = vadd.f32 %v3999_v26, %v3998_v29  ;;  %v4003_v19 = vunpack.c.l.bf16 %v2598_v41  ;;  %v4005_v0 = vmax.f32 %v4004_v48, 0.0  ;;  %v4021_v63 = vld [vmem:[#allocation51_spill] sm:$0xff]  ;;  %v4023_v26 = vld [vmem:[#allocation17_spill] sm:$0xff]  ;;  %v4027_v48 = vld [vmem:[#allocation18_spill] sm:$0xff] }
  0x67   :  { %v495_v5 = vadd.f32 %v4001_v57, %v4000_v52  ;;  %v4007_v51 = vunpack.c.l.bf16 %v4006_v37  ;;  %v4009_v1 = vmax.f32 %v4008_v28, 0.0  ;;  %v4011_v56 = vunpack.c.l.bf16 %v4010_v24  ;;  %v4025_v57 = vld [vmem:[#allocation52_spill] sm:$0xff]  ;;  %v4029_v37 = vld [vmem:[#allocation53_spill] sm:$0xff]  ;;  %v4075_v20 = vld [vmem:[#allocation63_spill] sm:$0xff] }
  0x68   :  { %v496_v54 = vadd.f32 %v4003_v19, %v4002_v45  ;;  %v4013_v2 = vmax.f32 %v4012_v23, 0.0  ;;  %v4015_v27 = vunpack.c.l.bf16 %v4014_v60  ;;  %v4017_v3 = vmax.f32 %v4016_v46, 0.0  ;;  %v4034_v23 = vld [vmem:[#allocation20_spill] sm:$0xff]  ;;  %v4036_v60 = vld [vmem:[#allocation54_spill] sm:$0xff]  ;;  %v4083_v33 = vld [vmem:[#allocation65_spill] sm:$0xff] }
  0x69   :  { %v497_v38 = vadd.f32 %v4007_v51, %v4005_v0  ;;  %v498_v30 = vadd.f32 %v4011_v56, %v4009_v1  ;;  %v4018_v41 = vunpack.c.l.bf16 %v2619_v21  ;;  %v4020_v43 = vmax.f32 %v4019_v62, 0.0  ;;  %v4031_v1 = vld [vmem:[#allocation19_spill] sm:$0xff]  ;;  %v4063_v9 = vld [vmem:[#allocation60_spill] sm:$0xff]  ;;  %v4087_v34 = vld [vmem:[#allocation66_spill] sm:$0xff] }
  0x6a   :  { %v499_v40 = vadd.f32 %v4015_v27, %v4013_v2  ;;  %v4022_v50 = vunpack.c.l.bf16 %v4021_v63  ;;  %v4024_v52 = vmax.f32 %v4023_v26, 0.0  ;;  %v4026_v45 = vunpack.c.l.bf16 %v4025_v57  ;;  %v4040_v62 = vld [vmem:[#allocation55_spill] sm:$0xff]  ;;  %v4079_v42 = vld [vmem:[#allocation64_spill] sm:$0xff]  ;;  %v4103_v39 = vld [vmem:[#allocation70_spill] sm:$0xff] }
  0x6b   :  { %v500_v61 = vadd.f32 %v4018_v41, %v4017_v3  ;;  %v4028_v0 = vmax.f32 %v4027_v48, 0.0  ;;  %v4030_v51 = vunpack.c.l.bf16 %v4029_v37  ;;  %v4032_v24 = vmax.f32 %v4031_v1, 0.0  ;;  %v4038_v3 = vld [vmem:[#allocation21_spill] sm:$0xff]  ;;  %v4046_v48 = vld [vmem:[#allocation23_spill] sm:$0xff]  ;;  %v4111_v22 = vld [vmem:[#allocation72_spill] sm:$0xff] }
  0x6c   :  { %v501_v29 = vadd.f32 %v4022_v50, %v4020_v43  ;;  %v502_v19 = vadd.f32 %v4026_v45, %v4024_v52  ;;  %v4033_v21 = vunpack.c.l.bf16 %v2643_v12  ;;  %v4035_v2 = vmax.f32 %v4034_v23, 0.0  ;;  %v4042_v50 = vld [vmem:[#allocation22_spill] sm:$0xff]  ;;  %v4044_v52 = vld [vmem:[#allocation56_spill] sm:$0xff]  ;;  %v4107_v13 = vld [vmem:[#allocation71_spill] sm:$0xff] }
  0x6d   :  { %v503_v28 = vadd.f32 %v4030_v51, %v4028_v0  ;;  %v4037_v27 = vunpack.c.l.bf16 %v4036_v60  ;;  %v4039_v41 = vmax.f32 %v4038_v3, 0.0  ;;  %v4041_v43 = vunpack.c.l.bf16 %v4040_v62  ;;  %v4049_v51 = vld [vmem:[#allocation24_spill] sm:$0xff]  ;;  %v4057_v62 = vld [vmem:[#allocation26_spill] sm:$0xff]  ;;  %v4115_v17 = vld [vmem:[#allocation73_spill] sm:$0xff] }
  0x6e   :  { %v504_v56 = vadd.f32 %v4033_v21, %v4032_v24  ;;  %v4043_v26 = vmax.f32 %v4042_v50, 0.0  ;;  %v4045_v57 = vunpack.c.l.bf16 %v4044_v52  ;;  %v4047_v0 = vmax.f32 %v4046_v48, 0.0  ;;  %v4051_v24 = vld [vmem:[#allocation57_spill] sm:$0xff]  ;;  %v4059_v50 = vld [vmem:[#allocation59_spill] sm:$0xff]  ;;  %v4119_v31 = vld [vmem:[#allocation74_spill] sm:$0xff] }
  0x6f   :  { %v505_v46 = vadd.f32 %v4037_v27, %v4035_v2  ;;  %v506_v63 = vadd.f32 %v4041_v43, %v4039_v41  ;;  %v4048_v12 = vunpack.c.l.bf16 %v2667_v18  ;;  %v4050_v1 = vmax.f32 %v4049_v51, 0.0  ;;  %v4053_v2 = vld [vmem:[#allocation25_spill] sm:$0xff]  ;;  %v4055_v27 = vld [vmem:[#allocation58_spill] sm:$0xff]  ;;  %v4123_v6 = vld [vmem:[#allocation75_spill] sm:$0xff] }
  0x70   :  { %v507_v45 = vadd.f32 %v4045_v57, %v4043_v26  ;;  %v4052_v21 = vunpack.c.l.bf16 %v4051_v24  ;;  %v4054_v60 = vmax.f32 %v4053_v2, 0.0  ;;  %v4056_v3 = vunpack.c.l.bf16 %v4055_v27  ;;  %v4061_v57 = vld [vmem:[#allocation27_spill] sm:$0xff] }
  0x71   :  { %v508_v37 = vadd.f32 %v4048_v12, %v4047_v0  ;;  %v4058_v43 = vmax.f32 %v4057_v62, 0.0  ;;  %v4060_v52 = vunpack.c.l.bf16 %v4059_v50  ;;  %v4062_v48 = vmax.f32 %v4061_v57, 0.0  ;;  %v4065_v12 = vld [vmem:[#allocation28_spill] sm:$0xff] }
  0x72   :  { %v509_v23 = vadd.f32 %v4052_v21, %v4050_v1  ;;  %v510_v41 = vadd.f32 %v4056_v3, %v4054_v60  ;;  %v4064_v18 = vunpack.c.l.bf16 %v4063_v9  ;;  %v4066_v51 = vmax.f32 %v4065_v12, 0.0  ;;  %v4069_v21 = vld [vmem:[#allocation29_spill] sm:$0xff]  ;;  %v4073_v3 = vld [vmem:[#allocation30_spill] sm:$0xff] }
  0x73   :  { %v511_v26 = vadd.f32 %v4060_v52, %v4058_v43  ;;  %v4068_v24 = vunpack.c.l.bf16 %v4067_v16  ;;  %v4070_v2 = vmax.f32 %v4069_v21, 0.0  ;;  %v4072_v27 = vunpack.c.l.bf16 %v4071_v4  ;;  %v4077_v52 = vld [vmem:[#allocation13_spill] sm:$0xff] }
  0x74   :  { %v512_v0 = vadd.f32 %v4064_v18, %v4062_v48  ;;  %v4074_v62 = vmax.f32 %v4073_v3, 0.0  ;;  %v4076_v50 = vunpack.c.l.bf16 %v4075_v20  ;;  %v4078_v57 = vmax.f32 %v4077_v52, 0.0  ;;  %v4081_v18 = vld [vmem:[#allocation14_spill] sm:$0xff] }
  0x75   :  { %v513_v1 = vadd.f32 %v4068_v24, %v4066_v51  ;;  %v514_v60 = vadd.f32 %v4072_v27, %v4070_v2  ;;  %v4080_v9 = vunpack.c.l.bf16 %v4079_v42  ;;  %v4082_v12 = vmax.f32 %v4081_v18, 0.0  ;;  %v4085_v24 = vld [vmem:[#allocation15_spill] sm:$0xff]  ;;  %v4089_v27 = vld [vmem:[#allocation2_spill] sm:$0xff] }
  0x76   :  { %v515_v43 = vadd.f32 %v4076_v50, %v4074_v62  ;;  %v4084_v16 = vunpack.c.l.bf16 %v4083_v33  ;;  %v4086_v21 = vmax.f32 %v4085_v24, 0.0  ;;  %v4088_v4 = vunpack.c.l.bf16 %v4087_v34  ;;  %v4093_v50 = vld [vmem:[#allocation3_spill] sm:$0xff] }
  0x77   :  { %v516_v48 = vadd.f32 %v4080_v9, %v4078_v57  ;;  %v4090_v3 = vmax.f32 %v4089_v27, 0.0  ;;  %v4092_v20 = vunpack.c.l.bf16 %v4091_v32  ;;  %v4094_v52 = vmax.f32 %v4093_v50, 0.0  ;;  %v4097_v9 = vld [vmem:[#allocation4_spill] sm:$0xff] }
  0x78   :  { %v517_v51 = vadd.f32 %v4084_v16, %v4082_v12  ;;  %v518_v2 = vadd.f32 %v4088_v4, %v4086_v21  ;;  %v4096_v42 = vunpack.c.l.bf16 %v4095_v7  ;;  %v4098_v18 = vmax.f32 %v4097_v9, 0.0  ;;  %v4101_v16 = vld [vmem:[#allocation5_spill] sm:$0xff]  ;;  %v4105_v4 = vld [vmem:[#allocation31_spill] sm:$0xff] }
  0x79   :  { %v519_v62 = vadd.f32 %v4092_v20, %v4090_v3  ;;  %v4100_v33 = vunpack.c.l.bf16 %v4099_v15  ;;  %v4102_v24 = vmax.f32 %v4101_v16, 0.0  ;;  %v4104_v34 = vunpack.c.l.bf16 %v4103_v39  ;;  %v4109_v20 = vld [vmem:[#allocation32_spill] sm:$0xff] }
  0x7a   :  { %v520_v57 = vadd.f32 %v4096_v42, %v4094_v52  ;;  %v4106_v27 = vmax.f32 %v4105_v4, 0.0  ;;  %v4108_v32 = vunpack.c.l.bf16 %v4107_v13  ;;  %v4110_v50 = vmax.f32 %v4109_v20, 0.0  ;;  %v4113_v42 = vld [vmem:[#allocation33_spill] sm:$0xff] }
  0x7b   :  { %v521_v12 = vadd.f32 %v4100_v33, %v4098_v18  ;;  %v522_v21 = vadd.f32 %v4104_v34, %v4102_v24  ;;  %v4112_v7 = vunpack.c.l.bf16 %v4111_v22  ;;  %v4114_v9 = vmax.f32 %v4113_v42, 0.0  ;;  %v4117_v33 = vld [vmem:[#allocation34_spill] sm:$0xff]  ;;  %v4121_v34 = vld [vmem:[#allocation35_spill] sm:$0xff] }
  0x7c   :  { %v523_v3 = vadd.f32 %v4108_v32, %v4106_v27  ;;  %v4116_v15 = vunpack.c.l.bf16 %v4115_v17  ;;  %v4118_v16 = vmax.f32 %v4117_v33, 0.0  ;;  %v4120_v39 = vunpack.c.l.bf16 %v4119_v31  ;;  %v4125_v32 = vld [vmem:[#allocation36_spill] sm:$0xff] }
  0x7d   :  { %v524_v52 = vadd.f32 %v4112_v7, %v4110_v50  ;;  %v4122_v4 = vmax.f32 %v4121_v34, 0.0  ;;  %v4124_v13 = vunpack.c.l.bf16 %v4123_v6  ;;  %v4126_v20 = vmax.f32 %v4125_v32, 0.0  ;;  %v4128_v7 = vld [vmem:[#allocation6_spill] sm:$0xff]  ;;  %v4133_v31 = vld [vmem:[#allocation76_spill] sm:$0xff]  ;;  %v4135_v34 = vld [vmem:[#allocation37_spill] sm:$0xff] }
  0x7e   :  { %v525_v18 = vadd.f32 %v4116_v15, %v4114_v9  ;;  %v526_v24 = vadd.f32 %v4120_v39, %v4118_v16  ;;  %v4127_v22 = vunpack.c.l.bf16 %v2791_v49  ;;  %v4129_v42 = vmax.f32 %v4128_v7, 0.0  ;;  %v4131_v15 = vld [vmem:[#allocation7_spill] sm:$0xff]  ;;  %v4139_v49 = vld [vmem:[#allocation38_spill] sm:$0xff] }
  0x7f   :  { %v527_v27 = vadd.f32 %v4124_v13, %v4122_v4  ;;  %v4130_v17 = vunpack.c.l.bf16 %v2796_v11  ;;  %v4132_v33 = vmax.f32 %v4131_v15, 0.0  ;;  %v4134_v16 = vunpack.c.l.bf16 %v4133_v31  ;;  %v4137_v4 = vld [vmem:[#allocation77_spill] sm:$0xff]  ;;  %v4145_v15 = vld [vmem:[#allocation79_spill] sm:$0xff] }
  0x80   :  { %v528_v50 = vadd.f32 %v4127_v22, %v4126_v20  ;;  %v4136_v6 = vmax.f32 %v4135_v34, 0.0  ;;  %v4138_v13 = vunpack.c.l.bf16 %v4137_v4  ;;  %v4140_v20 = vmax.f32 %v4139_v49, 0.0  ;;  %v4141_v22 = vld [vmem:[#allocation78_spill] sm:$0xff]  ;;  %v4149_v4 = vld [vmem:[#allocation80_spill] sm:$0xff] }
  0x81   :  { %v529_v9 = vadd.f32 %v4130_v17, %v4129_v42  ;;  %v530_v39 = vadd.f32 %v4134_v16, %v4132_v33  ;;  %v4142_v7 = vunpack.c.l.bf16 %v4141_v22  ;;  %v4143_v17 = vld [vmem:[#allocation39_spill] sm:$0xff]  ;;  %v4146_v31 = vunpack.c.l.bf16 %v4145_v15  ;;  %v4147_v33 = vld [vmem:[#allocation40_spill] sm:$0xff]  ;;  %v4155_v15 = vld [vmem:[#allocation41_spill] sm:$0xff] }
  0x82   :  { %v531_v32 = vadd.f32 %v4138_v13, %v4136_v6  ;;  %v4144_v42 = vmax.f32 %v4143_v17, 0.0  ;;  %v4148_v34 = vmax.f32 %v4147_v33, 0.0  ;;  %v4150_v6 = vunpack.c.l.bf16 %v4149_v4  ;;  %v4151_v49 = vld [vmem:[#allocation8_spill] sm:$0xff] }
  0x83   :  { %v532_v11 = vadd.f32 %v4142_v7, %v4140_v20  ;;  %v4152_v22 = vmax.f32 %v4151_v49, 0.0  ;;  %v4153_v7 = vld [vmem:[#allocation81_spill] sm:$0xff]  ;;  %v4161_v49 = vld [vmem:[#allocation83_spill] sm:$0xff] }
  0x84   :  { %v533_v16 = vadd.f32 %v4146_v31, %v4144_v42  ;;  %v534_v13 = vadd.f32 %v4150_v6, %v4148_v34  ;;  %v4154_v20 = vunpack.c.l.bf16 %v4153_v7  ;;  %v4156_v31 = vmax.f32 %v4155_v15, 0.0  ;;  %v4157_v42 = vld [vmem:[#allocation82_spill] sm:$0xff] }
  0x85   :  { %v4158_v33 = vunpack.c.l.bf16 %v4157_v42  ;;  %v4159_v6 = vld [vmem:[#allocation42_spill] sm:$0xff]  ;;  %v4162_v7 = vunpack.c.l.bf16 %v4161_v49  ;;  %v4165_v42 = vld [vmem:[#allocation84_spill] sm:$0xff] }
  0x86   :  { %v535_v17 = vadd.f32 %v4154_v20, %v4152_v22  ;;  %v4160_v34 = vmax.f32 %v4159_v6, 0.0  ;;  %v4163_v22 = vld [vmem:[#allocation43_spill] sm:$0xff]  ;;  %v4167_v6 = vld [vmem:[#allocation44_spill] sm:$0xff] }
  0x87   :  { %v536_v4 = vadd.f32 %v4158_v33, %v4156_v31  ;;  %v4164_v15 = vmax.f32 %v4163_v22, 0.0  ;;  %v4166_v31 = vunpack.c.l.bf16 %v4165_v42  ;;  %v4168_v49 = vmax.f32 %v4167_v6, 0.0  ;;  %v4171_v42 = vld [vmem:[#allocation45_spill] sm:$0xff] }
  0x88   :  { %v537_v20 = vadd.f32 %v4162_v7, %v4160_v34  ;;  %v4169_v7 = vld [vmem:[#allocation85_spill] sm:$0xff] }
  0x89   :  { %v538_v33 = vadd.f32 %v4166_v31, %v4164_v15  ;;  %v4170_v34 = vunpack.c.l.bf16 %v4169_v7  ;;  %v4172_v15 = vmax.f32 %v4171_v42, 0.0  ;;  %v4173_v31 = vld [vmem:[#allocation86_spill] sm:$0xff]  ;;  %v4177_v42 = vld [vmem:[#allocation87_spill] sm:$0xff] }
  0x8a   :  { %v4174_v6 = vunpack.c.l.bf16 %v4173_v31  ;;  %v4178_v31 = vunpack.c.l.bf16 %v4177_v42  ;;  %v4181_v42 = vld [vmem:[#allocation88_spill] sm:$0xff] }
  0x8b   :  { %v539_v22 = vadd.f32 %v4170_v34, %v4168_v49  ;;  %v4175_v34 = vld [vmem:[#allocation46_spill] sm:$0xff] }
  0x8c   :  { %v540_v7 = vadd.f32 %v4174_v6, %v4172_v15  ;;  %v4176_v49 = vmax.f32 %v4175_v34, 0.0  ;;  %v4179_v15 = vld [vmem:[#allocation47_spill] sm:$0xff] }
  0x8d   :  { %v4180_v34 = vmax.f32 %v4179_v15, 0.0  ;;  %v4183_v15 = vld [vmem:[#allocation89_spill] sm:$0xff] }
  0x8e   :  { %v541_v6 = vadd.f32 %v4178_v31, %v4176_v49  ;;  %v4182_v31 = vunpack.c.l.bf16 %v4181_v42  ;;  %v3159_v42 = vmax.f32 %v4183_v15, %v483_v59  ;;  %v4187_v15 = vld [vmem:[#allocation91_spill] sm:$0xff] }
  0x8f   :  { %v3165_v59 = vmax.f32 %v4187_v15, %v485_v25  ;;  %v3174_v15 = vmax.f32 %v489_v44, %v493_v14  ;;  %v3176_v25 = vmax.f32 %v490_v10, %v494_v47  ;;  %v3194_v44 = vmax.f32 %v511_v26, %v515_v43 }
  0x90   :  { %v542_v49 = vadd.f32 %v4182_v31, %v4180_v34  ;;  %4184 = vst [vmem:[#allocation9_spill] sm:$0xff] %v3159_v42  ;;  %v4185_v31 = vld [vmem:[#allocation90_spill] sm:$0xff]  ;;  %v4189_v42 = vld [vmem:[#allocation92_spill] sm:$0xff]  ;;  %v3196_v10 = vmax.f32 %v512_v0, %v516_v48  ;;  %v3200_v14 = vmax.f32 %v514_v60, %v518_v2  ;;  %v3202_v47 = vmax.f32 %v519_v62, %v523_v3 }
  0x91   :  { %v3162_v34 = vmax.f32 %v4185_v31, %v484_v36  ;;  %4188 = vst [vmem:[#allocation10_spill] sm:$0xff] %v3165_v59  ;;  %v3168_v31 = vmax.f32 %v4189_v42, %v486_v55  ;;  %v3170_v36 = vmax.f32 %v487_v58, %v491_v53  ;;  %v3178_v59 = vmax.f32 %v495_v5, %v499_v40 }
  0x92   :  { %v3180_v42 = vmax.f32 %v496_v54, %v500_v61  ;;  %v3182_v55 = vmax.f32 %v497_v38, %v501_v29  ;;  %v3186_v53 = vmax.f32 %v503_v28, %v507_v45  ;;  %v3188_v58 = vmax.f32 %v504_v56, %v508_v37 }
  0x93   :  { %4186 = vst [vmem:[#allocation48_spill] sm:$0xff] %v3162_v34  ;;  %4190 = vst [vmem:[#allocation49_spill] sm:$0xff] %v3168_v31  ;;  %v3172_v34 = vmax.f32 %v488_v35, %v492_v8  ;;  %v3184_v31 = vmax.f32 %v498_v30, %v502_v19  ;;  %v3192_v35 = vmax.f32 %v506_v63, %v510_v41  ;;  %v1424_v2 = vrot.slane %v3176_v25, 9 }
  0x94   :  { %4191 = vst [vmem:[#allocation11_spill] sm:$0xff] %v3170_v36  ;;  %v3190_v36 = vmax.f32 %v505_v46, %v509_v23  ;;  %v3198_v8 = vmax.f32 %v513_v1, %v517_v51  ;;  %v3204_v5 = vmax.f32 %v520_v57, %v524_v52  ;;  %v3206_v54 = vmax.f32 %v521_v12, %v525_v18 }
  0x95   :  { %v3208_v38 = vmax.f32 %v522_v21, %v526_v24  ;;  %v3210_v30 = vmax.f32 %v527_v27, %v531_v32  ;;  %v3212_v40 = vmax.f32 %v528_v50, %v532_v11  ;;  %v3214_v61 = vmax.f32 %v529_v9, %v533_v16 }
  0x96   :  { %4192 = vst [vmem:[#allocation50_spill] sm:$0xff] %v3206_v54  ;;  %v3216_v29 = vmax.f32 %v530_v39, %v534_v13  ;;  %v3218_v19 = vmax.f32 %v535_v17, %v539_v22  ;;  %v3220_v28 = vmax.f32 %v536_v4, %v540_v7  ;;  %v3222_v56 = vmax.f32 %v537_v20, %v541_v6 }
  0x97   :  { %4193 = vst [vmem:[#allocation12_spill] sm:$0xff] %v3208_v38  ;;  %4194 = vst [vmem:[#allocation16_spill] sm:$0xff] %v3212_v40  ;;  %v3224_v46 = vmax.f32 %v538_v33, %v542_v49  ;;  %v4199_v63 = vld [vmem:[#allocation9_spill] sm:$0xff]  ;;  %v1422_v48 = vrot.slane %v3172_v34, 9  ;;  %v1423_v51 = vrot.slane %v3174_v15, 9  ;;  %v1425_v62 = vrot.slane %v3178_v59, 9 }
  0x98   :  { %4195 = vst [vmem:[#allocation51_spill] sm:$0xff] %v3214_v61  ;;  %4196 = vst [vmem:[#allocation17_spill] sm:$0xff] %v3218_v19  ;;  %v1417_v45 = vrot.slane %v4199_v63, 9  ;;  %v4201_v41 = vld [vmem:[#allocation10_spill] sm:$0xff]  ;;  %v1426_v57 = vrot.slane %v3180_v42, 9  ;;  %v1427_v12 = vrot.slane %v3182_v55, 9 }
  0x99   :  { %4197 = vst [vmem:[#allocation52_spill] sm:$0xff] %v3220_v28  ;;  %4198 = vst [vmem:[#allocation18_spill] sm:$0xff] %v3224_v46  ;;  %v1419_v26 = vrot.slane %v4201_v41, 9  ;;  %v1428_v21 = vrot.slane %v3184_v31, 9  ;;  %v1429_v3 = vrot.slane %v3186_v53, 9  ;;  %v1430_v52 = vrot.slane %v3188_v58, 9 }
  0x9a   :  { %v4200_v37 = vld [vmem:[#allocation48_spill] sm:$0xff]  ;;  %v4202_v0 = vld [vmem:[#allocation49_spill] sm:$0xff]  ;;  %v1431_v18 = vrot.slane %v3190_v36, 9  ;;  %v1432_v24 = vrot.slane %v3192_v35, 9  ;;  %v1433_v27 = vrot.slane %v3194_v44, 9  ;;  %v1434_v50 = vrot.slane %v3196_v10, 9 }
  0x9b   :  { %v1418_v23 = vrot.slane %v4200_v37, 9  ;;  %v1420_v1 = vrot.slane %v4202_v0, 9  ;;  %v4203_v60 = vld [vmem:[#allocation11_spill] sm:$0xff]  ;;  %v1435_v9 = vrot.slane %v3198_v8, 9  ;;  %v1436_v39 = vrot.slane %v3200_v14, 9 }
  0x9c   :  { %v1421_v43 = vrot.slane %v4203_v60, 9  ;;  %v1437_v32 = vrot.slane %v3202_v47, 9  ;;  %v1438_v11 = vrot.slane %v3204_v5, 9  ;;  %v1439_v16 = vrot.slane %v3206_v54, 9 }
  0x9d   :  { %v1440_v13 = vrot.slane %v3208_v38, 9  ;;  %v1441_v17 = vrot.slane %v3210_v30, 9  ;;  %v1442_v4 = vrot.slane %v3212_v40, 9  ;;  %v1443_v20 = vrot.slane %v3214_v61, 9 }
  0x9e   :  { %v1444_v33 = vrot.slane %v3216_v29, 9  ;;  %v1445_v22 = vrot.slane %v3218_v19, 9  ;;  %v1446_v7 = vrot.slane %v3220_v28, 9  ;;  %v1447_v6 = vrot.slane %v3222_v56, 9 }
  0x9f   :  { %v1448_v49 = vrot.slane %v3224_v46, 9  ;;  %v3259_v54 = vmax.f32 %v4199_v63, %v1417_v45  ;;  %v3262_v38 = vmax.f32 %v4200_v37, %v1418_v23  ;;  %v3265_v40 = vmax.f32 %v4201_v41, %v1419_v26 }
  0xa0   :  { %v3268_v61 = vmax.f32 %v4202_v0, %v1420_v1  ;;  %v3271_v19 = vmax.f32 %v4203_v60, %v1421_v43  ;;  %v3274_v28 = vmax.f32 %v3172_v34, %v1422_v48  ;;  %v3277_v46 = vmax.f32 %v3174_v15, %v1423_v51  ;;  %v4209_v48 = vld [vmem:[#allocation52_spill] sm:$0xff] }
  0xa1   :  { %v3280_v63 = vmax.f32 %v3176_v25, %v1424_v2  ;;  %v3283_v45 = vmax.f32 %v3178_v59, %v1425_v62  ;;  %v3286_v37 = vmax.f32 %v3180_v42, %v1426_v57  ;;  %v3289_v23 = vmax.f32 %v3182_v55, %v1427_v12 }
  0xa2   :  { %v3292_v41 = vmax.f32 %v3184_v31, %v1428_v21  ;;  %v3295_v34 = vmax.f32 %v3186_v53, %v1429_v3  ;;  %v3298_v15 = vmax.f32 %v3188_v58, %v1430_v52  ;;  %v3301_v25 = vmax.f32 %v3190_v36, %v1431_v18 }
  0xa3   :  { %v3304_v59 = vmax.f32 %v3192_v35, %v1432_v24  ;;  %v3307_v42 = vmax.f32 %v3194_v44, %v1433_v27  ;;  %v3310_v55 = vmax.f32 %v3196_v10, %v1434_v50  ;;  %v3313_v31 = vmax.f32 %v3198_v8, %v1435_v9  ;;  %v4204_v35 = vld [vmem:[#allocation50_spill] sm:$0xff]  ;;  %v4205_v44 = vld [vmem:[#allocation12_spill] sm:$0xff] }
  0xa4   :  { %v3316_v53 = vmax.f32 %v3200_v14, %v1436_v39  ;;  %v3319_v58 = vmax.f32 %v3202_v47, %v1437_v32  ;;  %v3322_v36 = vmax.f32 %v3204_v5, %v1438_v11  ;;  %v3325_v26 = vmax.f32 %v4204_v35, %v1439_v16  ;;  %v4206_v8 = vld [vmem:[#allocation16_spill] sm:$0xff]  ;;  %v4207_v14 = vld [vmem:[#allocation51_spill] sm:$0xff]  ;;  %v4208_v5 = vld [vmem:[#allocation17_spill] sm:$0xff] }
  0xa5   :  { %v3328_v0 = vmax.f32 %v4205_v44, %v1440_v13  ;;  %v3331_v10 = vmax.f32 %v3210_v30, %v1441_v17  ;;  %v3334_v1 = vmax.f32 %v4206_v8, %v1442_v4  ;;  %v3337_v60 = vmax.f32 %v4207_v14, %v1443_v20  ;;  %v4210_v30 = vld [vmem:[#allocation18_spill] sm:$0xff] }
  0xa6   :  { %v3340_v47 = vmax.f32 %v3216_v29, %v1444_v33  ;;  %v3343_v43 = vmax.f32 %v4208_v5, %v1445_v22  ;;  %v3346_v51 = vmax.f32 %v4209_v48, %v1446_v7  ;;  %v3349_v2 = vmax.f32 %v3222_v56, %v1447_v6 }
  0xa7   :  { %v3352_v62 = vmax.f32 %v4210_v30, %v1448_v49  ;;  %v735_v57 = vpack.c.bf16 %v3259_v54, %v3259_v54  ;;  %v736_v12 = vpack.c.bf16 %v3262_v38, %v3262_v38  ;;  %v737_v29 = vpack.c.bf16 %v3265_v40, %v3265_v40 }
  0xa8   :  { %v738_v21 = vpack.c.bf16 %v3268_v61, %v3268_v61  ;;  %v739_v3 = vpack.c.bf16 %v3271_v19, %v3271_v19  ;;  %v740_v56 = vpack.c.bf16 %v3274_v28, %v3274_v28  ;;  %v741_v52 = vpack.c.bf16 %v3277_v46, %v3277_v46 }
  0xa9   :  { %v742_v54 = vpack.c.bf16 %v3280_v63, %v3280_v63  ;;  %v743_v38 = vpack.c.bf16 %v3283_v45, %v3283_v45  ;;  %v744_v40 = vpack.c.bf16 %v3286_v37, %v3286_v37  ;;  %v745_v61 = vpack.c.bf16 %v3289_v23, %v3289_v23 }
  0xaa   :  { %v746_v19 = vpack.c.bf16 %v3292_v41, %v3292_v41  ;;  %v747_v28 = vpack.c.bf16 %v3295_v34, %v3295_v34  ;;  %v748_v46 = vpack.c.bf16 %v3298_v15, %v3298_v15  ;;  %v1450_v18 = vmov 1983009808  }
  0xab   :  { %v800_v24 = vunpack.c.l.s4 %v1450_v18  ;;  %v4211_v27 = vlaneseq  ;;  %v749_v9 = vpack.c.bf16 %v3301_v25, %v3301_v25  ;;  %v750_v39 = vpack.c.bf16 %v3304_v59, %v3304_v59 }
  0xac   :  { %v751_v32 = vpack.c.bf16 %v3307_v42, %v3307_v42  ;;  %v752_v11 = vpack.c.bf16 %v3310_v55, %v3310_v55  ;;  %v753_v16 = vpack.c.bf16 %v3313_v31, %v3313_v31  ;;  %v754_v13 = vpack.c.bf16 %v3316_v53, %v3316_v53 }
  0xad   :  { %v803_v50 = vshrl.u32 %v4211_v27, 7  ;;  %v755_v17 = vpack.c.bf16 %v3319_v58, %v3319_v58  ;;  %v801_v4 = vunpack.c.0.s8 %v800_v24  ;;  %v756_v20 = vpack.c.bf16 %v3322_v36, %v3322_v36 }
  0xae   :  { %v757_v33 = vpack.c.bf16 %v3325_v26, %v3325_v26  ;;  %v758_v22 = vpack.c.bf16 %v3328_v0, %v3328_v0  ;;  %v759_v7 = vpack.c.bf16 %v3331_v10, %v3331_v10  ;;  %v760_v6 = vpack.c.bf16 %v3334_v1, %v3334_v1 }
  0xaf   :  { %v761_v49 = vpack.c.bf16 %v3337_v60, %v3337_v60  ;;  %v762_v63 = vpack.c.bf16 %v3340_v47, %v3340_v47  ;;  %v3411_v45 = vsub.s32 %v801_v4, %v803_v50  ;;  %v763_v37 = vpack.c.bf16 %v3343_v43, %v3343_v43 }
  0xb0   :  { %v764_v23 = vpack.c.bf16 %v3346_v51, %v3346_v51  ;;  %v765_v41 = vpack.c.bf16 %v3349_v2, %v3349_v2  ;;  %v766_v34 = vpack.c.bf16 %v3352_v62, %v3352_v62 }
  0xb1   :  { %v3422_v15 = vrot.slane %v735_v57, %v3411_v45  ;;  %v3425_v25 = vrot.slane %v736_v12, %v3411_v45  ;;  %v3428_v59 = vrot.slane %v737_v29, %v3411_v45  ;;  %v3431_v42 = vrot.slane %v738_v21, %v3411_v45 }
  0xb2   :  { %v3434_v55 = vrot.slane %v739_v3, %v3411_v45  ;;  %v3437_v31 = vrot.slane %v740_v56, %v3411_v45  ;;  %v3440_v53 = vrot.slane %v741_v52, %v3411_v45  ;;  %v3443_v58 = vrot.slane %v742_v54, %v3411_v45 }
  0xb3   :  { %v3446_v36 = vrot.slane %v743_v38, %v3411_v45  ;;  %v3449_v35 = vrot.slane %v744_v40, %v3411_v45  ;;  %v3452_v26 = vrot.slane %v745_v61, %v3411_v45  ;;  %v3455_v44 = vrot.slane %v746_v19, %v3411_v45 }
  0xb4   :  { %v3458_v0 = vrot.slane %v747_v28, %v3411_v45  ;;  %v3461_v10 = vrot.slane %v748_v46, %v3411_v45  ;;  %v3464_v8 = vrot.slane %v749_v9, %v3411_v45  ;;  %v3467_v1 = vrot.slane %v750_v39, %v3411_v45 }
  0xb5   :  { %v3470_v14 = vrot.slane %v751_v32, %v3411_v45  ;;  %v3473_v60 = vrot.slane %v752_v11, %v3411_v45  ;;  %v3476_v47 = vrot.slane %v753_v16, %v3411_v45  ;;  %v3479_v5 = vrot.slane %v754_v13, %v3411_v45 }
  0xb6   :  { %v3482_v43 = vrot.slane %v755_v17, %v3411_v45  ;;  %v3485_v48 = vrot.slane %v756_v20, %v3411_v45  ;;  %v3488_v51 = vrot.slane %v757_v33, %v3411_v45  ;;  %v3491_v2 = vrot.slane %v758_v22, %v3411_v45 }
  0xb7   :  { %v3494_v30 = vrot.slane %v759_v7, %v3411_v45  ;;  %v3497_v62 = vrot.slane %v760_v6, %v3411_v45  ;;  %v3500_v57 = vrot.slane %v761_v49, %v3411_v45  ;;  %v3503_v12 = vrot.slane %v762_v63, %v3411_v45 }
  0xb8   :  { %v3506_v29 = vrot.slane %v763_v37, %v3411_v45  ;;  %v3509_v21 = vrot.slane %v764_v23, %v3411_v45  ;;  %v3512_v3 = vrot.slane %v765_v41, %v3411_v45  ;;  %v3515_v56 = vrot.slane %v766_v34, %v3411_v45 }
  0xb9   :  { %v1029_v52 = vrot.slane %v3422_v15, %v3411_v45  ;;  %v1036_v54 = vrot.slane %v3425_v25, %v3411_v45  ;;  %v1043_v38 = vrot.slane %v3428_v59, %v3411_v45  ;;  %v1050_v40 = vrot.slane %v3431_v42, %v3411_v45 }
  0xba   :  { %v1057_v61 = vrot.slane %v3434_v55, %v3411_v45  ;;  %v1064_v19 = vrot.slane %v3437_v31, %v3411_v45  ;;  %v1071_v28 = vrot.slane %v3440_v53, %v3411_v45  ;;  %v1078_v46 = vrot.slane %v3443_v58, %v3411_v45 }
  0xbb   :  { %v1085_v18 = vrot.slane %v3446_v36, %v3411_v45  ;;  %v1092_v24 = vrot.slane %v3449_v35, %v3411_v45  ;;  %v1099_v27 = vrot.slane %v3452_v26, %v3411_v45  ;;  %v1106_v50 = vrot.slane %v3455_v44, %v3411_v45 }
  0xbc   :  { %v1113_v9 = vrot.slane %v3458_v0, %v3411_v45  ;;  %v1120_v39 = vrot.slane %v3461_v10, %v3411_v45  ;;  %v1127_v32 = vrot.slane %v3464_v8, %v3411_v45  ;;  %v1134_v11 = vrot.slane %v3467_v1, %v3411_v45 }
  0xbd   :  { %v1141_v16 = vrot.slane %v3470_v14, %v3411_v45  ;;  %v1148_v13 = vrot.slane %v3473_v60, %v3411_v45  ;;  %v1155_v17 = vrot.slane %v3476_v47, %v3411_v45  ;;  %v1162_v4 = vrot.slane %v3479_v5, %v3411_v45 }
  0xbe   :  { %v1169_v20 = vrot.slane %v3482_v43, %v3411_v45  ;;  %v1176_v33 = vrot.slane %v3485_v48, %v3411_v45  ;;  %v1183_v22 = vrot.slane %v3488_v51, %v3411_v45  ;;  %v1190_v7 = vrot.slane %v3491_v2, %v3411_v45 }
  0xbf   :  { %v1197_v6 = vrot.slane %v3494_v30, %v3411_v45  ;;  %v1204_v49 = vrot.slane %v3497_v62, %v3411_v45  ;;  %v1211_v63 = vrot.slane %v3500_v57, %v3411_v45  ;;  %v1218_v37 = vrot.slane %v3503_v12, %v3411_v45 }
  0xc0   :  { %v1225_v23 = vrot.slane %v3506_v29, %v3411_v45  ;;  %v1232_v41 = vrot.slane %v3509_v21, %v3411_v45  ;;  %v1239_v34 = vrot.slane %v3512_v3, %v3411_v45  ;;  %v1246_v15 = vrot.slane %v3515_v56, %v3411_v45 }
  0xc1   :  { %v1247_v25 = vunpack.c.l.b16 %v1029_v52  ;;  %v1248_v59 = vunpack.c.l.b16 %v1036_v54  ;;  %v1249_v42 = vunpack.c.l.b16 %v1043_v38  ;;  %v1250_v55 = vunpack.c.l.b16 %v1050_v40 }
  0xc2   :  { %v1251_v31 = vunpack.c.l.b16 %v1057_v61  ;;  %v1252_v53 = vunpack.c.l.b16 %v1064_v19  ;;  %v1253_v58 = vunpack.c.l.b16 %v1071_v28  ;;  %v1254_v36 = vunpack.c.l.b16 %v1078_v46 }
  0xc3   :  { %v1255_v35 = vunpack.c.l.b16 %v1085_v18  ;;  %v1256_v26 = vunpack.c.l.b16 %v1092_v24  ;;  %v1257_v44 = vunpack.c.l.b16 %v1099_v27  ;;  %v1258_v0 = vunpack.c.l.b16 %v1106_v50 }
  0xc4   :  { %v1259_v10 = vunpack.c.l.b16 %v1113_v9  ;;  %v1260_v8 = vunpack.c.l.b16 %v1120_v39  ;;  %v1261_v1 = vunpack.c.l.b16 %v1127_v32  ;;  %v1262_v14 = vunpack.c.l.b16 %v1134_v11 }
  0xc5   :  { %v1263_v60 = vunpack.c.l.b16 %v1141_v16  ;;  %v1264_v47 = vunpack.c.l.b16 %v1148_v13  ;;  %v1265_v5 = vunpack.c.l.b16 %v1155_v17  ;;  %v1266_v43 = vunpack.c.l.b16 %v1162_v4 }
  0xc6   :  { %v1267_v48 = vunpack.c.l.b16 %v1169_v20  ;;  %v1268_v51 = vunpack.c.l.b16 %v1176_v33  ;;  %v1269_v2 = vunpack.c.l.b16 %v1183_v22  ;;  %v1270_v30 = vunpack.c.l.b16 %v1190_v7 }
  0xc7   :  { %v1271_v62 = vunpack.c.l.b16 %v1197_v6  ;;  %v1272_v57 = vunpack.c.l.b16 %v1204_v49  ;;  %v1273_v12 = vunpack.c.l.b16 %v1211_v63  ;;  %v1274_v29 = vunpack.c.l.b16 %v1218_v37 }
  0xc8   :  { %v1275_v21 = vunpack.c.l.b16 %v1225_v23  ;;  %v1276_v3 = vunpack.c.l.b16 %v1232_v41  ;;  %v1277_v56 = vunpack.c.l.b16 %v1239_v34  ;;  %v1278_v52 = vunpack.c.l.b16 %v1246_v15 }
  0xc9   :  { %v1279_v54 = vrot.slane %v1248_v59, 7  ;;  %v1282_v38 = vrot.slane %v1249_v42, 6  ;;  %v1285_v40 = vrot.slane %v1250_v55, 5  ;;  %v1288_v61 = vrot.slane %v1252_v53, 7 }
  0xca   :  { %v1290_v19 = vrot.slane %v1253_v58, 6  ;;  %v1292_v28 = vrot.slane %v1254_v36, 5  ;;  %v1294_v46 = vrot.slane %v1256_v26, 7  ;;  %v1296_v18 = vrot.slane %v1257_v44, 6 }
  0xcb   :  { %v1281_v24 = vsel %vm1280_vm0, %v1279_v54, %v1247_v25  ;;  %v1289_v27 = vsel %vm1280_vm0, %v1288_v61, %v1251_v31  ;;  %v1298_v50 = vrot.slane %v1258_v0, 5  ;;  %v1300_v9 = vrot.slane %v1260_v8, 7 }
  0xcc   :  { %v1284_v39 = vsel %vm1283_vm1, %v1282_v38, %v1281_v24  ;;  %v1291_v32 = vsel %vm1283_vm1, %v1290_v19, %v1289_v27  ;;  %v1295_v11 = vsel %vm1280_vm0, %v1294_v46, %v1255_v35  ;;  %v1302_v16 = vrot.slane %v1261_v1, 6 }
  0xcd   :  { %v1287_v13 = vsel %vm1286_vm2, %v1285_v40, %v1284_v39  ;;  %v1293_v17 = vsel %vm1286_vm2, %v1292_v28, %v1291_v32  ;;  %v1297_v4 = vsel %vm1283_vm1, %v1296_v18, %v1295_v11  ;;  %v1301_v20 = vsel %vm1280_vm0, %v1300_v9, %v1259_v10 }
  0xce   :  { %v1299_v33 = vsel %vm1286_vm2, %v1298_v50, %v1297_v4  ;;  %v1303_v22 = vsel %vm1283_vm1, %v1302_v16, %v1301_v20  ;;  %v1304_v7 = vrot.slane %v1262_v14, 5  ;;  %v1306_v6 = vrot.slane %v1264_v47, 7 }
  0xcf   :  { %v1308_v49 = vrot.slane %v1265_v5, 6  ;;  %v1310_v63 = vrot.slane %v1266_v43, 5  ;;  %v1312_v37 = vrot.slane %v1268_v51, 7  ;;  %v1314_v23 = vrot.slane %v1269_v2, 6 }
  0xd0   :  { %v1305_v41 = vsel %vm1286_vm2, %v1304_v7, %v1303_v22  ;;  %v1307_v34 = vsel %vm1280_vm0, %v1306_v6, %v1263_v60  ;;  %v1316_v15 = vrot.slane %v1270_v30, 5  ;;  %v1318_v25 = vrot.slane %v1272_v57, 7 }
  0xd1   :  { %v1309_v59 = vsel %vm1283_vm1, %v1308_v49, %v1307_v34  ;;  %v1313_v42 = vsel %vm1280_vm0, %v1312_v37, %v1267_v48  ;;  %v1320_v55 = vrot.slane %v1273_v12, 6  ;;  %v1322_v31 = vrot.slane %v1274_v29, 5 }
  0xd2   :  { %v1311_v53 = vsel %vm1286_vm2, %v1310_v63, %v1309_v59  ;;  %v1315_v58 = vsel %vm1283_vm1, %v1314_v23, %v1313_v42  ;;  %v1319_v36 = vsel %vm1280_vm0, %v1318_v25, %v1271_v62  ;;  %v1324_v35 = vrot.slane %v1276_v3, 7 }
  0xd3   :  { %v1317_v26 = vsel %vm1286_vm2, %v1316_v15, %v1315_v58  ;;  %v1321_v44 = vsel %vm1283_vm1, %v1320_v55, %v1319_v36  ;;  %v1326_v0 = vrot.slane %v1277_v56, 6  ;;  %v1328_v10 = vrot.slane %v1278_v52, 5 }
  0xd4   :  { %v1323_v8 = vsel %vm1286_vm2, %v1322_v31, %v1321_v44  ;;  %v1325_v1 = vsel %vm1280_vm0, %v1324_v35, %v1275_v21  ;;  %v1330_v14 = vpack.c.b16 %v1287_v13, %v1287_v13  ;;  %v1331_v60 = vpack.c.b16 %v1293_v17, %v1293_v17 }
  0xd5   :  { %v1327_v47 = vsel %vm1283_vm1, %v1326_v0, %v1325_v1  ;;  %v1332_v5 = vpack.c.b16 %v1299_v33, %v1299_v33  ;;  %v1333_v43 = vpack.c.b16 %v1305_v41, %v1305_v41  ;;  %v1334_v48 = vpack.c.b16 %v1311_v53, %v1311_v53 }
  0xd6   :  { %v1329_v51 = vsel %vm1286_vm2, %v1328_v10, %v1327_v47  ;;  %v1335_v2 = vpack.c.b16 %v1317_v26, %v1317_v26  ;;  %v1336_v30 = vpack.c.b16 %v1323_v8, %v1323_v8  ;;  %v1344_v62 = vrot.slane %v1330_v14, %v3411_v45 }
  0xd7   :  { %v1337_v57 = vpack.c.b16 %v1329_v51, %v1329_v51  ;;  %v1351_v12 = vrot.slane %v1331_v60, %v3411_v45  ;;  %v1358_v29 = vrot.slane %v1332_v5, %v3411_v45  ;;  %v1365_v21 = vrot.slane %v1333_v43, %v3411_v45 }
  0xd8   :  { %v1372_v3 = vrot.slane %v1334_v48, %v3411_v45  ;;  %v1379_v56 = vrot.slane %v1335_v2, %v3411_v45  ;;  %v1386_v52 = vrot.slane %v1336_v30, %v3411_v45  ;;  %1403 = vst.msk [vmem:[%s3649_s4] sm:$0x3] %vm1402_vm3, %v1344_v62 }
  0xd9   :  { %v1393_v54 = vrot.slane %v1337_v57, %v3411_v45  ;;  %1404 = vst.msk [vmem:[%s3649_s4 + $0x2] sm:$0x3] %vm1402_vm3, %v1351_v12  ;;  %1405 = vst.msk [vmem:[%s3649_s4 + $0x4] sm:$0x3] %vm1402_vm3, %v1358_v29 }
  0xda   :  { %1406 = vst.msk [vmem:[%s3649_s4 + $0x6] sm:$0x3] %vm1402_vm3, %v1365_v21  ;;  %1407 = vst.msk [vmem:[%s3649_s4 + $0x8] sm:$0x3] %vm1402_vm3, %v1372_v3 }
  0xdb   :  { %1408 = vst.msk [vmem:[%s3649_s4 + $0xa] sm:$0x3] %vm1402_vm3, %v1379_v56  ;;  %1409 = vst.msk [vmem:[%s3649_s4 + $0xc] sm:$0x3] %vm1402_vm3, %v1386_v52 }
  0xdc   :  { %1410 = vst.msk [vmem:[%s3649_s4 + $0xe] sm:$0x3] %vm1402_vm3, %v1393_v54 }

// kernel: issegnet_forward.52
= control target key start
LH: loop header
LB: loop body
LE: loop exit
PB: predicated region body
PF: predicated region fallthrough
CT: control target
= control target key end

     0   :  { %vm186_vm0 = vcmask 519168   ;;  %vm191_vm1 = vcmask 523264   ;;  %s404_s3 = inlined_call_operand.vmem [shape: bf16[128,64], index: 3, kind: input, shape index: {}]   ;;  %s405_s0 = inlined_call_operand.vmem [shape: bf16[32,128], index: 0, kind: input, shape index: {}]   ;;  %s406_s1 = inlined_call_operand.vmem [shape: f32[1,128], index: 1, kind: input, shape index: {}]   ;;  %s407_s2 = inlined_call_operand.vmem [shape: f32[1,128], index: 2, kind: input, shape index: {}]   ;;  %s408_s4 = inlined_call_operand.vmem [shape: bf16[32,64], index: 4, kind: output, shape index: {0}]   ;;  %s409_s5 = inlined_call_operand.vmem [shape: f32[1,8,64], index: 5, kind: output, shape index: {1}]   ;;  %s410_s6 = inlined_call_operand.vmem [shape: f32[1,8,64], index: 6, kind: output, shape index: {2}]  }
   0x1   :  { %v293_v0 = vld [vmem:[%s404_s3] sm:$0xff]   ;;  %v294_v1 = vld [vmem:[%s404_s3 + $0x8] sm:$0xff]   ;;  %v295_v2 = vld [vmem:[%s404_s3 + $0x10] sm:$0xff]  }
   0x2   :  { %273 = vmatprep.subr.bf16.mxu0 %v293_v0  ;;  %v296_v3 = vld [vmem:[%s404_s3 + $0x18] sm:$0xff]   ;;  %v255_v4 = vld [vmem:[%s405_s0] sm:$0xff]   ;;  %v262_v9 = vld [vmem:[%s405_s0 + $0x8] sm:$0xff]  }
   0x3   :  { %274 = vmatpush3.bf16.msra.mxu0 %v293_v0  ;;  %v236_v5 = vld [vmem:[%s406_s1] ss:$0 sm:$0xff]  ;;  %v256_v6 = vunpack.c.l.bf16 %v255_v4  ;;  %v257_v7 = vunpack.c.h.bf16 %v255_v4  ;;  %v260_v15 = vunpack.c.l.bf16 %v262_v9  ;;  %v261_v16 = vunpack.c.h.bf16 %v262_v9  ;;  %v298_v19 = vld [vmem:[%s404_s3 + $0x28] sm:$0xff]   ;;  %v299_v23 = vld [vmem:[%s404_s3 + $0x30] sm:$0xff]  }
   0x4   :  { %275 = vmatprep.subr.bf16.mxu0 %v294_v1  ;;  %v237_v8 = vld [vmem:[%s407_s2] ss:$0 sm:$0xff]  ;;  %v300_v26 = vld [vmem:[%s404_s3 + $0x38] sm:$0xff]  }
   0x5   :  { %v36_v10 = vmul.f32 %v256_v6, %v236_v5  ;;  %v37_v11 = vmul.f32 %v257_v7, %v236_v5  ;;  %v297_v12 = vld [vmem:[%s404_s3 + $0x20] sm:$0xff]   ;;  %v38_v21 = vmul.f32 %v260_v15, %v236_v5  ;;  %v39_v22 = vmul.f32 %v261_v16, %v236_v5 }
   0x7   :  { %276 = vmatpush3.bf16.msra.mxu0 %v294_v1  ;;  %v47_v13 = vadd.f32 %v237_v8, %v36_v10  ;;  %v48_v14 = vadd.f32 %v237_v8, %v37_v11  ;;  %v49_v24 = vadd.f32 %v237_v8, %v38_v21  ;;  %v50_v25 = vadd.f32 %v237_v8, %v39_v22 }
   0x8   :  { %277 = vmatprep.subr.bf16.mxu0 %v295_v2 }
   0x9   :  { %v51_v17 = vmax.f32 %v47_v13, 0.0  ;;  %v52_v18 = vmax.f32 %v48_v14, 0.0  ;;  %v53_v27 = vmax.f32 %v49_v24, 0.0  ;;  %v54_v28 = vmax.f32 %v50_v25, 0.0 }
   0xb   :  { %278 = vmatpush3.bf16.msra.mxu0 %v295_v2  ;;  %v55_v20 = vpack.c.bf16 %v52_v18, %v51_v17  ;;  %v56_v29 = vpack.c.bf16 %v54_v28, %v53_v27 }
   0xc   :  { %279 = vmatprep.subr.bf16.mxu0 %v296_v3 }
   0xd   :  { %289 = vmatprep.mubr.bf16.mxu0 %v55_v20 }
   0xf   :  { %280 = vmatpush3.bf16.msra.mxu0 %v296_v3 }
  0x10   :  { %281 = vmatprep.subr.bf16.mxu0 %v297_v12 }
  0x13   :  { %282 = vmatpush3.bf16.msra.mxu0 %v297_v12 }
  0x14   :  { %283 = vmatprep.subr.bf16.mxu0 %v298_v19 }
  0x17   :  { %284 = vmatpush3.bf16.msra.mxu0 %v298_v19 }
  0x18   :  { %285 = vmatprep.subr.bf16.mxu0 %v299_v23 }
  0x1b   :  { %286 = vmatpush3.bf16.msra.mxu0 %v299_v23 }
  0x1c   :  { %287 = vmatprep.subr.bf16.mxu0 %v300_v26 }
  0x1f   :  { %288 = vmatpush3.bf16.msra.mxu0 %v300_v26 }
  0x22   :  { %290 = vmatmul.mubr.bf16.vlgmr.msra.gmra.mrb[0].mxu0 %v56_v29 }
  0xf5   :  { %v291_v30 = vpop.f32.mrb[0].mxu0 }
  0xf6   :  { %v252_v31 = vpack.c.bf16 %v291_v30, %v291_v30  ;;  %v155_v32 = vpop.f32.mrb[1].mxu0  ;;  %v207_v36 = vmul.f32 %v291_v30, %v291_v30  ;;  %v195_v44 = vsel %vm191_vm1, %v291_v30, 0.0 }
  0xf7   :  { %v250_v33 = vpack.c.bf16 %v155_v32, %v155_v32  ;;  %v205_v34 = vmul.f32 %v155_v32, %v155_v32  ;;  %v292_v35 = vpop.f32.mrb[2].mxu0  ;;  %v192_v39 = vsel %vm191_vm1, %v155_v32, 0.0 }
  0xf8   :  { %189 = vst.msk [vmem:[%s408_s4 + $0x8] sm:$0xf] %vm186_vm0, %v252_v31  ;;  %v253_v37 = vpack.c.bf16 %v292_v35, %v292_v35  ;;  %v158_v38 = vpop.f32.mrb[3].mxu0  ;;  %v208_v46 = vmul.f32 %v292_v35, %v292_v35  ;;  %v212_v50 = vsel %vm191_vm1, %v207_v36, 0.0  ;;  %v197_v51 = vsel %vm191_vm1, %v292_v35, 0.0 }
  0xf9   :  { %187 = vst.msk [vmem:[%s408_s4] sm:$0xf] %vm186_vm0, %v250_v33  ;;  %v251_v40 = vpack.c.bf16 %v158_v38, %v158_v38  ;;  %v193_v41 = vsel %vm191_vm1, %v158_v38, 0.0  ;;  %v206_v42 = vmul.f32 %v158_v38, %v158_v38  ;;  %v209_v45 = vsel %vm191_vm1, %v205_v34, 0.0 }
  0xfa   :  { %190 = vst.msk [vmem:[%s408_s4 + $0xc] sm:$0xf] %vm186_vm0, %v253_v37  ;;  %v194_v43 = vadd.f32 %v193_v41, %v192_v39  ;;  %v214_v54 = vsel %vm191_vm1, %v208_v46, 0.0 }
  0xfb   :  { %188 = vst.msk [vmem:[%s408_s4 + $0x4] sm:$0xf] %vm186_vm0, %v251_v40  ;;  %v210_v47 = vsel %vm191_vm1, %v206_v42, 0.0 }
  0xfc   :  { %v196_v48 = vadd.f32 %v195_v44, %v194_v43  ;;  %v211_v49 = vadd.f32 %v210_v47, %v209_v45 }
  0xfe   :  { %v198_v52 = vadd.f32 %v197_v51, %v196_v48  ;;  %v213_v53 = vadd.f32 %v212_v50, %v211_v49 }
 0x100   :  { %v199_v55 = vrot.slane %v198_v52, 4  ;;  %v215_v56 = vadd.f32 %v214_v54, %v213_v53 }
 0x102   :  { %v200_v57 = vadd.f32 %v199_v55, %v198_v52  ;;  %v216_v58 = vrot.slane %v215_v56, 4 }
 0x104   :  { %v201_v59 = vrot.slane %v200_v57, 2  ;;  %v217_v60 = vadd.f32 %v216_v58, %v215_v56 }
 0x106   :  { %v202_v61 = vadd.f32 %v201_v59, %v200_v57  ;;  %v218_v62 = vrot.slane %v217_v60, 2 }
 0x108   :  { %v203_v63 = vrot.slane %v202_v61, 1  ;;  %v219_v0 = vadd.f32 %v218_v62, %v217_v60 }
 0x10a   :  { %v204_v1 = vadd.f32 %v203_v63, %v202_v61  ;;  %v220_v2 = vrot.slane %v219_v0, 1 }
 0x10c   :  { %v221_v3 = vadd.f32 %v220_v2, %v219_v0  ;;  %222 = vst.msk [vmem:[%s409_s5] sm:$0xff] %vm191_vm1, %v204_v1 }
 0x10e   :  { %223 = vst.msk [vmem:[%s410_s6] sm:$0xff] %vm191_vm1, %v221_v3 }

// kernel: issegnet_forward.51
= control target key start
LH: loop header
LB: loop body
LE: loop exit
PB: predicated region body
PF: predicated region fallthrough
CT: control target
= control target key end

     0   :  { %vm365_vm0 = vcmask 523264   ;;  %s941_s1 = inlined_call_operand.vmem [shape: bf16[576,128], index: 1, kind: input, shape index: {}]   ;;  %s942_s0 = inlined_call_operand.vmem [shape: bf16[32,576], index: 0, kind: input, shape index: {}]   ;;  %s943_s2 = inlined_call_operand.vmem [shape: bf16[32,128], index: 2, kind: output, shape index: {0}]   ;;  %s944_s3 = inlined_call_operand.vmem [shape: f32[1,8,128], index: 3, kind: output, shape index: {1}]   ;;  %s945_s4 = inlined_call_operand.vmem [shape: f32[1,8,128], index: 4, kind: output, shape index: {2}]  }
   0x1   :  { %v716_v0 = vld [vmem:[%s941_s1 + $0x40] sm:$0xff]   ;;  %v720_v4 = vld [vmem:[%s941_s1 + $0x48] sm:$0xff]   ;;  %v724_v8 = vld [vmem:[%s941_s1 + $0x50] sm:$0xff]  }
   0x2   :  { %v717_v1 = vld [vmem:[%s941_s1 + $0xc0] sm:$0xff]   ;;  %642 = vmatprep.subr.bf16.mxu0 %v716_v0  ;;  %v721_v5 = vld [vmem:[%s941_s1 + $0xc8] sm:$0xff]   ;;  %v725_v9 = vld [vmem:[%s941_s1 + $0xd0] sm:$0xff]  }
   0x3   :  { %v718_v2 = vld [vmem:[%s941_s1] sm:$0xff]   ;;  %670 = vmatprep.subr.bf16.mxu1 %v717_v1  ;;  %v722_v6 = vld [vmem:[%s941_s1 + $0x8] sm:$0xff]   ;;  %v726_v10 = vld [vmem:[%s941_s1 + $0x10] sm:$0xff]  }
   0x4   :  { %v719_v3 = vld [vmem:[%s941_s1 + $0x80] sm:$0xff]   ;;  %643 = vmatpush3.bf16.msra.mxu0 %v718_v2  ;;  %v723_v7 = vld [vmem:[%s941_s1 + $0x88] sm:$0xff]   ;;  %v727_v11 = vld [vmem:[%s941_s1 + $0x90] sm:$0xff]  }
   0x5   :  { %671 = vmatpush3.bf16.msra.mxu1 %v719_v3  ;;  %644 = vmatprep.subr.bf16.mxu0 %v720_v4  ;;  %v728_v12 = vld [vmem:[%s941_s1 + $0x58] sm:$0xff]   ;;  %v732_v16 = vld [vmem:[%s941_s1 + $0x60] sm:$0xff]   ;;  %v736_v20 = vld [vmem:[%s941_s1 + $0x68] sm:$0xff]  }
   0x6   :  { %672 = vmatprep.subr.bf16.mxu1 %v721_v5  ;;  %v729_v13 = vld [vmem:[%s941_s1 + $0xd8] sm:$0xff]   ;;  %v733_v17 = vld [vmem:[%s941_s1 + $0xe0] sm:$0xff]   ;;  %v737_v21 = vld [vmem:[%s941_s1 + $0xe8] sm:$0xff]  }
   0x7   :  { %v730_v14 = vld [vmem:[%s941_s1 + $0x18] sm:$0xff]   ;;  %v734_v18 = vld [vmem:[%s941_s1 + $0x20] sm:$0xff]   ;;  %v738_v22 = vld [vmem:[%s941_s1 + $0x28] sm:$0xff]  }
   0x8   :  { %645 = vmatpush3.bf16.msra.mxu0 %v722_v6  ;;  %v731_v15 = vld [vmem:[%s941_s1 + $0x98] sm:$0xff]   ;;  %v735_v19 = vld [vmem:[%s941_s1 + $0xa0] sm:$0xff]   ;;  %v739_v23 = vld [vmem:[%s941_s1 + $0xa8] sm:$0xff]  }
   0x9   :  { %673 = vmatpush3.bf16.msra.mxu1 %v723_v7  ;;  %646 = vmatprep.subr.bf16.mxu0 %v724_v8  ;;  %v740_v24 = vld [vmem:[%s941_s1 + $0x70] sm:$0xff]   ;;  %v744_v28 = vld [vmem:[%s941_s1 + $0x78] sm:$0xff]   ;;  %v753_v35 = vld [vmem:[%s942_s0 + $0xc] ss:$20 sps:$4 sm:$0xff]  }
   0xa   :  { %674 = vmatprep.subr.bf16.mxu1 %v725_v9  ;;  %v741_v25 = vld [vmem:[%s941_s1 + $0xf0] sm:$0xff]   ;;  %v745_v29 = vld [vmem:[%s941_s1 + $0xf8] sm:$0xff]   ;;  %v754_v36 = vld [vmem:[%s941_s1 + $0x100] sm:$0xff]   ;;  %453 = vmatprep.mubr.bf16.mxu1 %v753_v35 }
   0xb   :  { %v742_v26 = vld [vmem:[%s941_s1 + $0x30] sm:$0xff]   ;;  %v746_v30 = vld [vmem:[%s941_s1 + $0x38] sm:$0xff]   ;;  %v755_v37 = vld [vmem:[%s941_s1 + $0x108] sm:$0xff]  }
   0xc   :  { %647 = vmatpush3.bf16.msra.mxu0 %v726_v10  ;;  %v743_v27 = vld [vmem:[%s941_s1 + $0xb0] sm:$0xff]   ;;  %v747_v31 = vld [vmem:[%s941_s1 + $0xb8] sm:$0xff]   ;;  %v756_v38 = vld [vmem:[%s942_s0 + $0x2c] ss:$20 sps:$4 sm:$0xff]  }
   0xd   :  { %675 = vmatpush3.bf16.msra.mxu1 %v727_v11  ;;  %648 = vmatprep.subr.bf16.mxu0 %v728_v12  ;;  %v748_v32 = vld [vmem:[%s942_s0] ss:$20 sps:$4 sm:$0xff]   ;;  %v750_v33 = vld [vmem:[%s942_s0 + $0x4] ss:$20 sps:$4 sm:$0xff]   ;;  %v751_v34 = vld [vmem:[%s942_s0 + $0x8] ss:$20 sps:$4 sm:$0xff]  }
   0xe   :  { %676 = vmatprep.subr.bf16.mxu1 %v729_v13  ;;  %404 = vmatprep.mubr.bf16.mxu0 %v750_v33  ;;  %v758_v39 = vld [vmem:[%s942_s0 + $0x34] ss:$20 sps:$4 sm:$0xff]   ;;  %v761_v42 = vld [vmem:[%s942_s0 + $0x30] ss:$20 sps:$4 sm:$0xff]   ;;  %v763_v44 = vld [vmem:[%s941_s1 + $0x118] sm:$0xff]  }
   0xf   :  { %v760_v40 = vld [vmem:[%s942_s0 + $0x28] ss:$20 sps:$4 sm:$0xff]   ;;  %v762_v41 = vld [vmem:[%s941_s1 + $0x110] sm:$0xff]   ;;  %v765_v45 = vld [vmem:[%s942_s0 + $0x38] ss:$20 sps:$4 sm:$0xff]  }
  0x10   :  { %649 = vmatpush3.bf16.msra.mxu0 %v730_v14  ;;  %v764_v43 = vld [vmem:[%s942_s0 + $0x10] ss:$20 sps:$4 sm:$0xff]  }
  0x11   :  { %677 = vmatpush3.bf16.msra.mxu1 %v731_v15  ;;  %650 = vmatprep.subr.bf16.mxu0 %v732_v16 }
  0x12   :  { %678 = vmatprep.subr.bf16.mxu1 %v733_v17 }
  0x14   :  { %651 = vmatpush3.bf16.msra.mxu0 %v734_v18 }
  0x15   :  { %679 = vmatpush3.bf16.msra.mxu1 %v735_v19  ;;  %652 = vmatprep.subr.bf16.mxu0 %v736_v20 }
  0x16   :  { %680 = vmatprep.subr.bf16.mxu1 %v737_v21 }
  0x18   :  { %653 = vmatpush3.bf16.msra.mxu0 %v738_v22 }
  0x19   :  { %681 = vmatpush3.bf16.msra.mxu1 %v739_v23  ;;  %654 = vmatprep.subr.bf16.mxu0 %v740_v24 }
  0x1a   :  { %682 = vmatprep.subr.bf16.mxu1 %v741_v25 }
  0x1c   :  { %655 = vmatpush3.bf16.msra.mxu0 %v742_v26 }
  0x1d   :  { %683 = vmatpush3.bf16.msra.mxu1 %v743_v27  ;;  %656 = vmatprep.subr.bf16.mxu0 %v744_v28 }
  0x1e   :  { %684 = vmatprep.subr.bf16.mxu1 %v745_v29 }
  0x20   :  { %657 = vmatpush3.bf16.msra.mxu0 %v746_v30 }
  0x21   :  { %685 = vmatpush3.bf16.msra.mxu1 %v747_v31  ;;  %704 = vmatprep.subr.bf16.mxu0 %v754_v36 }
  0x23   :  { %405 = vmatmul.mubr.bf16.vlgmr.msra.gmra.mrb[0].mxu0 %v748_v32 }
  0x24   :  { %454 = vmatmul.mubr.bf16.vlgmr.msra.gmra.mrb[0].mxu1 %v751_v34  ;;  %705 = vmatpush3.bf16.msra.mxu0 %v754_v36 }
  0x25   :  { %706 = vmatprep.subr.bf16.mxu0 %v755_v37  ;;  %412 = vmatprep.mubr.bf16.mxu0 %v756_v38 }
  0x26   :  { %461 = vmatprep.mubr.bf16.mxu1 %v758_v39 }
  0x28   :  { %707 = vmatpush3.bf16.msra.mxu0 %v755_v37 }
  0x29   :  { %708 = vmatprep.subr.bf16.mxu0 %v762_v41 }
  0x2b   :  { %413 = vmatmul.mubr.bf16.gmra.mrb[4].mxu0 %v760_v40 }
  0x2c   :  { %462 = vmatmul.mubr.bf16.gmra.mrb[4].mxu1 %v761_v42  ;;  %712 = vmatprep.mubr.msk.bf16.mxu0 %vm365_vm0, %v764_v43 }
  0x2d   :  { %709 = vmatpush3.bf16.msra.mxu0 %v762_v41 }
  0x2e   :  { %710 = vmatprep.subr.bf16.mxu0 %v763_v44 }
  0x31   :  { %711 = vmatpush3.bf16.msra.mxu0 %v763_v44 }
  0x34   :  { %713 = vmatmul.mubr.msk.bf16.vlgmr.msra.gmra.mrb[8].mxu0 %vm365_vm0, %v765_v45 }
  0xf6   :  { %v658_v46 = vpop.f32.mrb[0].mxu0 }
  0xf7   :  { %v686_v47 = vpop.f32.mrb[0].mxu1  ;;  %v659_v48 = vpop.f32.mrb[1].mxu0 }
  0xf8   :  { %v660_v49 = vadd.f32 %v659_v48, %v658_v46  ;;  %v687_v50 = vpop.f32.mrb[1].mxu1  ;;  %v661_v51 = vpop.f32.mrb[2].mxu0 }
  0xf9   :  { %v688_v52 = vadd.f32 %v687_v50, %v686_v47  ;;  %v689_v53 = vpop.f32.mrb[2].mxu1  ;;  %v662_v54 = vpop.f32.mrb[3].mxu0 }
  0xfa   :  { %v663_v55 = vadd.f32 %v662_v54, %v661_v51  ;;  %v690_v56 = vpop.f32.mrb[3].mxu1 }
  0xfb   :  { %v691_v57 = vadd.f32 %v690_v56, %v689_v53  ;;  %v456_v58 = vadd.f32 %v688_v52, %v660_v49 }
  0xfd   :  { %v459_v59 = vadd.f32 %v691_v57, %v663_v55 }
  0xfe   :  { %v664_v60 = vpop.f32.mrb[4].mxu0 }
  0xff   :  { %v692_v61 = vpop.f32.mrb[4].mxu1  ;;  %v665_v62 = vpop.f32.mrb[5].mxu0 }
 0x100   :  { %v666_v63 = vadd.f32 %v665_v62, %v664_v60  ;;  %v693_v0 = vpop.f32.mrb[5].mxu1  ;;  %v667_v1 = vpop.f32.mrb[6].mxu0 }
 0x101   :  { %v694_v2 = vadd.f32 %v693_v0, %v692_v61  ;;  %v695_v3 = vpop.f32.mrb[6].mxu1  ;;  %v668_v4 = vpop.f32.mrb[7].mxu0 }
 0x102   :  { %v669_v5 = vadd.f32 %v668_v4, %v667_v1  ;;  %v696_v6 = vpop.f32.mrb[7].mxu1 }
 0x103   :  { %v697_v7 = vadd.f32 %v696_v6, %v695_v3  ;;  %v464_v8 = vadd.f32 %v694_v2, %v666_v63 }
 0x105   :  { %v467_v9 = vadd.f32 %v697_v7, %v669_v5 }
 0x107   :  { %v714_v10 = vpop.f32.mrb[8].mxu0 }
 0x108   :  { %v513_v11 = vadd.f32 %v714_v10, %v464_v8  ;;  %v504_v12 = vpop.f32.mrb[9].mxu0 }
 0x109   :  { %v505_v13 = vadd.f32 %v504_v12, %v456_v58  ;;  %v715_v14 = vpop.f32.mrb[10].mxu0 }
 0x10a   :  { %v516_v15 = vadd.f32 %v715_v14, %v467_v9  ;;  %v507_v16 = vpop.f32.mrb[11].mxu0  ;;  %v550_v23 = vmul.f32 %v513_v11, %v513_v11 }
 0x10b   :  { %v508_v17 = vadd.f32 %v507_v16, %v459_v59  ;;  %v548_v19 = vmul.f32 %v505_v13, %v505_v13 }
 0x10c   :  { %v639_v18 = vpack.c.bf16 %v516_v15, %v513_v11  ;;  %v551_v26 = vmul.f32 %v516_v15, %v516_v15 }
 0x10d   :  { %v634_v20 = vpack.c.bf16 %v508_v17, %v505_v13  ;;  %v539_v21 = vadd.f32 %v508_v17, %v505_v13  ;;  %v549_v22 = vmul.f32 %v508_v17, %v508_v17 }
 0x10e   :  { %641 = vst [vmem:[%s943_s2 + $0x8] sm:$0xff] %v639_v18  }
 0x10f   :  { %635 = vst [vmem:[%s943_s2] sm:$0xff] %v634_v20   ;;  %v540_v24 = vadd.f32 %v539_v21, %v513_v11  ;;  %v552_v25 = vadd.f32 %v549_v22, %v548_v19 }
 0x111   :  { %v541_v27 = vadd.f32 %v540_v24, %v516_v15  ;;  %v553_v28 = vadd.f32 %v552_v25, %v550_v23 }
 0x113   :  { %v542_v29 = vrot.slane %v541_v27, 4  ;;  %v554_v30 = vadd.f32 %v553_v28, %v551_v26 }
 0x115   :  { %v543_v31 = vadd.f32 %v542_v29, %v541_v27  ;;  %v555_v32 = vrot.slane %v554_v30, 4 }
 0x117   :  { %v544_v33 = vrot.slane %v543_v31, 2  ;;  %v556_v34 = vadd.f32 %v555_v32, %v554_v30 }
 0x119   :  { %v545_v35 = vadd.f32 %v544_v33, %v543_v31  ;;  %v557_v36 = vrot.slane %v556_v34, 2 }
 0x11b   :  { %v546_v37 = vrot.slane %v545_v35, 1  ;;  %v558_v38 = vadd.f32 %v557_v36, %v556_v34 }
 0x11d   :  { %v547_v39 = vadd.f32 %v546_v37, %v545_v35  ;;  %v559_v40 = vrot.slane %v558_v38, 1 }
 0x11f   :  { %v560_v41 = vadd.f32 %v559_v40, %v558_v38  ;;  %561 = vst [vmem:[%s944_s3] sm:$0xff] %v547_v39 }
 0x121   :  { %562 = vst [vmem:[%s945_s4] sm:$0xff] %v560_v41 }

// kernel: issegnet_forward.53
= control target key start
LH: loop header
LB: loop body
LE: loop exit
PB: predicated region body
PF: predicated region fallthrough
CT: control target
= control target key end

     0   :  { %vm104_vm0 = vcmask 523264   ;;  %s365_s4 = inlined_call_operand.vmem [shape: bf16[64,128], index: 4, kind: input, shape index: {}]   ;;  %s366_s0 = inlined_call_operand.vmem [shape: bf16[32,64], index: 0, kind: input, shape index: {}]   ;;  %s367_s1 = inlined_call_operand.vmem [shape: f32[1,64], index: 1, kind: input, shape index: {}]   ;;  %s368_s3 = inlined_call_operand.vmem [shape: bf16[32,64], index: 3, kind: input, shape index: {}]   ;;  %s369_s2 = inlined_call_operand.vmem [shape: f32[1,64], index: 2, kind: input, shape index: {}]   ;;  %s370_s5 = inlined_call_operand.vmem [shape: bf16[32,128], index: 5, kind: output, shape index: {0}]   ;;  %s371_s6 = inlined_call_operand.vmem [shape: f32[1,8,128], index: 6, kind: output, shape index: {1}]   ;;  %s372_s7 = inlined_call_operand.vmem [shape: f32[1,8,128], index: 7, kind: output, shape index: {2}]  }
   0x1   :  { %v279_v0 = vld [vmem:[%s365_s4] sm:$0xff]   ;;  %v280_v1 = vld [vmem:[%s365_s4 + $0x8] sm:$0xff]   ;;  %v281_v2 = vld [vmem:[%s365_s4 + $0x10] sm:$0xff]  }
   0x2   :  { %267 = vmatprep.subr.bf16.mxu0 %v279_v0  ;;  %v233_v3 = vld [vmem:[%s366_s0] sm:$0xff]   ;;  %v258_v4 = vld [vmem:[%s366_s0 + $0x8] sm:$0xff]   ;;  %v282_v17 = vld [vmem:[%s365_s4 + $0x18] sm:$0xff]  }
   0x3   :  { %268 = vmatpush3.bf16.msra.mxu0 %v279_v0  ;;  %v216_v5 = vld [vmem:[%s367_s1] ss:$0 sm:$0xff]  ;;  %v234_v6 = vunpack.c.l.bf16 %v233_v3  ;;  %v235_v7 = vunpack.c.h.bf16 %v233_v3  ;;  %v238_v8 = vunpack.c.l.bf16 %v258_v4  ;;  %v239_v9 = vunpack.c.h.bf16 %v258_v4  ;;  %v259_v11 = vld [vmem:[%s368_s3 + $0x8] sm:$0xff]  }
   0x4   :  { %269 = vmatprep.subr.bf16.mxu0 %v280_v1  ;;  %v241_v10 = vld [vmem:[%s368_s3] sm:$0xff]   ;;  %v246_v20 = vunpack.c.l.bf16 %v259_v11  ;;  %v247_v21 = vunpack.c.h.bf16 %v259_v11 }
   0x5   :  { %v217_v12 = vld [vmem:[%s369_s2] ss:$0 sm:$0xff]  ;;  %v39_v13 = vmul.f32 %v234_v6, %v216_v5  ;;  %v40_v14 = vmul.f32 %v235_v7, %v216_v5  ;;  %v41_v15 = vmul.f32 %v238_v8, %v216_v5  ;;  %v42_v16 = vmul.f32 %v239_v9, %v216_v5 }
   0x6   :  { %v242_v18 = vunpack.c.l.bf16 %v241_v10  ;;  %v243_v19 = vunpack.c.h.bf16 %v241_v10 }
   0x7   :  { %270 = vmatpush3.bf16.msra.mxu0 %v280_v1  ;;  %v50_v22 = vadd.f32 %v217_v12, %v39_v13  ;;  %v51_v23 = vadd.f32 %v217_v12, %v40_v14  ;;  %v52_v24 = vadd.f32 %v217_v12, %v41_v15  ;;  %v53_v25 = vadd.f32 %v217_v12, %v42_v16 }
   0x8   :  { %271 = vmatprep.subr.bf16.mxu0 %v281_v2 }
   0x9   :  { %v54_v26 = vmax.f32 %v50_v22, 0.0  ;;  %v55_v27 = vmax.f32 %v51_v23, 0.0  ;;  %v56_v28 = vmax.f32 %v52_v24, 0.0  ;;  %v57_v29 = vmax.f32 %v53_v25, 0.0 }
   0xb   :  { %272 = vmatpush3.bf16.msra.mxu0 %v281_v2  ;;  %v66_v30 = vadd.f32 %v242_v18, %v54_v26  ;;  %v67_v31 = vadd.f32 %v243_v19, %v55_v27  ;;  %v68_v32 = vadd.f32 %v246_v20, %v56_v28  ;;  %v69_v33 = vadd.f32 %v247_v21, %v57_v29 }
   0xc   :  { %273 = vmatprep.subr.bf16.mxu0 %v282_v17 }
   0xd   :  { %v70_v34 = vpack.c.bf16 %v67_v31, %v66_v30  ;;  %v71_v35 = vpack.c.bf16 %v69_v33, %v68_v32 }
   0xf   :  { %274 = vmatpush3.bf16.msra.mxu0 %v282_v17  ;;  %275 = vmatprep.mubr.msk.bf16.mxu0 %vm104_vm0, %v70_v34 }
  0x12   :  { %276 = vmatmul.mubr.msk.bf16.vlgmr.msra.gmra.mrb[0].mxu0 %vm104_vm0, %v71_v35 }
  0xe5   :  { %v277_v36 = vpop.f32.mrb[0].mxu0 }
  0xe6   :  { %v145_v37 = vpop.f32.mrb[1].mxu0  ;;  %v191_v45 = vmul.f32 %v277_v36, %v277_v36 }
  0xe7   :  { %v278_v38 = vpop.f32.mrb[2].mxu0  ;;  %v189_v41 = vmul.f32 %v145_v37, %v145_v37 }
  0xe8   :  { %v256_v39 = vpack.c.bf16 %v278_v38, %v277_v36  ;;  %v148_v40 = vpop.f32.mrb[3].mxu0  ;;  %v192_v48 = vmul.f32 %v278_v38, %v278_v38 }
  0xe9   :  { %v251_v42 = vpack.c.bf16 %v148_v40, %v145_v37  ;;  %v180_v43 = vadd.f32 %v148_v40, %v145_v37  ;;  %v190_v44 = vmul.f32 %v148_v40, %v148_v40 }
  0xea   :  { %260 = vst [vmem:[%s370_s5 + $0x8] sm:$0xff] %v256_v39  }
  0xeb   :  { %252 = vst [vmem:[%s370_s5] sm:$0xff] %v251_v42   ;;  %v181_v46 = vadd.f32 %v277_v36, %v180_v43  ;;  %v193_v47 = vadd.f32 %v190_v44, %v189_v41 }
  0xed   :  { %v182_v49 = vadd.f32 %v278_v38, %v181_v46  ;;  %v194_v50 = vadd.f32 %v193_v47, %v191_v45 }
  0xef   :  { %v183_v51 = vrot.slane %v182_v49, 4  ;;  %v195_v52 = vadd.f32 %v194_v50, %v192_v48 }
  0xf1   :  { %v184_v53 = vadd.f32 %v183_v51, %v182_v49  ;;  %v196_v54 = vrot.slane %v195_v52, 4 }
  0xf3   :  { %v185_v55 = vrot.slane %v184_v53, 2  ;;  %v197_v56 = vadd.f32 %v196_v54, %v195_v52 }
  0xf5   :  { %v186_v57 = vadd.f32 %v185_v55, %v184_v53  ;;  %v198_v58 = vrot.slane %v197_v56, 2 }
  0xf7   :  { %v187_v59 = vrot.slane %v186_v57, 1  ;;  %v199_v60 = vadd.f32 %v198_v58, %v197_v56 }
  0xf9   :  { %v188_v61 = vadd.f32 %v187_v59, %v186_v57  ;;  %v200_v62 = vrot.slane %v199_v60, 1 }
  0xfb   :  { %v201_v63 = vadd.f32 %v200_v62, %v199_v60  ;;  %202 = vst [vmem:[%s371_s6] sm:$0xff] %v188_v61 }
  0xfd   :  { %203 = vst [vmem:[%s372_s7] sm:$0xff] %v201_v63 }

// kernel: issegnet_forward.57
= control target key start
LH: loop header
LB: loop body
LE: loop exit
PB: predicated region body
PF: predicated region fallthrough
CT: control target
= control target key end

     0   :  { %v549_v3 = vmov 1966171168   ;;  %v550_v5 = vmov 1935823168   ;;  %v226_v13 = vlaneseq  ;;  %vm456_vm0 = vcmask 1041409   ;;  %s778_s0 = inlined_call_operand.vmem [shape: bf16[4,2,2,2,64], index: 0, kind: input, shape index: {}]   ;;  %s779_s1 = inlined_call_operand.vmem [shape: f32[1,1,1,1,64], index: 1, kind: input, shape index: {}]   ;;  %s780_s2 = inlined_call_operand.vmem [shape: f32[1,1,1,1,64], index: 2, kind: input, shape index: {}]   ;;  %s781_s3 = inlined_call_operand.vmem [shape: bf16[4,2,2,2,64], index: 3, kind: input, shape index: {}]   ;;  %s782_s4 = inlined_call_operand.vmem [shape: bf16[4,2,64], index: 4, kind: output, shape index: {}]  }
   0x1   :  { %v17_v0 = vld [vmem:[%s778_s0] sm:$0x1]  ;;  %v18_v1 = vld [vmem:[%s778_s0 + $0x1] sm:$0x1]  ;;  %v19_v2 = vld [vmem:[%s778_s0 + $0x2] sm:$0x1]  ;;  %v224_v4 = vunpack.c.l.s4 %v549_v3  ;;  %v336_v6 = vunpack.c.l.s4 %v550_v5 }
   0x2   :  { %v20_v7 = vld [vmem:[%s778_s0 + $0x3] sm:$0x1]  ;;  %v33_v8 = vunpack.c.l.bf16 %v17_v0  ;;  %v34_v9 = vunpack.c.l.bf16 %v18_v1  ;;  %v35_v10 = vunpack.c.l.bf16 %v19_v2  ;;  %v591_v11 = vld [vmem:[%s779_s1] ss:$0 sm:$0xff]  ;;  %v112_v16 = vld [vmem:[%s781_s3 + $0x1] sm:$0x1] }
   0x3   :  { %v596_v12 = vld [vmem:[%s780_s2] ss:$0 sm:$0xff]  ;;  %v36_v14 = vunpack.c.l.bf16 %v20_v7  ;;  %v113_v17 = vld [vmem:[%s781_s3 + $0x2] sm:$0x1]  ;;  %v225_v18 = vunpack.c.0.s8 %v224_v4  ;;  %v114_v22 = vld [vmem:[%s781_s3 + $0x3] sm:$0x1]  ;;  %v337_v23 = vunpack.c.0.s8 %v336_v6  ;;  %v128_v28 = vunpack.c.l.bf16 %v112_v16 }
   0x4   :  { %v111_v15 = vld [vmem:[%s781_s3] sm:$0x1]  ;;  %v56_v19 = vmul.f32 %v591_v11, %v33_v8  ;;  %v57_v20 = vmul.f32 %v591_v11, %v34_v9  ;;  %v58_v21 = vmul.f32 %v591_v11, %v35_v10  ;;  %v21_v24 = vld [vmem:[%s778_s0 + $0x4] sm:$0x1]  ;;  %v22_v25 = vld [vmem:[%s778_s0 + $0x5] sm:$0x1]  ;;  %v129_v29 = vunpack.c.l.bf16 %v113_v17 }
   0x5   :  { %v59_v26 = vmul.f32 %v591_v11, %v36_v14  ;;  %v127_v27 = vunpack.c.l.bf16 %v111_v15  ;;  %v227_v33 = vshrl.u32 %v226_v13, 7  ;;  %v23_v34 = vld [vmem:[%s778_s0 + $0x6] sm:$0x1]  ;;  %v24_v35 = vld [vmem:[%s778_s0 + $0x7] sm:$0x1]  ;;  %v130_v37 = vunpack.c.l.bf16 %v114_v22 }
   0x6   :  { %v79_v30 = vadd.f32 %v596_v12, %v56_v19  ;;  %v80_v31 = vadd.f32 %v596_v12, %v57_v20  ;;  %v81_v32 = vadd.f32 %v596_v12, %v58_v21  ;;  %v37_v38 = vunpack.c.l.bf16 %v21_v24  ;;  %v115_v48 = vld [vmem:[%s781_s3 + $0x4] sm:$0x1]  ;;  %v116_v49 = vld [vmem:[%s781_s3 + $0x5] sm:$0x1]  ;;  %v117_v58 = vld [vmem:[%s781_s3 + $0x6] sm:$0x1] }
   0x7   :  { %v82_v36 = vadd.f32 %v596_v12, %v59_v26  ;;  %v38_v39 = vunpack.c.l.bf16 %v22_v25  ;;  %v630_v43 = vsub.s32 %v225_v18, %v227_v33  ;;  %v632_v45 = vsub.s32 %v337_v23, %v227_v33  ;;  %v118_v59 = vld [vmem:[%s781_s3 + $0x7] sm:$0x1]  ;;  %v25_v4 = vld [vmem:[%s778_s0 + $0x8] sm:$0x1]  ;;  %v26_v5 = vld [vmem:[%s778_s0 + $0x9] sm:$0x1] }
   0x8   :  { %v95_v40 = vmax.f32 %v79_v30, 0.0  ;;  %v96_v41 = vmax.f32 %v80_v31, 0.0  ;;  %v97_v42 = vmax.f32 %v81_v32, 0.0  ;;  %v39_v46 = vunpack.c.l.bf16 %v23_v34  ;;  %v27_v10 = vld [vmem:[%s778_s0 + $0xa] sm:$0x1] }
   0x9   :  { %v98_v44 = vmax.f32 %v82_v36, 0.0  ;;  %v40_v47 = vunpack.c.l.bf16 %v24_v35  ;;  %v60_v53 = vmul.f32 %v591_v11, %v37_v38  ;;  %v61_v55 = vmul.f32 %v591_v11, %v38_v39  ;;  %v28_v17 = vld [vmem:[%s778_s0 + $0xb] sm:$0x1] }
   0xa   :  { %v143_v50 = vadd.f32 %v127_v27, %v95_v40  ;;  %v144_v51 = vadd.f32 %v128_v28, %v96_v41  ;;  %v145_v52 = vadd.f32 %v129_v29, %v97_v42  ;;  %v62_v56 = vmul.f32 %v591_v11, %v39_v46  ;;  %v119_v42 = vld [vmem:[%s781_s3 + $0x8] sm:$0x1] }
   0xb   :  { %v146_v54 = vadd.f32 %v130_v37, %v98_v44  ;;  %v63_v57 = vmul.f32 %v591_v11, %v40_v47  ;;  %v83_v61 = vadd.f32 %v596_v12, %v60_v53  ;;  %v131_v62 = vunpack.c.l.bf16 %v115_v48 }
   0xc   :  { %v159_v60 = vmax.f32 %v143_v50, %v145_v52  ;;  %v132_v63 = vunpack.c.l.bf16 %v116_v49  ;;  %v84_v1 = vadd.f32 %v596_v12, %v61_v55  ;;  %v85_v2 = vadd.f32 %v596_v12, %v62_v56  ;;  %v120_v49 = vld [vmem:[%s781_s3 + $0x9] sm:$0x1]  ;;  %v122_v55 = vld [vmem:[%s781_s3 + $0xb] sm:$0x1] }
   0xd   :  { %v160_v0 = vmax.f32 %v144_v51, %v146_v54  ;;  %v86_v3 = vadd.f32 %v596_v12, %v63_v57  ;;  %v99_v7 = vmax.f32 %v83_v61, 0.0  ;;  %v133_v8 = vunpack.c.l.bf16 %v117_v58  ;;  %v121_v54 = vld [vmem:[%s781_s3 + $0xa] sm:$0x1] }
   0xe   :  { %v539_v6 = vrot.slane %v159_v60, 9  ;;  %v134_v9 = vunpack.c.l.bf16 %v118_v59  ;;  %v100_v14 = vmax.f32 %v84_v1, 0.0  ;;  %v101_v15 = vmax.f32 %v85_v2, 0.0 }
   0xf   :  { %v540_v13 = vrot.slane %v160_v0, 9  ;;  %v102_v16 = vmax.f32 %v86_v3, 0.0  ;;  %v147_v19 = vadd.f32 %v131_v62, %v99_v7  ;;  %v41_v20 = vunpack.c.l.bf16 %v25_v4 }
  0x10   :  { %v199_v18 = vmax.f32 %v159_v60, %v539_v6  ;;  %v42_v21 = vunpack.c.l.bf16 %v26_v5  ;;  %v148_v23 = vadd.f32 %v132_v63, %v100_v14  ;;  %v149_v24 = vadd.f32 %v133_v8, %v101_v15  ;;  %v30_v5 = vld [vmem:[%s778_s0 + $0xd] sm:$0x1] }
  0x11   :  { %v200_v22 = vmax.f32 %v160_v0, %v540_v13  ;;  %v150_v25 = vadd.f32 %v134_v9, %v102_v16  ;;  %v43_v27 = vunpack.c.l.bf16 %v27_v10  ;;  %v44_v28 = vunpack.c.l.bf16 %v28_v17  ;;  %v29_v0 = vld [vmem:[%s778_s0 + $0xc] sm:$0x1]  ;;  %v31_v10 = vld [vmem:[%s778_s0 + $0xe] sm:$0x1]  ;;  %v32_v13 = vld [vmem:[%s778_s0 + $0xf] sm:$0x1] }
  0x12   :  { %v207_v26 = vpack.c.bf16 %v199_v18, %v199_v18  ;;  %v64_v29 = vmul.f32 %v591_v11, %v41_v20  ;;  %v161_v31 = vmax.f32 %v147_v19, %v149_v24  ;;  %v65_v33 = vmul.f32 %v591_v11, %v42_v21 }
  0x13   :  { %v208_v30 = vpack.c.bf16 %v200_v22, %v200_v22  ;;  %v162_v32 = vmax.f32 %v148_v23, %v150_v25  ;;  %v66_v35 = vmul.f32 %v591_v11, %v43_v27  ;;  %v67_v36 = vmul.f32 %v591_v11, %v44_v28 }
  0x14   :  { %v229_v34 = vrot.slane %v207_v26, %v630_v43  ;;  %v87_v37 = vadd.f32 %v596_v12, %v64_v29  ;;  %v541_v39 = vrot.slane %v161_v31, 9  ;;  %v88_v41 = vadd.f32 %v596_v12, %v65_v33 }
  0x15   :  { %v243_v38 = vrot.slane %v208_v30, %v630_v43  ;;  %v542_v40 = vrot.slane %v162_v32, 9  ;;  %v89_v46 = vadd.f32 %v596_v12, %v66_v35  ;;  %v90_v47 = vadd.f32 %v596_v12, %v67_v36 }
  0x16   :  { %v236_v44 = vrot.slane %v229_v34, %v630_v43  ;;  %v103_v48 = vmax.f32 %v87_v37, 0.0  ;;  %v201_v51 = vmax.f32 %v161_v31, %v541_v39  ;;  %v104_v53 = vmax.f32 %v88_v41, 0.0 }
  0x17   :  { %v250_v50 = vrot.slane %v243_v38, %v630_v43  ;;  %v202_v52 = vmax.f32 %v162_v32, %v542_v40  ;;  %v105_v57 = vmax.f32 %v89_v46, 0.0  ;;  %v106_v58 = vmax.f32 %v90_v47, 0.0 }
  0x18   :  { %v341_v56 = vrot.slane %v236_v44, %v632_v45  ;;  %v135_v59 = vunpack.c.l.bf16 %v119_v42  ;;  %v209_v61 = vpack.c.bf16 %v201_v51, %v201_v51  ;;  %v136_v63 = vunpack.c.l.bf16 %v120_v49 }
  0x19   :  { %v355_v60 = vrot.slane %v250_v50, %v632_v45  ;;  %v210_v62 = vpack.c.bf16 %v202_v52, %v202_v52  ;;  %v137_v2 = vunpack.c.l.bf16 %v121_v54  ;;  %v138_v3 = vunpack.c.l.bf16 %v122_v55  ;;  %v124_v52 = vld [vmem:[%s781_s3 + $0xd] sm:$0x1] }
  0x1a   :  { %v348_v1 = vrot.slane %v341_v56, %v632_v45  ;;  %v151_v4 = vadd.f32 %v135_v59, %v103_v48  ;;  %v257_v7 = vrot.slane %v209_v61, %v630_v43  ;;  %v152_v9 = vadd.f32 %v136_v63, %v104_v53  ;;  %v125_v53 = vld [vmem:[%s781_s3 + $0xe] sm:$0x1] }
  0x1b   :  { %v362_v6 = vrot.slane %v355_v60, %v632_v45  ;;  %v271_v8 = vrot.slane %v210_v62, %v630_v43  ;;  %v153_v15 = vadd.f32 %v137_v2, %v105_v57  ;;  %v154_v16 = vadd.f32 %v138_v3, %v106_v58 }
  0x1c   :  { %v447_v14 = vunpack.c.l.b16 %v348_v1  ;;  %v45_v17 = vunpack.c.l.bf16 %v29_v0  ;;  %vm528_vm1 = vcmask 516096   ;;  %v264_v19 = vrot.slane %v257_v7, %v630_v43 }
  0x1d   :  { %v448_v18 = vunpack.c.l.b16 %v362_v6  ;;  %v278_v20 = vrot.slane %v271_v8, %v630_v43  ;;  %v46_v21 = vunpack.c.l.bf16 %v30_v5  ;;  %v163_v22 = vmax.f32 %v151_v4, %v153_v15 }
  0x1e   :  { %v164_v23 = vmax.f32 %v152_v9, %v154_v16  ;;  %v47_v24 = vunpack.c.l.bf16 %v31_v10  ;;  %v48_v25 = vunpack.c.l.bf16 %v32_v13  ;;  %v369_v27 = vrot.slane %v264_v19, %v632_v45 }
  0x1f   :  { %v455_v26 = vrot.slane %v448_v18, 7  ;;  %v383_v28 = vrot.slane %v278_v20, %v632_v45  ;;  %v68_v29 = vmul.f32 %v591_v11, %v45_v17  ;;  %v543_v30 = vrot.slane %v163_v22, 9 }
  0x20   :  { %v544_v31 = vrot.slane %v164_v23, 9  ;;  %v69_v32 = vmul.f32 %v591_v11, %v46_v21  ;;  %v70_v33 = vmul.f32 %v591_v11, %v47_v24  ;;  %v376_v35 = vrot.slane %v369_v27, %v632_v45 }
  0x21   :  { %v457_v34 = vsel %vm456_vm0, %v455_v26, %v447_v14  ;;  %v390_v36 = vrot.slane %v383_v28, %v632_v45  ;;  %v71_v37 = vmul.f32 %v591_v11, %v48_v25  ;;  %v203_v39 = vmax.f32 %v163_v22, %v543_v30  ;;  %v123_v11 = vld [vmem:[%s781_s3 + $0xc] sm:$0x1] }
  0x22   :  { %v464_v38 = vpack.c.b16 %v457_v34, %v457_v34  ;;  %v204_v40 = vmax.f32 %v164_v23, %v544_v31  ;;  %v91_v41 = vadd.f32 %v596_v12, %v68_v29  ;;  %v449_v42 = vunpack.c.l.b16 %v376_v35 }
  0x23   :  { %v450_v44 = vunpack.c.l.b16 %v390_v36  ;;  %v92_v46 = vadd.f32 %v596_v12, %v69_v32  ;;  %v93_v47 = vadd.f32 %v596_v12, %v70_v33  ;;  %v211_v49 = vpack.c.bf16 %v203_v39, %v203_v39 }
  0x24   :  { %v474_v48 = vrot.slane %v464_v38, %v630_v43  ;;  %v212_v50 = vpack.c.bf16 %v204_v40, %v204_v40  ;;  %v94_v51 = vadd.f32 %v596_v12, %v71_v37  ;;  %v107_v55 = vmax.f32 %v91_v41, 0.0  ;;  %v126_v12 = vld [vmem:[%s781_s3 + $0xf] sm:$0x1] }
  0x25   :  { %v458_v54 = vrot.slane %v450_v44, 7  ;;  %v108_v56 = vmax.f32 %v92_v46, 0.0  ;;  %v109_v57 = vmax.f32 %v93_v47, 0.0  ;;  %v285_v59 = vrot.slane %v211_v49, %v630_v43 }
  0x26   :  { %v481_v58 = vrot.slane %v474_v48, %v630_v43  ;;  %v299_v60 = vrot.slane %v212_v50, %v630_v43  ;;  %v110_v61 = vmax.f32 %v94_v51, 0.0  ;;  %v139_v63 = vunpack.c.l.bf16 %v123_v11 }
  0x27   :  { %v459_v62 = vsel %vm456_vm0, %v458_v54, %v449_v42  ;;  %v140_v0 = vunpack.c.l.bf16 %v124_v52  ;;  %v141_v1 = vunpack.c.l.bf16 %v125_v53  ;;  %v292_v3 = vrot.slane %v285_v59, %v630_v43 }
  0x28   :  { %529 = vst.msk [vmem:[%s782_s4] sm:$0x1] %vm528_vm1, %v481_v58  ;;  %v465_v2 = vpack.c.b16 %v459_v62, %v459_v62  ;;  %v306_v4 = vrot.slane %v299_v60, %v630_v43  ;;  %v142_v5 = vunpack.c.l.bf16 %v126_v12  ;;  %v155_v6 = vadd.f32 %v139_v63, %v107_v55 }
  0x29   :  { %v156_v7 = vadd.f32 %v140_v0, %v108_v56  ;;  %v157_v8 = vadd.f32 %v141_v1, %v109_v57  ;;  %v397_v10 = vrot.slane %v292_v3, %v632_v45 }
  0x2a   :  { %v488_v9 = vrot.slane %v465_v2, %v630_v43  ;;  %v411_v13 = vrot.slane %v306_v4, %v632_v45  ;;  %v158_v14 = vadd.f32 %v142_v5, %v110_v61 }
  0x2b   :  { %v165_v15 = vmax.f32 %v155_v6, %v157_v8  ;;  %v404_v17 = vrot.slane %v397_v10, %v632_v45 }
  0x2c   :  { %v495_v16 = vrot.slane %v488_v9, %v630_v43  ;;  %v418_v18 = vrot.slane %v411_v13, %v632_v45  ;;  %v166_v19 = vmax.f32 %v156_v7, %v158_v14 }
  0x2d   :  { %v545_v20 = vrot.slane %v165_v15, 9  ;;  %v451_v21 = vunpack.c.l.b16 %v404_v17 }
  0x2e   :  { %530 = vst.msk [vmem:[%s782_s4 + $0x1] sm:$0x1] %vm528_vm1, %v495_v16  ;;  %v452_v22 = vunpack.c.l.b16 %v418_v18  ;;  %v546_v23 = vrot.slane %v166_v19, 9 }
  0x2f   :  { %v205_v24 = vmax.f32 %v165_v15, %v545_v20 }
  0x30   :  { %v460_v25 = vrot.slane %v452_v22, 7  ;;  %v206_v26 = vmax.f32 %v166_v19, %v546_v23 }
  0x31   :  { %v213_v27 = vpack.c.bf16 %v205_v24, %v205_v24 }
  0x32   :  { %v461_v28 = vsel %vm456_vm0, %v460_v25, %v451_v21  ;;  %v214_v29 = vpack.c.bf16 %v206_v26, %v206_v26 }
  0x33   :  { %v466_v30 = vpack.c.b16 %v461_v28, %v461_v28  ;;  %v313_v31 = vrot.slane %v213_v27, %v630_v43 }
  0x34   :  { %v327_v32 = vrot.slane %v214_v29, %v630_v43 }
  0x35   :  { %v502_v33 = vrot.slane %v466_v30, %v630_v43  ;;  %v320_v34 = vrot.slane %v313_v31, %v630_v43 }
  0x36   :  { %v334_v35 = vrot.slane %v327_v32, %v630_v43 }
  0x37   :  { %v509_v36 = vrot.slane %v502_v33, %v630_v43  ;;  %v425_v37 = vrot.slane %v320_v34, %v632_v45 }
  0x38   :  { %v439_v38 = vrot.slane %v334_v35, %v632_v45 }
  0x39   :  { %531 = vst.msk [vmem:[%s782_s4 + $0x2] sm:$0x1] %vm528_vm1, %v509_v36  ;;  %v432_v39 = vrot.slane %v425_v37, %v632_v45 }
  0x3a   :  { %v446_v40 = vrot.slane %v439_v38, %v632_v45 }
  0x3b   :  { %v453_v41 = vunpack.c.l.b16 %v432_v39 }
  0x3c   :  { %v454_v42 = vunpack.c.l.b16 %v446_v40 }
  0x3e   :  { %v462_v44 = vrot.slane %v454_v42, 7 }
  0x40   :  { %v463_v46 = vsel %vm456_vm0, %v462_v44, %v453_v41 }
  0x41   :  { %v467_v47 = vpack.c.b16 %v463_v46, %v463_v46 }
  0x43   :  { %v516_v48 = vrot.slane %v467_v47, %v630_v43 }
  0x45   :  { %v523_v49 = vrot.slane %v516_v48, %v630_v43 }
  0x47   :  { %532 = vst.msk [vmem:[%s782_s4 + $0x3] sm:$0x1] %vm528_vm1, %v523_v49 }

// kernel: issegnet_forward.59
= control target key start
LH: loop header
LB: loop body
LE: loop exit
PB: predicated region body
PF: predicated region fallthrough
CT: control target
= control target key end

     0   :  { %vm34_vm0 = vcmask 257024   ;;  %s74_s0 = inlined_call_operand.vmem [shape: bf16[8,32], index: 0, kind: input, shape index: {}]   ;;  %s75_s1 = inlined_call_operand.vmem [shape: f32[1,32], index: 1, kind: input, shape index: {}]   ;;  %s76_s2 = inlined_call_operand.vmem [shape: f32[1,32], index: 2, kind: input, shape index: {}]   ;;  %s77_s3 = inlined_call_operand.vmem [shape: bf16[8,32], index: 3, kind: output, shape index: {}]  }
   0x1   :  { %v14_v0 = vld [vmem:[%s74_s0] sm:$0xf] }
   0x2   :  { %v40_v1 = vld [vmem:[%s75_s1] ss:$0 sm:$0xff]  ;;  %v15_v2 = vunpack.c.l.bf16 %v14_v0 }
   0x3   :  { %v41_v3 = vld [vmem:[%s76_s2] ss:$0 sm:$0xff] }
   0x4   :  { %v23_v4 = vmul.f32 %v40_v1, %v15_v2 }
   0x6   :  { %v31_v5 = vadd.f32 %v41_v3, %v23_v4 }
   0x8   :  { %v32_v6 = vmax.f32 %v31_v5, 0.0 }
   0xa   :  { %v33_v7 = vpack.c.bf16 %v32_v6, %v32_v6 }
   0xc   :  { %35 = vst.msk [vmem:[%s77_s3] sm:$0xf] %vm34_vm0, %v33_v7 }

// kernel: issegnet_forward.58
= control target key start
LH: loop header
LB: loop body
LE: loop exit
PB: predicated region body
PF: predicated region fallthrough
CT: control target
= control target key end

     0   :  { %v626_v36 = vmov 0.0   ;;  %vm627_vm0 = vmmov 0   ;;  %vm323_vm1 = vcmask 523264   ;;  %vm450_vm2 = vcmask 261120   ;;  %s783_s1 = inlined_call_operand.vmem [shape: bf16[576,32], index: 1, kind: input, shape index: {}]   ;;  %s784_s0 = inlined_call_operand.vmem [shape: bf16[8,576], index: 0, kind: input, shape index: {}]   ;;  %s785_s2 = inlined_call_operand.vmem [shape: bf16[8,32], index: 2, kind: output, shape index: {0}]   ;;  %s786_s3 = inlined_call_operand.vmem [shape: f32[1,8,32], index: 3, kind: output, shape index: {1}]   ;;  %s787_s4 = inlined_call_operand.vmem [shape: f32[1,8,32], index: 4, kind: output, shape index: {2}]  }
   0x1   :  { %v585_v0 = vld [vmem:[%s783_s1 + $0x40] sm:$0xff]   ;;  %v589_v4 = vld [vmem:[%s783_s1 + $0x48] sm:$0xff]   ;;  %v593_v8 = vld [vmem:[%s783_s1 + $0x50] sm:$0xff]   ;;  %vm448_vm3 = vcmask 257024  }
   0x2   :  { %v586_v1 = vld [vmem:[%s783_s1 + $0xc0] sm:$0xff]   ;;  %522 = vmatprep.subr.bf16.mxu0 %v585_v0  ;;  %v590_v5 = vld [vmem:[%s783_s1 + $0xc8] sm:$0xff]   ;;  %v594_v9 = vld [vmem:[%s783_s1 + $0xd0] sm:$0xff]  }
   0x3   :  { %v587_v2 = vld [vmem:[%s783_s1] sm:$0xff]   ;;  %544 = vmatprep.subr.bf16.mxu1 %v586_v1  ;;  %v591_v6 = vld [vmem:[%s783_s1 + $0x8] sm:$0xff]   ;;  %v595_v10 = vld [vmem:[%s783_s1 + $0x10] sm:$0xff]  }
   0x4   :  { %v588_v3 = vld [vmem:[%s783_s1 + $0x80] sm:$0xff]   ;;  %523 = vmatpush3.bf16.msra.mxu0 %v587_v2  ;;  %v592_v7 = vld [vmem:[%s783_s1 + $0x88] sm:$0xff]   ;;  %v596_v11 = vld [vmem:[%s783_s1 + $0x90] sm:$0xff]  }
   0x5   :  { %545 = vmatpush3.bf16.msra.mxu1 %v588_v3  ;;  %524 = vmatprep.subr.bf16.mxu0 %v589_v4  ;;  %v597_v12 = vld [vmem:[%s783_s1 + $0x58] sm:$0xff]   ;;  %v601_v16 = vld [vmem:[%s783_s1 + $0x60] sm:$0xff]   ;;  %v605_v20 = vld [vmem:[%s783_s1 + $0x68] sm:$0xff]  }
   0x6   :  { %546 = vmatprep.subr.bf16.mxu1 %v590_v5  ;;  %v598_v13 = vld [vmem:[%s783_s1 + $0xd8] sm:$0xff]   ;;  %v602_v17 = vld [vmem:[%s783_s1 + $0xe0] sm:$0xff]   ;;  %v606_v21 = vld [vmem:[%s783_s1 + $0xe8] sm:$0xff]  }
   0x7   :  { %v599_v14 = vld [vmem:[%s783_s1 + $0x18] sm:$0xff]   ;;  %v603_v18 = vld [vmem:[%s783_s1 + $0x20] sm:$0xff]   ;;  %v607_v22 = vld [vmem:[%s783_s1 + $0x28] sm:$0xff]  }
   0x8   :  { %525 = vmatpush3.bf16.msra.mxu0 %v591_v6  ;;  %v600_v15 = vld [vmem:[%s783_s1 + $0x98] sm:$0xff]   ;;  %v604_v19 = vld [vmem:[%s783_s1 + $0xa0] sm:$0xff]   ;;  %v608_v23 = vld [vmem:[%s783_s1 + $0xa8] sm:$0xff]  }
   0x9   :  { %547 = vmatpush3.bf16.msra.mxu1 %v592_v7  ;;  %526 = vmatprep.subr.bf16.mxu0 %v593_v8  ;;  %v609_v24 = vld [vmem:[%s783_s1 + $0x70] sm:$0xff]   ;;  %v613_v28 = vld [vmem:[%s783_s1 + $0x78] sm:$0xff]   ;;  %v15_v32 = vld [vmem:[%s784_s0] sm:$0xff] }
   0xa   :  { %548 = vmatprep.subr.bf16.mxu1 %v594_v9  ;;  %v610_v25 = vld [vmem:[%s783_s1 + $0xf0] sm:$0xff]   ;;  %v614_v29 = vld [vmem:[%s783_s1 + $0xf8] sm:$0xff]   ;;  %v480_v33 = vcombine.low %v15_v32, %v15_v32  ;;  %v481_v34 = vcombine.high %v15_v32, %v15_v32  ;;  %v16_v35 = vld [vmem:[%s784_s0 + $0x8] sm:$0xff] }
   0xb   :  { %v611_v26 = vld [vmem:[%s783_s1 + $0x30] sm:$0xff]   ;;  %v615_v30 = vld [vmem:[%s783_s1 + $0x38] sm:$0xff]   ;;  %v482_v37 = vcombine.low %v16_v35, %v16_v35  ;;  %v483_v38 = vcombine.high %v16_v35, %v16_v35  ;;  %v622_v39 = vld [vmem:[%s783_s1 + $0x100] sm:$0xff]  }
   0xc   :  { %527 = vmatpush3.bf16.msra.mxu0 %v595_v10  ;;  %v612_v27 = vld [vmem:[%s783_s1 + $0xb0] sm:$0xff]   ;;  %v616_v31 = vld [vmem:[%s783_s1 + $0xb8] sm:$0xff]   ;;  %359 = vmatprep.mubr.bf16.mxu0 %v481_v34  ;;  %v623_v40 = vld [vmem:[%s783_s1 + $0x108] sm:$0xff]  }
   0xd   :  { %549 = vmatpush3.bf16.msra.mxu1 %v596_v11  ;;  %528 = vmatprep.subr.bf16.mxu0 %v597_v12  ;;  %v624_v41 = vld [vmem:[%s783_s1 + $0x110] sm:$0xff]   ;;  %v625_v42 = vld [vmem:[%s783_s1 + $0x118] sm:$0xff]  }
   0xe   :  { %550 = vmatprep.subr.bf16.mxu1 %v598_v13  ;;  %399 = vmatprep.mubr.bf16.mxu1 %v483_v38  ;;  %v619_v43 = vld [vmem:[%s784_s0 + $0x10] ss:$0 sps:$4 sm:$0xff]  }
  0x10   :  { %529 = vmatpush3.bf16.msra.mxu0 %v599_v14 }
  0x11   :  { %551 = vmatpush3.bf16.msra.mxu1 %v600_v15  ;;  %530 = vmatprep.subr.bf16.mxu0 %v601_v16 }
  0x12   :  { %552 = vmatprep.subr.bf16.mxu1 %v602_v17 }
  0x14   :  { %531 = vmatpush3.bf16.msra.mxu0 %v603_v18 }
  0x15   :  { %553 = vmatpush3.bf16.msra.mxu1 %v604_v19  ;;  %532 = vmatprep.subr.bf16.mxu0 %v605_v20 }
  0x16   :  { %554 = vmatprep.subr.bf16.mxu1 %v606_v21 }
  0x18   :  { %533 = vmatpush3.bf16.msra.mxu0 %v607_v22 }
  0x19   :  { %555 = vmatpush3.bf16.msra.mxu1 %v608_v23  ;;  %534 = vmatprep.subr.bf16.mxu0 %v609_v24 }
  0x1a   :  { %556 = vmatprep.subr.bf16.mxu1 %v610_v25 }
  0x1c   :  { %535 = vmatpush3.bf16.msra.mxu0 %v611_v26 }
  0x1d   :  { %557 = vmatpush3.bf16.msra.mxu1 %v612_v27  ;;  %536 = vmatprep.subr.bf16.mxu0 %v613_v28 }
  0x1e   :  { %558 = vmatprep.subr.bf16.mxu1 %v614_v29 }
  0x20   :  { %537 = vmatpush3.bf16.msra.mxu0 %v615_v30 }
  0x21   :  { %559 = vmatpush3.bf16.msra.mxu1 %v616_v31  ;;  %571 = vmatprep.subr.bf16.mxu0 %v626_v36 }
  0x23   :  { %360 = vmatmul.mubr.bf16.vlgmr.msra.gmra.mrb[0].mxu0 %v480_v33 }
  0x24   :  { %400 = vmatmul.mubr.bf16.vlgmr.msra.gmra.mrb[0].mxu1 %v482_v37  ;;  %572 = vmatpush3.bf16.msra.mxu0 %v622_v39 }
  0x25   :  { %573 = vmatprep.subr.bf16.mxu0 %v626_v36  ;;  %579 = vmatprep.mubr.msk.bf16.mxu0 %vm627_vm0, %v626_v36 }
  0x28   :  { %574 = vmatpush3.bf16.msra.mxu0 %v623_v40 }
  0x29   :  { %575 = vmatprep.subr.bf16.mxu0 %v626_v36 }
  0x2c   :  { %576 = vmatpush3.bf16.msra.mxu0 %v624_v41 }
  0x2d   :  { %577 = vmatprep.subr.bf16.mxu0 %v626_v36 }
  0x30   :  { %578 = vmatpush3.bf16.msra.mxu0 %v625_v42 }
  0x33   :  { %580 = vmatmul.mubr.msk.bf16.vlgmr.msra.gmra.mrb[4].mxu0 %vm323_vm1, %v619_v43 }
  0xf6   :  { %v538_v44 = vpop.f32.mrb[0].mxu0 }
  0xf7   :  { %v560_v45 = vpop.f32.mrb[0].mxu1  ;;  %v539_v46 = vpop.f32.mrb[1].mxu0 }
  0xf8   :  { %v540_v47 = vadd.f32 %v539_v46, %v538_v44  ;;  %v561_v48 = vpop.f32.mrb[1].mxu1  ;;  %v541_v49 = vpop.f32.mrb[2].mxu0 }
  0xf9   :  { %v562_v50 = vadd.f32 %v561_v48, %v560_v45  ;;  %v542_v51 = vpop.f32.mrb[3].mxu0  ;;  %v563_v52 = vpop.f32.mrb[2].mxu1 }
  0xfa   :  { %v564_v53 = vpop.f32.mrb[3].mxu1 }
  0xfb   :  { %v402_v54 = vadd.f32 %v562_v50, %v540_v47 }
 0x106   :  { %v441_v55 = vpop.f32.mrb[4].mxu0 }
 0x107   :  { %v442_v56 = vadd.f32 %v441_v55, %v402_v54  ;;  %v581_v57 = vpop.f32.mrb[5].mxu0 }
 0x108   :  { %v444_v58 = vpop.f32.mrb[6].mxu0 }
 0x109   :  { %v447_v59 = vpack.c.bf16 %v442_v56, %v442_v56  ;;  %v451_v60 = vsel %vm450_vm2, %v442_v56, 0.0  ;;  %v458_v61 = vmul.f32 %v442_v56, %v442_v56  ;;  %v582_v62 = vpop.f32.mrb[7].mxu0 }
 0x10a   :  { %v452_v63 = vrot.slane %v451_v60, 4 }
 0x10b   :  { %449 = vst.msk [vmem:[%s785_s2] sm:$0xf] %vm448_vm3, %v447_v59  ;;  %v459_v0 = vsel %vm450_vm2, %v458_v61, 0.0 }
 0x10c   :  { %v453_v1 = vadd.f32 %v452_v63, %v451_v60  ;;  %v460_v2 = vrot.slane %v459_v0, 4 }
 0x10e   :  { %v454_v3 = vrot.slane %v453_v1, 2  ;;  %v461_v4 = vadd.f32 %v460_v2, %v459_v0 }
 0x110   :  { %v455_v5 = vadd.f32 %v454_v3, %v453_v1  ;;  %v462_v6 = vrot.slane %v461_v4, 2 }
 0x112   :  { %v456_v7 = vrot.slane %v455_v5, 1  ;;  %v463_v8 = vadd.f32 %v462_v6, %v461_v4 }
 0x114   :  { %v457_v9 = vadd.f32 %v456_v7, %v455_v5  ;;  %v464_v10 = vrot.slane %v463_v8, 1 }
 0x116   :  { %v465_v11 = vadd.f32 %v464_v10, %v463_v8  ;;  %466 = vst.msk [vmem:[%s786_s3] sm:$0xff] %vm450_vm2, %v457_v9 }
 0x118   :  { %467 = vst.msk [vmem:[%s787_s4] sm:$0xff] %vm450_vm2, %v465_v11 }

// kernel: issegnet_forward.60
= control target key start
LH: loop header
LB: loop body
LE: loop exit
PB: predicated region body
PF: predicated region fallthrough
CT: control target
= control target key end

     0   :  { %v307_v0 = vmov 0.0   ;;  %vm308_vm0 = vmmov 0   ;;  %v309_v3 = vmov 0   ;;  %vm96_vm1 = vcmask 523264   ;;  %s398_s1 = inlined_call_operand.vmem [shape: bf16[64,384], index: 1, kind: input, shape index: {}]   ;;  %s399_s0 = inlined_call_operand.vmem [shape: bf16[8,64], index: 0, kind: input, shape index: {}]   ;;  %s400_s2 = inlined_call_operand.vmem [shape: bf16[8,384], index: 2, kind: output, shape index: {0}]   ;;  %s401_s3 = inlined_call_operand.vmem [shape: f32[1,8,384], index: 3, kind: output, shape index: {1}]   ;;  %s402_s4 = inlined_call_operand.vmem [shape: f32[1,8,384], index: 4, kind: output, shape index: {2}]  }
   0x1   :  { %276 = vmatprep.subr.bf16.mxu1 %v307_v0  ;;  %v291_v1 = vld [vmem:[%s398_s1 + $0x4] ss:$12 sps:$4 sm:$0xff]   ;;  %284 = vmatprep.mubr.msk.bf16.mxu1 %vm308_vm0, %v307_v0  ;;  %v293_v2 = vld [vmem:[%s398_s1 + $0x8] ss:$12 sps:$4 sm:$0xff]   ;;  %v294_v4 = vld [vmem:[%s398_s1] ss:$12 sps:$4 sm:$0xff]  }
   0x2   :  { %132 = vmatprep.mubr.bf16.mxu0 %v309_v3  ;;  %100 = vmatprep.subr.bf16.mxu0 %v291_v1  ;;  %v295_v5 = vld [vmem:[%s398_s1 + $0x1c] ss:$12 sps:$4 sm:$0xff]   ;;  %v297_v6 = vld [vmem:[%s398_s1 + $0x20] ss:$12 sps:$4 sm:$0xff]   ;;  %v298_v7 = vld [vmem:[%s398_s1 + $0x18] ss:$12 sps:$4 sm:$0xff]  }
   0x3   :  { %277 = vmatpush3.bf16.msra.mxu1 %v293_v2  ;;  %101 = vmatpush1.bf16.msra.mxu0 %v294_v4  ;;  %v299_v8 = vld [vmem:[%s398_s1 + $0x34] ss:$12 sps:$4 sm:$0xff]   ;;  %v301_v9 = vld [vmem:[%s398_s1 + $0x38] ss:$12 sps:$4 sm:$0xff]   ;;  %v302_v10 = vld [vmem:[%s398_s1 + $0x30] ss:$12 sps:$4 sm:$0xff]  }
   0x4   :  { %278 = vmatprep.subr.bf16.mxu1 %v307_v0  ;;  %102 = vmatprep.subr.bf16.mxu0 %v295_v5  ;;  %v303_v11 = vld [vmem:[%s398_s1 + $0x4c] ss:$12 sps:$4 sm:$0xff]   ;;  %v305_v12 = vld [vmem:[%s398_s1 + $0x50] ss:$12 sps:$4 sm:$0xff]   ;;  %v306_v13 = vld [vmem:[%s398_s1 + $0x48] ss:$12 sps:$4 sm:$0xff]  }
   0x5   :  { %v15_v14 = vld [vmem:[%s399_s0] sm:$0xf] }
   0x7   :  { %279 = vmatpush3.bf16.msra.mxu1 %v297_v6  ;;  %103 = vmatpush1.bf16.msra.mxu0 %v298_v7 }
   0x8   :  { %280 = vmatprep.subr.bf16.mxu1 %v307_v0  ;;  %104 = vmatprep.subr.bf16.mxu0 %v299_v8 }
   0xb   :  { %281 = vmatpush3.bf16.msra.mxu1 %v301_v9  ;;  %105 = vmatpush1.bf16.msra.mxu0 %v302_v10 }
   0xc   :  { %282 = vmatprep.subr.bf16.mxu1 %v307_v0  ;;  %106 = vmatprep.subr.bf16.mxu0 %v303_v11 }
   0xf   :  { %283 = vmatpush3.bf16.msra.mxu1 %v305_v12  ;;  %107 = vmatpush1.bf16.msra.mxu0 %v306_v13 }
  0x12   :  { %285 = vmatmul.mubr.msk.bf16.vlgmr.msra.gmra.mrb[0].mxu1 %vm96_vm1, %v15_v14  ;;  %265 = vmatmul.mubr.msk.bf16.vlgmr.msra.gmra.mrb[0].mxu0 %vm96_vm1, %v15_v14 }
  0xe5   :  { %v175_v15 = vpop.f32.mrb[0].mxu1  ;;  %v134_v19 = vpop.f32.mrb[0].mxu0 }
  0xe6   :  { %v270_v16 = vpack.c.bf16 %v175_v15, %v175_v15  ;;  %v208_v17 = vrot.slane %v175_v15, 4  ;;  %v216_v18 = vmul.f32 %v175_v15, %v175_v15  ;;  %v286_v20 = vpop.f32.mrb[1].mxu1  ;;  %v196_v21 = vrot.slane %v134_v19, 4  ;;  %v136_v23 = vpop.f32.mrb[1].mxu0 }
  0xe7   :  { %v214_v22 = vmul.f32 %v134_v19, %v134_v19  ;;  %v178_v24 = vpop.f32.mrb[2].mxu1  ;;  %v269_v27 = vpack.c.bf16 %v136_v23, %v134_v19  ;;  %v202_v28 = vrot.slane %v136_v23, 4  ;;  %v138_v29 = vpop.f32.mrb[2].mxu0  ;;  %v215_v33 = vmul.f32 %v136_v23, %v136_v23 }
  0xe8   :  { %195 = vst [vmem:[%s400_s2 + $0x8] sm:$0xf] %v270_v16  ;;  %v209_v25 = vadd.f32 %v208_v17, %v175_v15  ;;  %v229_v26 = vrot.slane %v216_v18, 4  ;;  %v287_v30 = vpop.f32.mrb[3].mxu1  ;;  %v197_v31 = vadd.f32 %v196_v21, %v134_v19  ;;  %v139_v34 = vpop.f32.mrb[3].mxu0 }
  0xe9   :  { %v217_v32 = vrot.slane %v214_v22, 4  ;;  %194 = vst [vmem:[%s400_s2] sm:$0xff] %v269_v27  ;;  %v203_v37 = vadd.f32 %v202_v28, %v136_v23  ;;  %v223_v40 = vrot.slane %v215_v33, 4 }
  0xea   :  { %v210_v35 = vrot.slane %v209_v25, 2  ;;  %v230_v36 = vadd.f32 %v229_v26, %v216_v18  ;;  %v198_v38 = vrot.slane %v197_v31, 2 }
  0xeb   :  { %v218_v39 = vadd.f32 %v217_v32, %v214_v22  ;;  %v204_v43 = vrot.slane %v203_v37, 2  ;;  %v224_v46 = vadd.f32 %v223_v40, %v215_v33 }
  0xec   :  { %v211_v41 = vadd.f32 %v210_v35, %v209_v25  ;;  %v231_v42 = vrot.slane %v230_v36, 2  ;;  %v199_v44 = vadd.f32 %v198_v38, %v197_v31 }
  0xed   :  { %v219_v45 = vrot.slane %v218_v39, 2  ;;  %v205_v49 = vadd.f32 %v204_v43, %v203_v37  ;;  %v225_v52 = vrot.slane %v224_v46, 2 }
  0xee   :  { %v212_v47 = vrot.slane %v211_v41, 1  ;;  %v232_v48 = vadd.f32 %v231_v42, %v230_v36  ;;  %v200_v50 = vrot.slane %v199_v44, 1 }
  0xef   :  { %v220_v51 = vadd.f32 %v219_v45, %v218_v39  ;;  %v206_v55 = vrot.slane %v205_v49, 1  ;;  %v226_v58 = vadd.f32 %v225_v52, %v224_v46 }
  0xf0   :  { %v213_v53 = vadd.f32 %v212_v47, %v211_v41  ;;  %v233_v54 = vrot.slane %v232_v48, 1  ;;  %v201_v56 = vadd.f32 %v200_v50, %v199_v44 }
  0xf1   :  { %v221_v57 = vrot.slane %v220_v51, 1  ;;  %v207_v60 = vadd.f32 %v206_v55, %v205_v49  ;;  %v227_v62 = vrot.slane %v226_v58, 1 }
  0xf2   :  { %v234_v59 = vadd.f32 %v233_v54, %v232_v48  ;;  %237 = vst [vmem:[%s401_s3 + $0x10] sm:$0xff] %v213_v53  ;;  %235 = vst [vmem:[%s401_s3] sm:$0xff] %v201_v56 }
  0xf3   :  { %v222_v61 = vadd.f32 %v221_v57, %v220_v51  ;;  %236 = vst [vmem:[%s401_s3 + $0x8] sm:$0xff] %v207_v60  ;;  %v228_v63 = vadd.f32 %v227_v62, %v226_v58 }
  0xf4   :  { %240 = vst [vmem:[%s402_s4 + $0x10] sm:$0xff] %v234_v59 }
  0xf5   :  { %238 = vst [vmem:[%s402_s4] sm:$0xff] %v222_v61  ;;  %239 = vst [vmem:[%s402_s4 + $0x8] sm:$0xff] %v228_v63 }

// kernel: issegnet_forward.61
= control target key start
LH: loop header
LB: loop body
LE: loop exit
PB: predicated region body
PF: predicated region fallthrough
CT: control target
= control target key end

     0   :  { %v21_v0 = vlaneseq  ;;  %s123_s0 = inlined_call_operand.vmem [shape: bf16[8,384], index: 0, kind: input, shape index: {}]   ;;  %s124_s1 = inlined_call_operand.vmem [shape: f32[1,384], index: 1, kind: input, shape index: {}]   ;;  %s125_s2 = inlined_call_operand.vmem [shape: f32[1,384], index: 2, kind: input, shape index: {}]   ;;  %s126_s3 = inlined_call_operand.vmem [shape: bf16[8,384], index: 3, kind: output, shape index: {}]  }
   0x1   :  { %v14_v1 = vld [vmem:[%s123_s0] sm:$0xff]  ;;  %v15_v3 = vld [vmem:[%s123_s0 + $0x8] sm:$0xf] }
   0x2   :  { %v22_v2 = vshrl.u32 %v21_v0, 7  ;;  %v16_v4 = vunpack.c.l.bf16 %v14_v1  ;;  %v19_v5 = vld [vmem:[%s124_s1] sm:$0x7]  ;;  %v17_v7 = vunpack.c.h.bf16 %v14_v1  ;;  %v18_v11 = vunpack.c.l.bf16 %v15_v3 }
   0x3   :  { %v39_v6 = vld [vmem:[%s125_s2] sm:$0x7] }
   0x4   :  { %v23_v8 = vsub.s32 0, %v22_v2  ;;  %v27_v9 = vsub.s32 1, %v22_v2  ;;  %v31_v10 = vsub.s32 2, %v22_v2 }
   0x6   :  { %v24_v12 = vrot.slane %v19_v5, %v23_v8  ;;  %v28_v13 = vrot.slane %v19_v5, %v27_v9  ;;  %v44_v14 = vrot.slane %v39_v6, %v23_v8  ;;  %v48_v15 = vrot.slane %v39_v6, %v27_v9 }
   0x7   :  { %v32_v16 = vrot.slane %v19_v5, %v31_v10  ;;  %v52_v17 = vrot.slane %v39_v6, %v31_v10 }
   0x8   :  { %v36_v18 = vmul.f32 %v24_v12, %v16_v4  ;;  %v37_v19 = vmul.f32 %v28_v13, %v17_v7 }
   0x9   :  { %v38_v20 = vmul.f32 %v32_v16, %v18_v11 }
   0xa   :  { %v56_v21 = vadd.f32 %v44_v14, %v36_v18  ;;  %v57_v22 = vadd.f32 %v48_v15, %v37_v19 }
   0xb   :  { %v58_v23 = vadd.f32 %v52_v17, %v38_v20 }
   0xc   :  { %v59_v24 = vmax.f32 %v56_v21, 0.0  ;;  %v60_v25 = vmax.f32 %v57_v22, 0.0 }
   0xd   :  { %v61_v26 = vmax.f32 %v58_v23, 0.0 }
   0xe   :  { %v83_v27 = vpack.c.bf16 %v60_v25, %v59_v24 }
   0xf   :  { %v84_v28 = vpack.c.bf16 %v61_v26, %v61_v26 }
  0x10   :  { %75 = vst [vmem:[%s126_s3] sm:$0xff] %v83_v27 }
  0x11   :  { %76 = vst [vmem:[%s126_s3 + $0x8] sm:$0xf] %v84_v28 }

// kernel: issegnet_forward.63
= control target key start
LH: loop header
LB: loop body
LE: loop exit
PB: predicated region body
PF: predicated region fallthrough
CT: control target
= control target key end

     0   :  { %s418_s12 = smov 0   ;;  %s420_s13 = smov 0   ;;  %s450_s0 = inlined_call_operand.vmem [shape: bf16[3,8,32], index: 0, kind: input, shape index: {}]   ;;  %s451_s1 = inlined_call_operand.vmem [shape: f32[3,1,32], index: 1, kind: input, shape index: {}]   ;;  %s452_s2 = inlined_call_operand.vmem [shape: f32[3,1,32], index: 2, kind: input, shape index: {}]   ;;  %s453_s3 = inlined_call_operand.vmem [shape: bf16[3,8,32], index: 3, kind: output, shape index: {}]  }
   0x1   :  { %s422_s14 = smov 0  }
   0x2 LB: > { %s25_s15 = sadd.s32 1, %s392_s13  ;;  %p343_p0 = scmp.ge.s32.totalorder %s396_s14, 1  ;;  %s396_s14 = sphi %s422_s14, %s13_s14   ;;  %s392_s13 = sphi %s420_s13, %s455_s13   ;;  %s388_s12 = sphi %s418_s12, %s454_s12  }
   0x3   : > { %p27_p1 = scmp.ge.s32.totalorder %s25_s15, 3  ;;  %p171_p2 = scmp.lt.s32.totalorder %s396_s14, 4 }
   0x5   : > { %s457_s15 = smov (%p27_p1, %s25_s15), 0  ;;  %p172_p3 = pnand %p343_p0, %p171_p2 }
   0x6   : > { %p205_p4 = scmp.lt.s32.totalorder (!%p172_p3), %s388_s12, 2  ;;  %vm245_vm0 = vcmask (!%p172_p3), 257024  }
   0x7   : > { %175 = sbr.rel (%p172_p3) target bundleno = 29 (0x1d), region = 32 }
   0xe   : > { %s459_s12 = smov (!%p205_p4, %s388_s12), 2 }
   0xf   : > { %s344_s16 = sshll.u32 %s459_s12, 2  ;;  %s214_s19 = scalar_lea.vmem %s451_s1, %s459_s12 }
  0x10   : > { %s211_s22 = scalar_lea.vmem %s450_s0, %s344_s16  ;;  %s217_s25 = scalar_lea.vmem %s452_s2, %s459_s12  ;;  %v346_v1 = vld [vmem:[%s214_s19] ss:$0 sm:$0xff] }
  0x11   : > { %v225_v0 = vld [vmem:[%s211_s22] sm:$0xf]  ;;  %s224_s28 = scalar_lea.vmem %s453_s3, %s344_s16 }
  0x12   : > { %v226_v2 = vunpack.c.l.bf16 %v225_v0  ;;  %v347_v3 = vld [vmem:[%s217_s25] ss:$0 sm:$0xff] }
  0x14   : > { %v234_v4 = vmul.f32 %v346_v1, %v226_v2 }
  0x16   : > { %v242_v5 = vadd.f32 %v347_v3, %v234_v4 }
  0x18   : > { %v243_v6 = vmax.f32 %v242_v5, 0.0 }
  0x1a   : > { %v244_v7 = vpack.c.bf16 %v243_v6, %v243_v6 }
  0x1c   : > { %246 = vst.msk [vmem:[%s224_s28] sm:$0xf] %vm245_vm0, %v244_v7 }
  0x1d PF: > { %s13_s14 = sadd.s32 1, %s396_s14   ;;  %s454_s12 = smov %s392_s13 }
  0x1e   : > { %p10_p5 = scmp.ge.s32.totalorder %s13_s14, 5   ;;  %s455_s13 = smov %s457_s15 }
  0x20   :  { %12 = sbr.rel (!%p10_p5) target bundleno = 2 (0x2), region = 68 }

// kernel: issegnet_forward.62
= control target key start
LH: loop header
LB: loop body
LE: loop exit
PB: predicated region body
PF: predicated region fallthrough
CT: control target
= control target key end

     0   :  { %s1666_s15 = smov 0   ;;  %s1668_s16 = smov 0   ;;  %s1799_s0 = inlined_call_operand.vmem [shape: bf16[3,8,1152], index: 0, kind: input, shape index: {}]   ;;  %s1800_s1 = inlined_call_operand.vmem [shape: bf16[3,1152,32], index: 1, kind: input, shape index: {}]   ;;  %s1801_s2 = inlined_call_operand.vmem [shape: bf16[3,8,32], index: 2, kind: output, shape index: {0}]   ;;  %s1802_s3 = inlined_call_operand.vmem [shape: f32[3,1,8,32], index: 3, kind: output, shape index: {1}]   ;;  %s1803_s4 = inlined_call_operand.vmem [shape: f32[3,1,8,32], index: 4, kind: output, shape index: {2}]  }
   0x1   :  { %s1670_s17 = smov 0  }
   0x2 LB: > { %s27_s18 = sadd.s32 1, %s1633_s16  ;;  %p1300_p0 = scmp.ge.s32.totalorder %s1637_s17, 1  ;;  %s1637_s17 = sphi %s1670_s17, %s15_s17   ;;  %s1633_s16 = sphi %s1668_s16, %s1805_s16   ;;  %s1629_s15 = sphi %s1666_s15, %s1804_s15  }
   0x3   : > { %p29_p1 = scmp.ge.s32.totalorder %s27_s18, 3  ;;  %p201_p2 = scmp.lt.s32.totalorder %s1637_s17, 4 }
   0x5   : > { %s1807_s18 = smov (%p29_p1, %s27_s18), 0  ;;  %p202_p3 = pnand %p1300_p0, %p201_p2 }
   0x6   : > { %p252_p4 = scmp.lt.s32.totalorder (!%p202_p3), %s1629_s15, 2  ;;  %vm1640_vm0 = vmmov (!%p202_p3), 0   ;;  %vm1104_vm1 = vcmask (!%p202_p3), 261120   ;;  %vm1102_vm2 = vcmask (!%p202_p3), 257024  }
   0x7   : > { %205 = sbr.rel (%p202_p3) target bundleno = 346 (0x15a), region = 28 }
   0xe   : > { %s1809_s15 = smov (!%p252_p4, %s1629_s15), 2 }
   0xf   : > { %s1507_s19 = smul.u32 576, %s1809_s15  ;;  %s1303_s27 = sshll.u32 %s1809_s15, 2 }
  0x10   : > { %s1506_s23 = smul.u32 36, %s1809_s15  ;;  %s272_s30 = scalar_lea.vmem %s1801_s2, %s1303_s27 }
  0x11   : > { %s1690_s22 = scalar_lea.vmem %s1800_s1, %s1507_s19  ;;  %s1304_s5 = sshll.u32 %s1809_s15, 3 }
  0x12   : > { %v1534_v0 = vld [vmem:[%s1690_s22 + $0x40] sm:$0xff]   ;;  %v1538_v4 = vld [vmem:[%s1690_s22 + $0x48] sm:$0xff]   ;;  %v1542_v8 = vld [vmem:[%s1690_s22 + $0x50] sm:$0xff]   ;;  %s1726_s26 = scalar_lea.vmem %s1799_s0, %s1506_s23  ;;  %s279_s8 = scalar_lea.vmem %s1802_s3, %s1304_s5 }
  0x13   : > { %v1535_v1 = vld [vmem:[%s1690_s22 + $0xc0] sm:$0xff]   ;;  %1389 = vmatprep.subr.bf16.mxu0 %v1534_v0  ;;  %v1539_v5 = vld [vmem:[%s1690_s22 + $0xc8] sm:$0xff]   ;;  %v1543_v9 = vld [vmem:[%s1690_s22 + $0xd0] sm:$0xff]   ;;  %s286_s11 = scalar_lea.vmem %s1803_s4, %s1304_s5 }
  0x14   : > { %v1536_v2 = vld [vmem:[%s1690_s22] sm:$0xff]   ;;  %1411 = vmatprep.subr.bf16.mxu1 %v1535_v1  ;;  %v1540_v6 = vld [vmem:[%s1690_s22 + $0x8] sm:$0xff]   ;;  %v1544_v10 = vld [vmem:[%s1690_s22 + $0x10] sm:$0xff]  }
  0x15   : > { %v1537_v3 = vld [vmem:[%s1690_s22 + $0x80] sm:$0xff]   ;;  %1390 = vmatpush3.bf16.msra.mxu0 %v1536_v2  ;;  %v1541_v7 = vld [vmem:[%s1690_s22 + $0x88] sm:$0xff]   ;;  %v1545_v11 = vld [vmem:[%s1690_s22 + $0x90] sm:$0xff]  }
  0x16   : > { %1412 = vmatpush3.bf16.msra.mxu1 %v1537_v3  ;;  %1391 = vmatprep.subr.bf16.mxu0 %v1538_v4  ;;  %v1546_v12 = vld [vmem:[%s1690_s22 + $0x58] sm:$0xff]   ;;  %v1550_v16 = vld [vmem:[%s1690_s22 + $0x60] sm:$0xff]   ;;  %v1554_v20 = vld [vmem:[%s1690_s22 + $0x68] sm:$0xff]  }
  0x17   : > { %1413 = vmatprep.subr.bf16.mxu1 %v1539_v5  ;;  %v1547_v13 = vld [vmem:[%s1690_s22 + $0xd8] sm:$0xff]   ;;  %v1551_v17 = vld [vmem:[%s1690_s22 + $0xe0] sm:$0xff]   ;;  %v1555_v21 = vld [vmem:[%s1690_s22 + $0xe8] sm:$0xff]  }
  0x18   : > { %v1548_v14 = vld [vmem:[%s1690_s22 + $0x18] sm:$0xff]   ;;  %v1552_v18 = vld [vmem:[%s1690_s22 + $0x20] sm:$0xff]   ;;  %v1556_v22 = vld [vmem:[%s1690_s22 + $0x28] sm:$0xff]  }
  0x19   : > { %1392 = vmatpush3.bf16.msra.mxu0 %v1540_v6  ;;  %v1549_v15 = vld [vmem:[%s1690_s22 + $0x98] sm:$0xff]   ;;  %v1553_v19 = vld [vmem:[%s1690_s22 + $0xa0] sm:$0xff]   ;;  %v1557_v23 = vld [vmem:[%s1690_s22 + $0xa8] sm:$0xff]  }
  0x1a   : > { %1414 = vmatpush3.bf16.msra.mxu1 %v1541_v7  ;;  %1393 = vmatprep.subr.bf16.mxu0 %v1542_v8  ;;  %v1558_v24 = vld [vmem:[%s1690_s22 + $0x70] sm:$0xff]   ;;  %v1562_v28 = vld [vmem:[%s1690_s22 + $0x78] sm:$0xff]   ;;  %v288_v32 = vld [vmem:[%s1726_s26] sm:$0xff] }
  0x1b   : > { %1415 = vmatprep.subr.bf16.mxu1 %v1543_v9  ;;  %v1559_v25 = vld [vmem:[%s1690_s22 + $0xf0] sm:$0xff]   ;;  %v1563_v29 = vld [vmem:[%s1690_s22 + $0xf8] sm:$0xff]   ;;  %v289_v33 = vld [vmem:[%s1726_s26 + $0x8] sm:$0xff]  ;;  %v1306_v34 = vcombine.low %v288_v32, %v288_v32  ;;  %v1307_v35 = vcombine.high %v288_v32, %v288_v32 }
  0x1c   : > { %v1560_v26 = vld [vmem:[%s1690_s22 + $0x30] sm:$0xff]   ;;  %v1564_v30 = vld [vmem:[%s1690_s22 + $0x38] sm:$0xff]   ;;  %v1308_v36 = vcombine.low %v289_v33, %v289_v33  ;;  %v1309_v37 = vcombine.high %v289_v33, %v289_v33  ;;  %v1570_v38 = vld [vmem:[%s1690_s22 + $0x140] sm:$0xff]  }
  0x1d   : > { %1394 = vmatpush3.bf16.msra.mxu0 %v1544_v10  ;;  %v1561_v27 = vld [vmem:[%s1690_s22 + $0xb0] sm:$0xff]   ;;  %v1565_v31 = vld [vmem:[%s1690_s22 + $0xb8] sm:$0xff]   ;;  %v1571_v39 = vld [vmem:[%s1690_s22 + $0x100] sm:$0xff]   ;;  %933 = vmatprep.mubr.bf16.mxu0 %v1307_v35 }
  0x1e   : > { %1416 = vmatpush3.bf16.msra.mxu1 %v1545_v11  ;;  %1395 = vmatprep.subr.bf16.mxu0 %v1546_v12  ;;  %v1572_v40 = vld [vmem:[%s1690_s22 + $0x1c0] sm:$0xff]   ;;  %v1574_v42 = vld [vmem:[%s1690_s22 + $0x148] sm:$0xff]   ;;  %v1578_v46 = vld [vmem:[%s1690_s22 + $0x150] sm:$0xff]  }
  0x1f   : > { %1417 = vmatprep.subr.bf16.mxu1 %v1547_v13  ;;  %973 = vmatprep.mubr.bf16.mxu1 %v1309_v37  ;;  %v1573_v41 = vld [vmem:[%s1690_s22 + $0x180] sm:$0xff]   ;;  %v1575_v43 = vld [vmem:[%s1690_s22 + $0x108] sm:$0xff]   ;;  %v1579_v47 = vld [vmem:[%s1690_s22 + $0x110] sm:$0xff]   ;;  %v1639_v13 = vmov 0.0  }
  0x20   : > { %v1576_v44 = vld [vmem:[%s1690_s22 + $0x1c8] sm:$0xff]   ;;  %v1580_v48 = vld [vmem:[%s1690_s22 + $0x1d0] sm:$0xff]   ;;  %v1582_v50 = vld [vmem:[%s1690_s22 + $0x158] sm:$0xff]  }
  0x21   : > { %1396 = vmatpush3.bf16.msra.mxu0 %v1548_v14  ;;  %v1577_v45 = vld [vmem:[%s1690_s22 + $0x188] sm:$0xff]   ;;  %v1581_v49 = vld [vmem:[%s1690_s22 + $0x190] sm:$0xff]   ;;  %v1583_v51 = vld [vmem:[%s1690_s22 + $0x118] sm:$0xff]  }
  0x22   : > { %1418 = vmatpush3.bf16.msra.mxu1 %v1549_v15  ;;  %1397 = vmatprep.subr.bf16.mxu0 %v1550_v16  ;;  %v1584_v52 = vld [vmem:[%s1690_s22 + $0x1d8] sm:$0xff]   ;;  %v1586_v54 = vld [vmem:[%s1690_s22 + $0x160] sm:$0xff]   ;;  %v1590_v58 = vld [vmem:[%s1690_s22 + $0x168] sm:$0xff]  }
  0x23   : > { %1419 = vmatprep.subr.bf16.mxu1 %v1551_v17  ;;  %v1585_v53 = vld [vmem:[%s1690_s22 + $0x198] sm:$0xff]   ;;  %v1587_v55 = vld [vmem:[%s1690_s22 + $0x120] sm:$0xff]   ;;  %v1591_v59 = vld [vmem:[%s1690_s22 + $0x128] sm:$0xff]  }
  0x24   : > { %v1588_v56 = vld [vmem:[%s1690_s22 + $0x1e0] sm:$0xff]   ;;  %v1592_v60 = vld [vmem:[%s1690_s22 + $0x1e8] sm:$0xff]   ;;  %v1594_v62 = vld [vmem:[%s1690_s22 + $0x170] sm:$0xff]  }
  0x25   : > { %1398 = vmatpush3.bf16.msra.mxu0 %v1552_v18  ;;  %v1589_v57 = vld [vmem:[%s1690_s22 + $0x1a0] sm:$0xff]   ;;  %v1593_v61 = vld [vmem:[%s1690_s22 + $0x1a8] sm:$0xff]   ;;  %v1595_v63 = vld [vmem:[%s1690_s22 + $0x130] sm:$0xff]  }
  0x26   : > { %1420 = vmatpush3.bf16.msra.mxu1 %v1553_v19  ;;  %1399 = vmatprep.subr.bf16.mxu0 %v1554_v20  ;;  %v1596_v0 = vld [vmem:[%s1690_s22 + $0x1f0] sm:$0xff]   ;;  %v1598_v2 = vld [vmem:[%s1690_s22 + $0x178] sm:$0xff]   ;;  %v1606_v12 = vld [vmem:[%s1690_s22 + $0x200] sm:$0xff]  }
  0x27   : > { %1421 = vmatprep.subr.bf16.mxu1 %v1555_v21  ;;  %v1597_v1 = vld [vmem:[%s1690_s22 + $0x1b0] sm:$0xff]   ;;  %v1599_v3 = vld [vmem:[%s1690_s22 + $0x138] sm:$0xff]   ;;  %v1607_v14 = vld [vmem:[%s1690_s22 + $0x208] sm:$0xff]  }
  0x28   : > { %v1600_v4 = vld [vmem:[%s1690_s22 + $0x1f8] sm:$0xff]   ;;  %v290_v5 = vld [vmem:[%s1726_s26 + $0x10] sm:$0xff]  ;;  %v1610_v17 = vld [vmem:[%s1690_s22 + $0x220] sm:$0xff]  }
  0x29   : > { %1400 = vmatpush3.bf16.msra.mxu0 %v1556_v22  ;;  %v1311_v6 = vcombine.high %v290_v5, %v290_v5  ;;  %v1603_v7 = vld [vmem:[%s1690_s22 + $0x1b8] sm:$0xff]   ;;  %v1310_v8 = vcombine.low %v290_v5, %v290_v5  ;;  %v1608_v15 = vld [vmem:[%s1690_s22 + $0x210] sm:$0xff]   ;;  %v1611_v18 = vld [vmem:[%s1690_s22 + $0x228] sm:$0xff]  }
  0x2a   : > { %1422 = vmatpush3.bf16.msra.mxu1 %v1557_v23  ;;  %1401 = vmatprep.subr.bf16.mxu0 %v1558_v24  ;;  %v291_v9 = vld [vmem:[%s1726_s26 + $0x18] sm:$0xff]  ;;  %v1612_v19 = vld [vmem:[%s1690_s22 + $0x230] sm:$0xff]   ;;  %v1614_v21 = vld [vmem:[%s1726_s26 + $0x20] ss:$0 sps:$4 sm:$0xff]  }
  0x2b   : > { %1423 = vmatprep.subr.bf16.mxu1 %v1559_v25  ;;  %v1312_v10 = vcombine.low %v291_v9, %v291_v9  ;;  %v1313_v11 = vcombine.high %v291_v9, %v291_v9  ;;  %v1609_v16 = vld [vmem:[%s1690_s22 + $0x218] sm:$0xff]  }
  0x2c   : > { %v1613_v20 = vld [vmem:[%s1690_s22 + $0x238] sm:$0xff]  }
  0x2d   : > { %1402 = vmatpush3.bf16.msra.mxu0 %v1560_v26 }
  0x2e   : > { %1424 = vmatpush3.bf16.msra.mxu1 %v1561_v27  ;;  %1403 = vmatprep.subr.bf16.mxu0 %v1562_v28 }
  0x2f   : > { %1425 = vmatprep.subr.bf16.mxu1 %v1563_v29 }
  0x31   : > { %1404 = vmatpush3.bf16.msra.mxu0 %v1564_v30 }
  0x32   : > { %1426 = vmatpush3.bf16.msra.mxu1 %v1565_v31  ;;  %1433 = vmatprep.subr.bf16.mxu0 %v1570_v38 }
  0x33   : > { %1455 = vmatprep.subr.bf16.mxu1 %v1572_v40 }
  0x34   : > { %934 = vmatmul.mubr.bf16.vlgmr.msra.gmra.mrb[0].mxu0 %v1306_v34 }
  0x35   : > { %974 = vmatmul.mubr.bf16.vlgmr.msra.gmra.mrb[0].mxu1 %v1308_v36  ;;  %1434 = vmatpush3.bf16.msra.mxu0 %v1571_v39 }
  0x36   : > { %1456 = vmatpush3.bf16.msra.mxu1 %v1573_v41  ;;  %1435 = vmatprep.subr.bf16.mxu0 %v1574_v42 }
  0x37   : > { %1457 = vmatprep.subr.bf16.mxu1 %v1576_v44  ;;  %1013 = vmatprep.mubr.bf16.mxu0 %v1311_v6 }
  0x38   : > { %1053 = vmatprep.mubr.bf16.mxu1 %v1313_v11 }
  0x39   : > { %1436 = vmatpush3.bf16.msra.mxu0 %v1575_v43 }
  0x3a   : > { %1458 = vmatpush3.bf16.msra.mxu1 %v1577_v45  ;;  %1437 = vmatprep.subr.bf16.mxu0 %v1578_v46 }
  0x3b   : > { %1459 = vmatprep.subr.bf16.mxu1 %v1580_v48 }
  0x3d   : > { %1438 = vmatpush3.bf16.msra.mxu0 %v1579_v47 }
  0x3e   : > { %1460 = vmatpush3.bf16.msra.mxu1 %v1581_v49  ;;  %1439 = vmatprep.subr.bf16.mxu0 %v1582_v50 }
  0x3f   : > { %1461 = vmatprep.subr.bf16.mxu1 %v1584_v52 }
  0x41   : > { %1440 = vmatpush3.bf16.msra.mxu0 %v1583_v51 }
  0x42   : > { %1462 = vmatpush3.bf16.msra.mxu1 %v1585_v53  ;;  %1441 = vmatprep.subr.bf16.mxu0 %v1586_v54 }
  0x43   : > { %1463 = vmatprep.subr.bf16.mxu1 %v1588_v56 }
  0x45   : > { %1442 = vmatpush3.bf16.msra.mxu0 %v1587_v55 }
  0x46   : > { %1464 = vmatpush3.bf16.msra.mxu1 %v1589_v57  ;;  %1443 = vmatprep.subr.bf16.mxu0 %v1590_v58 }
  0x47   : > { %1465 = vmatprep.subr.bf16.mxu1 %v1592_v60 }
  0x49   : > { %1444 = vmatpush3.bf16.msra.mxu0 %v1591_v59 }
  0x4a   : > { %1466 = vmatpush3.bf16.msra.mxu1 %v1593_v61  ;;  %1445 = vmatprep.subr.bf16.mxu0 %v1594_v62 }
  0x4b   : > { %1467 = vmatprep.subr.bf16.mxu1 %v1596_v0 }
  0x4d   : > { %1446 = vmatpush3.bf16.msra.mxu0 %v1595_v63 }
  0x4e   : > { %1468 = vmatpush3.bf16.msra.mxu1 %v1597_v1  ;;  %1447 = vmatprep.subr.bf16.mxu0 %v1598_v2 }
  0x4f   : > { %1469 = vmatprep.subr.bf16.mxu1 %v1600_v4 }
  0x51   : > { %1448 = vmatpush3.bf16.msra.mxu0 %v1599_v3 }
  0x52   : > { %1470 = vmatpush3.bf16.msra.mxu1 %v1603_v7  ;;  %1486 = vmatprep.subr.bf16.mxu0 %v1639_v13 }
  0x54   : > { %1014 = vmatmul.mubr.bf16.vlgmr.msra.gmra.mrb[4].mxu0 %v1310_v8 }
  0x55   : > { %1487 = vmatpush3.bf16.msra.mxu0 %v1606_v12  ;;  %1054 = vmatmul.mubr.bf16.vlgmr.msra.gmra.mrb[4].mxu1 %v1312_v10 }
  0x56   : > { %1488 = vmatprep.subr.bf16.mxu0 %v1639_v13  ;;  %1502 = vmatprep.mubr.msk.bf16.mxu0 %vm1640_vm0, %v1639_v13 }
  0x59   : > { %1489 = vmatpush3.bf16.msra.mxu0 %v1607_v14 }
  0x5a   : > { %1490 = vmatprep.subr.bf16.mxu0 %v1639_v13 }
  0x5d   : > { %1491 = vmatpush3.bf16.msra.mxu0 %v1608_v15 }
  0x5e   : > { %1492 = vmatprep.subr.bf16.mxu0 %v1639_v13 }
  0x61   : > { %1493 = vmatpush3.bf16.msra.mxu0 %v1609_v16 }
  0x62   : > { %1494 = vmatprep.subr.bf16.mxu0 %v1639_v13 }
  0x65   : > { %1495 = vmatpush3.bf16.msra.mxu0 %v1610_v17 }
  0x66   : > { %1496 = vmatprep.subr.bf16.mxu0 %v1639_v13 }
  0x69   : > { %1497 = vmatpush3.bf16.msra.mxu0 %v1611_v18 }
  0x6a   : > { %1498 = vmatprep.subr.bf16.mxu0 %v1639_v13 }
  0x6d   : > { %1499 = vmatpush3.bf16.msra.mxu0 %v1612_v19 }
  0x6e   : > { %1500 = vmatprep.subr.bf16.mxu0 %v1639_v13 }
  0x71   : > { %1501 = vmatpush3.bf16.msra.mxu0 %v1613_v20 }
  0x74   : > { %1503 = vmatmul.mubr.bf16.vlgmr.msra.gmra.mrb[8].mxu0 %v1614_v21 }
 0x107   : > { %v1405_v22 = vpop.f32.mrb[0].mxu0 }
 0x108   : > { %v1427_v23 = vpop.f32.mrb[0].mxu1  ;;  %v1406_v24 = vpop.f32.mrb[1].mxu0 }
 0x109   : > { %v1428_v25 = vpop.f32.mrb[1].mxu1  ;;  %v1407_v26 = vadd.f32 %v1406_v24, %v1405_v22  ;;  %v1408_v28 = vpop.f32.mrb[2].mxu0 }
 0x10a   : > { %v1429_v27 = vadd.f32 %v1428_v25, %v1427_v23  ;;  %v1430_v29 = vpop.f32.mrb[2].mxu1  ;;  %v1409_v30 = vpop.f32.mrb[3].mxu0 }
 0x10b   : > { %v1431_v31 = vpop.f32.mrb[3].mxu1 }
 0x10c   : > { %v976_v32 = vadd.f32 %v1429_v27, %v1407_v26 }
 0x127   : > { %v1449_v33 = vpop.f32.mrb[4].mxu0 }
 0x128   : > { %v1450_v34 = vpop.f32.mrb[5].mxu0  ;;  %v1471_v35 = vpop.f32.mrb[4].mxu1 }
 0x129   : > { %v1451_v36 = vadd.f32 %v1450_v34, %v1449_v33  ;;  %v1452_v37 = vpop.f32.mrb[6].mxu0  ;;  %v1472_v38 = vpop.f32.mrb[5].mxu1 }
 0x12a   : > { %v1453_v39 = vpop.f32.mrb[7].mxu0  ;;  %v1473_v40 = vadd.f32 %v1472_v38, %v1471_v35  ;;  %v1474_v41 = vpop.f32.mrb[6].mxu1 }
 0x12b   : > { %v1016_v42 = vadd.f32 %v1451_v36, %v976_v32  ;;  %v1475_v43 = vpop.f32.mrb[7].mxu1 }
 0x12d   : > { %v1056_v44 = vadd.f32 %v1473_v40, %v1016_v42 }
 0x147   : > { %v1095_v45 = vpop.f32.mrb[8].mxu0 }
 0x148   : > { %v1096_v46 = vadd.f32 %v1095_v45, %v1056_v44  ;;  %v1504_v47 = vpop.f32.mrb[9].mxu0 }
 0x149   : > { %v1098_v48 = vpop.f32.mrb[10].mxu0 }
 0x14a   : > { %v1101_v49 = vpack.c.bf16 %v1096_v46, %v1096_v46  ;;  %v1105_v50 = vsel %vm1104_vm1, %v1096_v46, 0.0  ;;  %v1112_v51 = vmul.f32 %v1096_v46, %v1096_v46  ;;  %v1505_v52 = vpop.f32.mrb[11].mxu0 }
 0x14b   : > { %v1106_v53 = vrot.slane %v1105_v50, 4 }
 0x14c   : > { %1103 = vst.msk [vmem:[%s272_s30] sm:$0xf] %vm1102_vm2, %v1101_v49  ;;  %v1113_v54 = vsel %vm1104_vm1, %v1112_v51, 0.0 }
 0x14d   : > { %v1107_v55 = vadd.f32 %v1106_v53, %v1105_v50  ;;  %v1114_v56 = vrot.slane %v1113_v54, 4 }
 0x14f   : > { %v1108_v57 = vrot.slane %v1107_v55, 2  ;;  %v1115_v58 = vadd.f32 %v1114_v56, %v1113_v54 }
 0x151   : > { %v1109_v59 = vadd.f32 %v1108_v57, %v1107_v55  ;;  %v1116_v60 = vrot.slane %v1115_v58, 2 }
 0x153   : > { %v1110_v61 = vrot.slane %v1109_v59, 1  ;;  %v1117_v62 = vadd.f32 %v1116_v60, %v1115_v58 }
 0x155   : > { %v1111_v63 = vadd.f32 %v1110_v61, %v1109_v59  ;;  %v1118_v0 = vrot.slane %v1117_v62, 1 }
 0x157   : > { %v1119_v1 = vadd.f32 %v1118_v0, %v1117_v62  ;;  %1120 = vst.msk [vmem:[%s279_s8] sm:$0xff] %vm1104_vm1, %v1111_v63 }
 0x159   : > { %1121 = vst.msk [vmem:[%s286_s11] sm:$0xff] %vm1104_vm1, %v1119_v1 }
 0x15a PF: > { %s15_s17 = sadd.s32 1, %s1637_s17   ;;  %s1804_s15 = smov %s1633_s16 }
 0x15b   : > { %p12_p5 = scmp.ge.s32.totalorder %s15_s17, 5   ;;  %s1805_s16 = smov %s1807_s18 }
 0x15d   :  { %14 = sbr.rel (!%p12_p5) target bundleno = 2 (0x2), region = 85 }

// kernel: issegnet_forward.65
= control target key start
LH: loop header
LB: loop body
LE: loop exit
PB: predicated region body
PF: predicated region fallthrough
CT: control target
= control target key end

     0   :  { %v154_v0 = vmov 0.0   ;;  %vm155_vm0 = vmmov 0   ;;  %vm57_vm1 = vcmask 261120   ;;  %vm104_vm2 = vcmask 523264   ;;  %s219_s3 = inlined_call_operand.vmem [shape: bf16[32,64], index: 3, kind: input, shape index: {}]   ;;  %s220_s0 = inlined_call_operand.vmem [shape: bf16[8,32], index: 0, kind: input, shape index: {}]   ;;  %s221_s1 = inlined_call_operand.vmem [shape: f32[1,32], index: 1, kind: input, shape index: {}]   ;;  %s222_s2 = inlined_call_operand.vmem [shape: f32[1,32], index: 2, kind: input, shape index: {}]   ;;  %s223_s4 = inlined_call_operand.vmem [shape: bf16[8,64], index: 4, kind: output, shape index: {0}]   ;;  %s224_s5 = inlined_call_operand.vmem [shape: f32[1,8,64], index: 5, kind: output, shape index: {1}]   ;;  %s225_s6 = inlined_call_operand.vmem [shape: f32[1,8,64], index: 6, kind: output, shape index: {2}]  }
   0x1   :  { %142 = vmatprep.subr.bf16.mxu0 %v154_v0  ;;  %v152_v1 = vld [vmem:[%s219_s3] sm:$0xff]   ;;  %146 = vmatprep.mubr.msk.bf16.mxu0 %vm155_vm0, %v154_v0  ;;  %v153_v2 = vld [vmem:[%s219_s3 + $0x8] sm:$0xff]   ;;  %vm102_vm3 = vcmask 519168  }
   0x2   :  { %143 = vmatpush3.bf16.msra.mxu0 %v152_v1  ;;  %v21_v3 = vld [vmem:[%s220_s0] sm:$0xf] }
   0x3   :  { %v134_v4 = vld [vmem:[%s221_s1] ss:$0 sm:$0xff]  ;;  %144 = vmatprep.subr.bf16.mxu0 %v154_v0  ;;  %v22_v5 = vunpack.c.l.bf16 %v21_v3 }
   0x4   :  { %v135_v6 = vld [vmem:[%s222_s2] ss:$0 sm:$0xff] }
   0x5   :  { %v30_v7 = vmul.f32 %v134_v4, %v22_v5 }
   0x6   :  { %145 = vmatpush3.bf16.msra.mxu0 %v153_v2 }
   0x7   :  { %v38_v8 = vadd.f32 %v135_v6, %v30_v7 }
   0x9   :  { %v39_v9 = vmax.f32 %v38_v8, 0.0 }
   0xb   :  { %v40_v10 = vpack.c.bf16 %v39_v9, %v39_v9 }
   0xd   :  { %147 = vmatmul.mubr.msk.bf16.vlgmr.msra.gmra.mrb[0].mxu0 %vm57_vm1, %v40_v10 }
  0xe0   :  { %v95_v11 = vpop.f32.mrb[0].mxu0 }
  0xe1   :  { %v101_v12 = vpack.c.bf16 %v95_v11, %v95_v11  ;;  %v105_v13 = vsel %vm104_vm2, %v95_v11, 0.0  ;;  %v112_v14 = vmul.f32 %v95_v11, %v95_v11  ;;  %v148_v15 = vpop.f32.mrb[1].mxu0 }
  0xe2   :  { %v106_v16 = vrot.slane %v105_v13, 4  ;;  %v98_v17 = vpop.f32.mrb[2].mxu0 }
  0xe3   :  { %103 = vst.msk [vmem:[%s223_s4] sm:$0xf] %vm102_vm3, %v101_v12  ;;  %v113_v18 = vsel %vm104_vm2, %v112_v14, 0.0  ;;  %v149_v19 = vpop.f32.mrb[3].mxu0 }
  0xe4   :  { %v107_v20 = vadd.f32 %v106_v16, %v105_v13  ;;  %v114_v21 = vrot.slane %v113_v18, 4 }
  0xe6   :  { %v108_v22 = vrot.slane %v107_v20, 2  ;;  %v115_v23 = vadd.f32 %v114_v21, %v113_v18 }
  0xe8   :  { %v109_v24 = vadd.f32 %v108_v22, %v107_v20  ;;  %v116_v25 = vrot.slane %v115_v23, 2 }
  0xea   :  { %v110_v26 = vrot.slane %v109_v24, 1  ;;  %v117_v27 = vadd.f32 %v116_v25, %v115_v23 }
  0xec   :  { %v111_v28 = vadd.f32 %v110_v26, %v109_v24  ;;  %v118_v29 = vrot.slane %v117_v27, 1 }
  0xee   :  { %v119_v30 = vadd.f32 %v118_v29, %v117_v27  ;;  %120 = vst.msk [vmem:[%s224_s5] sm:$0xff] %vm104_vm2, %v111_v28 }
  0xf0   :  { %121 = vst.msk [vmem:[%s225_s6] sm:$0xff] %vm104_vm2, %v119_v30 }

// kernel: issegnet_forward.66
= control target key start
LH: loop header
LB: loop body
LE: loop exit
PB: predicated region body
PF: predicated region fallthrough
CT: control target
= control target key end

     0   :  { %vm40_vm0 = vcmask 519168   ;;  %s88_s0 = inlined_call_operand.vmem [shape: bf16[8,64], index: 0, kind: input, shape index: {}]   ;;  %s89_s1 = inlined_call_operand.vmem [shape: f32[1,64], index: 1, kind: input, shape index: {}]   ;;  %s90_s2 = inlined_call_operand.vmem [shape: f32[1,64], index: 2, kind: input, shape index: {}]   ;;  %s91_s3 = inlined_call_operand.vmem [shape: bf16[8,64], index: 3, kind: input, shape index: {}]   ;;  %s92_s4 = inlined_call_operand.vmem [shape: bf16[8,64], index: 4, kind: output, shape index: {}]  }
   0x1   :  { %v17_v0 = vld [vmem:[%s88_s0] sm:$0xf] }
   0x2   :  { %v46_v1 = vld [vmem:[%s89_s1] ss:$0 sm:$0xff]  ;;  %v18_v2 = vunpack.c.l.bf16 %v17_v0 }
   0x3   :  { %v47_v3 = vld [vmem:[%s90_s2] ss:$0 sm:$0xff] }
   0x4   :  { %v36_v4 = vld [vmem:[%s91_s3] sm:$0xf]  ;;  %v26_v5 = vmul.f32 %v46_v1, %v18_v2 }
   0x5   :  { %v37_v7 = vunpack.c.l.bf16 %v36_v4 }
   0x6   :  { %v34_v6 = vadd.f32 %v47_v3, %v26_v5 }
   0x8   :  { %v35_v8 = vmax.f32 %v34_v6, 0.0 }
   0xa   :  { %v38_v9 = vadd.f32 %v37_v7, %v35_v8 }
   0xc   :  { %v39_v10 = vpack.c.bf16 %v38_v9, %v38_v9 }
   0xe   :  { %41 = vst.msk [vmem:[%s92_s4] sm:$0xf] %vm40_vm0, %v39_v10 }

// kernel: issegnet_forward.64
= control target key start
LH: loop header
LB: loop body
LE: loop exit
PB: predicated region body
PF: predicated region fallthrough
CT: control target
= control target key end

     0   :  { %vm1143_vm0 = vmmov 0   ;;  %vm831_vm1 = vcmask 261120   ;;  %vm829_vm2 = vcmask 257024   ;;  %s1413_s1 = inlined_call_operand.vmem [shape: bf16[1152,32], index: 1, kind: input, shape index: {}]   ;;  %s1414_s0 = inlined_call_operand.vmem [shape: bf16[8,1152], index: 0, kind: input, shape index: {}]   ;;  %s1415_s2 = inlined_call_operand.vmem [shape: bf16[8,32], index: 2, kind: output, shape index: {0}]   ;;  %s1416_s3 = inlined_call_operand.vmem [shape: f32[1,8,32], index: 3, kind: output, shape index: {1}]   ;;  %s1417_s4 = inlined_call_operand.vmem [shape: f32[1,8,32], index: 4, kind: output, shape index: {2}]  }
   0x1   :  { %v1061_v0 = vld [vmem:[%s1413_s1 + $0x40] sm:$0xff]   ;;  %v1065_v4 = vld [vmem:[%s1413_s1 + $0x48] sm:$0xff]   ;;  %v1069_v8 = vld [vmem:[%s1413_s1 + $0x50] sm:$0xff]  }
   0x2   :  { %v1062_v1 = vld [vmem:[%s1413_s1 + $0xc0] sm:$0xff]   ;;  %942 = vmatprep.subr.bf16.mxu0 %v1061_v0  ;;  %v1066_v5 = vld [vmem:[%s1413_s1 + $0xc8] sm:$0xff]   ;;  %v1070_v9 = vld [vmem:[%s1413_s1 + $0xd0] sm:$0xff]  }
   0x3   :  { %v1063_v2 = vld [vmem:[%s1413_s1] sm:$0xff]   ;;  %964 = vmatprep.subr.bf16.mxu1 %v1062_v1  ;;  %v1067_v6 = vld [vmem:[%s1413_s1 + $0x8] sm:$0xff]   ;;  %v1071_v10 = vld [vmem:[%s1413_s1 + $0x10] sm:$0xff]  }
   0x4   :  { %v1064_v3 = vld [vmem:[%s1413_s1 + $0x80] sm:$0xff]   ;;  %943 = vmatpush3.bf16.msra.mxu0 %v1063_v2  ;;  %v1068_v7 = vld [vmem:[%s1413_s1 + $0x88] sm:$0xff]   ;;  %v1072_v11 = vld [vmem:[%s1413_s1 + $0x90] sm:$0xff]  }
   0x5   :  { %965 = vmatpush3.bf16.msra.mxu1 %v1064_v3  ;;  %944 = vmatprep.subr.bf16.mxu0 %v1065_v4  ;;  %v1073_v12 = vld [vmem:[%s1413_s1 + $0x58] sm:$0xff]   ;;  %v1077_v16 = vld [vmem:[%s1413_s1 + $0x60] sm:$0xff]   ;;  %v1081_v20 = vld [vmem:[%s1413_s1 + $0x68] sm:$0xff]  }
   0x6   :  { %966 = vmatprep.subr.bf16.mxu1 %v1066_v5  ;;  %v1074_v13 = vld [vmem:[%s1413_s1 + $0xd8] sm:$0xff]   ;;  %v1078_v17 = vld [vmem:[%s1413_s1 + $0xe0] sm:$0xff]   ;;  %v1082_v21 = vld [vmem:[%s1413_s1 + $0xe8] sm:$0xff]  }
   0x7   :  { %v1075_v14 = vld [vmem:[%s1413_s1 + $0x18] sm:$0xff]   ;;  %v1079_v18 = vld [vmem:[%s1413_s1 + $0x20] sm:$0xff]   ;;  %v1083_v22 = vld [vmem:[%s1413_s1 + $0x28] sm:$0xff]  }
   0x8   :  { %945 = vmatpush3.bf16.msra.mxu0 %v1067_v6  ;;  %v1076_v15 = vld [vmem:[%s1413_s1 + $0x98] sm:$0xff]   ;;  %v1080_v19 = vld [vmem:[%s1413_s1 + $0xa0] sm:$0xff]   ;;  %v1084_v23 = vld [vmem:[%s1413_s1 + $0xa8] sm:$0xff]  }
   0x9   :  { %967 = vmatpush3.bf16.msra.mxu1 %v1068_v7  ;;  %946 = vmatprep.subr.bf16.mxu0 %v1069_v8  ;;  %v1085_v24 = vld [vmem:[%s1413_s1 + $0x70] sm:$0xff]   ;;  %v1089_v28 = vld [vmem:[%s1413_s1 + $0x78] sm:$0xff]   ;;  %v15_v32 = vld [vmem:[%s1414_s0] sm:$0xff] }
   0xa   :  { %968 = vmatprep.subr.bf16.mxu1 %v1070_v9  ;;  %v1086_v25 = vld [vmem:[%s1413_s1 + $0xf0] sm:$0xff]   ;;  %v1090_v29 = vld [vmem:[%s1413_s1 + $0xf8] sm:$0xff]   ;;  %v16_v33 = vld [vmem:[%s1414_s0 + $0x8] sm:$0xff]  ;;  %v861_v34 = vcombine.low %v15_v32, %v15_v32  ;;  %v862_v35 = vcombine.high %v15_v32, %v15_v32 }
   0xb   :  { %v1087_v26 = vld [vmem:[%s1413_s1 + $0x30] sm:$0xff]   ;;  %v1091_v30 = vld [vmem:[%s1413_s1 + $0x38] sm:$0xff]   ;;  %v863_v36 = vcombine.low %v16_v33, %v16_v33  ;;  %v864_v37 = vcombine.high %v16_v33, %v16_v33  ;;  %v1097_v38 = vld [vmem:[%s1413_s1 + $0x140] sm:$0xff]  }
   0xc   :  { %947 = vmatpush3.bf16.msra.mxu0 %v1071_v10  ;;  %v1088_v27 = vld [vmem:[%s1413_s1 + $0xb0] sm:$0xff]   ;;  %v1092_v31 = vld [vmem:[%s1413_s1 + $0xb8] sm:$0xff]   ;;  %v1098_v39 = vld [vmem:[%s1413_s1 + $0x100] sm:$0xff]   ;;  %660 = vmatprep.mubr.bf16.mxu0 %v862_v35 }
   0xd   :  { %969 = vmatpush3.bf16.msra.mxu1 %v1072_v11  ;;  %948 = vmatprep.subr.bf16.mxu0 %v1073_v12  ;;  %v1099_v40 = vld [vmem:[%s1413_s1 + $0x1c0] sm:$0xff]   ;;  %v1101_v42 = vld [vmem:[%s1413_s1 + $0x148] sm:$0xff]   ;;  %v1105_v46 = vld [vmem:[%s1413_s1 + $0x150] sm:$0xff]  }
   0xe   :  { %970 = vmatprep.subr.bf16.mxu1 %v1074_v13  ;;  %700 = vmatprep.mubr.bf16.mxu1 %v864_v37  ;;  %v1100_v41 = vld [vmem:[%s1413_s1 + $0x180] sm:$0xff]   ;;  %v1102_v43 = vld [vmem:[%s1413_s1 + $0x108] sm:$0xff]   ;;  %v1106_v47 = vld [vmem:[%s1413_s1 + $0x110] sm:$0xff]   ;;  %v1142_v13 = vmov 0.0  }
   0xf   :  { %v1103_v44 = vld [vmem:[%s1413_s1 + $0x1c8] sm:$0xff]   ;;  %v1107_v48 = vld [vmem:[%s1413_s1 + $0x1d0] sm:$0xff]   ;;  %v1109_v50 = vld [vmem:[%s1413_s1 + $0x158] sm:$0xff]  }
  0x10   :  { %949 = vmatpush3.bf16.msra.mxu0 %v1075_v14  ;;  %v1104_v45 = vld [vmem:[%s1413_s1 + $0x188] sm:$0xff]   ;;  %v1108_v49 = vld [vmem:[%s1413_s1 + $0x190] sm:$0xff]   ;;  %v1110_v51 = vld [vmem:[%s1413_s1 + $0x118] sm:$0xff]  }
  0x11   :  { %971 = vmatpush3.bf16.msra.mxu1 %v1076_v15  ;;  %950 = vmatprep.subr.bf16.mxu0 %v1077_v16  ;;  %v1111_v52 = vld [vmem:[%s1413_s1 + $0x1d8] sm:$0xff]   ;;  %v1113_v54 = vld [vmem:[%s1413_s1 + $0x160] sm:$0xff]   ;;  %v1117_v58 = vld [vmem:[%s1413_s1 + $0x168] sm:$0xff]  }
  0x12   :  { %972 = vmatprep.subr.bf16.mxu1 %v1078_v17  ;;  %v1112_v53 = vld [vmem:[%s1413_s1 + $0x198] sm:$0xff]   ;;  %v1114_v55 = vld [vmem:[%s1413_s1 + $0x120] sm:$0xff]   ;;  %v1118_v59 = vld [vmem:[%s1413_s1 + $0x128] sm:$0xff]  }
  0x13   :  { %v1115_v56 = vld [vmem:[%s1413_s1 + $0x1e0] sm:$0xff]   ;;  %v1119_v60 = vld [vmem:[%s1413_s1 + $0x1e8] sm:$0xff]   ;;  %v1121_v62 = vld [vmem:[%s1413_s1 + $0x170] sm:$0xff]  }
  0x14   :  { %951 = vmatpush3.bf16.msra.mxu0 %v1079_v18  ;;  %v1116_v57 = vld [vmem:[%s1413_s1 + $0x1a0] sm:$0xff]   ;;  %v1120_v61 = vld [vmem:[%s1413_s1 + $0x1a8] sm:$0xff]   ;;  %v1122_v63 = vld [vmem:[%s1413_s1 + $0x130] sm:$0xff]  }
  0x15   :  { %973 = vmatpush3.bf16.msra.mxu1 %v1080_v19  ;;  %952 = vmatprep.subr.bf16.mxu0 %v1081_v20  ;;  %v1123_v0 = vld [vmem:[%s1413_s1 + $0x1f0] sm:$0xff]   ;;  %v1125_v2 = vld [vmem:[%s1413_s1 + $0x178] sm:$0xff]   ;;  %v1133_v12 = vld [vmem:[%s1413_s1 + $0x200] sm:$0xff]  }
  0x16   :  { %974 = vmatprep.subr.bf16.mxu1 %v1082_v21  ;;  %v1124_v1 = vld [vmem:[%s1413_s1 + $0x1b0] sm:$0xff]   ;;  %v1126_v3 = vld [vmem:[%s1413_s1 + $0x138] sm:$0xff]   ;;  %v1134_v14 = vld [vmem:[%s1413_s1 + $0x208] sm:$0xff]  }
  0x17   :  { %v1127_v4 = vld [vmem:[%s1413_s1 + $0x1f8] sm:$0xff]   ;;  %v17_v5 = vld [vmem:[%s1414_s0 + $0x10] sm:$0xff]  ;;  %v1137_v17 = vld [vmem:[%s1413_s1 + $0x220] sm:$0xff]  }
  0x18   :  { %953 = vmatpush3.bf16.msra.mxu0 %v1083_v22  ;;  %v866_v6 = vcombine.high %v17_v5, %v17_v5  ;;  %v1130_v7 = vld [vmem:[%s1413_s1 + $0x1b8] sm:$0xff]   ;;  %v865_v8 = vcombine.low %v17_v5, %v17_v5  ;;  %v1135_v15 = vld [vmem:[%s1413_s1 + $0x210] sm:$0xff]   ;;  %v1138_v18 = vld [vmem:[%s1413_s1 + $0x228] sm:$0xff]  }
  0x19   :  { %975 = vmatpush3.bf16.msra.mxu1 %v1084_v23  ;;  %954 = vmatprep.subr.bf16.mxu0 %v1085_v24  ;;  %v18_v9 = vld [vmem:[%s1414_s0 + $0x18] sm:$0xff]  ;;  %v1139_v19 = vld [vmem:[%s1413_s1 + $0x230] sm:$0xff]   ;;  %v1141_v21 = vld [vmem:[%s1414_s0 + $0x20] ss:$0 sps:$4 sm:$0xff]  }
  0x1a   :  { %976 = vmatprep.subr.bf16.mxu1 %v1086_v25  ;;  %v867_v10 = vcombine.low %v18_v9, %v18_v9  ;;  %v868_v11 = vcombine.high %v18_v9, %v18_v9  ;;  %v1136_v16 = vld [vmem:[%s1413_s1 + $0x218] sm:$0xff]  }
  0x1b   :  { %v1140_v20 = vld [vmem:[%s1413_s1 + $0x238] sm:$0xff]  }
  0x1c   :  { %955 = vmatpush3.bf16.msra.mxu0 %v1087_v26 }
  0x1d   :  { %977 = vmatpush3.bf16.msra.mxu1 %v1088_v27  ;;  %956 = vmatprep.subr.bf16.mxu0 %v1089_v28 }
  0x1e   :  { %978 = vmatprep.subr.bf16.mxu1 %v1090_v29 }
  0x20   :  { %957 = vmatpush3.bf16.msra.mxu0 %v1091_v30 }
  0x21   :  { %979 = vmatpush3.bf16.msra.mxu1 %v1092_v31  ;;  %986 = vmatprep.subr.bf16.mxu0 %v1097_v38 }
  0x22   :  { %1008 = vmatprep.subr.bf16.mxu1 %v1099_v40 }
  0x23   :  { %661 = vmatmul.mubr.bf16.vlgmr.msra.gmra.mrb[0].mxu0 %v861_v34 }
  0x24   :  { %701 = vmatmul.mubr.bf16.vlgmr.msra.gmra.mrb[0].mxu1 %v863_v36  ;;  %987 = vmatpush3.bf16.msra.mxu0 %v1098_v39 }
  0x25   :  { %1009 = vmatpush3.bf16.msra.mxu1 %v1100_v41  ;;  %988 = vmatprep.subr.bf16.mxu0 %v1101_v42 }
  0x26   :  { %1010 = vmatprep.subr.bf16.mxu1 %v1103_v44  ;;  %740 = vmatprep.mubr.bf16.mxu0 %v866_v6 }
  0x27   :  { %780 = vmatprep.mubr.bf16.mxu1 %v868_v11 }
  0x28   :  { %989 = vmatpush3.bf16.msra.mxu0 %v1102_v43 }
  0x29   :  { %1011 = vmatpush3.bf16.msra.mxu1 %v1104_v45  ;;  %990 = vmatprep.subr.bf16.mxu0 %v1105_v46 }
  0x2a   :  { %1012 = vmatprep.subr.bf16.mxu1 %v1107_v48 }
  0x2c   :  { %991 = vmatpush3.bf16.msra.mxu0 %v1106_v47 }
  0x2d   :  { %1013 = vmatpush3.bf16.msra.mxu1 %v1108_v49  ;;  %992 = vmatprep.subr.bf16.mxu0 %v1109_v50 }
  0x2e   :  { %1014 = vmatprep.subr.bf16.mxu1 %v1111_v52 }
  0x30   :  { %993 = vmatpush3.bf16.msra.mxu0 %v1110_v51 }
  0x31   :  { %1015 = vmatpush3.bf16.msra.mxu1 %v1112_v53  ;;  %994 = vmatprep.subr.bf16.mxu0 %v1113_v54 }
  0x32   :  { %1016 = vmatprep.subr.bf16.mxu1 %v1115_v56 }
  0x34   :  { %995 = vmatpush3.bf16.msra.mxu0 %v1114_v55 }
  0x35   :  { %1017 = vmatpush3.bf16.msra.mxu1 %v1116_v57  ;;  %996 = vmatprep.subr.bf16.mxu0 %v1117_v58 }
  0x36   :  { %1018 = vmatprep.subr.bf16.mxu1 %v1119_v60 }
  0x38   :  { %997 = vmatpush3.bf16.msra.mxu0 %v1118_v59 }
  0x39   :  { %1019 = vmatpush3.bf16.msra.mxu1 %v1120_v61  ;;  %998 = vmatprep.subr.bf16.mxu0 %v1121_v62 }
  0x3a   :  { %1020 = vmatprep.subr.bf16.mxu1 %v1123_v0 }
  0x3c   :  { %999 = vmatpush3.bf16.msra.mxu0 %v1122_v63 }
  0x3d   :  { %1021 = vmatpush3.bf16.msra.mxu1 %v1124_v1  ;;  %1000 = vmatprep.subr.bf16.mxu0 %v1125_v2 }
  0x3e   :  { %1022 = vmatprep.subr.bf16.mxu1 %v1127_v4 }
  0x40   :  { %1001 = vmatpush3.bf16.msra.mxu0 %v1126_v3 }
  0x41   :  { %1023 = vmatpush3.bf16.msra.mxu1 %v1130_v7  ;;  %1039 = vmatprep.subr.bf16.mxu0 %v1142_v13 }
  0x43   :  { %741 = vmatmul.mubr.bf16.vlgmr.msra.gmra.mrb[4].mxu0 %v865_v8 }
  0x44   :  { %1040 = vmatpush3.bf16.msra.mxu0 %v1133_v12  ;;  %781 = vmatmul.mubr.bf16.vlgmr.msra.gmra.mrb[4].mxu1 %v867_v10 }
  0x45   :  { %1041 = vmatprep.subr.bf16.mxu0 %v1142_v13  ;;  %1055 = vmatprep.mubr.msk.bf16.mxu0 %vm1143_vm0, %v1142_v13 }
  0x48   :  { %1042 = vmatpush3.bf16.msra.mxu0 %v1134_v14 }
  0x49   :  { %1043 = vmatprep.subr.bf16.mxu0 %v1142_v13 }
  0x4c   :  { %1044 = vmatpush3.bf16.msra.mxu0 %v1135_v15 }
  0x4d   :  { %1045 = vmatprep.subr.bf16.mxu0 %v1142_v13 }
  0x50   :  { %1046 = vmatpush3.bf16.msra.mxu0 %v1136_v16 }
  0x51   :  { %1047 = vmatprep.subr.bf16.mxu0 %v1142_v13 }
  0x54   :  { %1048 = vmatpush3.bf16.msra.mxu0 %v1137_v17 }
  0x55   :  { %1049 = vmatprep.subr.bf16.mxu0 %v1142_v13 }
  0x58   :  { %1050 = vmatpush3.bf16.msra.mxu0 %v1138_v18 }
  0x59   :  { %1051 = vmatprep.subr.bf16.mxu0 %v1142_v13 }
  0x5c   :  { %1052 = vmatpush3.bf16.msra.mxu0 %v1139_v19 }
  0x5d   :  { %1053 = vmatprep.subr.bf16.mxu0 %v1142_v13 }
  0x60   :  { %1054 = vmatpush3.bf16.msra.mxu0 %v1140_v20 }
  0x63   :  { %1056 = vmatmul.mubr.bf16.vlgmr.msra.gmra.mrb[8].mxu0 %v1141_v21 }
  0xf6   :  { %v958_v22 = vpop.f32.mrb[0].mxu0 }
  0xf7   :  { %v980_v23 = vpop.f32.mrb[0].mxu1  ;;  %v959_v24 = vpop.f32.mrb[1].mxu0 }
  0xf8   :  { %v981_v25 = vpop.f32.mrb[1].mxu1  ;;  %v960_v26 = vadd.f32 %v959_v24, %v958_v22  ;;  %v961_v28 = vpop.f32.mrb[2].mxu0 }
  0xf9   :  { %v982_v27 = vadd.f32 %v981_v25, %v980_v23  ;;  %v983_v29 = vpop.f32.mrb[2].mxu1  ;;  %v962_v30 = vpop.f32.mrb[3].mxu0 }
  0xfa   :  { %v984_v31 = vpop.f32.mrb[3].mxu1 }
  0xfb   :  { %v703_v32 = vadd.f32 %v982_v27, %v960_v26 }
 0x116   :  { %v1002_v33 = vpop.f32.mrb[4].mxu0 }
 0x117   :  { %v1003_v34 = vpop.f32.mrb[5].mxu0  ;;  %v1024_v35 = vpop.f32.mrb[4].mxu1 }
 0x118   :  { %v1004_v36 = vadd.f32 %v1003_v34, %v1002_v33  ;;  %v1005_v37 = vpop.f32.mrb[6].mxu0  ;;  %v1025_v38 = vpop.f32.mrb[5].mxu1 }
 0x119   :  { %v1006_v39 = vpop.f32.mrb[7].mxu0  ;;  %v1026_v40 = vadd.f32 %v1025_v38, %v1024_v35  ;;  %v1027_v41 = vpop.f32.mrb[6].mxu1 }
 0x11a   :  { %v743_v42 = vadd.f32 %v1004_v36, %v703_v32  ;;  %v1028_v43 = vpop.f32.mrb[7].mxu1 }
 0x11c   :  { %v783_v44 = vadd.f32 %v1026_v40, %v743_v42 }
 0x136   :  { %v822_v45 = vpop.f32.mrb[8].mxu0 }
 0x137   :  { %v823_v46 = vadd.f32 %v822_v45, %v783_v44  ;;  %v1057_v47 = vpop.f32.mrb[9].mxu0 }
 0x138   :  { %v825_v48 = vpop.f32.mrb[10].mxu0 }
 0x139   :  { %v828_v49 = vpack.c.bf16 %v823_v46, %v823_v46  ;;  %v832_v50 = vsel %vm831_vm1, %v823_v46, 0.0  ;;  %v839_v51 = vmul.f32 %v823_v46, %v823_v46  ;;  %v1058_v52 = vpop.f32.mrb[11].mxu0 }
 0x13a   :  { %v833_v53 = vrot.slane %v832_v50, 4 }
 0x13b   :  { %830 = vst.msk [vmem:[%s1415_s2] sm:$0xf] %vm829_vm2, %v828_v49  ;;  %v840_v54 = vsel %vm831_vm1, %v839_v51, 0.0 }
 0x13c   :  { %v834_v55 = vadd.f32 %v833_v53, %v832_v50  ;;  %v841_v56 = vrot.slane %v840_v54, 4 }
 0x13e   :  { %v835_v57 = vrot.slane %v834_v55, 2  ;;  %v842_v58 = vadd.f32 %v841_v56, %v840_v54 }
 0x140   :  { %v836_v59 = vadd.f32 %v835_v57, %v834_v55  ;;  %v843_v60 = vrot.slane %v842_v58, 2 }
 0x142   :  { %v837_v61 = vrot.slane %v836_v59, 1  ;;  %v844_v62 = vadd.f32 %v843_v60, %v842_v58 }
 0x144   :  { %v838_v63 = vadd.f32 %v837_v61, %v836_v59  ;;  %v845_v0 = vrot.slane %v844_v62, 1 }
 0x146   :  { %v846_v1 = vadd.f32 %v845_v0, %v844_v62  ;;  %847 = vst.msk [vmem:[%s1416_s3] sm:$0xff] %vm831_vm1, %v838_v63 }
 0x148   :  { %848 = vst.msk [vmem:[%s1417_s4] sm:$0xff] %vm831_vm1, %v846_v1 }

// kernel: tile.13
= control target key start
LH: loop header
LB: loop body
LE: loop exit
PB: predicated region body
PF: predicated region fallthrough
CT: control target
= control target key end

     0   :  { %s28_s0 = inlined_call_operand.vmem [shape: f32[16], index: 0, kind: input, shape index: {}]   ;;  %s29_s1 = inlined_call_operand.vmem [shape: f32[16,16], index: 1, kind: output, shape index: {}]  }
   0x1   :  { %v4_v0 = vld [vmem:[%s28_s0] ss:$0 sm:$0xff] }
   0x2   :  { %5 = vst [vmem:[%s29_s1] sm:$0xff] %v4_v0  ;;  %8 = vst [vmem:[%s29_s1 + $0x8] sm:$0xff] %v4_v0 }

// kernel: tile.18
= control target key start
LH: loop header
LB: loop body
LE: loop exit
PB: predicated region body
PF: predicated region fallthrough
CT: control target
= control target key end

     0   :  { %s7_s6 = smov 3  ;;  %s21_s9 = smov 3  ;;  %vm4_vm0 = vcmask 130048   ;;  %vm11_vm1 = vcmask 1048448   ;;  %vm18_vm2 = vcmask 917248   ;;  %vm25_vm3 = vcmask 786048   ;;  %s128_s0 = inlined_call_operand.vmem [shape: f32[16,16], index: 0, kind: input, shape index: {}]   ;;  %s129_s1 = inlined_call_operand.vmem [shape: f32[1,256], index: 1, kind: output, shape index: {}]  }
   0x1   :  { %v66_v0 = vld [vmem:[%s128_s0 + $0x7] ss:$8 sm:%s7_s6]   ;;  %s81_s10 = smov 112   ;;  %v68_v1 = vld [vmem:[%s128_s0 + $0x5] ss:$8 sm:%s21_s9]   ;;  %s14_s13 = smov 3 }
   0x2   :  { %9 = vrot.lane.b32.xlu0 %v66_v0, %s81_s10  ;;  %s82_s14 = smov 80   ;;  %v67_v2 = vld [vmem:[%s128_s0 + $0x6] ss:$8 sm:%s14_s13]   ;;  %s28_s17 = smov 3  ;;  %vm32_vm4 = vcmask 654848   ;;  %vm39_vm5 = vcmask 523648  }
   0x3   :  { %23 = vrot.lane.b32.xlu1 %v68_v1, %s82_s14  ;;  %v69_v3 = vld [vmem:[%s128_s0 + $0x4] ss:$8 sm:%s28_s17]   ;;  %s35_s20 = smov 3  ;;  %s42_s21 = smov 3  ;;  %vm46_vm6 = vcmask 392448   ;;  %vm53_vm7 = vcmask 261248  }
   0x4   :  { %s83_s22 = smov 96   ;;  %s84_s23 = smov 64   ;;  %v70_v4 = vld [vmem:[%s128_s0 + $0x3] ss:$8 sm:%s35_s20]   ;;  %v71_v5 = vld [vmem:[%s128_s0 + $0x2] ss:$8 sm:%s42_s21]  }
   0x5   :  { %s2_s26 = smov 3  ;;  %s49_s29 = smov 3 }
   0x6   :  { %16 = vrot.lane.b32.xlu0 %v67_v2, %s83_s22  ;;  %v3_v6 = vld [vmem:[%s128_s0] ss:$8 sm:%s2_s26]   ;;  %s85_s3 = smov 48   ;;  %s86_s4 = smov 32  }
   0x7   :  { %30 = vrot.lane.b32.xlu1 %v69_v3, %s84_s23  ;;  %5 = vst.msk [vmem:[#allocation0] ss:$8 sm:$0x3] %vm4_vm0, %v3_v6   ;;  %v72_v7 = vld [vmem:[%s128_s0 + $0x1] ss:$8 sm:%s49_s29]   ;;  %s87_s0 = smov 16  }
   0xa   :  { %37 = vrot.lane.b32.xlu0 %v70_v4, %s85_s3 }
   0xb   :  { %44 = vrot.lane.b32.xlu1 %v71_v5, %s86_s4 }
   0xe   :  { %51 = vrot.lane.b32.xlu0 %v72_v7, %s87_s0 }
  0x74   :  { %v10_v8 = vpop.permute.xlu0 %9  }
  0x75   :  { %12 = vst.msk [vmem:[#allocation0] ss:$8 sm:$0x3] %vm11_vm1, %v10_v8   ;;  %v24_v9 = vpop.permute.xlu1 %23  }
  0x78   :  { %v17_v10 = vpop.permute.xlu0 %16  }
  0x79   :  { %19 = vst.msk [vmem:[#allocation0] ss:$8 sm:$0x3] %vm18_vm2, %v17_v10   ;;  %v31_v11 = vpop.permute.xlu1 %30  }
  0x7a   :  { %26 = vst.msk [vmem:[#allocation0] ss:$8 sm:$0x3] %vm25_vm3, %v24_v9  }
  0x7b   :  { %33 = vst.msk [vmem:[#allocation0] ss:$8 sm:$0x3] %vm32_vm4, %v31_v11  }
  0x7c   :  { %v38_v12 = vpop.permute.xlu0 %37  }
  0x7d   :  { %40 = vst.msk [vmem:[#allocation0] ss:$8 sm:$0x3] %vm39_vm5, %v38_v12   ;;  %v45_v13 = vpop.permute.xlu1 %44  }
  0x7e   :  { %47 = vst.msk [vmem:[#allocation0] ss:$8 sm:$0x3] %vm46_vm6, %v45_v13  }
  0x80   :  { %v52_v14 = vpop.permute.xlu0 %51  }
  0x81   :  { %54 = vst.msk [vmem:[#allocation0] ss:$8 sm:$0x3] %vm53_vm7, %v52_v14  }
  0x88   :  { %v58_v15 = vld [vmem:[#allocation0] sm:$0x1]  ;;  %v62_v16 = vld [vmem:[#allocation0 + $0x8] sm:$0x1] }
  0x89   :  { %60 = vst [vmem:[%s129_s1] sm:$0x1] %v58_v15  ;;  %73 = vst [vmem:[%s129_s1 + $0x1] sm:$0x1] %v62_v16 }

// kernel: issegnet_forward.68
= control target key start
LH: loop header
LB: loop body
LE: loop exit
PB: predicated region body
PF: predicated region fallthrough
CT: control target
= control target key end

     0   :  { %v289_v1 = vmov 0   ;;  %vm96_vm0 = vcmask 261120   ;;  %s384_s4 = inlined_call_operand.vmem [shape: bf16[32,256], index: 4, kind: input, shape index: {}]   ;;  %s385_s0 = inlined_call_operand.vmem [shape: bf16[32,32], index: 0, kind: input, shape index: {}]   ;;  %s386_s1 = inlined_call_operand.vmem [shape: f32[1,32], index: 1, kind: input, shape index: {}]   ;;  %s387_s3 = inlined_call_operand.vmem [shape: bf16[32,32], index: 3, kind: input, shape index: {}]   ;;  %s388_s2 = inlined_call_operand.vmem [shape: f32[1,32], index: 2, kind: input, shape index: {}]   ;;  %s389_s5 = inlined_call_operand.vmem [shape: bf16[32,256], index: 5, kind: output, shape index: {0}]   ;;  %s390_s6 = inlined_call_operand.vmem [shape: f32[1,8,256], index: 6, kind: output, shape index: {1}]   ;;  %s391_s7 = inlined_call_operand.vmem [shape: f32[1,8,256], index: 7, kind: output, shape index: {2}]  }
   0x1   :  { %v283_v0 = vld [vmem:[%s384_s4 + $0x4] ss:$8 sps:$4 sm:$0xff]   ;;  %135 = vmatprep.mubr.bf16.mxu0 %v289_v1  ;;  %145 = vmatprep.mubr.bf16.mxu1 %v289_v1  ;;  %v285_v2 = vld [vmem:[%s384_s4] ss:$8 sps:$4 sm:$0xff]   ;;  %v286_v3 = vld [vmem:[%s384_s4 + $0x14] ss:$8 sps:$4 sm:$0xff]  }
   0x2   :  { %103 = vmatprep.subr.bf16.mxu0 %v283_v0  ;;  %278 = vmatprep.subr.bf16.mxu1 %v283_v0  ;;  %v261_v4 = vld [vmem:[%s385_s0] sm:$0xff]   ;;  %v288_v5 = vld [vmem:[%s384_s4 + $0x10] ss:$8 sps:$4 sm:$0xff]   ;;  %v276_v11 = vld [vmem:[%s385_s0 + $0x8] sm:$0xff]  }
   0x3   :  { %104 = vmatpush1.bf16.msra.mxu0 %v285_v2  ;;  %280 = vmatpush1.bf16.msra.mxu1 %v285_v2  ;;  %v262_v6 = vunpack.c.l.bf16 %v261_v4  ;;  %v263_v7 = vunpack.c.h.bf16 %v261_v4  ;;  %v244_v8 = vld [vmem:[%s386_s1] ss:$0 sm:$0xff]  ;;  %v266_v14 = vunpack.c.l.bf16 %v276_v11  ;;  %v267_v15 = vunpack.c.h.bf16 %v276_v11  ;;  %v277_v17 = vld [vmem:[%s387_s3 + $0x8] sm:$0xff]  }
   0x4   :  { %v269_v9 = vld [vmem:[%s387_s3] sm:$0xff]   ;;  %105 = vmatprep.subr.bf16.mxu0 %v286_v3  ;;  %279 = vmatprep.subr.bf16.mxu1 %v286_v3  ;;  %v274_v26 = vunpack.c.l.bf16 %v277_v17  ;;  %v275_v28 = vunpack.c.h.bf16 %v277_v17 }
   0x5   :  { %v245_v10 = vld [vmem:[%s388_s2] ss:$0 sm:$0xff]  ;;  %v39_v12 = vmul.f32 %v262_v6, %v244_v8  ;;  %v40_v13 = vmul.f32 %v263_v7, %v244_v8  ;;  %v270_v16 = vunpack.c.l.bf16 %v269_v9  ;;  %v271_v20 = vunpack.c.h.bf16 %v269_v9 }
   0x6   :  { %v41_v21 = vmul.f32 %v266_v14, %v244_v8  ;;  %v42_v22 = vmul.f32 %v267_v15, %v244_v8 }
   0x7   :  { %106 = vmatpush1.bf16.msra.mxu0 %v288_v5  ;;  %281 = vmatpush1.bf16.msra.mxu1 %v288_v5  ;;  %v50_v18 = vadd.f32 %v245_v10, %v39_v12  ;;  %v51_v19 = vadd.f32 %v245_v10, %v40_v13 }
   0x8   :  { %v52_v25 = vadd.f32 %v245_v10, %v41_v21  ;;  %v53_v27 = vadd.f32 %v245_v10, %v42_v22 }
   0x9   :  { %v54_v23 = vmax.f32 %v50_v18, 0.0  ;;  %v55_v24 = vmax.f32 %v51_v19, 0.0 }
   0xa   :  { %v56_v31 = vmax.f32 %v52_v25, 0.0  ;;  %v57_v32 = vmax.f32 %v53_v27, 0.0 }
   0xb   :  { %v66_v29 = vadd.f32 %v270_v16, %v54_v23  ;;  %v67_v30 = vadd.f32 %v271_v20, %v55_v24 }
   0xc   :  { %v68_v34 = vadd.f32 %v274_v26, %v56_v31  ;;  %v69_v35 = vadd.f32 %v275_v28, %v57_v32 }
   0xd   :  { %v70_v33 = vpack.c.bf16 %v67_v30, %v66_v29 }
   0xe   :  { %v71_v36 = vpack.c.bf16 %v69_v35, %v68_v34 }
   0xf   :  { %250 = vmatmul.mubr.msk.bf16.vlgmr.msra.gmra.mrb[0].mxu0 %vm96_vm0, %v70_v33 }
  0x10   :  { %251 = vmatmul.mubr.msk.bf16.vlgmr.msra.gmra.mrb[0].mxu1 %vm96_vm0, %v71_v36 }
  0xe2   :  { %v137_v37 = vpop.f32.mrb[0].mxu0 }
  0xe3   :  { %v139_v38 = vpop.f32.mrb[1].mxu0  ;;  %v202_v41 = vmul.f32 %v137_v37, %v137_v37  ;;  %v147_v43 = vpop.f32.mrb[0].mxu1 }
  0xe4   :  { %v256_v39 = vpack.c.bf16 %v139_v38, %v137_v37  ;;  %v141_v40 = vpop.f32.mrb[2].mxu0  ;;  %v203_v42 = vmul.f32 %v139_v38, %v139_v38  ;;  %v206_v47 = vmul.f32 %v147_v43, %v147_v43  ;;  %v149_v48 = vpop.f32.mrb[1].mxu1 }
  0xe5   :  { %v184_v44 = vadd.f32 %v141_v40, %v137_v37  ;;  %v204_v45 = vmul.f32 %v141_v40, %v141_v40  ;;  %v143_v46 = vpop.f32.mrb[3].mxu0  ;;  %v258_v53 = vpack.c.bf16 %v149_v48, %v147_v43  ;;  %v207_v54 = vmul.f32 %v149_v48, %v149_v48  ;;  %v151_v55 = vpop.f32.mrb[2].mxu1 }
  0xe6   :  { %180 = vst [vmem:[%s389_s5] sm:$0xff] %v256_v39  ;;  %v257_v49 = vpack.c.bf16 %v143_v46, %v141_v40  ;;  %v193_v50 = vadd.f32 %v143_v46, %v139_v38  ;;  %v205_v51 = vmul.f32 %v143_v46, %v143_v46  ;;  %v153_v58 = vpop.f32.mrb[3].mxu1  ;;  %v208_v61 = vmul.f32 %v151_v55, %v151_v55 }
  0xe7   :  { %v210_v52 = vadd.f32 %v204_v45, %v202_v41  ;;  %v185_v56 = vadd.f32 %v184_v44, %v147_v43  ;;  %182 = vst [vmem:[%s389_s5 + $0x10] sm:$0xff] %v258_v53  ;;  %v259_v63 = vpack.c.bf16 %v153_v58, %v151_v55  ;;  %v209_v1 = vmul.f32 %v153_v58, %v153_v58 }
  0xe8   :  { %181 = vst [vmem:[%s389_s5 + $0x8] sm:$0xff] %v257_v49  ;;  %v219_v57 = vadd.f32 %v205_v51, %v203_v42  ;;  %v194_v59 = vadd.f32 %v193_v50, %v149_v48 }
  0xe9   :  { %v186_v60 = vadd.f32 %v185_v56, %v151_v55  ;;  %v211_v62 = vadd.f32 %v210_v52, %v206_v47  ;;  %183 = vst [vmem:[%s389_s5 + $0x18] sm:$0xff] %v259_v63 }
  0xea   :  { %v195_v0 = vadd.f32 %v194_v59, %v153_v58  ;;  %v220_v2 = vadd.f32 %v219_v57, %v207_v54 }
  0xeb   :  { %v187_v3 = vrot.slane %v186_v60, 4  ;;  %v212_v4 = vadd.f32 %v211_v62, %v208_v61 }
  0xec   :  { %v196_v5 = vrot.slane %v195_v0, 4  ;;  %v221_v6 = vadd.f32 %v220_v2, %v209_v1 }
  0xed   :  { %v188_v7 = vadd.f32 %v187_v3, %v186_v60  ;;  %v213_v8 = vrot.slane %v212_v4, 4 }
  0xee   :  { %v197_v9 = vadd.f32 %v196_v5, %v195_v0  ;;  %v222_v10 = vrot.slane %v221_v6, 4 }
  0xef   :  { %v189_v11 = vrot.slane %v188_v7, 2  ;;  %v214_v12 = vadd.f32 %v213_v8, %v212_v4 }
  0xf0   :  { %v198_v13 = vrot.slane %v197_v9, 2  ;;  %v223_v14 = vadd.f32 %v222_v10, %v221_v6 }
  0xf1   :  { %v190_v15 = vadd.f32 %v189_v11, %v188_v7  ;;  %v215_v16 = vrot.slane %v214_v12, 2 }
  0xf2   :  { %v199_v17 = vadd.f32 %v198_v13, %v197_v9  ;;  %v224_v18 = vrot.slane %v223_v14, 2 }
  0xf3   :  { %v191_v19 = vrot.slane %v190_v15, 1  ;;  %v216_v20 = vadd.f32 %v215_v16, %v214_v12 }
  0xf4   :  { %v200_v21 = vrot.slane %v199_v17, 1  ;;  %v225_v22 = vadd.f32 %v224_v18, %v223_v14 }
  0xf5   :  { %v192_v23 = vadd.f32 %v191_v19, %v190_v15  ;;  %v217_v24 = vrot.slane %v216_v20, 1 }
  0xf6   :  { %v201_v25 = vadd.f32 %v200_v21, %v199_v17  ;;  %v226_v26 = vrot.slane %v225_v22, 1 }
  0xf7   :  { %v218_v27 = vadd.f32 %v217_v24, %v216_v20  ;;  %228 = vst [vmem:[%s390_s6] sm:$0xff] %v192_v23 }
  0xf8   :  { %v227_v28 = vadd.f32 %v226_v26, %v225_v22  ;;  %229 = vst [vmem:[%s390_s6 + $0x8] sm:$0xff] %v201_v25 }
  0xf9   :  { %230 = vst [vmem:[%s391_s7] sm:$0xff] %v218_v27 }
  0xfa   :  { %231 = vst [vmem:[%s391_s7 + $0x8] sm:$0xff] %v227_v28 }

// kernel: issegnet_forward.67
= control target key start
LH: loop header
LB: loop body
LE: loop exit
PB: predicated region body
PF: predicated region fallthrough
CT: control target
= control target key end

     0   :  { %vm365_vm0 = vcmask 523264   ;;  %vm535_vm1 = vcmask 257024   ;;  %vm540_vm2 = vcmask 261120   ;;  %s960_s1 = inlined_call_operand.vmem [shape: bf16[576,32], index: 1, kind: input, shape index: {}]   ;;  %s961_s0 = inlined_call_operand.vmem [shape: bf16[32,576], index: 0, kind: input, shape index: {}]   ;;  %s962_s2 = inlined_call_operand.vmem [shape: bf16[32,32], index: 2, kind: output, shape index: {0}]   ;;  %s963_s3 = inlined_call_operand.vmem [shape: f32[1,8,32], index: 3, kind: output, shape index: {1}]   ;;  %s964_s4 = inlined_call_operand.vmem [shape: f32[1,8,32], index: 4, kind: output, shape index: {2}]  }
   0x1   :  { %v715_v0 = vld [vmem:[%s960_s1 + $0x40] sm:$0xff]   ;;  %v719_v4 = vld [vmem:[%s960_s1 + $0x48] sm:$0xff]   ;;  %v723_v8 = vld [vmem:[%s960_s1 + $0x50] sm:$0xff]  }
   0x2   :  { %v716_v1 = vld [vmem:[%s960_s1 + $0xc0] sm:$0xff]   ;;  %641 = vmatprep.subr.bf16.mxu0 %v715_v0  ;;  %v720_v5 = vld [vmem:[%s960_s1 + $0xc8] sm:$0xff]   ;;  %v724_v9 = vld [vmem:[%s960_s1 + $0xd0] sm:$0xff]  }
   0x3   :  { %v717_v2 = vld [vmem:[%s960_s1] sm:$0xff]   ;;  %669 = vmatprep.subr.bf16.mxu1 %v716_v1  ;;  %v721_v6 = vld [vmem:[%s960_s1 + $0x8] sm:$0xff]   ;;  %v725_v10 = vld [vmem:[%s960_s1 + $0x10] sm:$0xff]  }
   0x4   :  { %v718_v3 = vld [vmem:[%s960_s1 + $0x80] sm:$0xff]   ;;  %642 = vmatpush3.bf16.msra.mxu0 %v717_v2  ;;  %v722_v7 = vld [vmem:[%s960_s1 + $0x88] sm:$0xff]   ;;  %v726_v11 = vld [vmem:[%s960_s1 + $0x90] sm:$0xff]  }
   0x5   :  { %670 = vmatpush3.bf16.msra.mxu1 %v718_v3  ;;  %643 = vmatprep.subr.bf16.mxu0 %v719_v4  ;;  %v727_v12 = vld [vmem:[%s960_s1 + $0x58] sm:$0xff]   ;;  %v731_v16 = vld [vmem:[%s960_s1 + $0x60] sm:$0xff]   ;;  %v735_v20 = vld [vmem:[%s960_s1 + $0x68] sm:$0xff]  }
   0x6   :  { %671 = vmatprep.subr.bf16.mxu1 %v720_v5  ;;  %v728_v13 = vld [vmem:[%s960_s1 + $0xd8] sm:$0xff]   ;;  %v732_v17 = vld [vmem:[%s960_s1 + $0xe0] sm:$0xff]   ;;  %v736_v21 = vld [vmem:[%s960_s1 + $0xe8] sm:$0xff]  }
   0x7   :  { %v729_v14 = vld [vmem:[%s960_s1 + $0x18] sm:$0xff]   ;;  %v733_v18 = vld [vmem:[%s960_s1 + $0x20] sm:$0xff]   ;;  %v737_v22 = vld [vmem:[%s960_s1 + $0x28] sm:$0xff]  }
   0x8   :  { %644 = vmatpush3.bf16.msra.mxu0 %v721_v6  ;;  %v730_v15 = vld [vmem:[%s960_s1 + $0x98] sm:$0xff]   ;;  %v734_v19 = vld [vmem:[%s960_s1 + $0xa0] sm:$0xff]   ;;  %v738_v23 = vld [vmem:[%s960_s1 + $0xa8] sm:$0xff]  }
   0x9   :  { %672 = vmatpush3.bf16.msra.mxu1 %v722_v7  ;;  %645 = vmatprep.subr.bf16.mxu0 %v723_v8  ;;  %v739_v24 = vld [vmem:[%s960_s1 + $0x70] sm:$0xff]   ;;  %v743_v28 = vld [vmem:[%s960_s1 + $0x78] sm:$0xff]   ;;  %v752_v35 = vld [vmem:[%s961_s0 + $0xc] ss:$20 sps:$4 sm:$0xff]  }
   0xa   :  { %673 = vmatprep.subr.bf16.mxu1 %v724_v9  ;;  %v740_v25 = vld [vmem:[%s960_s1 + $0xf0] sm:$0xff]   ;;  %v744_v29 = vld [vmem:[%s960_s1 + $0xf8] sm:$0xff]   ;;  %v753_v36 = vld [vmem:[%s960_s1 + $0x100] sm:$0xff]   ;;  %453 = vmatprep.mubr.bf16.mxu1 %v752_v35 }
   0xb   :  { %v741_v26 = vld [vmem:[%s960_s1 + $0x30] sm:$0xff]   ;;  %v745_v30 = vld [vmem:[%s960_s1 + $0x38] sm:$0xff]   ;;  %v754_v37 = vld [vmem:[%s960_s1 + $0x108] sm:$0xff]  }
   0xc   :  { %646 = vmatpush3.bf16.msra.mxu0 %v725_v10  ;;  %v742_v27 = vld [vmem:[%s960_s1 + $0xb0] sm:$0xff]   ;;  %v746_v31 = vld [vmem:[%s960_s1 + $0xb8] sm:$0xff]   ;;  %v755_v38 = vld [vmem:[%s961_s0 + $0x2c] ss:$20 sps:$4 sm:$0xff]  }
   0xd   :  { %674 = vmatpush3.bf16.msra.mxu1 %v726_v11  ;;  %647 = vmatprep.subr.bf16.mxu0 %v727_v12  ;;  %v747_v32 = vld [vmem:[%s961_s0] ss:$20 sps:$4 sm:$0xff]   ;;  %v749_v33 = vld [vmem:[%s961_s0 + $0x4] ss:$20 sps:$4 sm:$0xff]   ;;  %v750_v34 = vld [vmem:[%s961_s0 + $0x8] ss:$20 sps:$4 sm:$0xff]  }
   0xe   :  { %675 = vmatprep.subr.bf16.mxu1 %v728_v13  ;;  %404 = vmatprep.mubr.bf16.mxu0 %v749_v33  ;;  %v757_v39 = vld [vmem:[%s961_s0 + $0x34] ss:$20 sps:$4 sm:$0xff]   ;;  %v760_v42 = vld [vmem:[%s961_s0 + $0x30] ss:$20 sps:$4 sm:$0xff]   ;;  %v762_v44 = vld [vmem:[%s960_s1 + $0x118] sm:$0xff]  }
   0xf   :  { %v759_v40 = vld [vmem:[%s961_s0 + $0x28] ss:$20 sps:$4 sm:$0xff]   ;;  %v761_v41 = vld [vmem:[%s960_s1 + $0x110] sm:$0xff]   ;;  %v764_v45 = vld [vmem:[%s961_s0 + $0x38] ss:$20 sps:$4 sm:$0xff]  }
  0x10   :  { %648 = vmatpush3.bf16.msra.mxu0 %v729_v14  ;;  %v763_v43 = vld [vmem:[%s961_s0 + $0x10] ss:$20 sps:$4 sm:$0xff]  }
  0x11   :  { %676 = vmatpush3.bf16.msra.mxu1 %v730_v15  ;;  %649 = vmatprep.subr.bf16.mxu0 %v731_v16 }
  0x12   :  { %677 = vmatprep.subr.bf16.mxu1 %v732_v17 }
  0x14   :  { %650 = vmatpush3.bf16.msra.mxu0 %v733_v18 }
  0x15   :  { %678 = vmatpush3.bf16.msra.mxu1 %v734_v19  ;;  %651 = vmatprep.subr.bf16.mxu0 %v735_v20 }
  0x16   :  { %679 = vmatprep.subr.bf16.mxu1 %v736_v21 }
  0x18   :  { %652 = vmatpush3.bf16.msra.mxu0 %v737_v22 }
  0x19   :  { %680 = vmatpush3.bf16.msra.mxu1 %v738_v23  ;;  %653 = vmatprep.subr.bf16.mxu0 %v739_v24 }
  0x1a   :  { %681 = vmatprep.subr.bf16.mxu1 %v740_v25 }
  0x1c   :  { %654 = vmatpush3.bf16.msra.mxu0 %v741_v26 }
  0x1d   :  { %682 = vmatpush3.bf16.msra.mxu1 %v742_v27  ;;  %655 = vmatprep.subr.bf16.mxu0 %v743_v28 }
  0x1e   :  { %683 = vmatprep.subr.bf16.mxu1 %v744_v29 }
  0x20   :  { %656 = vmatpush3.bf16.msra.mxu0 %v745_v30 }
  0x21   :  { %684 = vmatpush3.bf16.msra.mxu1 %v746_v31  ;;  %703 = vmatprep.subr.bf16.mxu0 %v753_v36 }
  0x23   :  { %405 = vmatmul.mubr.bf16.vlgmr.msra.gmra.mrb[0].mxu0 %v747_v32 }
  0x24   :  { %454 = vmatmul.mubr.bf16.vlgmr.msra.gmra.mrb[0].mxu1 %v750_v34  ;;  %704 = vmatpush3.bf16.msra.mxu0 %v753_v36 }
  0x25   :  { %705 = vmatprep.subr.bf16.mxu0 %v754_v37  ;;  %412 = vmatprep.mubr.bf16.mxu0 %v755_v38 }
  0x26   :  { %461 = vmatprep.mubr.bf16.mxu1 %v757_v39 }
  0x28   :  { %706 = vmatpush3.bf16.msra.mxu0 %v754_v37 }
  0x29   :  { %707 = vmatprep.subr.bf16.mxu0 %v761_v41 }
  0x2b   :  { %413 = vmatmul.mubr.bf16.gmra.mrb[4].mxu0 %v759_v40 }
  0x2c   :  { %462 = vmatmul.mubr.bf16.gmra.mrb[4].mxu1 %v760_v42  ;;  %711 = vmatprep.mubr.msk.bf16.mxu0 %vm365_vm0, %v763_v43 }
  0x2d   :  { %708 = vmatpush3.bf16.msra.mxu0 %v761_v41 }
  0x2e   :  { %709 = vmatprep.subr.bf16.mxu0 %v762_v44 }
  0x31   :  { %710 = vmatpush3.bf16.msra.mxu0 %v762_v44 }
  0x34   :  { %712 = vmatmul.mubr.msk.bf16.vlgmr.msra.gmra.mrb[8].mxu0 %vm365_vm0, %v764_v45 }
  0xf6   :  { %v657_v46 = vpop.f32.mrb[0].mxu0 }
  0xf7   :  { %v685_v47 = vpop.f32.mrb[0].mxu1  ;;  %v658_v48 = vpop.f32.mrb[1].mxu0 }
  0xf8   :  { %v659_v49 = vadd.f32 %v658_v48, %v657_v46  ;;  %v686_v50 = vpop.f32.mrb[1].mxu1  ;;  %v660_v51 = vpop.f32.mrb[2].mxu0 }
  0xf9   :  { %v687_v52 = vadd.f32 %v686_v50, %v685_v47  ;;  %v688_v53 = vpop.f32.mrb[2].mxu1  ;;  %v661_v54 = vpop.f32.mrb[3].mxu0 }
  0xfa   :  { %v662_v55 = vadd.f32 %v661_v54, %v660_v51  ;;  %v689_v56 = vpop.f32.mrb[3].mxu1 }
  0xfb   :  { %v690_v57 = vadd.f32 %v689_v56, %v688_v53  ;;  %v456_v58 = vadd.f32 %v687_v52, %v659_v49 }
  0xfd   :  { %v459_v59 = vadd.f32 %v690_v57, %v662_v55 }
  0xfe   :  { %v663_v60 = vpop.f32.mrb[4].mxu0 }
  0xff   :  { %v691_v61 = vpop.f32.mrb[4].mxu1  ;;  %v664_v62 = vpop.f32.mrb[5].mxu0 }
 0x100   :  { %v665_v63 = vadd.f32 %v664_v62, %v663_v60  ;;  %v692_v0 = vpop.f32.mrb[5].mxu1  ;;  %v666_v1 = vpop.f32.mrb[6].mxu0 }
 0x101   :  { %v693_v2 = vadd.f32 %v692_v0, %v691_v61  ;;  %v694_v3 = vpop.f32.mrb[6].mxu1  ;;  %v667_v4 = vpop.f32.mrb[7].mxu0 }
 0x102   :  { %v668_v5 = vadd.f32 %v667_v4, %v666_v1  ;;  %v695_v6 = vpop.f32.mrb[7].mxu1 }
 0x103   :  { %v696_v7 = vadd.f32 %v695_v6, %v694_v3  ;;  %v464_v8 = vadd.f32 %v693_v2, %v665_v63 }
 0x105   :  { %v467_v9 = vadd.f32 %v696_v7, %v668_v5 }
 0x107   :  { %v713_v10 = vpop.f32.mrb[8].mxu0 }
 0x108   :  { %v513_v11 = vadd.f32 %v713_v10, %v464_v8  ;;  %v504_v12 = vpop.f32.mrb[9].mxu0 }
 0x109   :  { %v505_v13 = vadd.f32 %v504_v12, %v456_v58  ;;  %v714_v14 = vpop.f32.mrb[10].mxu0 }
 0x10a   :  { %v639_v15 = vpack.c.bf16 %v513_v11, %v513_v11  ;;  %v516_v16 = vadd.f32 %v714_v14, %v467_v9  ;;  %v507_v17 = vpop.f32.mrb[11].mxu0  ;;  %v556_v21 = vmul.f32 %v513_v11, %v513_v11  ;;  %v544_v28 = vsel %vm540_vm2, %v513_v11, 0.0 }
 0x10b   :  { %v637_v18 = vpack.c.bf16 %v505_v13, %v505_v13  ;;  %v554_v19 = vmul.f32 %v505_v13, %v505_v13  ;;  %v508_v20 = vadd.f32 %v507_v17, %v459_v59  ;;  %v541_v23 = vsel %vm540_vm2, %v505_v13, 0.0 }
 0x10c   :  { %538 = vst.msk [vmem:[%s962_s2 + $0x8] sm:$0xf] %vm535_vm1, %v639_v15  ;;  %v640_v22 = vpack.c.bf16 %v516_v16, %v516_v16  ;;  %v557_v30 = vmul.f32 %v516_v16, %v516_v16  ;;  %v561_v34 = vsel %vm540_vm2, %v556_v21, 0.0  ;;  %v546_v35 = vsel %vm540_vm2, %v516_v16, 0.0 }
 0x10d   :  { %536 = vst.msk [vmem:[%s962_s2] sm:$0xf] %vm535_vm1, %v637_v18  ;;  %v638_v24 = vpack.c.bf16 %v508_v20, %v508_v20  ;;  %v542_v25 = vsel %vm540_vm2, %v508_v20, 0.0  ;;  %v555_v26 = vmul.f32 %v508_v20, %v508_v20  ;;  %v558_v29 = vsel %vm540_vm2, %v554_v19, 0.0 }
 0x10e   :  { %539 = vst.msk [vmem:[%s962_s2 + $0xc] sm:$0xf] %vm535_vm1, %v640_v22  ;;  %v543_v27 = vadd.f32 %v542_v25, %v541_v23  ;;  %v563_v38 = vsel %vm540_vm2, %v557_v30, 0.0 }
 0x10f   :  { %537 = vst.msk [vmem:[%s962_s2 + $0x4] sm:$0xf] %vm535_vm1, %v638_v24  ;;  %v559_v31 = vsel %vm540_vm2, %v555_v26, 0.0 }
 0x110   :  { %v545_v32 = vadd.f32 %v544_v28, %v543_v27  ;;  %v560_v33 = vadd.f32 %v559_v31, %v558_v29 }
 0x112   :  { %v547_v36 = vadd.f32 %v546_v35, %v545_v32  ;;  %v562_v37 = vadd.f32 %v561_v34, %v560_v33 }
 0x114   :  { %v548_v39 = vrot.slane %v547_v36, 4  ;;  %v564_v40 = vadd.f32 %v563_v38, %v562_v37 }
 0x116   :  { %v549_v41 = vadd.f32 %v548_v39, %v547_v36  ;;  %v565_v42 = vrot.slane %v564_v40, 4 }
 0x118   :  { %v550_v43 = vrot.slane %v549_v41, 2  ;;  %v566_v44 = vadd.f32 %v565_v42, %v564_v40 }
 0x11a   :  { %v551_v45 = vadd.f32 %v550_v43, %v549_v41  ;;  %v567_v46 = vrot.slane %v566_v44, 2 }
 0x11c   :  { %v552_v47 = vrot.slane %v551_v45, 1  ;;  %v568_v48 = vadd.f32 %v567_v46, %v566_v44 }
 0x11e   :  { %v553_v49 = vadd.f32 %v552_v47, %v551_v45  ;;  %v569_v50 = vrot.slane %v568_v48, 1 }
 0x120   :  { %v570_v51 = vadd.f32 %v569_v50, %v568_v48  ;;  %571 = vst.msk [vmem:[%s963_s3] sm:$0xff] %vm540_vm2, %v553_v49 }
 0x122   :  { %572 = vst.msk [vmem:[%s964_s4] sm:$0xff] %vm540_vm2, %v570_v51 }

// kernel: issegnet_forward.69
= control target key start
LH: loop header
LB: loop body
LE: loop exit
PB: predicated region body
PF: predicated region fallthrough
CT: control target
= control target key end

     0   :  { %v35_v5 = vlaneseq  ;;  %s465_s3 = inlined_call_operand.vmem [shape: bf16[256,128], index: 3, kind: input, shape index: {}]   ;;  %s466_s0 = inlined_call_operand.vmem [shape: bf16[32,256], index: 0, kind: input, shape index: {}]   ;;  %s467_s1 = inlined_call_operand.vmem [shape: f32[1,256], index: 1, kind: input, shape index: {}]   ;;  %s468_s2 = inlined_call_operand.vmem [shape: f32[1,256], index: 2, kind: input, shape index: {}]   ;;  %s469_s4 = inlined_call_operand.vmem [shape: f32[1,128], index: 4, kind: input, shape index: {}]   ;;  %s470_s5 = inlined_call_operand.vmem [shape: f32[32,128], index: 5, kind: output, shape index: {}]  }
   0x1   :  { %v338_v0 = vld [vmem:[%s465_s3 + $0x40] sm:$0xff]   ;;  %v340_v2 = vld [vmem:[%s465_s3 + $0x48] sm:$0xff]   ;;  %v342_v4 = vld [vmem:[%s465_s3 + $0x50] sm:$0xff]  }
   0x2   :  { %v339_v1 = vld [vmem:[%s465_s3] sm:$0xff]   ;;  %294 = vmatprep.subr.bf16.mxu0 %v338_v0  ;;  %322 = vmatprep.subr.bf16.mxu1 %v338_v0  ;;  %v341_v3 = vld [vmem:[%s465_s3 + $0x8] sm:$0xff]   ;;  %v343_v6 = vld [vmem:[%s465_s3 + $0x10] sm:$0xff]   ;;  %v36_v8 = vshrl.u32 %v35_v5, 7 }
   0x3   :  { %295 = vmatpush3.bf16.msra.mxu0 %v339_v1  ;;  %330 = vmatpush3.bf16.msra.mxu1 %v339_v1  ;;  %v344_v7 = vld [vmem:[%s465_s3 + $0x58] sm:$0xff]   ;;  %v346_v10 = vld [vmem:[%s465_s3 + $0x60] sm:$0xff]   ;;  %v348_v14 = vld [vmem:[%s465_s3 + $0x68] sm:$0xff]  }
   0x4   :  { %296 = vmatprep.subr.bf16.mxu0 %v340_v2  ;;  %323 = vmatprep.subr.bf16.mxu1 %v340_v2  ;;  %v345_v9 = vld [vmem:[%s465_s3 + $0x18] sm:$0xff]   ;;  %v37_v11 = vsub.s32 0, %v36_v8  ;;  %v347_v12 = vld [vmem:[%s465_s3 + $0x20] sm:$0xff]   ;;  %v41_v13 = vsub.s32 1, %v36_v8  ;;  %v22_v16 = vld [vmem:[%s466_s0 + $0x8] sm:$0xff] }
   0x5   :  { %v21_v15 = vld [vmem:[%s466_s0] sm:$0xff]  ;;  %v27_v20 = vunpack.c.l.bf16 %v22_v16  ;;  %v28_v21 = vunpack.c.h.bf16 %v22_v16  ;;  %v23_v23 = vld [vmem:[%s466_s0 + $0x10] sm:$0xff]  ;;  %v24_v24 = vld [vmem:[%s466_s0 + $0x18] sm:$0xff] }
   0x6   :  { %v33_v17 = vld [vmem:[%s467_s1] sm:$0x3]  ;;  %v25_v18 = vunpack.c.l.bf16 %v21_v15  ;;  %v26_v19 = vunpack.c.h.bf16 %v21_v15  ;;  %v349_v29 = vld [vmem:[%s465_s3 + $0x28] sm:$0xff]   ;;  %v29_v30 = vunpack.c.l.bf16 %v23_v23  ;;  %v30_v31 = vunpack.c.h.bf16 %v23_v23  ;;  %v350_v34 = vld [vmem:[%s465_s3 + $0x70] sm:$0xff]  }
   0x7   :  { %297 = vmatpush3.bf16.msra.mxu0 %v341_v3  ;;  %331 = vmatpush3.bf16.msra.mxu1 %v341_v3  ;;  %v53_v22 = vld [vmem:[%s468_s2] sm:$0x3]  ;;  %v38_v25 = vrot.slane %v33_v17, %v37_v11  ;;  %v42_v26 = vrot.slane %v33_v17, %v41_v13  ;;  %v31_v32 = vunpack.c.l.bf16 %v24_v24  ;;  %v32_v33 = vunpack.c.h.bf16 %v24_v24  ;;  %v351_v46 = vld [vmem:[%s465_s3 + $0x30] sm:$0xff]   ;;  %v352_v50 = vld [vmem:[%s465_s3 + $0x78] sm:$0xff]  }
   0x8   :  { %298 = vmatprep.subr.bf16.mxu0 %v342_v4  ;;  %324 = vmatprep.subr.bf16.mxu1 %v342_v4  ;;  %v58_v27 = vrot.slane %v53_v22, %v37_v11  ;;  %v62_v28 = vrot.slane %v53_v22, %v41_v13  ;;  %v353_v61 = vld [vmem:[%s465_s3 + $0x38] sm:$0xff]   ;;  %v277_v4 = vld [vmem:[%s469_s4] ss:$0 sm:$0xff] }
   0x9   :  { %v46_v35 = vmul.f32 %v42_v26, %v26_v19  ;;  %v48_v36 = vmul.f32 %v42_v26, %v28_v21  ;;  %v45_v37 = vmul.f32 %v38_v25, %v25_v18  ;;  %v50_v38 = vmul.f32 %v42_v26, %v30_v31 }
   0xa   :  { %v52_v39 = vmul.f32 %v42_v26, %v32_v33  ;;  %v47_v40 = vmul.f32 %v38_v25, %v27_v20  ;;  %v49_v41 = vmul.f32 %v38_v25, %v29_v30  ;;  %v51_v45 = vmul.f32 %v38_v25, %v31_v32 }
   0xb   :  { %299 = vmatpush3.bf16.msra.mxu0 %v343_v6  ;;  %332 = vmatpush3.bf16.msra.mxu1 %v343_v6  ;;  %v66_v42 = vadd.f32 %v62_v28, %v46_v35  ;;  %v68_v43 = vadd.f32 %v62_v28, %v48_v36  ;;  %v65_v44 = vadd.f32 %v58_v27, %v45_v37 }
   0xc   :  { %300 = vmatprep.subr.bf16.mxu0 %v344_v7  ;;  %325 = vmatprep.subr.bf16.mxu1 %v344_v7  ;;  %v70_v47 = vadd.f32 %v62_v28, %v50_v38  ;;  %v72_v48 = vadd.f32 %v62_v28, %v52_v39  ;;  %v67_v49 = vadd.f32 %v58_v27, %v47_v40 }
   0xd   :  { %v74_v51 = vmax.f32 %v66_v42, 0.0  ;;  %v76_v52 = vmax.f32 %v68_v43, 0.0  ;;  %v69_v53 = vadd.f32 %v58_v27, %v49_v41  ;;  %v71_v56 = vadd.f32 %v58_v27, %v51_v45 }
   0xe   :  { %v78_v54 = vmax.f32 %v70_v47, 0.0  ;;  %v80_v55 = vmax.f32 %v72_v48, 0.0  ;;  %v73_v58 = vmax.f32 %v65_v44, 0.0  ;;  %v75_v59 = vmax.f32 %v67_v49, 0.0 }
   0xf   :  { %301 = vmatpush3.bf16.msra.mxu0 %v345_v9  ;;  %333 = vmatpush3.bf16.msra.mxu1 %v345_v9  ;;  %v82_v57 = vpack.c.bf16 %v76_v52, %v74_v51  ;;  %v77_v60 = vmax.f32 %v69_v53, 0.0  ;;  %v79_v63 = vmax.f32 %v71_v56, 0.0 }
  0x10   :  { %302 = vmatprep.subr.bf16.mxu0 %v346_v10  ;;  %326 = vmatprep.subr.bf16.mxu1 %v346_v10  ;;  %v84_v62 = vpack.c.bf16 %v80_v55, %v78_v54  ;;  %v81_v0 = vpack.c.bf16 %v75_v59, %v73_v58 }
  0x11   :  { %252 = vmatprep.mubr.bf16.mxu0 %v82_v57  ;;  %v83_v1 = vpack.c.bf16 %v79_v63, %v77_v60 }
  0x12   :  { %260 = vmatprep.mubr.bf16.mxu1 %v84_v62 }
  0x13   :  { %303 = vmatpush3.bf16.msra.mxu0 %v347_v12  ;;  %334 = vmatpush3.bf16.msra.mxu1 %v347_v12 }
  0x14   :  { %304 = vmatprep.subr.bf16.mxu0 %v348_v14  ;;  %327 = vmatprep.subr.bf16.mxu1 %v348_v14 }
  0x17   :  { %305 = vmatpush3.bf16.msra.mxu0 %v349_v29  ;;  %335 = vmatpush3.bf16.msra.mxu1 %v349_v29 }
  0x18   :  { %306 = vmatprep.subr.bf16.mxu0 %v350_v34  ;;  %328 = vmatprep.subr.bf16.mxu1 %v350_v34 }
  0x1b   :  { %307 = vmatpush3.bf16.msra.mxu0 %v351_v46  ;;  %336 = vmatpush3.bf16.msra.mxu1 %v351_v46 }
  0x1c   :  { %308 = vmatprep.subr.bf16.mxu0 %v352_v50  ;;  %329 = vmatprep.subr.bf16.mxu1 %v352_v50 }
  0x1f   :  { %309 = vmatpush3.bf16.msra.mxu0 %v353_v61  ;;  %337 = vmatpush3.bf16.msra.mxu1 %v353_v61 }
  0x22   :  { %253 = vmatmul.mubr.bf16.vlgmr.msra.gmra.mrb[0].mxu0 %v81_v0  ;;  %261 = vmatmul.mubr.bf16.vlgmr.msra.gmra.mrb[0].mxu1 %v83_v1 }
  0xf5   :  { %v310_v2 = vpop.f32.mrb[0].mxu0  ;;  %v316_v3 = vpop.f32.mrb[0].mxu1 }
  0xf6   :  { %v311_v5 = vpop.f32.mrb[1].mxu0  ;;  %v317_v6 = vpop.f32.mrb[1].mxu1 }
  0xf7   :  { %v312_v7 = vadd.f32 %v311_v5, %v310_v2  ;;  %v318_v8 = vadd.f32 %v317_v6, %v316_v3  ;;  %v313_v9 = vpop.f32.mrb[2].mxu0  ;;  %v319_v10 = vpop.f32.mrb[2].mxu1 }
  0xf8   :  { %v314_v11 = vpop.f32.mrb[3].mxu0  ;;  %v320_v12 = vpop.f32.mrb[3].mxu1 }
  0xf9   :  { %v255_v13 = vadd.f32 %v312_v7, %v277_v4  ;;  %v263_v14 = vadd.f32 %v318_v8, %v277_v4  ;;  %v315_v15 = vadd.f32 %v314_v11, %v313_v9  ;;  %v321_v16 = vadd.f32 %v320_v12, %v319_v10 }
  0xfb   :  { %269 = vst [vmem:[%s470_s5] sm:$0xff] %v255_v13  ;;  %271 = vst [vmem:[%s470_s5 + $0x10] sm:$0xff] %v263_v14  ;;  %v258_v17 = vadd.f32 %v315_v15, %v277_v4  ;;  %v266_v18 = vadd.f32 %v321_v16, %v277_v4 }
  0xfd   :  { %270 = vst [vmem:[%s470_s5 + $0x8] sm:$0xff] %v258_v17  ;;  %272 = vst [vmem:[%s470_s5 + $0x18] sm:$0xff] %v266_v18 }

</bundles_post_ra>
